<compile_context>
chip_gen: v7x
topology: tpu7x:2x2x1
jax: 0.10.0
libtpu: 0.0.40
codegen_flags: <defaults>
</compile_context>

<pallas_src>
import functools

import numpy as np
import jax
import jax.numpy as jnp
from jax.experimental import pallas as pl
from jax.experimental.pallas import tpu as pltpu

BN_EPS = 1e-5

# scaled channel plan (original: 628, 628, 1256, 2512, 5024, 10048, fc 10048, 34)
C_IN = 8
CH = [8, 8, 16, 32, 64, 128]
FC_HIDDEN = CH[-1]
NUM_CLASSES = 34

BF16 = jnp.bfloat16
F32 = jnp.float32

TAPS9 = tuple((kd, kh) for kd in range(3) for kh in range(3))


def _round_up(x, m):
    return (x + m - 1) // m * m


def bn_fold(p):
    """Fold eval-mode BatchNorm (+ conv/linear bias) into (scale, bias)."""
    s = p["gamma"] / jnp.sqrt(p["var"] + BN_EPS)
    b = (p["b"] - p["mean"]) * s + p["beta"]
    return s, b


# ----------------------------------------------------------------------------
# Weight preparation (BN folded, mapped into the (w,channel)-in-lanes layout)
# ----------------------------------------------------------------------------
def prep_1x1(p, W, pooled):
    """1x1 conv as a block-diagonal (W*Cin, W*Cout) matmul.

    pooled=True additionally orders output columns (delta_w, w2, cout) so the
    w-direction of MaxPool3d(2) is a max of two 128-lane-aligned halves, and
    returns the bias in the pooled (w2, cout) lane order (applied after max).
    """
    s, b = bn_fold(p)
    Cout = p["w"].shape[0]
    Wm = p["w"].reshape(Cout, -1).T * s[None, :]              # (Cin, Cout), BN folded
    Cin = Wm.shape[0]
    if not pooled:
        eye = np.eye(W, dtype=np.float32)
        bd = jnp.einsum("wv,cf->wcvf", jnp.asarray(eye), Wm)
        bd = bd.reshape(W * Cin, W * Cout)
        bias = jnp.tile(b, W)                                 # lanes (w, cout)
    else:
        W2 = W // 2
        sel = np.zeros((W, 2, W2), np.float32)
        for w in range(W):
            for dw in range(2):
                for w2 in range(W2):
                    if w == 2 * w2 + dw:
                        sel[w, dw, w2] = 1.0
        bd = jnp.einsum("wdv,cf->wcdvf", jnp.asarray(sel), Wm)
        bd = bd.reshape(W * Cin, 2 * W2 * Cout)
        bias = jnp.tile(b, W2)                                # lanes (w2, cout), post-pool
    return bd.astype(BF16), bias.reshape(1, -1).astype(F32)


def prep_conv3(p, W):
    """3x3x3 conv -> 9 block-Toeplitz matrices (one per (kd,kh) tap pair).

    Each matrix maps input lanes (w_in, cin) to output lanes (delta_w, w2, cout)
    so the kw taps are folded into the contraction (K = W*Cin = 128) and the
    w-direction zero padding / pooling is handled in lane space.  BN scale is
    folded in; the bias is returned in the pooled (w2, cout) lane order.
    """
    s, b = bn_fold(p)
    Cout, Cin = p["w"].shape[0], p["w"].shape[1]
    W2 = W // 2
    Wt = jnp.transpose(p["w"], (2, 3, 4, 1, 0)) * s           # (kd,kh,kw,Cin,Cout)
    E = np.zeros((3, W, 2, W2), np.float32)
    for kw in range(3):
        for w in range(W):
            for dw in range(2):
                for w2 in range(W2):
                    if w == 2 * w2 + dw + kw - 1:             # implicit w zero-pad
                        E[kw, w, dw, w2] = 1.0
    A = jnp.einsum("xwdv,yzxcf->yzwcdvf", jnp.asarray(E), Wt)
    A = A.reshape(9, W * Cin, 2 * W2 * Cout).astype(BF16)
    bias = jnp.tile(b, W2).reshape(1, -1).astype(F32)
    return A, bias


def prep_fc(p, with_bn):
    if with_bn:
        s, b = bn_fold(p)
        w = p["w"].T * s[None, :]
    else:
        w = p["w"].T
        b = p["b"]
    return w.astype(BF16), b.reshape(1, -1).astype(F32)


def _pad_dh_rows(act, r_in):
    """(N, D, H, W*C) -> zero-pad d,h halo, flatten (d,h) rows, pad rows to r_in."""
    N, D, H, L = act.shape
    xp = jnp.pad(act, ((0, 0), (1, 1), (1, 1), (0, 0)))
    xp = xp.reshape(N, (D + 2) * (H + 2), L)
    extra = r_in - (D + 2) * (H + 2)
    if extra:
        xp = jnp.pad(xp, ((0, 0), (0, extra), (0, 0)))
    return xp.reshape(N * r_in, L).astype(BF16)


# ----------------------------------------------------------------------------
# Kernel A: layers 1-3 (1x1 conv + BN + ReLU, x3) + MaxPool3d(2), fused.
# Rows are ordered ((dd,dh)-phase major, (d2,h2)) per sample, lanes are (w,c),
# so the chain is 3 dense K=128 matmuls, the (d,h)-phase max is an elementwise
# max of 4 aligned row slabs and the w-max is a max of two lane halves.
# ----------------------------------------------------------------------------
def _layers123_kernel(x_ref, w1_ref, b1_ref, w2_ref, b2_ref, w3_ref, b3_ref,
                      o_ref):
    x = x_ref[...]                                            # (4*R, 128) bf16
    h = jnp.dot(x, w1_ref[...], preferred_element_type=jnp.float32) + b1_ref[...]
    h = jnp.maximum(h, 0.0).astype(jnp.bfloat16)
    h = jnp.dot(h, w2_ref[...], preferred_element_type=jnp.float32) + b2_ref[...]
    h = jnp.maximum(h, 0.0).astype(jnp.bfloat16)
    y = jnp.dot(h, w3_ref[...], preferred_element_type=jnp.float32)
    half = y.shape[1] // 2
    y = jnp.maximum(y[:, :half], y[:, half:])                 # w-direction pool
    r = y.shape[0] // 4
    m = jnp.maximum(jnp.maximum(y[0:r], y[r:2 * r]),
                    jnp.maximum(y[2 * r:3 * r], y[3 * r:4 * r]))  # (d,h)-phase pool
    o_ref[...] = jnp.maximum(m + b3_ref[...], 0.0).astype(o_ref.dtype)


def layers123_pool(x_ndhwc, p1, p2, p3):
    N, D, H, W, C = x_ndhwc.shape
    D2, H2 = D // 2, H // 2
    L = W * C                                                 # 128
    R = D2 * H2                                               # pooled rows / sample
    # rows per sample: (dd, dh, d2, h2) phase-major
    xg = x_ndhwc.reshape(N, D2, 2, H2, 2, L).transpose(0, 2, 4, 1, 3, 5)
    xg = xg.reshape(N * 4 * R, L).astype(BF16)

    w1, b1 = prep_1x1(p1, W, pooled=False)
    w2, b2 = prep_1x1(p2, W, pooled=False)
    w3, b3 = prep_1x1(p3, W, pooled=True)
    Lout = w3.shape[1] // 2                                   # pooled lane width (128)

    # grid=(N,)=2: both v7x TensorCores get one block; negligible extra step on
    # v5e/v6e single-core parts.
    out = pl.pallas_call(
        _layers123_kernel,
        out_shape=jax.ShapeDtypeStruct((N * R, Lout), BF16),
        grid_spec=pltpu.PrefetchScalarGridSpec(
            num_scalar_prefetch=0,
            grid=(N,),
            in_specs=[
                pl.BlockSpec((4 * R, L), lambda n: (n, 0)),
                pl.BlockSpec(w1.shape, lambda n: (0, 0)),
                pl.BlockSpec(b1.shape, lambda n: (0, 0)),
                pl.BlockSpec(w2.shape, lambda n: (0, 0)),
                pl.BlockSpec(b2.shape, lambda n: (0, 0)),
                pl.BlockSpec(w3.shape, lambda n: (0, 0)),
                pl.BlockSpec(b3.shape, lambda n: (0, 0)),
            ],
            out_specs=pl.BlockSpec((R, Lout), lambda n: (n, 0)),
        ),
        compiler_params=pltpu.CompilerParams(
            dimension_semantics=("parallel",)),
    )(xg, w1, b1, w2, b2, w3, b3)
    return out.reshape(N, D2, H2, Lout)        # rows (d2,h2), lanes (w2, c)


# ----------------------------------------------------------------------------
# Kernel B: 3x3x3 conv + folded BN + ReLU + MaxPool3d(2), fully fused.
# 9 shifted K=128 matmuls (kw taps folded into lanes) accumulate the conv in
# VMEM; only the pooled (D2*H2, 128) slab is written back to HBM.
# ----------------------------------------------------------------------------
def _conv_pool_kernel(x_ref, w_ref, b_ref, o_ref, wp_ref, *, Hp, H, D, D2, H2):
    rows = (D - 1) * Hp + H                   # covers every valid (d,h) output row
    acc = None
    for t, (kd, kh) in enumerate(TAPS9):
        sh = kd * Hp + kh
        xs = x_ref[sh:sh + rows, :]                            # (rows, 128) bf16
        y = jnp.dot(xs, w_ref[t], preferred_element_type=jnp.float32)
        acc = y if acc is None else acc + y
    half = acc.shape[1] // 2
    wp_ref[0:rows, :] = jnp.maximum(acc[:, :half], acc[:, half:])   # w-pool
    for d2 in range(D2):                                       # (d,h)-pool epilogue
        for h2 in range(H2):
            r0 = 2 * d2 * Hp + 2 * h2
            r1 = r0 + Hp
            v = jnp.maximum(wp_ref[r0:r0 + 2, :], wp_ref[r1:r1 + 2, :])
            v = jnp.max(v, axis=0, keepdims=True)
            v = jnp.maximum(v + b_ref[...], 0.0)               # bias+ReLU after max
            row = d2 * H2 + h2
            o_ref[row:row + 1, :] = v.astype(o_ref.dtype)


def conv3_bn_relu_pool(act, p):
    # act: (N, D, H, W*Cin) bf16, rows (d,h), lanes (w,c)
    N, D, H, L = act.shape
    Cout, Cin = p["w"].shape[0], p["w"].shape[1]
    W = L // Cin
    Hp, Dp = H + 2, D + 2
    D2, H2, W2 = D // 2, H // 2, W // 2
    r_in = _round_up(Dp * Hp, 8)
    xp = _pad_dh_rows(act, r_in)                               # (N*r_in, L)

    wA, bA = prep_conv3(p, W)
    Lout = W2 * Cout                                           # pooled lane width (128)
    Rout = D2 * H2
    rows_cmp = (D - 1) * Hp + H

    kernel = functools.partial(_conv_pool_kernel, Hp=Hp, H=H, D=D, D2=D2, H2=H2)
    out = pl.pallas_call(
        kernel,
        out_shape=jax.ShapeDtypeStruct((N * Rout, Lout), BF16),
        grid_spec=pltpu.PrefetchScalarGridSpec(
            num_scalar_prefetch=0,
            grid=(N,),
            in_specs=[
                pl.BlockSpec((r_in, L), lambda n: (n, 0)),
                pl.BlockSpec(wA.shape, lambda n: (0, 0, 0)),
                pl.BlockSpec(bA.shape, lambda n: (0, 0)),
            ],
            out_specs=pl.BlockSpec((Rout, Lout), lambda n: (n, 0)),
            scratch_shapes=[pltpu.VMEM((_round_up(rows_cmp, 8), Lout), F32)],
        ),
        compiler_params=pltpu.CompilerParams(
            dimension_semantics=("parallel",)),
    )(xp, wA, bA)
    return out.reshape(N, D2, H2, Lout)


# ----------------------------------------------------------------------------
# Kernel C: layer5 (conv+BN+ReLU+pool) + layer6 (conv+BN+ReLU+pool) + flatten +
#           fc0(+BN1d+ReLU) + fc1, all in one call (grid=(1,)).
# Layer6's padded input is assembled in a zero-initialised VMEM scratch, so no
# intermediate activation between layer5 and the logits ever touches HBM.
# ----------------------------------------------------------------------------
def _tail_head_kernel(x5_ref, w5_ref, b5_ref, w6_ref, b6_ref,
                      wf0_ref, bf0_ref, wf1_ref, bf1_ref, o_ref,
                      x6_ref, wp_ref, p6_ref, *,
                      n_batch, hp5, d5, h5, hp6, d6, h6):
    r_in5 = x5_ref.shape[0] // n_batch
    r_in6 = x6_ref.shape[0] // n_batch
    rows5 = (d5 - 1) * hp5 + h5
    rows6 = (d6 - 1) * hp6 + h6

    x6_ref[...] = jnp.zeros_like(x6_ref)       # halo zeros for layer6's conv
    p6_ref[...] = jnp.zeros_like(p6_ref)

    # ---- layer 5: conv + pool, write pooled rows into padded layer6 input ----
    for n in range(n_batch):
        base = n * r_in5
        acc = None
        for t, (kd, kh) in enumerate(TAPS9):
            sh = kd * hp5 + kh
            xs = x5_ref[base + sh:base + sh + rows5, :]
            y = jnp.dot(xs, w5_ref[t], preferred_element_type=jnp.float32)
            acc = y if acc is None else acc + y
        half = acc.shape[1] // 2
        wp_ref[0:rows5, :] = jnp.maximum(acc[:, :half], acc[:, half:])
        for d2 in range(d5 // 2):
            for h2 in range(h5 // 2):
                r0 = 2 * d2 * hp5 + 2 * h2
                r1 = r0 + hp5
                v = jnp.maximum(wp_ref[r0:r0 + 2, :], wp_ref[r1:r1 + 2, :])
                v = jnp.max(v, axis=0, keepdims=True)
                v = jnp.maximum(v + b5_ref[...], 0.0).astype(jnp.bfloat16)
                row6 = n * r_in6 + (d2 + 1) * hp6 + (h2 + 1)   # interior of halo
                x6_ref[row6:row6 + 1, :] = v

    # ---- layer 6: conv + pool -> (1, 128) per sample ----
    for n in range(n_batch):
        base = n * r_in6
        acc = None
        for t, (kd, kh) in enumerate(TAPS9):
            sh = kd * hp6 + kh
            xs = x6_ref[base + sh:base + sh + rows6, :]
            y = jnp.dot(xs, w6_ref[t], preferred_element_type=jnp.float32)
            acc = y if acc is None else acc + y
        half = acc.shape[1] // 2
        wp_ref[0:rows6, :] = jnp.maximum(acc[:, :half], acc[:, half:])
        for d2 in range(d6 // 2):
            for h2 in range(h6 // 2):
                r0 = 2 * d2 * hp6 + 2 * h2
                r1 = r0 + hp6
                v = jnp.maximum(wp_ref[r0:r0 + 2, :], wp_ref[r1:r1 + 2, :])
                v = jnp.max(v, axis=0, keepdims=True)
                v = jnp.maximum(v + b6_ref[...], 0.0)
                p6_ref[n:n + 1, :] = v

    # ---- head: flatten + fc0 + BN1d + ReLU (+ Dropout eval = id) + fc1 ----
    z = p6_ref[0:n_batch, :].astype(jnp.bfloat16)              # (N, 128)
    h = jnp.dot(z, wf0_ref[...], preferred_element_type=jnp.float32) + bf0_ref[...]
    h = jnp.maximum(h, 0.0).astype(jnp.bfloat16)
    # TODO(synk): Dropout(0.5) is identity at inference time (eval mode).
    o_ref[...] = jnp.dot(h, wf1_ref[...],
                         preferred_element_type=jnp.float32) + bf1_ref[...]


def tail_head(x5_flat, p5, p6, pf0, pf1, n_batch):
    L5 = x5_flat.shape[1]
    Cin5, Cout5 = p5["w"].shape[1], p5["w"].shape[0]
    W5 = L5 // Cin5
    D5 = H5 = W5
    Hp5 = H5 + 2
    Cin6 = p6["w"].shape[1]
    L6 = (W5 // 2) * Cout5                                     # layer6 input lanes (128)
    W6 = L6 // Cin6
    D6 = H6 = W6
    Hp6 = H6 + 2
    r_in6 = _round_up((D6 + 2) * Hp6, 8)
    rows5 = (D5 - 1) * Hp5 + H5

    w5, b5 = prep_conv3(p5, W5)
    w6, b6 = prep_conv3(p6, W6)
    wf0, bf0 = prep_fc(pf0, with_bn=True)
    wf1, bf1 = prep_fc(pf1, with_bn=False)

    kernel = functools.partial(_tail_head_kernel, n_batch=n_batch,
                               hp5=Hp5, d5=D5, h5=H5, hp6=Hp6, d6=D6, h6=H6)
    return pl.pallas_call(
        kernel,
        out_shape=jax.ShapeDtypeStruct((n_batch, NUM_CLASSES), F32),
        grid_spec=pltpu.PrefetchScalarGridSpec(
            num_scalar_prefetch=0,
            grid=(1,),
            in_specs=[
                pl.BlockSpec(x5_flat.shape, lambda i: (0, 0)),
                pl.BlockSpec(w5.shape, lambda i: (0, 0, 0)),
                pl.BlockSpec(b5.shape, lambda i: (0, 0)),
                pl.BlockSpec(w6.shape, lambda i: (0, 0, 0)),
                pl.BlockSpec(b6.shape, lambda i: (0, 0)),
                pl.BlockSpec(wf0.shape, lambda i: (0, 0)),
                pl.BlockSpec(bf0.shape, lambda i: (0, 0)),
                pl.BlockSpec(wf1.shape, lambda i: (0, 0)),
                pl.BlockSpec(bf1.shape, lambda i: (0, 0)),
            ],
            out_specs=pl.BlockSpec((n_batch, NUM_CLASSES), lambda i: (0, 0)),
            scratch_shapes=[
                pltpu.VMEM((n_batch * r_in6, L6), BF16),       # padded layer6 input
                pltpu.VMEM((_round_up(rows5, 8), L6), F32),    # w-pooled conv rows
                pltpu.VMEM((8, L6), F32),                      # pooled layer6 / fc input
            ],
        ),
        compiler_params=pltpu.CompilerParams(
            dimension_semantics=("arbitrary",)),
    )(x5_flat, w5, b5, w6, b6, wf0, bf0, wf1, bf1)


# ----------------------------------------------------------------------------
# Parameters (deterministic synthetic init, eval-mode BN running stats)
# ----------------------------------------------------------------------------
def _block_params(key, cin, cout, ksize):
    ks = jax.random.split(key, 6)
    fan_in = cin * ksize ** 3
    w = jax.random.normal(ks[0], (cout, cin, ksize, ksize, ksize),
                          jnp.float32) / jnp.sqrt(fan_in)
    return dict(
        w=w,
        b=0.01 * jax.random.normal(ks[1], (cout,), jnp.float32),
        gamma=1.0 + 0.1 * jax.random.normal(ks[2], (cout,), jnp.float32),
        beta=0.1 * jax.random.normal(ks[3], (cout,), jnp.float32),
        mean=0.1 * jax.random.normal(ks[4], (cout,), jnp.float32),
        var=0.9 + 0.1 * jnp.abs(jax.random.normal(ks[5], (cout,), jnp.float32)),
    )


def _fc_params(key, cin, cout, with_bn):
    ks = jax.random.split(key, 6)
    p = dict(
        w=jax.random.normal(ks[0], (cout, cin), jnp.float32) / jnp.sqrt(cin),
        b=0.01 * jax.random.normal(ks[1], (cout,), jnp.float32),
    )
    if with_bn:
        p.update(
            gamma=1.0 + 0.1 * jax.random.normal(ks[2], (cout,), jnp.float32),
            beta=0.1 * jax.random.normal(ks[3], (cout,), jnp.float32),
            mean=0.1 * jax.random.normal(ks[4], (cout,), jnp.float32),
            var=0.9 + 0.1 * jnp.abs(jax.random.normal(ks[5], (cout,),
                                                      jnp.float32)),
        )
    return p


def init_params(key):
    ks = jax.random.split(key, 8)
    return dict(
        layer1=_block_params(ks[0], C_IN, CH[0], 1),
        layer2=_block_params(ks[1], CH[0], CH[1], 1),
        layer3=_block_params(ks[2], CH[1], CH[2], 1),
        layer4=_block_params(ks[3], CH[2], CH[3], 3),
        layer5=_block_params(ks[4], CH[3], CH[4], 3),
        layer6=_block_params(ks[5], CH[4], CH[5], 3),
        fc0=_fc_params(ks[6], CH[5], FC_HIDDEN, with_bn=True),
        fc1=_fc_params(ks[7], FC_HIDDEN, NUM_CLASSES, with_bn=False),
    )


# ----------------------------------------------------------------------------
# Forward pass (inference semantics: eval BN, Dropout = identity)
# ----------------------------------------------------------------------------
def forward(params, x_ncdhw):
    x = jnp.transpose(x_ncdhw, (0, 2, 3, 4, 1))                # NCDHW -> NDHWC
    N = x.shape[0]

    # layers 1-3 (1x1 conv+BN+ReLU x3) + MaxPool3d(2): ONE fused kernel
    a = layers123_pool(x, params["layer1"], params["layer2"], params["layer3"])
    # a: (N, 8, 8, 128) with rows (d,h) and lanes (w, c=16)

    # layer 4: conv+BN+ReLU + MaxPool3d(2) fused in one kernel
    b4 = conv3_bn_relu_pool(a, params["layer4"])               # (N, 4, 4, 128)

    # layers 5-6 (+pools) + fc head: ONE fused kernel
    r_in5 = _round_up((b4.shape[1] + 2) * (b4.shape[2] + 2), 8)
    x5 = _pad_dh_rows(b4, r_in5)                               # (N*r_in5, 128)
    return tail_head(x5, params["layer5"], params["layer6"],
                     params["fc0"], params["fc1"], N)


# ----------------------------------------------------------------------------
if __name__ == "__main__":
    params = init_params(jax.random.PRNGKey(42))

    # input in PyTorch NCDHW layout: (batch, channels, D, H, W)
    x = jax.random.normal(jax.random.PRNGKey(0), (2, C_IN, 16, 16, 16),
                          jnp.float32)

    fwd = jax.jit(forward)
    out = jax.block_until_ready(fwd(params, x))
    assert out.shape == (2, NUM_CLASSES), out.shape
    assert out.dtype == jnp.float32
    assert bool(jnp.all(jnp.isfinite(out)))
    print("KERNEL_OK")
</pallas_src>

<mosaic_0001>
module attributes {stable_mosaic.version = 11 : i64} {
  func.func @_layers123_kernel(%arg0: i32, %arg1: memref<256x128xbf16, #tpu.memory_space<vmem>>, %arg2: memref<128x128xbf16, #tpu.memory_space<vmem>>, %arg3: memref<1x128xf32, #tpu.memory_space<vmem>>, %arg4: memref<128x128xbf16, #tpu.memory_space<vmem>>, %arg5: memref<1x128xf32, #tpu.memory_space<vmem>>, %arg6: memref<128x256xbf16, #tpu.memory_space<vmem>>, %arg7: memref<1x128xf32, #tpu.memory_space<vmem>>, %arg8: memref<64x128xbf16, #tpu.memory_space<vmem>>) attributes {dimension_semantics = [#tpu.dimension_semantics<parallel>], iteration_bounds = array<i64: 2>, scalar_prefetch = 0 : i64, scratch_operands = 0 : i64, tpu.core_type = #tpu.core_type<tc>, window_params = [{transform_indices = @transform_0, window_bounds = array<i64: 256, 128>}, {pipeline_mode = #tpu.pipeline_mode<synchronous>, transform_indices = @transform_1, window_bounds = array<i64: 128, 128>}, {pipeline_mode = #tpu.pipeline_mode<synchronous>, transform_indices = @transform_2, window_bounds = array<i64: 1, 128>}, {pipeline_mode = #tpu.pipeline_mode<synchronous>, transform_indices = @transform_3, window_bounds = array<i64: 128, 128>}, {pipeline_mode = #tpu.pipeline_mode<synchronous>, transform_indices = @transform_4, window_bounds = array<i64: 1, 128>}, {pipeline_mode = #tpu.pipeline_mode<synchronous>, transform_indices = @transform_5, window_bounds = array<i64: 128, 256>}, {pipeline_mode = #tpu.pipeline_mode<synchronous>, transform_indices = @transform_6, window_bounds = array<i64: 1, 128>}, {transform_indices = @transform_7, window_bounds = array<i64: 64, 128>}]} {
    %c0 = arith.constant 0 : index
    %c0_0 = arith.constant 0 : index
    %0 = vector.load %arg1[%c0, %c0_0] : memref<256x128xbf16, #tpu.memory_space<vmem>>, vector<256x128xbf16>
    %c0_1 = arith.constant 0 : index
    %c0_2 = arith.constant 0 : index
    %1 = vector.load %arg2[%c0_1, %c0_2] : memref<128x128xbf16, #tpu.memory_space<vmem>>, vector<128x128xbf16>
    %cst = arith.constant dense<0.000000e+00> : vector<256x128xf32>
    %2 = tpu.matmul %0, %1, %cst {dimension_numbers = #tpu.dot_dimension_numbers<[1], [0], [0], [1], [0, 0, 1, 1], [], []>} : vector<256x128xbf16>, vector<128x128xbf16>, vector<256x128xf32> -> vector<256x128xf32>
    %c0_3 = arith.constant 0 : index
    %c0_4 = arith.constant 0 : index
    %3 = vector.load %arg3[%c0_3, %c0_4] : memref<1x128xf32, #tpu.memory_space<vmem>>, vector<1x128xf32>
    %4 = vector.broadcast %3 : vector<1x128xf32> to vector<256x128xf32>
    %5 = arith.addf %2, %4 : vector<256x128xf32>
    %cst_5 = arith.constant 0.000000e+00 : f32
    %6 = vector.broadcast %cst_5 : f32 to vector<256x128xf32>
    %7 = arith.maximumf %5, %6 : vector<256x128xf32>
    %8 = arith.truncf %7 : vector<256x128xf32> to vector<256x128xbf16>
    %c0_6 = arith.constant 0 : index
    %c0_7 = arith.constant 0 : index
    %9 = vector.load %arg4[%c0_6, %c0_7] : memref<128x128xbf16, #tpu.memory_space<vmem>>, vector<128x128xbf16>
    %cst_8 = arith.constant dense<0.000000e+00> : vector<256x128xf32>
    %10 = tpu.matmul %8, %9, %cst_8 {dimension_numbers = #tpu.dot_dimension_numbers<[1], [0], [0], [1], [0, 0, 1, 1], [], []>} : vector<256x128xbf16>, vector<128x128xbf16>, vector<256x128xf32> -> vector<256x128xf32>
    %c0_9 = arith.constant 0 : index
    %c0_10 = arith.constant 0 : index
    %11 = vector.load %arg5[%c0_9, %c0_10] : memref<1x128xf32, #tpu.memory_space<vmem>>, vector<1x128xf32>
    %12 = vector.broadcast %11 : vector<1x128xf32> to vector<256x128xf32>
    %13 = arith.addf %10, %12 : vector<256x128xf32>
    %cst_11 = arith.constant 0.000000e+00 : f32
    %14 = vector.broadcast %cst_11 : f32 to vector<256x128xf32>
    %15 = arith.maximumf %13, %14 : vector<256x128xf32>
    %16 = arith.truncf %15 : vector<256x128xf32> to vector<256x128xbf16>
    %c0_12 = arith.constant 0 : index
    %c0_13 = arith.constant 0 : index
    %17 = vector.load %arg6[%c0_12, %c0_13] : memref<128x256xbf16, #tpu.memory_space<vmem>>, vector<128x256xbf16>
    %cst_14 = arith.constant dense<0.000000e+00> : vector<256x256xf32>
    %18 = tpu.matmul %16, %17, %cst_14 {dimension_numbers = #tpu.dot_dimension_numbers<[1], [0], [0], [1], [0, 0, 1, 1], [], []>} : vector<256x128xbf16>, vector<128x256xbf16>, vector<256x256xf32> -> vector<256x256xf32>
    %19 = vector.extract_strided_slice %18 {offsets = [0, 0], sizes = [256, 128], strides = [1, 1]} : vector<256x256xf32> to vector<256x128xf32>
    %20 = vector.extract_strided_slice %18 {offsets = [0, 128], sizes = [256, 128], strides = [1, 1]} : vector<256x256xf32> to vector<256x128xf32>
    %21 = arith.maximumf %19, %20 : vector<256x128xf32>
    %22 = vector.extract_strided_slice %21 {offsets = [0, 0], sizes = [64, 128], strides = [1, 1]} : vector<256x128xf32> to vector<64x128xf32>
    %23 = vector.extract_strided_slice %21 {offsets = [64, 0], sizes = [64, 128], strides = [1, 1]} : vector<256x128xf32> to vector<64x128xf32>
    %24 = arith.maximumf %22, %23 : vector<64x128xf32>
    %25 = vector.extract_strided_slice %21 {offsets = [128, 0], sizes = [64, 128], strides = [1, 1]} : vector<256x128xf32> to vector<64x128xf32>
    %26 = vector.extract_strided_slice %21 {offsets = [192, 0], sizes = [64, 128], strides = [1, 1]} : vector<256x128xf32> to vector<64x128xf32>
    %27 = arith.maximumf %25, %26 : vector<64x128xf32>
    %28 = arith.maximumf %24, %27 : vector<64x128xf32>
    %c0_15 = arith.constant 0 : index
    %c0_16 = arith.constant 0 : index
    %29 = vector.load %arg7[%c0_15, %c0_16] : memref<1x128xf32, #tpu.memory_space<vmem>>, vector<1x128xf32>
    %30 = vector.broadcast %29 : vector<1x128xf32> to vector<64x128xf32>
    %31 = arith.addf %28, %30 : vector<64x128xf32>
    %cst_17 = arith.constant 0.000000e+00 : f32
    %32 = vector.broadcast %cst_17 : f32 to vector<64x128xf32>
    %33 = arith.maximumf %31, %32 : vector<64x128xf32>
    %34 = arith.truncf %33 : vector<64x128xf32> to vector<64x128xbf16>
    %c0_18 = arith.constant 0 : index
    %c0_19 = arith.constant 0 : index
    %35 = vector.load %arg8[%c0_18, %c0_19] : memref<64x128xbf16, #tpu.memory_space<vmem>>, vector<64x128xbf16>
    tpu.vector_store %arg8[%c0_18, %c0_19], %34 {strides = array<i32>} : memref<64x128xbf16, #tpu.memory_space<vmem>>, vector<64x128xbf16>,
    return
  }
  func.func @transform_0(%arg0: i32) -> (i32, i32) {
    %c0_i32 = arith.constant 0 : i32
    %c0_i32_0 = arith.constant 0 : i32
    return %arg0, %c0_i32 : i32, i32
  }
  func.func @transform_1(%arg0: i32) -> (i32, i32) {
    %c0_i32 = arith.constant 0 : i32
    %c0_i32_0 = arith.constant 0 : i32
    %c0_i32_1 = arith.constant 0 : i32
    return %c0_i32, %c0_i32_0 : i32, i32
  }
  func.func @transform_2(%arg0: i32) -> (i32, i32) {
    %c0_i32 = arith.constant 0 : i32
    %c0_i32_0 = arith.constant 0 : i32
    %c0_i32_1 = arith.constant 0 : i32
    return %c0_i32, %c0_i32_0 : i32, i32
  }
  func.func @transform_3(%arg0: i32) -> (i32, i32) {
    %c0_i32 = arith.constant 0 : i32
    %c0_i32_0 = arith.constant 0 : i32
    %c0_i32_1 = arith.constant 0 : i32
    return %c0_i32, %c0_i32_0 : i32, i32
  }
  func.func @transform_4(%arg0: i32) -> (i32, i32) {
    %c0_i32 = arith.constant 0 : i32
    %c0_i32_0 = arith.constant 0 : i32
    %c0_i32_1 = arith.constant 0 : i32
    return %c0_i32, %c0_i32_0 : i32, i32
  }
  func.func @transform_5(%arg0: i32) -> (i32, i32) {
    %c0_i32 = arith.constant 0 : i32
    %c0_i32_0 = arith.constant 0 : i32
    %c0_i32_1 = arith.constant 0 : i32
    return %c0_i32, %c0_i32_0 : i32, i32
  }
  func.func @transform_6(%arg0: i32) -> (i32, i32) {
    %c0_i32 = arith.constant 0 : i32
    %c0_i32_0 = arith.constant 0 : i32
    %c0_i32_1 = arith.constant 0 : i32
    return %c0_i32, %c0_i32_0 : i32, i32
  }
  func.func @transform_7(%arg0: i32) -> (i32, i32) {
    %c0_i32 = arith.constant 0 : i32
    %c0_i32_0 = arith.constant 0 : i32
    return %arg0, %c0_i32 : i32, i32
  }
}

module attributes {stable_mosaic.version = 11 : i64} {
  func.func @_conv_pool_kernel(%arg0: i32, %arg1: memref<104x128xbf16, #tpu.memory_space<vmem>>, %arg2: memref<9x128x256xbf16, #tpu.memory_space<vmem>>, %arg3: memref<1x128xf32, #tpu.memory_space<vmem>>, %arg4: memref<16x128xbf16, #tpu.memory_space<vmem>>, %arg5: memref<80x128xf32, #tpu.memory_space<vmem>>) attributes {dimension_semantics = [#tpu.dimension_semantics<parallel>], iteration_bounds = array<i64: 2>, scalar_prefetch = 0 : i64, scratch_operands = 1 : i64, tpu.core_type = #tpu.core_type<tc>, window_params = [{transform_indices = @transform_0, window_bounds = array<i64: 104, 128>}, {pipeline_mode = #tpu.pipeline_mode<synchronous>, transform_indices = @transform_1, window_bounds = array<i64: 9, 128, 256>}, {pipeline_mode = #tpu.pipeline_mode<synchronous>, transform_indices = @transform_2, window_bounds = array<i64: 1, 128>}, {transform_indices = @transform_3, window_bounds = array<i64: 16, 128>}]} {
    %c0 = arith.constant 0 : index
    %c0_0 = arith.constant 0 : index
    %0 = vector.load %arg1[%c0, %c0_0] : memref<104x128xbf16, #tpu.memory_space<vmem>>, vector<78x128xbf16>
    %c0_1 = arith.constant 0 : index
    %c0_2 = arith.constant 0 : index
    %c0_3 = arith.constant 0 : index
    %1 = vector.load %arg2[%c0_1, %c0_2, %c0_3] : memref<9x128x256xbf16, #tpu.memory_space<vmem>>, vector<1x128x256xbf16>
    %2 = vector.shape_cast %1 : vector<1x128x256xbf16> to vector<128x256xbf16>
    %cst = arith.constant dense<0.000000e+00> : vector<78x256xf32>
    %3 = tpu.matmul %0, %2, %cst {dimension_numbers = #tpu.dot_dimension_numbers<[1], [0], [0], [1], [0, 0, 1, 1], [], []>} : vector<78x128xbf16>, vector<128x256xbf16>, vector<78x256xf32> -> vector<78x256xf32>
    %c1 = arith.constant 1 : index
    %c0_4 = arith.constant 0 : index
    %4 = vector.load %arg1[%c1, %c0_4] : memref<104x128xbf16, #tpu.memory_space<vmem>>, vector<78x128xbf16>
    %c1_5 = arith.constant 1 : index
    %c0_6 = arith.constant 0 : index
    %c0_7 = arith.constant 0 : index
    %5 = vector.load %arg2[%c1_5, %c0_6, %c0_7] : memref<9x128x256xbf16, #tpu.memory_space<vmem>>, vector<1x128x256xbf16>
    %6 = vector.shape_cast %5 : vector<1x128x256xbf16> to vector<128x256xbf16>
    %cst_8 = arith.constant dense<0.000000e+00> : vector<78x256xf32>
    %7 = tpu.matmul %4, %6, %cst_8 {dimension_numbers = #tpu.dot_dimension_numbers<[1], [0], [0], [1], [0, 0, 1, 1], [], []>} : vector<78x128xbf16>, vector<128x256xbf16>, vector<78x256xf32> -> vector<78x256xf32>
    %8 = arith.addf %3, %7 : vector<78x256xf32>
    %c2 = arith.constant 2 : index
    %c0_9 = arith.constant 0 : index
    %9 = vector.load %arg1[%c2, %c0_9] : memref<104x128xbf16, #tpu.memory_space<vmem>>, vector<78x128xbf16>
    %c2_10 = arith.constant 2 : index
    %c0_11 = arith.constant 0 : index
    %c0_12 = arith.constant 0 : index
    %10 = vector.load %arg2[%c2_10, %c0_11, %c0_12] : memref<9x128x256xbf16, #tpu.memory_space<vmem>>, vector<1x128x256xbf16>
    %11 = vector.shape_cast %10 : vector<1x128x256xbf16> to vector<128x256xbf16>
    %cst_13 = arith.constant dense<0.000000e+00> : vector<78x256xf32>
    %12 = tpu.matmul %9, %11, %cst_13 {dimension_numbers = #tpu.dot_dimension_numbers<[1], [0], [0], [1], [0, 0, 1, 1], [], []>} : vector<78x128xbf16>, vector<128x256xbf16>, vector<78x256xf32> -> vector<78x256xf32>
    %13 = arith.addf %8, %12 : vector<78x256xf32>
    %c10 = arith.constant 10 : index
    %c0_14 = arith.constant 0 : index
    %14 = vector.load %arg1[%c10, %c0_14] : memref<104x128xbf16, #tpu.memory_space<vmem>>, vector<78x128xbf16>
    %c3 = arith.constant 3 : index
    %c0_15 = arith.constant 0 : index
    %c0_16 = arith.constant 0 : index
    %15 = vector.load %arg2[%c3, %c0_15, %c0_16] : memref<9x128x256xbf16, #tpu.memory_space<vmem>>, vector<1x128x256xbf16>
    %16 = vector.shape_cast %15 : vector<1x128x256xbf16> to vector<128x256xbf16>
    %cst_17 = arith.constant dense<0.000000e+00> : vector<78x256xf32>
    %17 = tpu.matmul %14, %16, %cst_17 {dimension_numbers = #tpu.dot_dimension_numbers<[1], [0], [0], [1], [0, 0, 1, 1], [], []>} : vector<78x128xbf16>, vector<128x256xbf16>, vector<78x256xf32> -> vector<78x256xf32>
    %18 = arith.addf %13, %17 : vector<78x256xf32>
    %c11 = arith.constant 11 : index
    %c0_18 = arith.constant 0 : index
    %19 = vector.load %arg1[%c11, %c0_18] : memref<104x128xbf16, #tpu.memory_space<vmem>>, vector<78x128xbf16>
    %c4 = arith.constant 4 : index
    %c0_19 = arith.constant 0 : index
    %c0_20 = arith.constant 0 : index
    %20 = vector.load %arg2[%c4, %c0_19, %c0_20] : memref<9x128x256xbf16, #tpu.memory_space<vmem>>, vector<1x128x256xbf16>
    %21 = vector.shape_cast %20 : vector<1x128x256xbf16> to vector<128x256xbf16>
    %cst_21 = arith.constant dense<0.000000e+00> : vector<78x256xf32>
    %22 = tpu.matmul %19, %21, %cst_21 {dimension_numbers = #tpu.dot_dimension_numbers<[1], [0], [0], [1], [0, 0, 1, 1], [], []>} : vector<78x128xbf16>, vector<128x256xbf16>, vector<78x256xf32> -> vector<78x256xf32>
    %23 = arith.addf %18, %22 : vector<78x256xf32>
    %c12 = arith.constant 12 : index
    %c0_22 = arith.constant 0 : index
    %24 = vector.load %arg1[%c12, %c0_22] : memref<104x128xbf16, #tpu.memory_space<vmem>>, vector<78x128xbf16>
    %c5 = arith.constant 5 : index
    %c0_23 = arith.constant 0 : index
    %c0_24 = arith.constant 0 : index
    %25 = vector.load %arg2[%c5, %c0_23, %c0_24] : memref<9x128x256xbf16, #tpu.memory_space<vmem>>, vector<1x128x256xbf16>
    %26 = vector.shape_cast %25 : vector<1x128x256xbf16> to vector<128x256xbf16>
    %cst_25 = arith.constant dense<0.000000e+00> : vector<78x256xf32>
    %27 = tpu.matmul %24, %26, %cst_25 {dimension_numbers = #tpu.dot_dimension_numbers<[1], [0], [0], [1], [0, 0, 1, 1], [], []>} : vector<78x128xbf16>, vector<128x256xbf16>, vector<78x256xf32> -> vector<78x256xf32>
    %28 = arith.addf %23, %27 : vector<78x256xf32>
    %c20 = arith.constant 20 : index
    %c0_26 = arith.constant 0 : index
    %29 = vector.load %arg1[%c20, %c0_26] : memref<104x128xbf16, #tpu.memory_space<vmem>>, vector<78x128xbf16>
    %c6 = arith.constant 6 : index
    %c0_27 = arith.constant 0 : index
    %c0_28 = arith.constant 0 : index
    %30 = vector.load %arg2[%c6, %c0_27, %c0_28] : memref<9x128x256xbf16, #tpu.memory_space<vmem>>, vector<1x128x256xbf16>
    %31 = vector.shape_cast %30 : vector<1x128x256xbf16> to vector<128x256xbf16>
    %cst_29 = arith.constant dense<0.000000e+00> : vector<78x256xf32>
    %32 = tpu.matmul %29, %31, %cst_29 {dimension_numbers = #tpu.dot_dimension_numbers<[1], [0], [0], [1], [0, 0, 1, 1], [], []>} : vector<78x128xbf16>, vector<128x256xbf16>, vector<78x256xf32> -> vector<78x256xf32>
    %33 = arith.addf %28, %32 : vector<78x256xf32>
    %c21 = arith.constant 21 : index
    %c0_30 = arith.constant 0 : index
    %34 = vector.load %arg1[%c21, %c0_30] : memref<104x128xbf16, #tpu.memory_space<vmem>>, vector<78x128xbf16>
    %c7 = arith.constant 7 : index
    %c0_31 = arith.constant 0 : index
    %c0_32 = arith.constant 0 : index
    %35 = vector.load %arg2[%c7, %c0_31, %c0_32] : memref<9x128x256xbf16, #tpu.memory_space<vmem>>, vector<1x128x256xbf16>
    %36 = vector.shape_cast %35 : vector<1x128x256xbf16> to vector<128x256xbf16>
    %cst_33 = arith.constant dense<0.000000e+00> : vector<78x256xf32>
    %37 = tpu.matmul %34, %36, %cst_33 {dimension_numbers = #tpu.dot_dimension_numbers<[1], [0], [0], [1], [0, 0, 1, 1], [], []>} : vector<78x128xbf16>, vector<128x256xbf16>, vector<78x256xf32> -> vector<78x256xf32>
    %38 = arith.addf %33, %37 : vector<78x256xf32>
    %c22 = arith.constant 22 : index
    %c0_34 = arith.constant 0 : index
    %39 = vector.load %arg1[%c22, %c0_34] : memref<104x128xbf16, #tpu.memory_space<vmem>>, vector<78x128xbf16>
    %c8 = arith.constant 8 : index
    %c0_35 = arith.constant 0 : index
    %c0_36 = arith.constant 0 : index
    %40 = vector.load %arg2[%c8, %c0_35, %c0_36] : memref<9x128x256xbf16, #tpu.memory_space<vmem>>, vector<1x128x256xbf16>
    %41 = vector.shape_cast %40 : vector<1x128x256xbf16> to vector<128x256xbf16>
    %cst_37 = arith.constant dense<0.000000e+00> : vector<78x256xf32>
    %42 = tpu.matmul %39, %41, %cst_37 {dimension_numbers = #tpu.dot_dimension_numbers<[1], [0], [0], [1], [0, 0, 1, 1], [], []>} : vector<78x128xbf16>, vector<128x256xbf16>, vector<78x256xf32> -> vector<78x256xf32>
    %43 = arith.addf %38, %42 : vector<78x256xf32>
    %44 = vector.extract_strided_slice %43 {offsets = [0, 0], sizes = [78, 128], strides = [1, 1]} : vector<78x256xf32> to vector<78x128xf32>
    %45 = vector.extract_strided_slice %43 {offsets = [0, 128], sizes = [78, 128], strides = [1, 1]} : vector<78x256xf32> to vector<78x128xf32>
    %46 = arith.maximumf %44, %45 : vector<78x128xf32>
    %c0_38 = arith.constant 0 : index
    %c0_39 = arith.constant 0 : index
    %47 = vector.load %arg5[%c0_38, %c0_39] : memref<80x128xf32, #tpu.memory_space<vmem>>, vector<78x128xf32>
    tpu.vector_store %arg5[%c0_38, %c0_39], %46 {strides = array<i32>} : memref<80x128xf32, #tpu.memory_space<vmem>>, vector<78x128xf32>,
    %c0_40 = arith.constant 0 : index
    %c0_41 = arith.constant 0 : index
    %48 = vector.load %arg5[%c0_40, %c0_41] : memref<80x128xf32, #tpu.memory_space<vmem>>, vector<2x128xf32>
    %c10_42 = arith.constant 10 : index
    %c0_43 = arith.constant 0 : index
    %49 = vector.load %arg5[%c10_42, %c0_43] : memref<80x128xf32, #tpu.memory_space<vmem>>, vector<2x128xf32>
    %50 = arith.maximumf %48, %49 : vector<2x128xf32>
    %cst_44 = arith.constant dense<0xFF800000> : vector<128xf32>
    %51 = vector.multi_reduction <maximumf>, %50, %cst_44 [0] : vector<2x128xf32> to vector<128xf32>
    %52 = vector.shape_cast %51 : vector<128xf32> to vector<1x128xf32>
    %c0_45 = arith.constant 0 : index
    %c0_46 = arith.constant 0 : index
    %53 = vector.load %arg3[%c0_45, %c0_46] : memref<1x128xf32, #tpu.memory_space<vmem>>, vector<1x128xf32>
    %54 = arith.addf %52, %53 : vector<1x128xf32>
    %cst_47 = arith.constant 0.000000e+00 : f32
    %55 = vector.broadcast %cst_47 : f32 to vector<1x128xf32>
    %56 = arith.maximumf %54, %55 : vector<1x128xf32>
    %57 = arith.truncf %56 : vector<1x128xf32> to vector<1x128xbf16>
    %c0_48 = arith.constant 0 : index
    %c0_49 = arith.constant 0 : index
    %58 = vector.load %arg4[%c0_48, %c0_49] : memref<16x128xbf16, #tpu.memory_space<vmem>>, vector<1x128xbf16>
    tpu.vector_store %arg4[%c0_48, %c0_49], %57 {strides = array<i32>} : memref<16x128xbf16, #tpu.memory_space<vmem>>, vector<1x128xbf16>,
    %c2_50 = arith.constant 2 : index
    %c0_51 = arith.constant 0 : index
    %59 = vector.load %arg5[%c2_50, %c0_51] : memref<80x128xf32, #tpu.memory_space<vmem>>, vector<2x128xf32>
    %c12_52 = arith.constant 12 : index
    %c0_53 = arith.constant 0 : index
    %60 = vector.load %arg5[%c12_52, %c0_53] : memref<80x128xf32, #tpu.memory_space<vmem>>, vector<2x128xf32>
    %61 = arith.maximumf %59, %60 : vector<2x128xf32>
    %cst_54 = arith.constant dense<0xFF800000> : vector<128xf32>
    %62 = vector.multi_reduction <maximumf>, %61, %cst_54 [0] : vector<2x128xf32> to vector<128xf32>
    %63 = vector.shape_cast %62 : vector<128xf32> to vector<1x128xf32>
    %c0_55 = arith.constant 0 : index
    %c0_56 = arith.constant 0 : index
    %64 = vector.load %arg3[%c0_55, %c0_56] : memref<1x128xf32, #tpu.memory_space<vmem>>, vector<1x128xf32>
    %65 = arith.addf %63, %64 : vector<1x128xf32>
    %cst_57 = arith.constant 0.000000e+00 : f32
    %66 = vector.broadcast %cst_57 : f32 to vector<1x128xf32>
    %67 = arith.maximumf %65, %66 : vector<1x128xf32>
    %68 = arith.truncf %67 : vector<1x128xf32> to vector<1x128xbf16>
    %c1_58 = arith.constant 1 : index
    %c0_59 = arith.constant 0 : index
    %69 = vector.load %arg4[%c1_58, %c0_59] : memref<16x128xbf16, #tpu.memory_space<vmem>>, vector<1x128xbf16>
    tpu.vector_store %arg4[%c1_58, %c0_59], %68 {strides = array<i32>} : memref<16x128xbf16, #tpu.memory_space<vmem>>, vector<1x128xbf16>,
    %c4_60 = arith.constant 4 : index
    %c0_61 = arith.constant 0 : index
    %70 = vector.load %arg5[%c4_60, %c0_61] : memref<80x128xf32, #tpu.memory_space<vmem>>, vector<2x128xf32>
    %c14 = arith.constant 14 : index
    %c0_62 = arith.constant 0 : index
    %71 = vector.load %arg5[%c14, %c0_62] : memref<80x128xf32, #tpu.memory_space<vmem>>, vector<2x128xf32>
    %72 = arith.maximumf %70, %71 : vector<2x128xf32>
    %cst_63 = arith.constant dense<0xFF800000> : vector<128xf32>
    %73 = vector.multi_reduction <maximumf>, %72, %cst_63 [0] : vector<2x128xf32> to vector<128xf32>
    %74 = vector.shape_cast %73 : vector<128xf32> to vector<1x128xf32>
    %c0_64 = arith.constant 0 : index
    %c0_65 = arith.constant 0 : index
    %75 = vector.load %arg3[%c0_64, %c0_65] : memref<1x128xf32, #tpu.memory_space<vmem>>, vector<1x128xf32>
    %76 = arith.addf %74, %75 : vector<1x128xf32>
    %cst_66 = arith.constant 0.000000e+00 : f32
    %77 = vector.broadcast %cst_66 : f32 to vector<1x128xf32>
    %78 = arith.maximumf %76, %77 : vector<1x128xf32>
    %79 = arith.truncf %78 : vector<1x128xf32> to vector<1x128xbf16>
    %c2_67 = arith.constant 2 : index
    %c0_68 = arith.constant 0 : index
    %80 = vector.load %arg4[%c2_67, %c0_68] : memref<16x128xbf16, #tpu.memory_space<vmem>>, vector<1x128xbf16>
    tpu.vector_store %arg4[%c2_67, %c0_68], %79 {strides = array<i32>} : memref<16x128xbf16, #tpu.memory_space<vmem>>, vector<1x128xbf16>,
    %c6_69 = arith.constant 6 : index
    %c0_70 = arith.constant 0 : index
    %81 = vector.load %arg5[%c6_69, %c0_70] : memref<80x128xf32, #tpu.memory_space<vmem>>, vector<2x128xf32>
    %c16 = arith.constant 16 : index
    %c0_71 = arith.constant 0 : index
    %82 = vector.load %arg5[%c16, %c0_71] : memref<80x128xf32, #tpu.memory_space<vmem>>, vector<2x128xf32>
    %83 = arith.maximumf %81, %82 : vector<2x128xf32>
    %cst_72 = arith.constant dense<0xFF800000> : vector<128xf32>
    %84 = vector.multi_reduction <maximumf>, %83, %cst_72 [0] : vector<2x128xf32> to vector<128xf32>
    %85 = vector.shape_cast %84 : vector<128xf32> to vector<1x128xf32>
    %c0_73 = arith.constant 0 : index
    %c0_74 = arith.constant 0 : index
    %86 = vector.load %arg3[%c0_73, %c0_74] : memref<1x128xf32, #tpu.memory_space<vmem>>, vector<1x128xf32>
    %87 = arith.addf %85, %86 : vector<1x128xf32>
    %cst_75 = arith.constant 0.000000e+00 : f32
    %88 = vector.broadcast %cst_75 : f32 to vector<1x128xf32>
    %89 = arith.maximumf %87, %88 : vector<1x128xf32>
    %90 = arith.truncf %89 : vector<1x128xf32> to vector<1x128xbf16>
    %c3_76 = arith.constant 3 : index
    %c0_77 = arith.constant 0 : index
    %91 = vector.load %arg4[%c3_76, %c0_77] : memref<16x128xbf16, #tpu.memory_space<vmem>>, vector<1x128xbf16>
    tpu.vector_store %arg4[%c3_76, %c0_77], %90 {strides = array<i32>} : memref<16x128xbf16, #tpu.memory_space<vmem>>, vector<1x128xbf16>,
    %c20_78 = arith.constant 20 : index
    %c0_79 = arith.constant 0 : index
    %92 = vector.load %arg5[%c20_78, %c0_79] : memref<80x128xf32, #tpu.memory_space<vmem>>, vector<2x128xf32>
    %c30 = arith.constant 30 : index
    %c0_80 = arith.constant 0 : index
    %93 = vector.load %arg5[%c30, %c0_80] : memref<80x128xf32, #tpu.memory_space<vmem>>, vector<2x128xf32>
    %94 = arith.maximumf %92, %93 : vector<2x128xf32>
    %cst_81 = arith.constant dense<0xFF800000> : vector<128xf32>
    %95 = vector.multi_reduction <maximumf>, %94, %cst_81 [0] : vector<2x128xf32> to vector<128xf32>
    %96 = vector.shape_cast %95 : vector<128xf32> to vector<1x128xf32>
    %c0_82 = arith.constant 0 : index
    %c0_83 = arith.constant 0 : index
    %97 = vector.load %arg3[%c0_82, %c0_83] : memref<1x128xf32, #tpu.memory_space<vmem>>, vector<1x128xf32>
    %98 = arith.addf %96, %97 : vector<1x128xf32>
    %cst_84 = arith.constant 0.000000e+00 : f32
    %99 = vector.broadcast %cst_84 : f32 to vector<1x128xf32>
    %100 = arith.maximumf %98, %99 : vector<1x128xf32>
    %101 = arith.truncf %100 : vector<1x128xf32> to vector<1x128xbf16>
    %c4_85 = arith.constant 4 : index
    %c0_86 = arith.constant 0 : index
    %102 = vector.load %arg4[%c4_85, %c0_86] : memref<16x128xbf16, #tpu.memory_space<vmem>>, vector<1x128xbf16>
    tpu.vector_store %arg4[%c4_85, %c0_86], %101 {strides = array<i32>} : memref<16x128xbf16, #tpu.memory_space<vmem>>, vector<1x128xbf16>,
    %c22_87 = arith.constant 22 : index
    %c0_88 = arith.constant 0 : index
    %103 = vector.load %arg5[%c22_87, %c0_88] : memref<80x128xf32, #tpu.memory_space<vmem>>, vector<2x128xf32>
    %c32 = arith.constant 32 : index
    %c0_89 = arith.constant 0 : index
    %104 = vector.load %arg5[%c32, %c0_89] : memref<80x128xf32, #tpu.memory_space<vmem>>, vector<2x128xf32>
    %105 = arith.maximumf %103, %104 : vector<2x128xf32>
    %cst_90 = arith.constant dense<0xFF800000> : vector<128xf32>
    %106 = vector.multi_reduction <maximumf>, %105, %cst_90 [0] : vector<2x128xf32> to vector<128xf32>
    %107 = vector.shape_cast %106 : vector<128xf32> to vector<1x128xf32>
    %c0_91 = arith.constant 0 : index
    %c0_92 = arith.constant 0 : index
    %108 = vector.load %arg3[%c0_91, %c0_92] : memref<1x128xf32, #tpu.memory_space<vmem>>, vector<1x128xf32>
    %109 = arith.addf %107, %108 : vector<1x128xf32>
    %cst_93 = arith.constant 0.000000e+00 : f32
    %110 = vector.broadcast %cst_93 : f32 to vector<1x128xf32>
    %111 = arith.maximumf %109, %110 : vector<1x128xf32>
    %112 = arith.truncf %111 : vector<1x128xf32> to vector<1x128xbf16>
    %c5_94 = arith.constant 5 : index
    %c0_95 = arith.constant 0 : index
    %113 = vector.load %arg4[%c5_94, %c0_95] : memref<16x128xbf16, #tpu.memory_space<vmem>>, vector<1x128xbf16>
    tpu.vector_store %arg4[%c5_94, %c0_95], %112 {strides = array<i32>} : memref<16x128xbf16, #tpu.memory_space<vmem>>, vector<1x128xbf16>,
    %c24 = arith.constant 24 : index
    %c0_96 = arith.constant 0 : index
    %114 = vector.load %arg5[%c24, %c0_96] : memref<80x128xf32, #tpu.memory_space<vmem>>, vector<2x128xf32>
    %c34 = arith.constant 34 : index
    %c0_97 = arith.constant 0 : index
    %115 = vector.load %arg5[%c34, %c0_97] : memref<80x128xf32, #tpu.memory_space<vmem>>, vector<2x128xf32>
    %116 = arith.maximumf %114, %115 : vector<2x128xf32>
    %cst_98 = arith.constant dense<0xFF800000> : vector<128xf32>
    %117 = vector.multi_reduction <maximumf>, %116, %cst_98 [0] : vector<2x128xf32> to vector<128xf32>
    %118 = vector.shape_cast %117 : vector<128xf32> to vector<1x128xf32>
    %c0_99 = arith.constant 0 : index
    %c0_100 = arith.constant 0 : index
    %119 = vector.load %arg3[%c0_99, %c0_100] : memref<1x128xf32, #tpu.memory_space<vmem>>, vector<1x128xf32>
    %120 = arith.addf %118, %119 : vector<1x128xf32>
    %cst_101 = arith.constant 0.000000e+00 : f32
    %121 = vector.broadcast %cst_101 : f32 to vector<1x128xf32>
    %122 = arith.maximumf %120, %121 : vector<1x128xf32>
    %123 = arith.truncf %122 : vector<1x128xf32> to vector<1x128xbf16>
    %c6_102 = arith.constant 6 : index
    %c0_103 = arith.constant 0 : index
    %124 = vector.load %arg4[%c6_102, %c0_103] : memref<16x128xbf16, #tpu.memory_space<vmem>>, vector<1x128xbf16>
    tpu.vector_store %arg4[%c6_102, %c0_103], %123 {strides = array<i32>} : memref<16x128xbf16, #tpu.memory_space<vmem>>, vector<1x128xbf16>,
    %c26 = arith.constant 26 : index
    %c0_104 = arith.constant 0 : index
    %125 = vector.load %arg5[%c26, %c0_104] : memref<80x128xf32, #tpu.memory_space<vmem>>, vector<2x128xf32>
    %c36 = arith.constant 36 : index
    %c0_105 = arith.constant 0 : index
    %126 = vector.load %arg5[%c36, %c0_105] : memref<80x128xf32, #tpu.memory_space<vmem>>, vector<2x128xf32>
    %127 = arith.maximumf %125, %126 : vector<2x128xf32>
    %cst_106 = arith.constant dense<0xFF800000> : vector<128xf32>
    %128 = vector.multi_reduction <maximumf>, %127, %cst_106 [0] : vector<2x128xf32> to vector<128xf32>
    %129 = vector.shape_cast %128 : vector<128xf32> to vector<1x128xf32>
    %c0_107 = arith.constant 0 : index
    %c0_108 = arith.constant 0 : index
    %130 = vector.load %arg3[%c0_107, %c0_108] : memref<1x128xf32, #tpu.memory_space<vmem>>, vector<1x128xf32>
    %131 = arith.addf %129, %130 : vector<1x128xf32>
    %cst_109 = arith.constant 0.000000e+00 : f32
    %132 = vector.broadcast %cst_109 : f32 to vector<1x128xf32>
    %133 = arith.maximumf %131, %132 : vector<1x128xf32>
    %134 = arith.truncf %133 : vector<1x128xf32> to vector<1x128xbf16>
    %c7_110 = arith.constant 7 : index
    %c0_111 = arith.constant 0 : index
    %135 = vector.load %arg4[%c7_110, %c0_111] : memref<16x128xbf16, #tpu.memory_space<vmem>>, vector<1x128xbf16>
    tpu.vector_store %arg4[%c7_110, %c0_111], %134 {strides = array<i32>} : memref<16x128xbf16, #tpu.memory_space<vmem>>, vector<1x128xbf16>,
    %c40 = arith.constant 40 : index
    %c0_112 = arith.constant 0 : index
    %136 = vector.load %arg5[%c40, %c0_112] : memref<80x128xf32, #tpu.memory_space<vmem>>, vector<2x128xf32>
    %c50 = arith.constant 50 : index
    %c0_113 = arith.constant 0 : index
    %137 = vector.load %arg5[%c50, %c0_113] : memref<80x128xf32, #tpu.memory_space<vmem>>, vector<2x128xf32>
    %138 = arith.maximumf %136, %137 : vector<2x128xf32>
    %cst_114 = arith.constant dense<0xFF800000> : vector<128xf32>
    %139 = vector.multi_reduction <maximumf>, %138, %cst_114 [0] : vector<2x128xf32> to vector<128xf32>
    %140 = vector.shape_cast %139 : vector<128xf32> to vector<1x128xf32>
    %c0_115 = arith.constant 0 : index
    %c0_116 = arith.constant 0 : index
    %141 = vector.load %arg3[%c0_115, %c0_116] : memref<1x128xf32, #tpu.memory_space<vmem>>, vector<1x128xf32>
    %142 = arith.addf %140, %141 : vector<1x128xf32>
    %cst_117 = arith.constant 0.000000e+00 : f32
    %143 = vector.broadcast %cst_117 : f32 to vector<1x128xf32>
    %144 = arith.maximumf %142, %143 : vector<1x128xf32>
    %145 = arith.truncf %144 : vector<1x128xf32> to vector<1x128xbf16>
    %c8_118 = arith.constant 8 : index
    %c0_119 = arith.constant 0 : index
    %146 = vector.load %arg4[%c8_118, %c0_119] : memref<16x128xbf16, #tpu.memory_space<vmem>>, vector<1x128xbf16>
    tpu.vector_store %arg4[%c8_118, %c0_119], %145 {strides = array<i32>} : memref<16x128xbf16, #tpu.memory_space<vmem>>, vector<1x128xbf16>,
    %c42 = arith.constant 42 : index
    %c0_120 = arith.constant 0 : index
    %147 = vector.load %arg5[%c42, %c0_120] : memref<80x128xf32, #tpu.memory_space<vmem>>, vector<2x128xf32>
    %c52 = arith.constant 52 : index
    %c0_121 = arith.constant 0 : index
    %148 = vector.load %arg5[%c52, %c0_121] : memref<80x128xf32, #tpu.memory_space<vmem>>, vector<2x128xf32>
    %149 = arith.maximumf %147, %148 : vector<2x128xf32>
    %cst_122 = arith.constant dense<0xFF800000> : vector<128xf32>
    %150 = vector.multi_reduction <maximumf>, %149, %cst_122 [0] : vector<2x128xf32> to vector<128xf32>
    %151 = vector.shape_cast %150 : vector<128xf32> to vector<1x128xf32>
    %c0_123 = arith.constant 0 : index
    %c0_124 = arith.constant 0 : index
    %152 = vector.load %arg3[%c0_123, %c0_124] : memref<1x128xf32, #tpu.memory_space<vmem>>, vector<1x128xf32>
    %153 = arith.addf %151, %152 : vector<1x128xf32>
    %cst_125 = arith.constant 0.000000e+00 : f32
    %154 = vector.broadcast %cst_125 : f32 to vector<1x128xf32>
    %155 = arith.maximumf %153, %154 : vector<1x128xf32>
    %156 = arith.truncf %155 : vector<1x128xf32> to vector<1x128xbf16>
    %c9 = arith.constant 9 : index
    %c0_126 = arith.constant 0 : index
    %157 = vector.load %arg4[%c9, %c0_126] : memref<16x128xbf16, #tpu.memory_space<vmem>>, vector<1x128xbf16>
    tpu.vector_store %arg4[%c9, %c0_126], %156 {strides = array<i32>} : memref<16x128xbf16, #tpu.memory_space<vmem>>, vector<1x128xbf16>,
    %c44 = arith.constant 44 : index
    %c0_127 = arith.constant 0 : index
    %158 = vector.load %arg5[%c44, %c0_127] : memref<80x128xf32, #tpu.memory_space<vmem>>, vector<2x128xf32>
    %c54 = arith.constant 54 : index
    %c0_128 = arith.constant 0 : index
    %159 = vector.load %arg5[%c54, %c0_128] : memref<80x128xf32, #tpu.memory_space<vmem>>, vector<2x128xf32>
    %160 = arith.maximumf %158, %159 : vector<2x128xf32>
    %cst_129 = arith.constant dense<0xFF800000> : vector<128xf32>
    %161 = vector.multi_reduction <maximumf>, %160, %cst_129 [0] : vector<2x128xf32> to vector<128xf32>
    %162 = vector.shape_cast %161 : vector<128xf32> to vector<1x128xf32>
    %c0_130 = arith.constant 0 : index
    %c0_131 = arith.constant 0 : index
    %163 = vector.load %arg3[%c0_130, %c0_131] : memref<1x128xf32, #tpu.memory_space<vmem>>, vector<1x128xf32>
    %164 = arith.addf %162, %163 : vector<1x128xf32>
    %cst_132 = arith.constant 0.000000e+00 : f32
    %165 = vector.broadcast %cst_132 : f32 to vector<1x128xf32>
    %166 = arith.maximumf %164, %165 : vector<1x128xf32>
    %167 = arith.truncf %166 : vector<1x128xf32> to vector<1x128xbf16>
    %c10_133 = arith.constant 10 : index
    %c0_134 = arith.constant 0 : index
    %168 = vector.load %arg4[%c10_133, %c0_134] : memref<16x128xbf16, #tpu.memory_space<vmem>>, vector<1x128xbf16>
    tpu.vector_store %arg4[%c10_133, %c0_134], %167 {strides = array<i32>} : memref<16x128xbf16, #tpu.memory_space<vmem>>, vector<1x128xbf16>,
    %c46 = arith.constant 46 : index
    %c0_135 = arith.constant 0 : index
    %169 = vector.load %arg5[%c46, %c0_135] : memref<80x128xf32, #tpu.memory_space<vmem>>, vector<2x128xf32>
    %c56 = arith.constant 56 : index
    %c0_136 = arith.constant 0 : index
    %170 = vector.load %arg5[%c56, %c0_136] : memref<80x128xf32, #tpu.memory_space<vmem>>, vector<2x128xf32>
    %171 = arith.maximumf %169, %170 : vector<2x128xf32>
    %cst_137 = arith.constant dense<0xFF800000> : vector<128xf32>
    %172 = vector.multi_reduction <maximumf>, %171, %cst_137 [0] : vector<2x128xf32> to vector<128xf32>
    %173 = vector.shape_cast %172 : vector<128xf32> to vector<1x128xf32>
    %c0_138 = arith.constant 0 : index
    %c0_139 = arith.constant 0 : index
    %174 = vector.load %arg3[%c0_138, %c0_139] : memref<1x128xf32, #tpu.memory_space<vmem>>, vector<1x128xf32>
    %175 = arith.addf %173, %174 : vector<1x128xf32>
    %cst_140 = arith.constant 0.000000e+00 : f32
    %176 = vector.broadcast %cst_140 : f32 to vector<1x128xf32>
    %177 = arith.maximumf %175, %176 : vector<1x128xf32>
    %178 = arith.truncf %177 : vector<1x128xf32> to vector<1x128xbf16>
    %c11_141 = arith.constant 11 : index
    %c0_142 = arith.constant 0 : index
    %179 = vector.load %arg4[%c11_141, %c0_142] : memref<16x128xbf16, #tpu.memory_space<vmem>>, vector<1x128xbf16>
    tpu.vector_store %arg4[%c11_141, %c0_142], %178 {strides = array<i32>} : memref<16x128xbf16, #tpu.memory_space<vmem>>, vector<1x128xbf16>,
    %c60 = arith.constant 60 : index
    %c0_143 = arith.constant 0 : index
    %180 = vector.load %arg5[%c60, %c0_143] : memref<80x128xf32, #tpu.memory_space<vmem>>, vector<2x128xf32>
    %c70 = arith.constant 70 : index
    %c0_144 = arith.constant 0 : index
    %181 = vector.load %arg5[%c70, %c0_144] : memref<80x128xf32, #tpu.memory_space<vmem>>, vector<2x128xf32>
    %182 = arith.maximumf %180, %181 : vector<2x128xf32>
    %cst_145 = arith.constant dense<0xFF800000> : vector<128xf32>
    %183 = vector.multi_reduction <maximumf>, %182, %cst_145 [0] : vector<2x128xf32> to vector<128xf32>
    %184 = vector.shape_cast %183 : vector<128xf32> to vector<1x128xf32>
    %c0_146 = arith.constant 0 : index
    %c0_147 = arith.constant 0 : index
    %185 = vector.load %arg3[%c0_146, %c0_147] : memref<1x128xf32, #tpu.memory_space<vmem>>, vector<1x128xf32>
    %186 = arith.addf %184, %185 : vector<1x128xf32>
    %cst_148 = arith.constant 0.000000e+00 : f32
    %187 = vector.broadcast %cst_148 : f32 to vector<1x128xf32>
    %188 = arith.maximumf %186, %187 : vector<1x128xf32>
    %189 = arith.truncf %188 : vector<1x128xf32> to vector<1x128xbf16>
    %c12_149 = arith.constant 12 : index
    %c0_150 = arith.constant 0 : index
    %190 = vector.load %arg4[%c12_149, %c0_150] : memref<16x128xbf16, #tpu.memory_space<vmem>>, vector<1x128xbf16>
    tpu.vector_store %arg4[%c12_149, %c0_150], %189 {strides = array<i32>} : memref<16x128xbf16, #tpu.memory_space<vmem>>, vector<1x128xbf16>,
    %c62 = arith.constant 62 : index
    %c0_151 = arith.constant 0 : index
    %191 = vector.load %arg5[%c62, %c0_151] : memref<80x128xf32, #tpu.memory_space<vmem>>, vector<2x128xf32>
    %c72 = arith.constant 72 : index
    %c0_152 = arith.constant 0 : index
    %192 = vector.load %arg5[%c72, %c0_152] : memref<80x128xf32, #tpu.memory_space<vmem>>, vector<2x128xf32>
    %193 = arith.maximumf %191, %192 : vector<2x128xf32>
    %cst_153 = arith.constant dense<0xFF800000> : vector<128xf32>
    %194 = vector.multi_reduction <maximumf>, %193, %cst_153 [0] : vector<2x128xf32> to vector<128xf32>
    %195 = vector.shape_cast %194 : vector<128xf32> to vector<1x128xf32>
    %c0_154 = arith.constant 0 : index
    %c0_155 = arith.constant 0 : index
    %196 = vector.load %arg3[%c0_154, %c0_155] : memref<1x128xf32, #tpu.memory_space<vmem>>, vector<1x128xf32>
    %197 = arith.addf %195, %196 : vector<1x128xf32>
    %cst_156 = arith.constant 0.000000e+00 : f32
    %198 = vector.broadcast %cst_156 : f32 to vector<1x128xf32>
    %199 = arith.maximumf %197, %198 : vector<1x128xf32>
    %200 = arith.truncf %199 : vector<1x128xf32> to vector<1x128xbf16>
    %c13 = arith.constant 13 : index
    %c0_157 = arith.constant 0 : index
    %201 = vector.load %arg4[%c13, %c0_157] : memref<16x128xbf16, #tpu.memory_space<vmem>>, vector<1x128xbf16>
    tpu.vector_store %arg4[%c13, %c0_157], %200 {strides = array<i32>} : memref<16x128xbf16, #tpu.memory_space<vmem>>, vector<1x128xbf16>,
    %c64 = arith.constant 64 : index
    %c0_158 = arith.constant 0 : index
    %202 = vector.load %arg5[%c64, %c0_158] : memref<80x128xf32, #tpu.memory_space<vmem>>, vector<2x128xf32>
    %c74 = arith.constant 74 : index
    %c0_159 = arith.constant 0 : index
    %203 = vector.load %arg5[%c74, %c0_159] : memref<80x128xf32, #tpu.memory_space<vmem>>, vector<2x128xf32>
    %204 = arith.maximumf %202, %203 : vector<2x128xf32>
    %cst_160 = arith.constant dense<0xFF800000> : vector<128xf32>
    %205 = vector.multi_reduction <maximumf>, %204, %cst_160 [0] : vector<2x128xf32> to vector<128xf32>
    %206 = vector.shape_cast %205 : vector<128xf32> to vector<1x128xf32>
    %c0_161 = arith.constant 0 : index
    %c0_162 = arith.constant 0 : index
    %207 = vector.load %arg3[%c0_161, %c0_162] : memref<1x128xf32, #tpu.memory_space<vmem>>, vector<1x128xf32>
    %208 = arith.addf %206, %207 : vector<1x128xf32>
    %cst_163 = arith.constant 0.000000e+00 : f32
    %209 = vector.broadcast %cst_163 : f32 to vector<1x128xf32>
    %210 = arith.maximumf %208, %209 : vector<1x128xf32>
    %211 = arith.truncf %210 : vector<1x128xf32> to vector<1x128xbf16>
    %c14_164 = arith.constant 14 : index
    %c0_165 = arith.constant 0 : index
    %212 = vector.load %arg4[%c14_164, %c0_165] : memref<16x128xbf16, #tpu.memory_space<vmem>>, vector<1x128xbf16>
    tpu.vector_store %arg4[%c14_164, %c0_165], %211 {strides = array<i32>} : memref<16x128xbf16, #tpu.memory_space<vmem>>, vector<1x128xbf16>,
    %c66 = arith.constant 66 : index
    %c0_166 = arith.constant 0 : index
    %213 = vector.load %arg5[%c66, %c0_166] : memref<80x128xf32, #tpu.memory_space<vmem>>, vector<2x128xf32>
    %c76 = arith.constant 76 : index
    %c0_167 = arith.constant 0 : index
    %214 = vector.load %arg5[%c76, %c0_167] : memref<80x128xf32, #tpu.memory_space<vmem>>, vector<2x128xf32>
    %215 = arith.maximumf %213, %214 : vector<2x128xf32>
    %cst_168 = arith.constant dense<0xFF800000> : vector<128xf32>
    %216 = vector.multi_reduction <maximumf>, %215, %cst_168 [0] : vector<2x128xf32> to vector<128xf32>
    %217 = vector.shape_cast %216 : vector<128xf32> to vector<1x128xf32>
    %c0_169 = arith.constant 0 : index
    %c0_170 = arith.constant 0 : index
    %218 = vector.load %arg3[%c0_169, %c0_170] : memref<1x128xf32, #tpu.memory_space<vmem>>, vector<1x128xf32>
    %219 = arith.addf %217, %218 : vector<1x128xf32>
    %cst_171 = arith.constant 0.000000e+00 : f32
    %220 = vector.broadcast %cst_171 : f32 to vector<1x128xf32>
    %221 = arith.maximumf %219, %220 : vector<1x128xf32>
    %222 = arith.truncf %221 : vector<1x128xf32> to vector<1x128xbf16>
    %c15 = arith.constant 15 : index
    %c0_172 = arith.constant 0 : index
    %223 = vector.load %arg4[%c15, %c0_172] : memref<16x128xbf16, #tpu.memory_space<vmem>>, vector<1x128xbf16>
    tpu.vector_store %arg4[%c15, %c0_172], %222 {strides = array<i32>} : memref<16x128xbf16, #tpu.memory_space<vmem>>, vector<1x128xbf16>,
    return
  }
  func.func @transform_0(%arg0: i32) -> (i32, i32) {
    %c0_i32 = arith.constant 0 : i32
    %c0_i32_0 = arith.constant 0 : i32
    return %arg0, %c0_i32 : i32, i32
  }
  func.func @transform_1(%arg0: i32) -> (i32, i32, i32) {
    %c0_i32 = arith.constant 0 : i32
    %c0_i32_0 = arith.constant 0 : i32
    %c0_i32_1 = arith.constant 0 : i32
    %c0_i32_2 = arith.constant 0 : i32
    return %c0_i32, %c0_i32_0, %c0_i32_1 : i32, i32, i32
  }
  func.func @transform_2(%arg0: i32) -> (i32, i32) {
    %c0_i32 = arith.constant 0 : i32
    %c0_i32_0 = arith.constant 0 : i32
    %c0_i32_1 = arith.constant 0 : i32
    return %c0_i32, %c0_i32_0 : i32, i32
  }
  func.func @transform_3(%arg0: i32) -> (i32, i32) {
    %c0_i32 = arith.constant 0 : i32
    %c0_i32_0 = arith.constant 0 : i32
    return %arg0, %c0_i32 : i32, i32
  }
}

module attributes {stable_mosaic.version = 11 : i64} {
  func.func @_tail_head_kernel(%arg0: i32, %arg1: memref<80x128xbf16, #tpu.memory_space<vmem>>, %arg2: memref<9x128x256xbf16, #tpu.memory_space<vmem>>, %arg3: memref<1x128xf32, #tpu.memory_space<vmem>>, %arg4: memref<9x128x256xbf16, #tpu.memory_space<vmem>>, %arg5: memref<1x128xf32, #tpu.memory_space<vmem>>, %arg6: memref<128x128xbf16, #tpu.memory_space<vmem>>, %arg7: memref<1x128xf32, #tpu.memory_space<vmem>>, %arg8: memref<128x34xbf16, #tpu.memory_space<vmem>>, %arg9: memref<1x34xf32, #tpu.memory_space<vmem>>, %arg10: memref<2x34xf32, #tpu.memory_space<vmem>>, %arg11: memref<32x128xbf16, #tpu.memory_space<vmem>>, %arg12: memref<24x128xf32, #tpu.memory_space<vmem>>, %arg13: memref<8x128xf32, #tpu.memory_space<vmem>>) attributes {dimension_semantics = [#tpu.dimension_semantics<arbitrary>], iteration_bounds = array<i64: 1>, scalar_prefetch = 0 : i64, scratch_operands = 3 : i64, tpu.core_type = #tpu.core_type<tc>, window_params = [{pipeline_mode = #tpu.pipeline_mode<synchronous>, transform_indices = @transform_0, window_bounds = array<i64: 80, 128>}, {pipeline_mode = #tpu.pipeline_mode<synchronous>, transform_indices = @transform_1, window_bounds = array<i64: 9, 128, 256>}, {pipeline_mode = #tpu.pipeline_mode<synchronous>, transform_indices = @transform_2, window_bounds = array<i64: 1, 128>}, {pipeline_mode = #tpu.pipeline_mode<synchronous>, transform_indices = @transform_3, window_bounds = array<i64: 9, 128, 256>}, {pipeline_mode = #tpu.pipeline_mode<synchronous>, transform_indices = @transform_4, window_bounds = array<i64: 1, 128>}, {pipeline_mode = #tpu.pipeline_mode<synchronous>, transform_indices = @transform_5, window_bounds = array<i64: 128, 128>}, {pipeline_mode = #tpu.pipeline_mode<synchronous>, transform_indices = @transform_6, window_bounds = array<i64: 1, 128>}, {pipeline_mode = #tpu.pipeline_mode<synchronous>, transform_indices = @transform_7, window_bounds = array<i64: 128, 34>}, {pipeline_mode = #tpu.pipeline_mode<synchronous>, transform_indices = @transform_8, window_bounds = array<i64: 1, 34>}, {pipeline_mode = #tpu.pipeline_mode<synchronous>, transform_indices = @transform_9, window_bounds = array<i64: 2, 34>}]} {
    %cst = arith.constant 0.000000e+00 : bf16
    %0 = vector.broadcast %cst : bf16 to vector<32x128xbf16>
    %c0 = arith.constant 0 : index
    %c0_0 = arith.constant 0 : index
    %1 = vector.load %arg11[%c0, %c0_0] : memref<32x128xbf16, #tpu.memory_space<vmem>>, vector<32x128xbf16>
    tpu.vector_store %arg11[%c0, %c0_0], %0 {strides = array<i32>} : memref<32x128xbf16, #tpu.memory_space<vmem>>, vector<32x128xbf16>,
    %cst_1 = arith.constant 0.000000e+00 : f32
    %2 = vector.broadcast %cst_1 : f32 to vector<8x128xf32>
    %c0_2 = arith.constant 0 : index
    %c0_3 = arith.constant 0 : index
    %3 = vector.load %arg13[%c0_2, %c0_3] : memref<8x128xf32, #tpu.memory_space<vmem>>, vector<8x128xf32>
    tpu.vector_store %arg13[%c0_2, %c0_3], %2 {strides = array<i32>} : memref<8x128xf32, #tpu.memory_space<vmem>>, vector<8x128xf32>,
    %c0_4 = arith.constant 0 : index
    %c0_5 = arith.constant 0 : index
    %4 = vector.load %arg1[%c0_4, %c0_5] : memref<80x128xbf16, #tpu.memory_space<vmem>>, vector<22x128xbf16>
    %c0_6 = arith.constant 0 : index
    %c0_7 = arith.constant 0 : index
    %c0_8 = arith.constant 0 : index
    %5 = vector.load %arg2[%c0_6, %c0_7, %c0_8] : memref<9x128x256xbf16, #tpu.memory_space<vmem>>, vector<1x128x256xbf16>
    %6 = vector.shape_cast %5 : vector<1x128x256xbf16> to vector<128x256xbf16>
    %cst_9 = arith.constant dense<0.000000e+00> : vector<22x256xf32>
    %7 = tpu.matmul %4, %6, %cst_9 {dimension_numbers = #tpu.dot_dimension_numbers<[1], [0], [0], [1], [0, 0, 1, 1], [], []>} : vector<22x128xbf16>, vector<128x256xbf16>, vector<22x256xf32> -> vector<22x256xf32>
    %c1 = arith.constant 1 : index
    %c0_10 = arith.constant 0 : index
    %8 = vector.load %arg1[%c1, %c0_10] : memref<80x128xbf16, #tpu.memory_space<vmem>>, vector<22x128xbf16>
    %c1_11 = arith.constant 1 : index
    %c0_12 = arith.constant 0 : index
    %c0_13 = arith.constant 0 : index
    %9 = vector.load %arg2[%c1_11, %c0_12, %c0_13] : memref<9x128x256xbf16, #tpu.memory_space<vmem>>, vector<1x128x256xbf16>
    %10 = vector.shape_cast %9 : vector<1x128x256xbf16> to vector<128x256xbf16>
    %cst_14 = arith.constant dense<0.000000e+00> : vector<22x256xf32>
    %11 = tpu.matmul %8, %10, %cst_14 {dimension_numbers = #tpu.dot_dimension_numbers<[1], [0], [0], [1], [0, 0, 1, 1], [], []>} : vector<22x128xbf16>, vector<128x256xbf16>, vector<22x256xf32> -> vector<22x256xf32>
    %12 = arith.addf %7, %11 : vector<22x256xf32>
    %c2 = arith.constant 2 : index
    %c0_15 = arith.constant 0 : index
    %13 = vector.load %arg1[%c2, %c0_15] : memref<80x128xbf16, #tpu.memory_space<vmem>>, vector<22x128xbf16>
    %c2_16 = arith.constant 2 : index
    %c0_17 = arith.constant 0 : index
    %c0_18 = arith.constant 0 : index
    %14 = vector.load %arg2[%c2_16, %c0_17, %c0_18] : memref<9x128x256xbf16, #tpu.memory_space<vmem>>, vector<1x128x256xbf16>
    %15 = vector.shape_cast %14 : vector<1x128x256xbf16> to vector<128x256xbf16>
    %cst_19 = arith.constant dense<0.000000e+00> : vector<22x256xf32>
    %16 = tpu.matmul %13, %15, %cst_19 {dimension_numbers = #tpu.dot_dimension_numbers<[1], [0], [0], [1], [0, 0, 1, 1], [], []>} : vector<22x128xbf16>, vector<128x256xbf16>, vector<22x256xf32> -> vector<22x256xf32>
    %17 = arith.addf %12, %16 : vector<22x256xf32>
    %c6 = arith.constant 6 : index
    %c0_20 = arith.constant 0 : index
    %18 = vector.load %arg1[%c6, %c0_20] : memref<80x128xbf16, #tpu.memory_space<vmem>>, vector<22x128xbf16>
    %c3 = arith.constant 3 : index
    %c0_21 = arith.constant 0 : index
    %c0_22 = arith.constant 0 : index
    %19 = vector.load %arg2[%c3, %c0_21, %c0_22] : memref<9x128x256xbf16, #tpu.memory_space<vmem>>, vector<1x128x256xbf16>
    %20 = vector.shape_cast %19 : vector<1x128x256xbf16> to vector<128x256xbf16>
    %cst_23 = arith.constant dense<0.000000e+00> : vector<22x256xf32>
    %21 = tpu.matmul %18, %20, %cst_23 {dimension_numbers = #tpu.dot_dimension_numbers<[1], [0], [0], [1], [0, 0, 1, 1], [], []>} : vector<22x128xbf16>, vector<128x256xbf16>, vector<22x256xf32> -> vector<22x256xf32>
    %22 = arith.addf %17, %21 : vector<22x256xf32>
    %c7 = arith.constant 7 : index
    %c0_24 = arith.constant 0 : index
    %23 = vector.load %arg1[%c7, %c0_24] : memref<80x128xbf16, #tpu.memory_space<vmem>>, vector<22x128xbf16>
    %c4 = arith.constant 4 : index
    %c0_25 = arith.constant 0 : index
    %c0_26 = arith.constant 0 : index
    %24 = vector.load %arg2[%c4, %c0_25, %c0_26] : memref<9x128x256xbf16, #tpu.memory_space<vmem>>, vector<1x128x256xbf16>
    %25 = vector.shape_cast %24 : vector<1x128x256xbf16> to vector<128x256xbf16>
    %cst_27 = arith.constant dense<0.000000e+00> : vector<22x256xf32>
    %26 = tpu.matmul %23, %25, %cst_27 {dimension_numbers = #tpu.dot_dimension_numbers<[1], [0], [0], [1], [0, 0, 1, 1], [], []>} : vector<22x128xbf16>, vector<128x256xbf16>, vector<22x256xf32> -> vector<22x256xf32>
    %27 = arith.addf %22, %26 : vector<22x256xf32>
    %c8 = arith.constant 8 : index
    %c0_28 = arith.constant 0 : index
    %28 = vector.load %arg1[%c8, %c0_28] : memref<80x128xbf16, #tpu.memory_space<vmem>>, vector<22x128xbf16>
    %c5 = arith.constant 5 : index
    %c0_29 = arith.constant 0 : index
    %c0_30 = arith.constant 0 : index
    %29 = vector.load %arg2[%c5, %c0_29, %c0_30] : memref<9x128x256xbf16, #tpu.memory_space<vmem>>, vector<1x128x256xbf16>
    %30 = vector.shape_cast %29 : vector<1x128x256xbf16> to vector<128x256xbf16>
    %cst_31 = arith.constant dense<0.000000e+00> : vector<22x256xf32>
    %31 = tpu.matmul %28, %30, %cst_31 {dimension_numbers = #tpu.dot_dimension_numbers<[1], [0], [0], [1], [0, 0, 1, 1], [], []>} : vector<22x128xbf16>, vector<128x256xbf16>, vector<22x256xf32> -> vector<22x256xf32>
    %32 = arith.addf %27, %31 : vector<22x256xf32>
    %c12 = arith.constant 12 : index
    %c0_32 = arith.constant 0 : index
    %33 = vector.load %arg1[%c12, %c0_32] : memref<80x128xbf16, #tpu.memory_space<vmem>>, vector<22x128xbf16>
    %c6_33 = arith.constant 6 : index
    %c0_34 = arith.constant 0 : index
    %c0_35 = arith.constant 0 : index
    %34 = vector.load %arg2[%c6_33, %c0_34, %c0_35] : memref<9x128x256xbf16, #tpu.memory_space<vmem>>, vector<1x128x256xbf16>
    %35 = vector.shape_cast %34 : vector<1x128x256xbf16> to vector<128x256xbf16>
    %cst_36 = arith.constant dense<0.000000e+00> : vector<22x256xf32>
    %36 = tpu.matmul %33, %35, %cst_36 {dimension_numbers = #tpu.dot_dimension_numbers<[1], [0], [0], [1], [0, 0, 1, 1], [], []>} : vector<22x128xbf16>, vector<128x256xbf16>, vector<22x256xf32> -> vector<22x256xf32>
    %37 = arith.addf %32, %36 : vector<22x256xf32>
    %c13 = arith.constant 13 : index
    %c0_37 = arith.constant 0 : index
    %38 = vector.load %arg1[%c13, %c0_37] : memref<80x128xbf16, #tpu.memory_space<vmem>>, vector<22x128xbf16>
    %c7_38 = arith.constant 7 : index
    %c0_39 = arith.constant 0 : index
    %c0_40 = arith.constant 0 : index
    %39 = vector.load %arg2[%c7_38, %c0_39, %c0_40] : memref<9x128x256xbf16, #tpu.memory_space<vmem>>, vector<1x128x256xbf16>
    %40 = vector.shape_cast %39 : vector<1x128x256xbf16> to vector<128x256xbf16>
    %cst_41 = arith.constant dense<0.000000e+00> : vector<22x256xf32>
    %41 = tpu.matmul %38, %40, %cst_41 {dimension_numbers = #tpu.dot_dimension_numbers<[1], [0], [0], [1], [0, 0, 1, 1], [], []>} : vector<22x128xbf16>, vector<128x256xbf16>, vector<22x256xf32> -> vector<22x256xf32>
    %42 = arith.addf %37, %41 : vector<22x256xf32>
    %c14 = arith.constant 14 : index
    %c0_42 = arith.constant 0 : index
    %43 = vector.load %arg1[%c14, %c0_42] : memref<80x128xbf16, #tpu.memory_space<vmem>>, vector<22x128xbf16>
    %c8_43 = arith.constant 8 : index
    %c0_44 = arith.constant 0 : index
    %c0_45 = arith.constant 0 : index
    %44 = vector.load %arg2[%c8_43, %c0_44, %c0_45] : memref<9x128x256xbf16, #tpu.memory_space<vmem>>, vector<1x128x256xbf16>
    %45 = vector.shape_cast %44 : vector<1x128x256xbf16> to vector<128x256xbf16>
    %cst_46 = arith.constant dense<0.000000e+00> : vector<22x256xf32>
    %46 = tpu.matmul %43, %45, %cst_46 {dimension_numbers = #tpu.dot_dimension_numbers<[1], [0], [0], [1], [0, 0, 1, 1], [], []>} : vector<22x128xbf16>, vector<128x256xbf16>, vector<22x256xf32> -> vector<22x256xf32>
    %47 = arith.addf %42, %46 : vector<22x256xf32>
    %48 = vector.extract_strided_slice %47 {offsets = [0, 0], sizes = [22, 128], strides = [1, 1]} : vector<22x256xf32> to vector<22x128xf32>
    %49 = vector.extract_strided_slice %47 {offsets = [0, 128], sizes = [22, 128], strides = [1, 1]} : vector<22x256xf32> to vector<22x128xf32>
    %50 = arith.maximumf %48, %49 : vector<22x128xf32>
    %c0_47 = arith.constant 0 : index
    %c0_48 = arith.constant 0 : index
    %51 = vector.load %arg12[%c0_47, %c0_48] : memref<24x128xf32, #tpu.memory_space<vmem>>, vector<22x128xf32>
    tpu.vector_store %arg12[%c0_47, %c0_48], %50 {strides = array<i32>} : memref<24x128xf32, #tpu.memory_space<vmem>>, vector<22x128xf32>,
    %c0_49 = arith.constant 0 : index
    %c0_50 = arith.constant 0 : index
    %52 = vector.load %arg12[%c0_49, %c0_50] : memref<24x128xf32, #tpu.memory_space<vmem>>, vector<2x128xf32>
    %c6_51 = arith.constant 6 : index
    %c0_52 = arith.constant 0 : index
    %53 = vector.load %arg12[%c6_51, %c0_52] : memref<24x128xf32, #tpu.memory_space<vmem>>, vector<2x128xf32>
    %54 = arith.maximumf %52, %53 : vector<2x128xf32>
    %cst_53 = arith.constant dense<0xFF800000> : vector<128xf32>
    %55 = vector.multi_reduction <maximumf>, %54, %cst_53 [0] : vector<2x128xf32> to vector<128xf32>
    %56 = vector.shape_cast %55 : vector<128xf32> to vector<1x128xf32>
    %c0_54 = arith.constant 0 : index
    %c0_55 = arith.constant 0 : index
    %57 = vector.load %arg3[%c0_54, %c0_55] : memref<1x128xf32, #tpu.memory_space<vmem>>, vector<1x128xf32>
    %58 = arith.addf %56, %57 : vector<1x128xf32>
    %cst_56 = arith.constant 0.000000e+00 : f32
    %59 = vector.broadcast %cst_56 : f32 to vector<1x128xf32>
    %60 = arith.maximumf %58, %59 : vector<1x128xf32>
    %61 = arith.truncf %60 : vector<1x128xf32> to vector<1x128xbf16>
    %c5_57 = arith.constant 5 : index
    %c0_58 = arith.constant 0 : index
    %62 = vector.load %arg11[%c5_57, %c0_58] : memref<32x128xbf16, #tpu.memory_space<vmem>>, vector<1x128xbf16>
    tpu.vector_store %arg11[%c5_57, %c0_58], %61 {strides = array<i32>} : memref<32x128xbf16, #tpu.memory_space<vmem>>, vector<1x128xbf16>,
    %c2_59 = arith.constant 2 : index
    %c0_60 = arith.constant 0 : index
    %63 = vector.load %arg12[%c2_59, %c0_60] : memref<24x128xf32, #tpu.memory_space<vmem>>, vector<2x128xf32>
    %c8_61 = arith.constant 8 : index
    %c0_62 = arith.constant 0 : index
    %64 = vector.load %arg12[%c8_61, %c0_62] : memref<24x128xf32, #tpu.memory_space<vmem>>, vector<2x128xf32>
    %65 = arith.maximumf %63, %64 : vector<2x128xf32>
    %cst_63 = arith.constant dense<0xFF800000> : vector<128xf32>
    %66 = vector.multi_reduction <maximumf>, %65, %cst_63 [0] : vector<2x128xf32> to vector<128xf32>
    %67 = vector.shape_cast %66 : vector<128xf32> to vector<1x128xf32>
    %c0_64 = arith.constant 0 : index
    %c0_65 = arith.constant 0 : index
    %68 = vector.load %arg3[%c0_64, %c0_65] : memref<1x128xf32, #tpu.memory_space<vmem>>, vector<1x128xf32>
    %69 = arith.addf %67, %68 : vector<1x128xf32>
    %cst_66 = arith.constant 0.000000e+00 : f32
    %70 = vector.broadcast %cst_66 : f32 to vector<1x128xf32>
    %71 = arith.maximumf %69, %70 : vector<1x128xf32>
    %72 = arith.truncf %71 : vector<1x128xf32> to vector<1x128xbf16>
    %c6_67 = arith.constant 6 : index
    %c0_68 = arith.constant 0 : index
    %73 = vector.load %arg11[%c6_67, %c0_68] : memref<32x128xbf16, #tpu.memory_space<vmem>>, vector<1x128xbf16>
    tpu.vector_store %arg11[%c6_67, %c0_68], %72 {strides = array<i32>} : memref<32x128xbf16, #tpu.memory_space<vmem>>, vector<1x128xbf16>,
    %c12_69 = arith.constant 12 : index
    %c0_70 = arith.constant 0 : index
    %74 = vector.load %arg12[%c12_69, %c0_70] : memref<24x128xf32, #tpu.memory_space<vmem>>, vector<2x128xf32>
    %c18 = arith.constant 18 : index
    %c0_71 = arith.constant 0 : index
    %75 = vector.load %arg12[%c18, %c0_71] : memref<24x128xf32, #tpu.memory_space<vmem>>, vector<2x128xf32>
    %76 = arith.maximumf %74, %75 : vector<2x128xf32>
    %cst_72 = arith.constant dense<0xFF800000> : vector<128xf32>
    %77 = vector.multi_reduction <maximumf>, %76, %cst_72 [0] : vector<2x128xf32> to vector<128xf32>
    %78 = vector.shape_cast %77 : vector<128xf32> to vector<1x128xf32>
    %c0_73 = arith.constant 0 : index
    %c0_74 = arith.constant 0 : index
    %79 = vector.load %arg3[%c0_73, %c0_74] : memref<1x128xf32, #tpu.memory_space<vmem>>, vector<1x128xf32>
    %80 = arith.addf %78, %79 : vector<1x128xf32>
    %cst_75 = arith.constant 0.000000e+00 : f32
    %81 = vector.broadcast %cst_75 : f32 to vector<1x128xf32>
    %82 = arith.maximumf %80, %81 : vector<1x128xf32>
    %83 = arith.truncf %82 : vector<1x128xf32> to vector<1x128xbf16>
    %c9 = arith.constant 9 : index
    %c0_76 = arith.constant 0 : index
    %84 = vector.load %arg11[%c9, %c0_76] : memref<32x128xbf16, #tpu.memory_space<vmem>>, vector<1x128xbf16>
    tpu.vector_store %arg11[%c9, %c0_76], %83 {strides = array<i32>} : memref<32x128xbf16, #tpu.memory_space<vmem>>, vector<1x128xbf16>,
    %c14_77 = arith.constant 14 : index
    %c0_78 = arith.constant 0 : index
    %85 = vector.load %arg12[%c14_77, %c0_78] : memref<24x128xf32, #tpu.memory_space<vmem>>, vector<2x128xf32>
    %c20 = arith.constant 20 : index
    %c0_79 = arith.constant 0 : index
    %86 = vector.load %arg12[%c20, %c0_79] : memref<24x128xf32, #tpu.memory_space<vmem>>, vector<2x128xf32>
    %87 = arith.maximumf %85, %86 : vector<2x128xf32>
    %cst_80 = arith.constant dense<0xFF800000> : vector<128xf32>
    %88 = vector.multi_reduction <maximumf>, %87, %cst_80 [0] : vector<2x128xf32> to vector<128xf32>
    %89 = vector.shape_cast %88 : vector<128xf32> to vector<1x128xf32>
    %c0_81 = arith.constant 0 : index
    %c0_82 = arith.constant 0 : index
    %90 = vector.load %arg3[%c0_81, %c0_82] : memref<1x128xf32, #tpu.memory_space<vmem>>, vector<1x128xf32>
    %91 = arith.addf %89, %90 : vector<1x128xf32>
    %cst_83 = arith.constant 0.000000e+00 : f32
    %92 = vector.broadcast %cst_83 : f32 to vector<1x128xf32>
    %93 = arith.maximumf %91, %92 : vector<1x128xf32>
    %94 = arith.truncf %93 : vector<1x128xf32> to vector<1x128xbf16>
    %c10 = arith.constant 10 : index
    %c0_84 = arith.constant 0 : index
    %95 = vector.load %arg11[%c10, %c0_84] : memref<32x128xbf16, #tpu.memory_space<vmem>>, vector<1x128xbf16>
    tpu.vector_store %arg11[%c10, %c0_84], %94 {strides = array<i32>} : memref<32x128xbf16, #tpu.memory_space<vmem>>, vector<1x128xbf16>,
    %c40 = arith.constant 40 : index
    %c0_85 = arith.constant 0 : index
    %96 = vector.load %arg1[%c40, %c0_85] : memref<80x128xbf16, #tpu.memory_space<vmem>>, vector<22x128xbf16>
    %c0_86 = arith.constant 0 : index
    %c0_87 = arith.constant 0 : index
    %c0_88 = arith.constant 0 : index
    %97 = vector.load %arg2[%c0_86, %c0_87, %c0_88] : memref<9x128x256xbf16, #tpu.memory_space<vmem>>, vector<1x128x256xbf16>
    %98 = vector.shape_cast %97 : vector<1x128x256xbf16> to vector<128x256xbf16>
    %cst_89 = arith.constant dense<0.000000e+00> : vector<22x256xf32>
    %99 = tpu.matmul %96, %98, %cst_89 {dimension_numbers = #tpu.dot_dimension_numbers<[1], [0], [0], [1], [0, 0, 1, 1], [], []>} : vector<22x128xbf16>, vector<128x256xbf16>, vector<22x256xf32> -> vector<22x256xf32>
    %c41 = arith.constant 41 : index
    %c0_90 = arith.constant 0 : index
    %100 = vector.load %arg1[%c41, %c0_90] : memref<80x128xbf16, #tpu.memory_space<vmem>>, vector<22x128xbf16>
    %c1_91 = arith.constant 1 : index
    %c0_92 = arith.constant 0 : index
    %c0_93 = arith.constant 0 : index
    %101 = vector.load %arg2[%c1_91, %c0_92, %c0_93] : memref<9x128x256xbf16, #tpu.memory_space<vmem>>, vector<1x128x256xbf16>
    %102 = vector.shape_cast %101 : vector<1x128x256xbf16> to vector<128x256xbf16>
    %cst_94 = arith.constant dense<0.000000e+00> : vector<22x256xf32>
    %103 = tpu.matmul %100, %102, %cst_94 {dimension_numbers = #tpu.dot_dimension_numbers<[1], [0], [0], [1], [0, 0, 1, 1], [], []>} : vector<22x128xbf16>, vector<128x256xbf16>, vector<22x256xf32> -> vector<22x256xf32>
    %104 = arith.addf %99, %103 : vector<22x256xf32>
    %c42 = arith.constant 42 : index
    %c0_95 = arith.constant 0 : index
    %105 = vector.load %arg1[%c42, %c0_95] : memref<80x128xbf16, #tpu.memory_space<vmem>>, vector<22x128xbf16>
    %c2_96 = arith.constant 2 : index
    %c0_97 = arith.constant 0 : index
    %c0_98 = arith.constant 0 : index
    %106 = vector.load %arg2[%c2_96, %c0_97, %c0_98] : memref<9x128x256xbf16, #tpu.memory_space<vmem>>, vector<1x128x256xbf16>
    %107 = vector.shape_cast %106 : vector<1x128x256xbf16> to vector<128x256xbf16>
    %cst_99 = arith.constant dense<0.000000e+00> : vector<22x256xf32>
    %108 = tpu.matmul %105, %107, %cst_99 {dimension_numbers = #tpu.dot_dimension_numbers<[1], [0], [0], [1], [0, 0, 1, 1], [], []>} : vector<22x128xbf16>, vector<128x256xbf16>, vector<22x256xf32> -> vector<22x256xf32>
    %109 = arith.addf %104, %108 : vector<22x256xf32>
    %c46 = arith.constant 46 : index
    %c0_100 = arith.constant 0 : index
    %110 = vector.load %arg1[%c46, %c0_100] : memref<80x128xbf16, #tpu.memory_space<vmem>>, vector<22x128xbf16>
    %c3_101 = arith.constant 3 : index
    %c0_102 = arith.constant 0 : index
    %c0_103 = arith.constant 0 : index
    %111 = vector.load %arg2[%c3_101, %c0_102, %c0_103] : memref<9x128x256xbf16, #tpu.memory_space<vmem>>, vector<1x128x256xbf16>
    %112 = vector.shape_cast %111 : vector<1x128x256xbf16> to vector<128x256xbf16>
    %cst_104 = arith.constant dense<0.000000e+00> : vector<22x256xf32>
    %113 = tpu.matmul %110, %112, %cst_104 {dimension_numbers = #tpu.dot_dimension_numbers<[1], [0], [0], [1], [0, 0, 1, 1], [], []>} : vector<22x128xbf16>, vector<128x256xbf16>, vector<22x256xf32> -> vector<22x256xf32>
    %114 = arith.addf %109, %113 : vector<22x256xf32>
    %c47 = arith.constant 47 : index
    %c0_105 = arith.constant 0 : index
    %115 = vector.load %arg1[%c47, %c0_105] : memref<80x128xbf16, #tpu.memory_space<vmem>>, vector<22x128xbf16>
    %c4_106 = arith.constant 4 : index
    %c0_107 = arith.constant 0 : index
    %c0_108 = arith.constant 0 : index
    %116 = vector.load %arg2[%c4_106, %c0_107, %c0_108] : memref<9x128x256xbf16, #tpu.memory_space<vmem>>, vector<1x128x256xbf16>
    %117 = vector.shape_cast %116 : vector<1x128x256xbf16> to vector<128x256xbf16>
    %cst_109 = arith.constant dense<0.000000e+00> : vector<22x256xf32>
    %118 = tpu.matmul %115, %117, %cst_109 {dimension_numbers = #tpu.dot_dimension_numbers<[1], [0], [0], [1], [0, 0, 1, 1], [], []>} : vector<22x128xbf16>, vector<128x256xbf16>, vector<22x256xf32> -> vector<22x256xf32>
    %119 = arith.addf %114, %118 : vector<22x256xf32>
    %c48 = arith.constant 48 : index
    %c0_110 = arith.constant 0 : index
    %120 = vector.load %arg1[%c48, %c0_110] : memref<80x128xbf16, #tpu.memory_space<vmem>>, vector<22x128xbf16>
    %c5_111 = arith.constant 5 : index
    %c0_112 = arith.constant 0 : index
    %c0_113 = arith.constant 0 : index
    %121 = vector.load %arg2[%c5_111, %c0_112, %c0_113] : memref<9x128x256xbf16, #tpu.memory_space<vmem>>, vector<1x128x256xbf16>
    %122 = vector.shape_cast %121 : vector<1x128x256xbf16> to vector<128x256xbf16>
    %cst_114 = arith.constant dense<0.000000e+00> : vector<22x256xf32>
    %123 = tpu.matmul %120, %122, %cst_114 {dimension_numbers = #tpu.dot_dimension_numbers<[1], [0], [0], [1], [0, 0, 1, 1], [], []>} : vector<22x128xbf16>, vector<128x256xbf16>, vector<22x256xf32> -> vector<22x256xf32>
    %124 = arith.addf %119, %123 : vector<22x256xf32>
    %c52 = arith.constant 52 : index
    %c0_115 = arith.constant 0 : index
    %125 = vector.load %arg1[%c52, %c0_115] : memref<80x128xbf16, #tpu.memory_space<vmem>>, vector<22x128xbf16>
    %c6_116 = arith.constant 6 : index
    %c0_117 = arith.constant 0 : index
    %c0_118 = arith.constant 0 : index
    %126 = vector.load %arg2[%c6_116, %c0_117, %c0_118] : memref<9x128x256xbf16, #tpu.memory_space<vmem>>, vector<1x128x256xbf16>
    %127 = vector.shape_cast %126 : vector<1x128x256xbf16> to vector<128x256xbf16>
    %cst_119 = arith.constant dense<0.000000e+00> : vector<22x256xf32>
    %128 = tpu.matmul %125, %127, %cst_119 {dimension_numbers = #tpu.dot_dimension_numbers<[1], [0], [0], [1], [0, 0, 1, 1], [], []>} : vector<22x128xbf16>, vector<128x256xbf16>, vector<22x256xf32> -> vector<22x256xf32>
    %129 = arith.addf %124, %128 : vector<22x256xf32>
    %c53 = arith.constant 53 : index
    %c0_120 = arith.constant 0 : index
    %130 = vector.load %arg1[%c53, %c0_120] : memref<80x128xbf16, #tpu.memory_space<vmem>>, vector<22x128xbf16>
    %c7_121 = arith.constant 7 : index
    %c0_122 = arith.constant 0 : index
    %c0_123 = arith.constant 0 : index
    %131 = vector.load %arg2[%c7_121, %c0_122, %c0_123] : memref<9x128x256xbf16, #tpu.memory_space<vmem>>, vector<1x128x256xbf16>
    %132 = vector.shape_cast %131 : vector<1x128x256xbf16> to vector<128x256xbf16>
    %cst_124 = arith.constant dense<0.000000e+00> : vector<22x256xf32>
    %133 = tpu.matmul %130, %132, %cst_124 {dimension_numbers = #tpu.dot_dimension_numbers<[1], [0], [0], [1], [0, 0, 1, 1], [], []>} : vector<22x128xbf16>, vector<128x256xbf16>, vector<22x256xf32> -> vector<22x256xf32>
    %134 = arith.addf %129, %133 : vector<22x256xf32>
    %c54 = arith.constant 54 : index
    %c0_125 = arith.constant 0 : index
    %135 = vector.load %arg1[%c54, %c0_125] : memref<80x128xbf16, #tpu.memory_space<vmem>>, vector<22x128xbf16>
    %c8_126 = arith.constant 8 : index
    %c0_127 = arith.constant 0 : index
    %c0_128 = arith.constant 0 : index
    %136 = vector.load %arg2[%c8_126, %c0_127, %c0_128] : memref<9x128x256xbf16, #tpu.memory_space<vmem>>, vector<1x128x256xbf16>
    %137 = vector.shape_cast %136 : vector<1x128x256xbf16> to vector<128x256xbf16>
    %cst_129 = arith.constant dense<0.000000e+00> : vector<22x256xf32>
    %138 = tpu.matmul %135, %137, %cst_129 {dimension_numbers = #tpu.dot_dimension_numbers<[1], [0], [0], [1], [0, 0, 1, 1], [], []>} : vector<22x128xbf16>, vector<128x256xbf16>, vector<22x256xf32> -> vector<22x256xf32>
    %139 = arith.addf %134, %138 : vector<22x256xf32>
    %140 = vector.extract_strided_slice %139 {offsets = [0, 0], sizes = [22, 128], strides = [1, 1]} : vector<22x256xf32> to vector<22x128xf32>
    %141 = vector.extract_strided_slice %139 {offsets = [0, 128], sizes = [22, 128], strides = [1, 1]} : vector<22x256xf32> to vector<22x128xf32>
    %142 = arith.maximumf %140, %141 : vector<22x128xf32>
    %c0_130 = arith.constant 0 : index
    %c0_131 = arith.constant 0 : index
    %143 = vector.load %arg12[%c0_130, %c0_131] : memref<24x128xf32, #tpu.memory_space<vmem>>, vector<22x128xf32>
    tpu.vector_store %arg12[%c0_130, %c0_131], %142 {strides = array<i32>} : memref<24x128xf32, #tpu.memory_space<vmem>>, vector<22x128xf32>,
    %c0_132 = arith.constant 0 : index
    %c0_133 = arith.constant 0 : index
    %144 = vector.load %arg12[%c0_132, %c0_133] : memref<24x128xf32, #tpu.memory_space<vmem>>, vector<2x128xf32>
    %c6_134 = arith.constant 6 : index
    %c0_135 = arith.constant 0 : index
    %145 = vector.load %arg12[%c6_134, %c0_135] : memref<24x128xf32, #tpu.memory_space<vmem>>, vector<2x128xf32>
    %146 = arith.maximumf %144, %145 : vector<2x128xf32>
    %cst_136 = arith.constant dense<0xFF800000> : vector<128xf32>
    %147 = vector.multi_reduction <maximumf>, %146, %cst_136 [0] : vector<2x128xf32> to vector<128xf32>
    %148 = vector.shape_cast %147 : vector<128xf32> to vector<1x128xf32>
    %c0_137 = arith.constant 0 : index
    %c0_138 = arith.constant 0 : index
    %149 = vector.load %arg3[%c0_137, %c0_138] : memref<1x128xf32, #tpu.memory_space<vmem>>, vector<1x128xf32>
    %150 = arith.addf %148, %149 : vector<1x128xf32>
    %cst_139 = arith.constant 0.000000e+00 : f32
    %151 = vector.broadcast %cst_139 : f32 to vector<1x128xf32>
    %152 = arith.maximumf %150, %151 : vector<1x128xf32>
    %153 = arith.truncf %152 : vector<1x128xf32> to vector<1x128xbf16>
    %c21 = arith.constant 21 : index
    %c0_140 = arith.constant 0 : index
    %154 = vector.load %arg11[%c21, %c0_140] : memref<32x128xbf16, #tpu.memory_space<vmem>>, vector<1x128xbf16>
    tpu.vector_store %arg11[%c21, %c0_140], %153 {strides = array<i32>} : memref<32x128xbf16, #tpu.memory_space<vmem>>, vector<1x128xbf16>,
    %c2_141 = arith.constant 2 : index
    %c0_142 = arith.constant 0 : index
    %155 = vector.load %arg12[%c2_141, %c0_142] : memref<24x128xf32, #tpu.memory_space<vmem>>, vector<2x128xf32>
    %c8_143 = arith.constant 8 : index
    %c0_144 = arith.constant 0 : index
    %156 = vector.load %arg12[%c8_143, %c0_144] : memref<24x128xf32, #tpu.memory_space<vmem>>, vector<2x128xf32>
    %157 = arith.maximumf %155, %156 : vector<2x128xf32>
    %cst_145 = arith.constant dense<0xFF800000> : vector<128xf32>
    %158 = vector.multi_reduction <maximumf>, %157, %cst_145 [0] : vector<2x128xf32> to vector<128xf32>
    %159 = vector.shape_cast %158 : vector<128xf32> to vector<1x128xf32>
    %c0_146 = arith.constant 0 : index
    %c0_147 = arith.constant 0 : index
    %160 = vector.load %arg3[%c0_146, %c0_147] : memref<1x128xf32, #tpu.memory_space<vmem>>, vector<1x128xf32>
    %161 = arith.addf %159, %160 : vector<1x128xf32>
    %cst_148 = arith.constant 0.000000e+00 : f32
    %162 = vector.broadcast %cst_148 : f32 to vector<1x128xf32>
    %163 = arith.maximumf %161, %162 : vector<1x128xf32>
    %164 = arith.truncf %163 : vector<1x128xf32> to vector<1x128xbf16>
    %c22 = arith.constant 22 : index
    %c0_149 = arith.constant 0 : index
    %165 = vector.load %arg11[%c22, %c0_149] : memref<32x128xbf16, #tpu.memory_space<vmem>>, vector<1x128xbf16>
    tpu.vector_store %arg11[%c22, %c0_149], %164 {strides = array<i32>} : memref<32x128xbf16, #tpu.memory_space<vmem>>, vector<1x128xbf16>,
    %c12_150 = arith.constant 12 : index
    %c0_151 = arith.constant 0 : index
    %166 = vector.load %arg12[%c12_150, %c0_151] : memref<24x128xf32, #tpu.memory_space<vmem>>, vector<2x128xf32>
    %c18_152 = arith.constant 18 : index
    %c0_153 = arith.constant 0 : index
    %167 = vector.load %arg12[%c18_152, %c0_153] : memref<24x128xf32, #tpu.memory_space<vmem>>, vector<2x128xf32>
    %168 = arith.maximumf %166, %167 : vector<2x128xf32>
    %cst_154 = arith.constant dense<0xFF800000> : vector<128xf32>
    %169 = vector.multi_reduction <maximumf>, %168, %cst_154 [0] : vector<2x128xf32> to vector<128xf32>
    %170 = vector.shape_cast %169 : vector<128xf32> to vector<1x128xf32>
    %c0_155 = arith.constant 0 : index
    %c0_156 = arith.constant 0 : index
    %171 = vector.load %arg3[%c0_155, %c0_156] : memref<1x128xf32, #tpu.memory_space<vmem>>, vector<1x128xf32>
    %172 = arith.addf %170, %171 : vector<1x128xf32>
    %cst_157 = arith.constant 0.000000e+00 : f32
    %173 = vector.broadcast %cst_157 : f32 to vector<1x128xf32>
    %174 = arith.maximumf %172, %173 : vector<1x128xf32>
    %175 = arith.truncf %174 : vector<1x128xf32> to vector<1x128xbf16>
    %c25 = arith.constant 25 : index
    %c0_158 = arith.constant 0 : index
    %176 = vector.load %arg11[%c25, %c0_158] : memref<32x128xbf16, #tpu.memory_space<vmem>>, vector<1x128xbf16>
    tpu.vector_store %arg11[%c25, %c0_158], %175 {strides = array<i32>} : memref<32x128xbf16, #tpu.memory_space<vmem>>, vector<1x128xbf16>,
    %c14_159 = arith.constant 14 : index
    %c0_160 = arith.constant 0 : index
    %177 = vector.load %arg12[%c14_159, %c0_160] : memref<24x128xf32, #tpu.memory_space<vmem>>, vector<2x128xf32>
    %c20_161 = arith.constant 20 : index
    %c0_162 = arith.constant 0 : index
    %178 = vector.load %arg12[%c20_161, %c0_162] : memref<24x128xf32, #tpu.memory_space<vmem>>, vector<2x128xf32>
    %179 = arith.maximumf %177, %178 : vector<2x128xf32>
    %cst_163 = arith.constant dense<0xFF800000> : vector<128xf32>
    %180 = vector.multi_reduction <maximumf>, %179, %cst_163 [0] : vector<2x128xf32> to vector<128xf32>
    %181 = vector.shape_cast %180 : vector<128xf32> to vector<1x128xf32>
    %c0_164 = arith.constant 0 : index
    %c0_165 = arith.constant 0 : index
    %182 = vector.load %arg3[%c0_164, %c0_165] : memref<1x128xf32, #tpu.memory_space<vmem>>, vector<1x128xf32>
    %183 = arith.addf %181, %182 : vector<1x128xf32>
    %cst_166 = arith.constant 0.000000e+00 : f32
    %184 = vector.broadcast %cst_166 : f32 to vector<1x128xf32>
    %185 = arith.maximumf %183, %184 : vector<1x128xf32>
    %186 = arith.truncf %185 : vector<1x128xf32> to vector<1x128xbf16>
    %c26 = arith.constant 26 : index
    %c0_167 = arith.constant 0 : index
    %187 = vector.load %arg11[%c26, %c0_167] : memref<32x128xbf16, #tpu.memory_space<vmem>>, vector<1x128xbf16>
    tpu.vector_store %arg11[%c26, %c0_167], %186 {strides = array<i32>} : memref<32x128xbf16, #tpu.memory_space<vmem>>, vector<1x128xbf16>,
    %c0_168 = arith.constant 0 : index
    %c0_169 = arith.constant 0 : index
    %188 = vector.load %arg11[%c0_168, %c0_169] : memref<32x128xbf16, #tpu.memory_space<vmem>>, vector<6x128xbf16>
    %c0_170 = arith.constant 0 : index
    %c0_171 = arith.constant 0 : index
    %c0_172 = arith.constant 0 : index
    %189 = vector.load %arg4[%c0_170, %c0_171, %c0_172] : memref<9x128x256xbf16, #tpu.memory_space<vmem>>, vector<1x128x256xbf16>
    %190 = vector.shape_cast %189 : vector<1x128x256xbf16> to vector<128x256xbf16>
    %cst_173 = arith.constant dense<0.000000e+00> : vector<6x256xf32>
    %191 = tpu.matmul %188, %190, %cst_173 {dimension_numbers = #tpu.dot_dimension_numbers<[1], [0], [0], [1], [0, 0, 1, 1], [], []>} : vector<6x128xbf16>, vector<128x256xbf16>, vector<6x256xf32> -> vector<6x256xf32>
    %c1_174 = arith.constant 1 : index
    %c0_175 = arith.constant 0 : index
    %192 = vector.load %arg11[%c1_174, %c0_175] : memref<32x128xbf16, #tpu.memory_space<vmem>>, vector<6x128xbf16>
    %c1_176 = arith.constant 1 : index
    %c0_177 = arith.constant 0 : index
    %c0_178 = arith.constant 0 : index
    %193 = vector.load %arg4[%c1_176, %c0_177, %c0_178] : memref<9x128x256xbf16, #tpu.memory_space<vmem>>, vector<1x128x256xbf16>
    %194 = vector.shape_cast %193 : vector<1x128x256xbf16> to vector<128x256xbf16>
    %cst_179 = arith.constant dense<0.000000e+00> : vector<6x256xf32>
    %195 = tpu.matmul %192, %194, %cst_179 {dimension_numbers = #tpu.dot_dimension_numbers<[1], [0], [0], [1], [0, 0, 1, 1], [], []>} : vector<6x128xbf16>, vector<128x256xbf16>, vector<6x256xf32> -> vector<6x256xf32>
    %196 = arith.addf %191, %195 : vector<6x256xf32>
    %c2_180 = arith.constant 2 : index
    %c0_181 = arith.constant 0 : index
    %197 = vector.load %arg11[%c2_180, %c0_181] : memref<32x128xbf16, #tpu.memory_space<vmem>>, vector<6x128xbf16>
    %c2_182 = arith.constant 2 : index
    %c0_183 = arith.constant 0 : index
    %c0_184 = arith.constant 0 : index
    %198 = vector.load %arg4[%c2_182, %c0_183, %c0_184] : memref<9x128x256xbf16, #tpu.memory_space<vmem>>, vector<1x128x256xbf16>
    %199 = vector.shape_cast %198 : vector<1x128x256xbf16> to vector<128x256xbf16>
    %cst_185 = arith.constant dense<0.000000e+00> : vector<6x256xf32>
    %200 = tpu.matmul %197, %199, %cst_185 {dimension_numbers = #tpu.dot_dimension_numbers<[1], [0], [0], [1], [0, 0, 1, 1], [], []>} : vector<6x128xbf16>, vector<128x256xbf16>, vector<6x256xf32> -> vector<6x256xf32>
    %201 = arith.addf %196, %200 : vector<6x256xf32>
    %c4_186 = arith.constant 4 : index
    %c0_187 = arith.constant 0 : index
    %202 = vector.load %arg11[%c4_186, %c0_187] : memref<32x128xbf16, #tpu.memory_space<vmem>>, vector<6x128xbf16>
    %c3_188 = arith.constant 3 : index
    %c0_189 = arith.constant 0 : index
    %c0_190 = arith.constant 0 : index
    %203 = vector.load %arg4[%c3_188, %c0_189, %c0_190] : memref<9x128x256xbf16, #tpu.memory_space<vmem>>, vector<1x128x256xbf16>
    %204 = vector.shape_cast %203 : vector<1x128x256xbf16> to vector<128x256xbf16>
    %cst_191 = arith.constant dense<0.000000e+00> : vector<6x256xf32>
    %205 = tpu.matmul %202, %204, %cst_191 {dimension_numbers = #tpu.dot_dimension_numbers<[1], [0], [0], [1], [0, 0, 1, 1], [], []>} : vector<6x128xbf16>, vector<128x256xbf16>, vector<6x256xf32> -> vector<6x256xf32>
    %206 = arith.addf %201, %205 : vector<6x256xf32>
    %c5_192 = arith.constant 5 : index
    %c0_193 = arith.constant 0 : index
    %207 = vector.load %arg11[%c5_192, %c0_193] : memref<32x128xbf16, #tpu.memory_space<vmem>>, vector<6x128xbf16>
    %c4_194 = arith.constant 4 : index
    %c0_195 = arith.constant 0 : index
    %c0_196 = arith.constant 0 : index
    %208 = vector.load %arg4[%c4_194, %c0_195, %c0_196] : memref<9x128x256xbf16, #tpu.memory_space<vmem>>, vector<1x128x256xbf16>
    %209 = vector.shape_cast %208 : vector<1x128x256xbf16> to vector<128x256xbf16>
    %cst_197 = arith.constant dense<0.000000e+00> : vector<6x256xf32>
    %210 = tpu.matmul %207, %209, %cst_197 {dimension_numbers = #tpu.dot_dimension_numbers<[1], [0], [0], [1], [0, 0, 1, 1], [], []>} : vector<6x128xbf16>, vector<128x256xbf16>, vector<6x256xf32> -> vector<6x256xf32>
    %211 = arith.addf %206, %210 : vector<6x256xf32>
    %c6_198 = arith.constant 6 : index
    %c0_199 = arith.constant 0 : index
    %212 = vector.load %arg11[%c6_198, %c0_199] : memref<32x128xbf16, #tpu.memory_space<vmem>>, vector<6x128xbf16>
    %c5_200 = arith.constant 5 : index
    %c0_201 = arith.constant 0 : index
    %c0_202 = arith.constant 0 : index
    %213 = vector.load %arg4[%c5_200, %c0_201, %c0_202] : memref<9x128x256xbf16, #tpu.memory_space<vmem>>, vector<1x128x256xbf16>
    %214 = vector.shape_cast %213 : vector<1x128x256xbf16> to vector<128x256xbf16>
    %cst_203 = arith.constant dense<0.000000e+00> : vector<6x256xf32>
    %215 = tpu.matmul %212, %214, %cst_203 {dimension_numbers = #tpu.dot_dimension_numbers<[1], [0], [0], [1], [0, 0, 1, 1], [], []>} : vector<6x128xbf16>, vector<128x256xbf16>, vector<6x256xf32> -> vector<6x256xf32>
    %216 = arith.addf %211, %215 : vector<6x256xf32>
    %c8_204 = arith.constant 8 : index
    %c0_205 = arith.constant 0 : index
    %217 = vector.load %arg11[%c8_204, %c0_205] : memref<32x128xbf16, #tpu.memory_space<vmem>>, vector<6x128xbf16>
    %c6_206 = arith.constant 6 : index
    %c0_207 = arith.constant 0 : index
    %c0_208 = arith.constant 0 : index
    %218 = vector.load %arg4[%c6_206, %c0_207, %c0_208] : memref<9x128x256xbf16, #tpu.memory_space<vmem>>, vector<1x128x256xbf16>
    %219 = vector.shape_cast %218 : vector<1x128x256xbf16> to vector<128x256xbf16>
    %cst_209 = arith.constant dense<0.000000e+00> : vector<6x256xf32>
    %220 = tpu.matmul %217, %219, %cst_209 {dimension_numbers = #tpu.dot_dimension_numbers<[1], [0], [0], [1], [0, 0, 1, 1], [], []>} : vector<6x128xbf16>, vector<128x256xbf16>, vector<6x256xf32> -> vector<6x256xf32>
    %221 = arith.addf %216, %220 : vector<6x256xf32>
    %c9_210 = arith.constant 9 : index
    %c0_211 = arith.constant 0 : index
    %222 = vector.load %arg11[%c9_210, %c0_211] : memref<32x128xbf16, #tpu.memory_space<vmem>>, vector<6x128xbf16>
    %c7_212 = arith.constant 7 : index
    %c0_213 = arith.constant 0 : index
    %c0_214 = arith.constant 0 : index
    %223 = vector.load %arg4[%c7_212, %c0_213, %c0_214] : memref<9x128x256xbf16, #tpu.memory_space<vmem>>, vector<1x128x256xbf16>
    %224 = vector.shape_cast %223 : vector<1x128x256xbf16> to vector<128x256xbf16>
    %cst_215 = arith.constant dense<0.000000e+00> : vector<6x256xf32>
    %225 = tpu.matmul %222, %224, %cst_215 {dimension_numbers = #tpu.dot_dimension_numbers<[1], [0], [0], [1], [0, 0, 1, 1], [], []>} : vector<6x128xbf16>, vector<128x256xbf16>, vector<6x256xf32> -> vector<6x256xf32>
    %226 = arith.addf %221, %225 : vector<6x256xf32>
    %c10_216 = arith.constant 10 : index
    %c0_217 = arith.constant 0 : index
    %227 = vector.load %arg11[%c10_216, %c0_217] : memref<32x128xbf16, #tpu.memory_space<vmem>>, vector<6x128xbf16>
    %c8_218 = arith.constant 8 : index
    %c0_219 = arith.constant 0 : index
    %c0_220 = arith.constant 0 : index
    %228 = vector.load %arg4[%c8_218, %c0_219, %c0_220] : memref<9x128x256xbf16, #tpu.memory_space<vmem>>, vector<1x128x256xbf16>
    %229 = vector.shape_cast %228 : vector<1x128x256xbf16> to vector<128x256xbf16>
    %cst_221 = arith.constant dense<0.000000e+00> : vector<6x256xf32>
    %230 = tpu.matmul %227, %229, %cst_221 {dimension_numbers = #tpu.dot_dimension_numbers<[1], [0], [0], [1], [0, 0, 1, 1], [], []>} : vector<6x128xbf16>, vector<128x256xbf16>, vector<6x256xf32> -> vector<6x256xf32>
    %231 = arith.addf %226, %230 : vector<6x256xf32>
    %232 = vector.extract_strided_slice %231 {offsets = [0, 0], sizes = [6, 128], strides = [1, 1]} : vector<6x256xf32> to vector<6x128xf32>
    %233 = vector.extract_strided_slice %231 {offsets = [0, 128], sizes = [6, 128], strides = [1, 1]} : vector<6x256xf32> to vector<6x128xf32>
    %234 = arith.maximumf %232, %233 : vector<6x128xf32>
    %c0_222 = arith.constant 0 : index
    %c0_223 = arith.constant 0 : index
    %235 = vector.load %arg12[%c0_222, %c0_223] : memref<24x128xf32, #tpu.memory_space<vmem>>, vector<6x128xf32>
    tpu.vector_store %arg12[%c0_222, %c0_223], %234 {strides = array<i32>} : memref<24x128xf32, #tpu.memory_space<vmem>>, vector<6x128xf32>,
    %c0_224 = arith.constant 0 : index
    %c0_225 = arith.constant 0 : index
    %236 = vector.load %arg12[%c0_224, %c0_225] : memref<24x128xf32, #tpu.memory_space<vmem>>, vector<2x128xf32>
    %c4_226 = arith.constant 4 : index
    %c0_227 = arith.constant 0 : index
    %237 = vector.load %arg12[%c4_226, %c0_227] : memref<24x128xf32, #tpu.memory_space<vmem>>, vector<2x128xf32>
    %238 = arith.maximumf %236, %237 : vector<2x128xf32>
    %cst_228 = arith.constant dense<0xFF800000> : vector<128xf32>
    %239 = vector.multi_reduction <maximumf>, %238, %cst_228 [0] : vector<2x128xf32> to vector<128xf32>
    %240 = vector.shape_cast %239 : vector<128xf32> to vector<1x128xf32>
    %c0_229 = arith.constant 0 : index
    %c0_230 = arith.constant 0 : index
    %241 = vector.load %arg5[%c0_229, %c0_230] : memref<1x128xf32, #tpu.memory_space<vmem>>, vector<1x128xf32>
    %242 = arith.addf %240, %241 : vector<1x128xf32>
    %cst_231 = arith.constant 0.000000e+00 : f32
    %243 = vector.broadcast %cst_231 : f32 to vector<1x128xf32>
    %244 = arith.maximumf %242, %243 : vector<1x128xf32>
    %c0_232 = arith.constant 0 : index
    %c0_233 = arith.constant 0 : index
    %245 = vector.load %arg13[%c0_232, %c0_233] : memref<8x128xf32, #tpu.memory_space<vmem>>, vector<1x128xf32>
    tpu.vector_store %arg13[%c0_232, %c0_233], %244 {strides = array<i32>} : memref<8x128xf32, #tpu.memory_space<vmem>>, vector<1x128xf32>,
    %c16 = arith.constant 16 : index
    %c0_234 = arith.constant 0 : index
    %246 = vector.load %arg11[%c16, %c0_234] : memref<32x128xbf16, #tpu.memory_space<vmem>>, vector<6x128xbf16>
    %c0_235 = arith.constant 0 : index
    %c0_236 = arith.constant 0 : index
    %c0_237 = arith.constant 0 : index
    %247 = vector.load %arg4[%c0_235, %c0_236, %c0_237] : memref<9x128x256xbf16, #tpu.memory_space<vmem>>, vector<1x128x256xbf16>
    %248 = vector.shape_cast %247 : vector<1x128x256xbf16> to vector<128x256xbf16>
    %cst_238 = arith.constant dense<0.000000e+00> : vector<6x256xf32>
    %249 = tpu.matmul %246, %248, %cst_238 {dimension_numbers = #tpu.dot_dimension_numbers<[1], [0], [0], [1], [0, 0, 1, 1], [], []>} : vector<6x128xbf16>, vector<128x256xbf16>, vector<6x256xf32> -> vector<6x256xf32>
    %c17 = arith.constant 17 : index
    %c0_239 = arith.constant 0 : index
    %250 = vector.load %arg11[%c17, %c0_239] : memref<32x128xbf16, #tpu.memory_space<vmem>>, vector<6x128xbf16>
    %c1_240 = arith.constant 1 : index
    %c0_241 = arith.constant 0 : index
    %c0_242 = arith.constant 0 : index
    %251 = vector.load %arg4[%c1_240, %c0_241, %c0_242] : memref<9x128x256xbf16, #tpu.memory_space<vmem>>, vector<1x128x256xbf16>
    %252 = vector.shape_cast %251 : vector<1x128x256xbf16> to vector<128x256xbf16>
    %cst_243 = arith.constant dense<0.000000e+00> : vector<6x256xf32>
    %253 = tpu.matmul %250, %252, %cst_243 {dimension_numbers = #tpu.dot_dimension_numbers<[1], [0], [0], [1], [0, 0, 1, 1], [], []>} : vector<6x128xbf16>, vector<128x256xbf16>, vector<6x256xf32> -> vector<6x256xf32>
    %254 = arith.addf %249, %253 : vector<6x256xf32>
    %c18_244 = arith.constant 18 : index
    %c0_245 = arith.constant 0 : index
    %255 = vector.load %arg11[%c18_244, %c0_245] : memref<32x128xbf16, #tpu.memory_space<vmem>>, vector<6x128xbf16>
    %c2_246 = arith.constant 2 : index
    %c0_247 = arith.constant 0 : index
    %c0_248 = arith.constant 0 : index
    %256 = vector.load %arg4[%c2_246, %c0_247, %c0_248] : memref<9x128x256xbf16, #tpu.memory_space<vmem>>, vector<1x128x256xbf16>
    %257 = vector.shape_cast %256 : vector<1x128x256xbf16> to vector<128x256xbf16>
    %cst_249 = arith.constant dense<0.000000e+00> : vector<6x256xf32>
    %258 = tpu.matmul %255, %257, %cst_249 {dimension_numbers = #tpu.dot_dimension_numbers<[1], [0], [0], [1], [0, 0, 1, 1], [], []>} : vector<6x128xbf16>, vector<128x256xbf16>, vector<6x256xf32> -> vector<6x256xf32>
    %259 = arith.addf %254, %258 : vector<6x256xf32>
    %c20_250 = arith.constant 20 : index
    %c0_251 = arith.constant 0 : index
    %260 = vector.load %arg11[%c20_250, %c0_251] : memref<32x128xbf16, #tpu.memory_space<vmem>>, vector<6x128xbf16>
    %c3_252 = arith.constant 3 : index
    %c0_253 = arith.constant 0 : index
    %c0_254 = arith.constant 0 : index
    %261 = vector.load %arg4[%c3_252, %c0_253, %c0_254] : memref<9x128x256xbf16, #tpu.memory_space<vmem>>, vector<1x128x256xbf16>
    %262 = vector.shape_cast %261 : vector<1x128x256xbf16> to vector<128x256xbf16>
    %cst_255 = arith.constant dense<0.000000e+00> : vector<6x256xf32>
    %263 = tpu.matmul %260, %262, %cst_255 {dimension_numbers = #tpu.dot_dimension_numbers<[1], [0], [0], [1], [0, 0, 1, 1], [], []>} : vector<6x128xbf16>, vector<128x256xbf16>, vector<6x256xf32> -> vector<6x256xf32>
    %264 = arith.addf %259, %263 : vector<6x256xf32>
    %c21_256 = arith.constant 21 : index
    %c0_257 = arith.constant 0 : index
    %265 = vector.load %arg11[%c21_256, %c0_257] : memref<32x128xbf16, #tpu.memory_space<vmem>>, vector<6x128xbf16>
    %c4_258 = arith.constant 4 : index
    %c0_259 = arith.constant 0 : index
    %c0_260 = arith.constant 0 : index
    %266 = vector.load %arg4[%c4_258, %c0_259, %c0_260] : memref<9x128x256xbf16, #tpu.memory_space<vmem>>, vector<1x128x256xbf16>
    %267 = vector.shape_cast %266 : vector<1x128x256xbf16> to vector<128x256xbf16>
    %cst_261 = arith.constant dense<0.000000e+00> : vector<6x256xf32>
    %268 = tpu.matmul %265, %267, %cst_261 {dimension_numbers = #tpu.dot_dimension_numbers<[1], [0], [0], [1], [0, 0, 1, 1], [], []>} : vector<6x128xbf16>, vector<128x256xbf16>, vector<6x256xf32> -> vector<6x256xf32>
    %269 = arith.addf %264, %268 : vector<6x256xf32>
    %c22_262 = arith.constant 22 : index
    %c0_263 = arith.constant 0 : index
    %270 = vector.load %arg11[%c22_262, %c0_263] : memref<32x128xbf16, #tpu.memory_space<vmem>>, vector<6x128xbf16>
    %c5_264 = arith.constant 5 : index
    %c0_265 = arith.constant 0 : index
    %c0_266 = arith.constant 0 : index
    %271 = vector.load %arg4[%c5_264, %c0_265, %c0_266] : memref<9x128x256xbf16, #tpu.memory_space<vmem>>, vector<1x128x256xbf16>
    %272 = vector.shape_cast %271 : vector<1x128x256xbf16> to vector<128x256xbf16>
    %cst_267 = arith.constant dense<0.000000e+00> : vector<6x256xf32>
    %273 = tpu.matmul %270, %272, %cst_267 {dimension_numbers = #tpu.dot_dimension_numbers<[1], [0], [0], [1], [0, 0, 1, 1], [], []>} : vector<6x128xbf16>, vector<128x256xbf16>, vector<6x256xf32> -> vector<6x256xf32>
    %274 = arith.addf %269, %273 : vector<6x256xf32>
    %c24 = arith.constant 24 : index
    %c0_268 = arith.constant 0 : index
    %275 = vector.load %arg11[%c24, %c0_268] : memref<32x128xbf16, #tpu.memory_space<vmem>>, vector<6x128xbf16>
    %c6_269 = arith.constant 6 : index
    %c0_270 = arith.constant 0 : index
    %c0_271 = arith.constant 0 : index
    %276 = vector.load %arg4[%c6_269, %c0_270, %c0_271] : memref<9x128x256xbf16, #tpu.memory_space<vmem>>, vector<1x128x256xbf16>
    %277 = vector.shape_cast %276 : vector<1x128x256xbf16> to vector<128x256xbf16>
    %cst_272 = arith.constant dense<0.000000e+00> : vector<6x256xf32>
    %278 = tpu.matmul %275, %277, %cst_272 {dimension_numbers = #tpu.dot_dimension_numbers<[1], [0], [0], [1], [0, 0, 1, 1], [], []>} : vector<6x128xbf16>, vector<128x256xbf16>, vector<6x256xf32> -> vector<6x256xf32>
    %279 = arith.addf %274, %278 : vector<6x256xf32>
    %c25_273 = arith.constant 25 : index
    %c0_274 = arith.constant 0 : index
    %280 = vector.load %arg11[%c25_273, %c0_274] : memref<32x128xbf16, #tpu.memory_space<vmem>>, vector<6x128xbf16>
    %c7_275 = arith.constant 7 : index
    %c0_276 = arith.constant 0 : index
    %c0_277 = arith.constant 0 : index
    %281 = vector.load %arg4[%c7_275, %c0_276, %c0_277] : memref<9x128x256xbf16, #tpu.memory_space<vmem>>, vector<1x128x256xbf16>
    %282 = vector.shape_cast %281 : vector<1x128x256xbf16> to vector<128x256xbf16>
    %cst_278 = arith.constant dense<0.000000e+00> : vector<6x256xf32>
    %283 = tpu.matmul %280, %282, %cst_278 {dimension_numbers = #tpu.dot_dimension_numbers<[1], [0], [0], [1], [0, 0, 1, 1], [], []>} : vector<6x128xbf16>, vector<128x256xbf16>, vector<6x256xf32> -> vector<6x256xf32>
    %284 = arith.addf %279, %283 : vector<6x256xf32>
    %c26_279 = arith.constant 26 : index
    %c0_280 = arith.constant 0 : index
    %285 = vector.load %arg11[%c26_279, %c0_280] : memref<32x128xbf16, #tpu.memory_space<vmem>>, vector<6x128xbf16>
    %c8_281 = arith.constant 8 : index
    %c0_282 = arith.constant 0 : index
    %c0_283 = arith.constant 0 : index
    %286 = vector.load %arg4[%c8_281, %c0_282, %c0_283] : memref<9x128x256xbf16, #tpu.memory_space<vmem>>, vector<1x128x256xbf16>
    %287 = vector.shape_cast %286 : vector<1x128x256xbf16> to vector<128x256xbf16>
    %cst_284 = arith.constant dense<0.000000e+00> : vector<6x256xf32>
    %288 = tpu.matmul %285, %287, %cst_284 {dimension_numbers = #tpu.dot_dimension_numbers<[1], [0], [0], [1], [0, 0, 1, 1], [], []>} : vector<6x128xbf16>, vector<128x256xbf16>, vector<6x256xf32> -> vector<6x256xf32>
    %289 = arith.addf %284, %288 : vector<6x256xf32>
    %290 = vector.extract_strided_slice %289 {offsets = [0, 0], sizes = [6, 128], strides = [1, 1]} : vector<6x256xf32> to vector<6x128xf32>
    %291 = vector.extract_strided_slice %289 {offsets = [0, 128], sizes = [6, 128], strides = [1, 1]} : vector<6x256xf32> to vector<6x128xf32>
    %292 = arith.maximumf %290, %291 : vector<6x128xf32>
    %c0_285 = arith.constant 0 : index
    %c0_286 = arith.constant 0 : index
    %293 = vector.load %arg12[%c0_285, %c0_286] : memref<24x128xf32, #tpu.memory_space<vmem>>, vector<6x128xf32>
    tpu.vector_store %arg12[%c0_285, %c0_286], %292 {strides = array<i32>} : memref<24x128xf32, #tpu.memory_space<vmem>>, vector<6x128xf32>,
    %c0_287 = arith.constant 0 : index
    %c0_288 = arith.constant 0 : index
    %294 = vector.load %arg12[%c0_287, %c0_288] : memref<24x128xf32, #tpu.memory_space<vmem>>, vector<2x128xf32>
    %c4_289 = arith.constant 4 : index
    %c0_290 = arith.constant 0 : index
    %295 = vector.load %arg12[%c4_289, %c0_290] : memref<24x128xf32, #tpu.memory_space<vmem>>, vector<2x128xf32>
    %296 = arith.maximumf %294, %295 : vector<2x128xf32>
    %cst_291 = arith.constant dense<0xFF800000> : vector<128xf32>
    %297 = vector.multi_reduction <maximumf>, %296, %cst_291 [0] : vector<2x128xf32> to vector<128xf32>
    %298 = vector.shape_cast %297 : vector<128xf32> to vector<1x128xf32>
    %c0_292 = arith.constant 0 : index
    %c0_293 = arith.constant 0 : index
    %299 = vector.load %arg5[%c0_292, %c0_293] : memref<1x128xf32, #tpu.memory_space<vmem>>, vector<1x128xf32>
    %300 = arith.addf %298, %299 : vector<1x128xf32>
    %cst_294 = arith.constant 0.000000e+00 : f32
    %301 = vector.broadcast %cst_294 : f32 to vector<1x128xf32>
    %302 = arith.maximumf %300, %301 : vector<1x128xf32>
    %c1_295 = arith.constant 1 : index
    %c0_296 = arith.constant 0 : index
    %303 = vector.load %arg13[%c1_295, %c0_296] : memref<8x128xf32, #tpu.memory_space<vmem>>, vector<1x128xf32>
    tpu.vector_store %arg13[%c1_295, %c0_296], %302 {strides = array<i32>} : memref<8x128xf32, #tpu.memory_space<vmem>>, vector<1x128xf32>,
    %c0_297 = arith.constant 0 : index
    %c0_298 = arith.constant 0 : index
    %304 = vector.load %arg13[%c0_297, %c0_298] : memref<8x128xf32, #tpu.memory_space<vmem>>, vector<2x128xf32>
    %305 = arith.truncf %304 : vector<2x128xf32> to vector<2x128xbf16>
    %c0_299 = arith.constant 0 : index
    %c0_300 = arith.constant 0 : index
    %306 = vector.load %arg6[%c0_299, %c0_300] : memref<128x128xbf16, #tpu.memory_space<vmem>>, vector<128x128xbf16>
    %cst_301 = arith.constant dense<0.000000e+00> : vector<2x128xf32>
    %307 = tpu.matmul %305, %306, %cst_301 {dimension_numbers = #tpu.dot_dimension_numbers<[1], [0], [0], [1], [0, 0, 1, 1], [], []>} : vector<2x128xbf16>, vector<128x128xbf16>, vector<2x128xf32> -> vector<2x128xf32>
    %c0_302 = arith.constant 0 : index
    %c0_303 = arith.constant 0 : index
    %308 = vector.load %arg7[%c0_302, %c0_303] : memref<1x128xf32, #tpu.memory_space<vmem>>, vector<1x128xf32>
    %309 = vector.broadcast %308 : vector<1x128xf32> to vector<2x128xf32>
    %310 = arith.addf %307, %309 : vector<2x128xf32>
    %cst_304 = arith.constant 0.000000e+00 : f32
    %311 = vector.broadcast %cst_304 : f32 to vector<2x128xf32>
    %312 = arith.maximumf %310, %311 : vector<2x128xf32>
    %313 = arith.truncf %312 : vector<2x128xf32> to vector<2x128xbf16>
    %c0_305 = arith.constant 0 : index
    %c0_306 = arith.constant 0 : index
    %314 = vector.load %arg8[%c0_305, %c0_306] : memref<128x34xbf16, #tpu.memory_space<vmem>>, vector<128x34xbf16>
    %cst_307 = arith.constant dense<0.000000e+00> : vector<2x34xf32>
    %315 = tpu.matmul %313, %314, %cst_307 {dimension_numbers = #tpu.dot_dimension_numbers<[1], [0], [0], [1], [0, 0, 1, 1], [], []>} : vector<2x128xbf16>, vector<128x34xbf16>, vector<2x34xf32> -> vector<2x34xf32>
    %c0_308 = arith.constant 0 : index
    %c0_309 = arith.constant 0 : index
    %316 = vector.load %arg9[%c0_308, %c0_309] : memref<1x34xf32, #tpu.memory_space<vmem>>, vector<1x34xf32>
    %317 = vector.broadcast %316 : vector<1x34xf32> to vector<2x34xf32>
    %318 = arith.addf %315, %317 : vector<2x34xf32>
    %c0_310 = arith.constant 0 : index
    %c0_311 = arith.constant 0 : index
    %319 = vector.load %arg10[%c0_310, %c0_311] : memref<2x34xf32, #tpu.memory_space<vmem>>, vector<2x34xf32>
    tpu.vector_store %arg10[%c0_310, %c0_311], %318 {strides = array<i32>} : memref<2x34xf32, #tpu.memory_space<vmem>>, vector<2x34xf32>,
    return
  }
  func.func @transform_0(%arg0: i32) -> (i32, i32) {
    %c0_i32 = arith.constant 0 : i32
    %c0_i32_0 = arith.constant 0 : i32
    %c0_i32_1 = arith.constant 0 : i32
    return %c0_i32, %c0_i32_0 : i32, i32
  }
  func.func @transform_1(%arg0: i32) -> (i32, i32, i32) {
    %c0_i32 = arith.constant 0 : i32
    %c0_i32_0 = arith.constant 0 : i32
    %c0_i32_1 = arith.constant 0 : i32
    %c0_i32_2 = arith.constant 0 : i32
    return %c0_i32, %c0_i32_0, %c0_i32_1 : i32, i32, i32
  }
  func.func @transform_2(%arg0: i32) -> (i32, i32) {
    %c0_i32 = arith.constant 0 : i32
    %c0_i32_0 = arith.constant 0 : i32
    %c0_i32_1 = arith.constant 0 : i32
    return %c0_i32, %c0_i32_0 : i32, i32
  }
  func.func @transform_3(%arg0: i32) -> (i32, i32, i32) {
    %c0_i32 = arith.constant 0 : i32
    %c0_i32_0 = arith.constant 0 : i32
    %c0_i32_1 = arith.constant 0 : i32
    %c0_i32_2 = arith.constant 0 : i32
    return %c0_i32, %c0_i32_0, %c0_i32_1 : i32, i32, i32
  }
  func.func @transform_4(%arg0: i32) -> (i32, i32) {
    %c0_i32 = arith.constant 0 : i32
    %c0_i32_0 = arith.constant 0 : i32
    %c0_i32_1 = arith.constant 0 : i32
    return %c0_i32, %c0_i32_0 : i32, i32
  }
  func.func @transform_5(%arg0: i32) -> (i32, i32) {
    %c0_i32 = arith.constant 0 : i32
    %c0_i32_0 = arith.constant 0 : i32
    %c0_i32_1 = arith.constant 0 : i32
    return %c0_i32, %c0_i32_0 : i32, i32
  }
  func.func @transform_6(%arg0: i32) -> (i32, i32) {
    %c0_i32 = arith.constant 0 : i32
    %c0_i32_0 = arith.constant 0 : i32
    %c0_i32_1 = arith.constant 0 : i32
    return %c0_i32, %c0_i32_0 : i32, i32
  }
  func.func @transform_7(%arg0: i32) -> (i32, i32) {
    %c0_i32 = arith.constant 0 : i32
    %c0_i32_0 = arith.constant 0 : i32
    %c0_i32_1 = arith.constant 0 : i32
    return %c0_i32, %c0_i32_0 : i32, i32
  }
  func.func @transform_8(%arg0: i32) -> (i32, i32) {
    %c0_i32 = arith.constant 0 : i32
    %c0_i32_0 = arith.constant 0 : i32
    %c0_i32_1 = arith.constant 0 : i32
    return %c0_i32, %c0_i32_0 : i32, i32
  }
  func.func @transform_9(%arg0: i32) -> (i32, i32) {
    %c0_i32 = arith.constant 0 : i32
    %c0_i32_0 = arith.constant 0 : i32
    %c0_i32_1 = arith.constant 0 : i32
    return %c0_i32, %c0_i32_0 : i32, i32
  }
}

</mosaic_0001>

<bundles_post_ra>
// kernel: tile.29
= control target key start
LH: loop header
LB: loop body
LE: loop exit
PB: predicated region body
PF: predicated region fallthrough
CT: control target
= control target key end

     0   :  { %s28_s0 = inlined_call_operand.vmem [shape: f32[8], index: 0, kind: input, shape index: {}]   ;;  %s29_s1 = inlined_call_operand.vmem [shape: f32[16,8], index: 1, kind: output, shape index: {}]  }
   0x1   :  { %v4_v0 = vld [vmem:[%s28_s0] ss:$0 sm:$0xff] }
   0x2   :  { %5 = vst [vmem:[%s29_s1] sm:$0xff] %v4_v0  ;;  %8 = vst [vmem:[%s29_s1 + $0x8] sm:$0xff] %v4_v0 }

// kernel: tile.30
= control target key start
LH: loop header
LB: loop body
LE: loop exit
PB: predicated region body
PF: predicated region fallthrough
CT: control target
= control target key end

     0   :  { %s131_s10 = smov 120   ;;  %s132_s11 = smov 104   ;;  %vm3_vm0 = vcmask 64512   ;;  %vm9_vm1 = vcmask 1048512   ;;  %vm15_vm2 = vcmask 982912   ;;  %vm21_vm3 = vcmask 917312   ;;  %s207_s0 = inlined_call_operand.vmem [shape: f32[16,8], index: 0, kind: input, shape index: {}]   ;;  %s208_s1 = inlined_call_operand.vmem [shape: f32[1,128], index: 1, kind: output, shape index: {}]  }
   0x1   :  { %v101_v0 = vld [vmem:[%s207_s0 + $0xf] sm:$0x1]   ;;  %v103_v1 = vld [vmem:[%s207_s0 + $0xd] sm:$0x1]   ;;  %v102_v2 = vld [vmem:[%s207_s0 + $0xe] sm:$0x1]  }
   0x2   :  { %7 = vrot.lane.b32.xlu0 %v101_v0, %s131_s10  ;;  %19 = vrot.lane.b32.xlu1 %v103_v1, %s132_s11  ;;  %v104_v3 = vld [vmem:[%s207_s0 + $0xc] sm:$0x1]   ;;  %s133_s16 = smov 112   ;;  %s134_s17 = smov 96   ;;  %v105_v4 = vld [vmem:[%s207_s0 + $0xb] sm:$0x1]  }
   0x3   :  { %v106_v5 = vld [vmem:[%s207_s0 + $0xa] sm:$0x1]   ;;  %v2_v6 = vld [vmem:[%s207_s0] sm:$0x1]   ;;  %s135_s24 = smov 88   ;;  %s136_s25 = smov 80  }
   0x4   :  { %4 = vst.msk [vmem:[#allocation0] sm:$0x1] %vm3_vm0, %v2_v6   ;;  %v107_v7 = vld [vmem:[%s207_s0 + $0x9] sm:$0x1]   ;;  %v108_v8 = vld [vmem:[%s207_s0 + $0x8] sm:$0x1]  }
   0x5   :  { %s137_s30 = smov 72   ;;  %s138_s2 = smov 64   ;;  %v109_v9 = vld [vmem:[%s207_s0 + $0x7] sm:$0x1]   ;;  %v110_v10 = vld [vmem:[%s207_s0 + $0x6] sm:$0x1]  }
   0x6   :  { %13 = vrot.lane.b32.xlu0 %v102_v2, %s133_s16  ;;  %25 = vrot.lane.b32.xlu1 %v104_v3, %s134_s17  ;;  %s139_s7 = smov 56   ;;  %s140_s8 = smov 48   ;;  %v111_v11 = vld [vmem:[%s207_s0 + $0x5] sm:$0x1]   ;;  %v112_v12 = vld [vmem:[%s207_s0 + $0x4] sm:$0x1]  }
   0x7   :  { %s141_s13 = smov 40   ;;  %s142_s14 = smov 32   ;;  %v113_v13 = vld [vmem:[%s207_s0 + $0x3] sm:$0x1]   ;;  %v114_v14 = vld [vmem:[%s207_s0 + $0x2] sm:$0x1]  }
   0x8   :  { %s143_s19 = smov 24   ;;  %s144_s20 = smov 16   ;;  %v115_v15 = vld [vmem:[%s207_s0 + $0x1] sm:$0x1]   ;;  %vm27_vm4 = vcmask 851712   ;;  %vm33_vm5 = vcmask 786112  }
   0x9   :  { %s145_s0 = smov 8   ;;  %vm39_vm6 = vcmask 720512   ;;  %vm45_vm7 = vcmask 654912   ;;  %vm51_vm8 = vcmask 589312   ;;  %vm57_vm9 = vcmask 523712  }
   0xa   :  { %31 = vrot.lane.b32.xlu0 %v105_v4, %s135_s24  ;;  %37 = vrot.lane.b32.xlu1 %v106_v5, %s136_s25  ;;  %vm63_vm10 = vcmask 458112   ;;  %vm69_vm11 = vcmask 392512   ;;  %vm75_vm12 = vcmask 326912   ;;  %vm81_vm13 = vcmask 261312  }
   0xb   :  { %vm87_vm14 = vcmask 195712   ;;  %vm93_vm15 = vcmask 130112  }
   0xe   :  { %43 = vrot.lane.b32.xlu0 %v107_v7, %s137_s30  ;;  %49 = vrot.lane.b32.xlu1 %v108_v8, %s138_s2 }
  0x12   :  { %55 = vrot.lane.b32.xlu0 %v109_v9, %s139_s7  ;;  %61 = vrot.lane.b32.xlu1 %v110_v10, %s140_s8 }
  0x16   :  { %67 = vrot.lane.b32.xlu0 %v111_v11, %s141_s13  ;;  %73 = vrot.lane.b32.xlu1 %v112_v12, %s142_s14 }
  0x1a   :  { %79 = vrot.lane.b32.xlu0 %v113_v13, %s143_s19  ;;  %85 = vrot.lane.b32.xlu1 %v114_v14, %s144_s20 }
  0x1e   :  { %91 = vrot.lane.b32.xlu0 %v115_v15, %s145_s0 }
  0x74   :  { %v8_v16 = vpop.permute.xlu0 %7   ;;  %v20_v17 = vpop.permute.xlu1 %19  }
  0x75   :  { %10 = vst.msk [vmem:[#allocation0] sm:$0x1] %vm9_vm1, %v8_v16  }
  0x78   :  { %v14_v18 = vpop.permute.xlu0 %13   ;;  %v26_v19 = vpop.permute.xlu1 %25  }
  0x79   :  { %16 = vst.msk [vmem:[#allocation0] sm:$0x1] %vm15_vm2, %v14_v18  }
  0x7a   :  { %22 = vst.msk [vmem:[#allocation0] sm:$0x1] %vm21_vm3, %v20_v17  }
  0x7b   :  { %28 = vst.msk [vmem:[#allocation0] sm:$0x1] %vm27_vm4, %v26_v19  }
  0x7c   :  { %v32_v20 = vpop.permute.xlu0 %31   ;;  %v38_v21 = vpop.permute.xlu1 %37  }
  0x7d   :  { %34 = vst.msk [vmem:[#allocation0] sm:$0x1] %vm33_vm5, %v32_v20  }
  0x7e   :  { %40 = vst.msk [vmem:[#allocation0] sm:$0x1] %vm39_vm6, %v38_v21  }
  0x80   :  { %v44_v22 = vpop.permute.xlu0 %43   ;;  %v50_v23 = vpop.permute.xlu1 %49  }
  0x81   :  { %46 = vst.msk [vmem:[#allocation0] sm:$0x1] %vm45_vm7, %v44_v22  }
  0x82   :  { %52 = vst.msk [vmem:[#allocation0] sm:$0x1] %vm51_vm8, %v50_v23  }
  0x84   :  { %v56_v24 = vpop.permute.xlu0 %55   ;;  %v62_v25 = vpop.permute.xlu1 %61  }
  0x85   :  { %58 = vst.msk [vmem:[#allocation0] sm:$0x1] %vm57_vm9, %v56_v24  }
  0x86   :  { %64 = vst.msk [vmem:[#allocation0] sm:$0x1] %vm63_vm10, %v62_v25  }
  0x88   :  { %v68_v26 = vpop.permute.xlu0 %67   ;;  %v74_v27 = vpop.permute.xlu1 %73  }
  0x89   :  { %70 = vst.msk [vmem:[#allocation0] sm:$0x1] %vm69_vm11, %v68_v26  }
  0x8a   :  { %76 = vst.msk [vmem:[#allocation0] sm:$0x1] %vm75_vm12, %v74_v27  }
  0x8c   :  { %v80_v28 = vpop.permute.xlu0 %79   ;;  %v86_v29 = vpop.permute.xlu1 %85  }
  0x8d   :  { %82 = vst.msk [vmem:[#allocation0] sm:$0x1] %vm81_vm13, %v80_v28  }
  0x8e   :  { %88 = vst.msk [vmem:[#allocation0] sm:$0x1] %vm87_vm14, %v86_v29  }
  0x90   :  { %v92_v30 = vpop.permute.xlu0 %91  }
  0x91   :  { %94 = vst.msk [vmem:[#allocation0] sm:$0x1] %vm93_vm15, %v92_v30  }
  0x98   :  { %v98_v31 = vld [vmem:[#allocation0] sm:$0x1] }
  0x99   :  { %100 = vst [vmem:[%s208_s1] sm:$0x1] %v98_v31 }

// kernel: tile.39
= control target key start
LH: loop header
LB: loop body
LE: loop exit
PB: predicated region body
PF: predicated region fallthrough
CT: control target
= control target key end

     0   :  { %s22_s0 = inlined_call_operand.vmem [shape: f32[16], index: 0, kind: input, shape index: {}]   ;;  %s23_s1 = inlined_call_operand.vmem [shape: f32[8,16], index: 1, kind: output, shape index: {}]  }
   0x1   :  { %v4_v0 = vld [vmem:[%s22_s0] ss:$0 sm:$0xff] }
   0x2   :  { %5 = vst [vmem:[%s23_s1] sm:$0xff] %v4_v0 }

// kernel: tile.40
= control target key start
LH: loop header
LB: loop body
LE: loop exit
PB: predicated region body
PF: predicated region fallthrough
CT: control target
= control target key end

     0   :  { %s67_s10 = smov 112   ;;  %s68_s11 = smov 80   ;;  %vm3_vm0 = vcmask 130048   ;;  %vm9_vm1 = vcmask 1048448   ;;  %vm15_vm2 = vcmask 917248   ;;  %vm21_vm3 = vcmask 786048   ;;  %s111_s0 = inlined_call_operand.vmem [shape: f32[8,16], index: 0, kind: input, shape index: {}]   ;;  %s112_s1 = inlined_call_operand.vmem [shape: f32[1,128], index: 1, kind: output, shape index: {}]  }
   0x1   :  { %v53_v0 = vld [vmem:[%s111_s0 + $0x7] sm:$0x1]   ;;  %v55_v1 = vld [vmem:[%s111_s0 + $0x5] sm:$0x1]   ;;  %v54_v2 = vld [vmem:[%s111_s0 + $0x6] sm:$0x1]  }
   0x2   :  { %7 = vrot.lane.b32.xlu0 %v53_v0, %s67_s10  ;;  %19 = vrot.lane.b32.xlu1 %v55_v1, %s68_s11  ;;  %v56_v3 = vld [vmem:[%s111_s0 + $0x4] sm:$0x1]   ;;  %v2_v4 = vld [vmem:[%s111_s0] sm:$0x1]   ;;  %s69_s18 = smov 96   ;;  %s70_s19 = smov 64  }
   0x3   :  { %4 = vst.msk [vmem:[#allocation0] sm:$0x1] %vm3_vm0, %v2_v4   ;;  %v57_v5 = vld [vmem:[%s111_s0 + $0x3] sm:$0x1]   ;;  %v58_v6 = vld [vmem:[%s111_s0 + $0x2] sm:$0x1]  }
   0x4   :  { %s71_s24 = smov 48   ;;  %s72_s25 = smov 32   ;;  %v59_v7 = vld [vmem:[%s111_s0 + $0x1] sm:$0x1]   ;;  %vm27_vm4 = vcmask 654848   ;;  %vm33_vm5 = vcmask 523648  }
   0x5   :  { %s73_s0 = smov 16   ;;  %vm39_vm6 = vcmask 392448   ;;  %vm45_vm7 = vcmask 261248  }
   0x6   :  { %13 = vrot.lane.b32.xlu0 %v54_v2, %s69_s18  ;;  %25 = vrot.lane.b32.xlu1 %v56_v3, %s70_s19 }
   0xa   :  { %31 = vrot.lane.b32.xlu0 %v57_v5, %s71_s24  ;;  %37 = vrot.lane.b32.xlu1 %v58_v6, %s72_s25 }
   0xe   :  { %43 = vrot.lane.b32.xlu0 %v59_v7, %s73_s0 }
  0x74   :  { %v8_v8 = vpop.permute.xlu0 %7   ;;  %v20_v9 = vpop.permute.xlu1 %19  }
  0x75   :  { %10 = vst.msk [vmem:[#allocation0] sm:$0x1] %vm9_vm1, %v8_v8  }
  0x78   :  { %v14_v10 = vpop.permute.xlu0 %13   ;;  %v26_v11 = vpop.permute.xlu1 %25  }
  0x79   :  { %16 = vst.msk [vmem:[#allocation0] sm:$0x1] %vm15_vm2, %v14_v10  }
  0x7a   :  { %22 = vst.msk [vmem:[#allocation0] sm:$0x1] %vm21_vm3, %v20_v9  }
  0x7b   :  { %28 = vst.msk [vmem:[#allocation0] sm:$0x1] %vm27_vm4, %v26_v11  }
  0x7c   :  { %v32_v12 = vpop.permute.xlu0 %31   ;;  %v38_v13 = vpop.permute.xlu1 %37  }
  0x7d   :  { %34 = vst.msk [vmem:[#allocation0] sm:$0x1] %vm33_vm5, %v32_v12  }
  0x7e   :  { %40 = vst.msk [vmem:[#allocation0] sm:$0x1] %vm39_vm6, %v38_v13  }
  0x80   :  { %v44_v14 = vpop.permute.xlu0 %43  }
  0x81   :  { %46 = vst.msk [vmem:[#allocation0] sm:$0x1] %vm45_vm7, %v44_v14  }
  0x88   :  { %v50_v15 = vld [vmem:[#allocation0] sm:$0x1] }
  0x89   :  { %52 = vst [vmem:[%s112_s1] sm:$0x1] %v50_v15 }

// kernel: forward.3
= control target key start
LH: loop header
LB: loop body
LE: loop exit
PB: predicated region body
PF: predicated region fallthrough
CT: control target
= control target key end

     0   :  { %s1794_s24 = smov 0   ;;  %s2067_s0 = inlined_call_operand.vmem [shape: bf16[512,128], index: 0, kind: input, shape index: {}]   ;;  %s2068_s1 = inlined_call_operand.vmem [shape: bf16[128,128], index: 1, kind: input, shape index: {}]   ;;  %s2069_s2 = inlined_call_operand.vmem [shape: f32[1,128], index: 2, kind: input, shape index: {}]   ;;  %s2070_s3 = inlined_call_operand.vmem [shape: bf16[128,128], index: 3, kind: input, shape index: {}]   ;;  %s2071_s4 = inlined_call_operand.vmem [shape: f32[1,128], index: 4, kind: input, shape index: {}]   ;;  %s2072_s5 = inlined_call_operand.vmem [shape: bf16[128,256], index: 5, kind: input, shape index: {}]   ;;  %s2073_s6 = inlined_call_operand.vmem [shape: f32[1,128], index: 6, kind: input, shape index: {}]   ;;  %s2074_s7 = inlined_call_operand.vmem [shape: bf16[128,128], index: 7, kind: output, shape index: {}]  }
   0x1 LB: > { %s1435_s25 = sadd.s32 4294967295, %s1751_s24   ;;  %p1439_p0 = scmp.ge.s32.totalorder %s1751_s24, 1  ;;  %s1751_s24 = sphi %s1794_s24, %s17_s24  }
   0x2   : > { %p238_p1 = scmp.lt.s32.totalorder %s1751_s24, 3 }
   0x4   : > { %p239_p2 = pnand %p1439_p0, %p238_p1 }
   0x5   : > { %v1689_v0 = vld [vmem:[%s2068_s1] sm:$0xff] (!%p239_p2)   ;;  %s1440_s28 = sshll.u32 (!%p239_p2), %s1435_s25, 5  ;;  %v1690_v1 = vld [vmem:[%s2068_s1 + $0x8] sm:$0xff] (!%p239_p2)   ;;  %v1691_v2 = vld [vmem:[%s2068_s1 + $0x10] sm:$0xff] (!%p239_p2)   ;;  %s1442_s14 = sshll.u32 (!%p239_p2), %s1435_s25, 3 }
   0x6   : > { %242 = sbr.rel (%p239_p2) target bundleno = 829 (0x33d), region = 48  ;;  %p271_p3 = scmp.lt.s32.totalorder (!%p239_p2), %s1440_s28, 63  ;;  %1584 = vmatprep.subr.bf16.mxu1 (!%p239_p2), %v1689_v0  ;;  %v1692_v3 = vld [vmem:[%s2068_s1 + $0x18] sm:$0xff] (!%p239_p2)   ;;  %v1693_v5 = vld [vmem:[%s2068_s1 + $0x20] sm:$0xff] (!%p239_p2)   ;;  %v1694_v6 = vld [vmem:[%s2068_s1 + $0x28] sm:$0xff] (!%p239_p2)  }
   0x7   : > { %1585 = vmatpush3.bf16.msra.mxu1 (!%p239_p2), %v1689_v0  ;;  %v1695_v7 = vld [vmem:[%s2068_s1 + $0x30] sm:$0xff] (!%p239_p2)   ;;  %v1696_v8 = vld [vmem:[%s2068_s1 + $0x38] sm:$0xff] (!%p239_p2)   ;;  %v1713_v10 = vld [vmem:[%s2070_s3] sm:$0xff] (!%p239_p2)   ;;  %p277_p4 = scmp.lt.s32.totalorder (!%p239_p2), %s1442_s14, 15 }
   0x8   : > { %1586 = vmatprep.subr.bf16.mxu1 (!%p239_p2), %v1690_v1  ;;  %v1714_v12 = vld [vmem:[%s2070_s3 + $0x8] sm:$0xff] (!%p239_p2)   ;;  %v1715_v13 = vld [vmem:[%s2070_s3 + $0x10] sm:$0xff] (!%p239_p2)   ;;  %v1716_v16 = vld [vmem:[%s2070_s3 + $0x18] sm:$0xff] (!%p239_p2)  }
   0x9   : > { %v1717_v17 = vld [vmem:[%s2070_s3 + $0x20] sm:$0xff] (!%p239_p2)   ;;  %v1718_v20 = vld [vmem:[%s2070_s3 + $0x28] sm:$0xff] (!%p239_p2)   ;;  %v1719_v21 = vld [vmem:[%s2070_s3 + $0x30] sm:$0xff] (!%p239_p2)  }
   0xa   : > { %v1720_v31 = vld [vmem:[%s2070_s3 + $0x38] sm:$0xff] (!%p239_p2)   ;;  %v1721_v32 = vld [vmem:[%s2072_s5 + $0x4] ss:$8 sps:$4 sm:$0xff] (!%p239_p2)   ;;  %v1723_v33 = vld [vmem:[%s2072_s5] ss:$8 sps:$4 sm:$0xff] (!%p239_p2)  }
   0xb   : > { %1587 = vmatpush3.bf16.msra.mxu1 (!%p239_p2), %v1690_v1  ;;  %v1724_v34 = vld [vmem:[%s2072_s5 + $0x14] ss:$8 sps:$4 sm:$0xff] (!%p239_p2)   ;;  %1067 = vmatprep.subr.bf16.mxu0 (!%p239_p2), %v1721_v32  ;;  %v1726_v35 = vld [vmem:[%s2072_s5 + $0x10] ss:$8 sps:$4 sm:$0xff] (!%p239_p2)   ;;  %v1727_v36 = vld [vmem:[%s2072_s5 + $0x24] ss:$8 sps:$4 sm:$0xff] (!%p239_p2)  }
   0xc   : > { %1588 = vmatprep.subr.bf16.mxu1 (!%p239_p2), %v1691_v2  ;;  %1068 = vmatpush1.bf16.msra.mxu0 (!%p239_p2), %v1723_v33  ;;  %v1729_v37 = vld [vmem:[%s2072_s5 + $0x20] ss:$8 sps:$4 sm:$0xff] (!%p239_p2)   ;;  %v1730_v38 = vld [vmem:[%s2072_s5 + $0x34] ss:$8 sps:$4 sm:$0xff] (!%p239_p2)   ;;  %v1732_v39 = vld [vmem:[%s2072_s5 + $0x30] ss:$8 sps:$4 sm:$0xff] (!%p239_p2)  }
   0xd   : > { %s2076_s28 = smov (!%p271_p3, %s1440_s28), 63  ;;  %1069 = vmatprep.subr.bf16.mxu0 %v1724_v34  ;;  %v1733_v40 = vld [vmem:[%s2072_s5 + $0x44] ss:$8 sps:$4 sm:$0xff]   ;;  %v1735_v41 = vld [vmem:[%s2072_s5 + $0x40] ss:$8 sps:$4 sm:$0xff]   ;;  %s2078_s14 = smov (!%p277_p4, %s1442_s14), 15 }
   0xe   : > { %s1441_s10 = sshll.u32 %s2076_s28, 2  ;;  %v1736_v42 = vld [vmem:[%s2072_s5 + $0x54] ss:$8 sps:$4 sm:$0xff]   ;;  %v1738_v43 = vld [vmem:[%s2072_s5 + $0x50] ss:$8 sps:$4 sm:$0xff]   ;;  %s1443_s25 = sshll.u32 %s2078_s14, 2 }
   0xf   : > { %s1816_s13 = scalar_lea.vmem %s2067_s0, %s1441_s10  ;;  %1589 = vmatpush3.bf16.msra.mxu1 %v1691_v2  ;;  %v1912_v44 = vld [vmem:[%s2069_s2] ss:$0 sm:$0xff]  ;;  %s2052_s19 = scalar_lea.vmem %s2074_s7, %s1443_s25 }
  0x10   : > { %v1697_v4 = vld [vmem:[%s1816_s13] sm:$0xff]   ;;  %1590 = vmatprep.subr.bf16.mxu1 %v1692_v3  ;;  %v1698_v9 = vld [vmem:[%s1816_s13 + $0x8] sm:$0xff]   ;;  %v1699_v11 = vld [vmem:[%s1816_s13 + $0x10] sm:$0xff]   ;;  %1070 = vmatpush1.bf16.msra.mxu0 %v1726_v35 }
  0x11   : > { %1600 = vmatprep.mubr.bf16.mxu1 %v1697_v4  ;;  %v1700_v14 = vld [vmem:[%s1816_s13 + $0x18] sm:$0xff]   ;;  %v1701_v15 = vld [vmem:[%s1816_s13 + $0x20] sm:$0xff]   ;;  %v1702_v18 = vld [vmem:[%s1816_s13 + $0x28] sm:$0xff]   ;;  %1071 = vmatprep.subr.bf16.mxu0 %v1727_v36 }
  0x12   : > { %v1703_v19 = vld [vmem:[%s1816_s13 + $0x30] sm:$0xff]   ;;  %v1704_v22 = vld [vmem:[%s1816_s13 + $0x38] sm:$0xff]   ;;  %v1705_v23 = vld [vmem:[%s1816_s13 + $0x40] sm:$0xff]  }
  0x13   : > { %1591 = vmatpush3.bf16.msra.mxu1 %v1692_v3  ;;  %v1706_v24 = vld [vmem:[%s1816_s13 + $0x48] sm:$0xff]   ;;  %v1707_v25 = vld [vmem:[%s1816_s13 + $0x50] sm:$0xff]   ;;  %v1708_v26 = vld [vmem:[%s1816_s13 + $0x58] sm:$0xff]  }
  0x14   : > { %1592 = vmatprep.subr.bf16.mxu1 %v1693_v5  ;;  %v1709_v27 = vld [vmem:[%s1816_s13 + $0x60] sm:$0xff]   ;;  %v1710_v28 = vld [vmem:[%s1816_s13 + $0x68] sm:$0xff]   ;;  %v1711_v29 = vld [vmem:[%s1816_s13 + $0x70] sm:$0xff]   ;;  %1072 = vmatpush1.bf16.msra.mxu0 %v1729_v37 }
  0x15   : > { %v1712_v30 = vld [vmem:[%s1816_s13 + $0x78] sm:$0xff]   ;;  %1073 = vmatprep.subr.bf16.mxu0 %v1730_v38 }
  0x17   : > { %1593 = vmatpush3.bf16.msra.mxu1 %v1693_v5 }
  0x18   : > { %1594 = vmatprep.subr.bf16.mxu1 %v1694_v6  ;;  %1074 = vmatpush1.bf16.msra.mxu0 %v1732_v39 }
  0x19   : > { %1075 = vmatprep.subr.bf16.mxu0 %v1733_v40 }
  0x1b   : > { %1595 = vmatpush3.bf16.msra.mxu1 %v1694_v6 }
  0x1c   : > { %1596 = vmatprep.subr.bf16.mxu1 %v1695_v7  ;;  %1076 = vmatpush1.bf16.msra.mxu0 %v1735_v41 }
  0x1d   : > { %1077 = vmatprep.subr.bf16.mxu0 %v1736_v42 }
  0x1f   : > { %1597 = vmatpush3.bf16.msra.mxu1 %v1695_v7 }
  0x20   : > { %1598 = vmatprep.subr.bf16.mxu1 %v1696_v8  ;;  %1078 = vmatpush1.bf16.msra.mxu0 %v1738_v43 }
  0x23   : > { %1599 = vmatpush3.bf16.msra.mxu1 %v1696_v8 }
  0x24   : > { %1632 = vmatprep.subr.bf16.mxu1 %v1713_v10 }
  0x26   : > { %1601 = vmatmul.mubr.bf16.vlgmr.msra.gmra.mrb[0].mxu1 %v1698_v9 }
  0x27   : > { %1604 = vmatprep.mubr.bf16.mxu1 %v1699_v11  ;;  %1633 = vmatpush3.bf16.msra.mxu1 %v1713_v10 }
  0x28   : > { %1634 = vmatprep.subr.bf16.mxu1 %v1714_v12 }
  0x2b   : > { %1635 = vmatpush3.bf16.msra.mxu1 %v1714_v12 }
  0x2c   : > { %1636 = vmatprep.subr.bf16.mxu1 %v1715_v13 }
  0x2e   : > { %1605 = vmatmul.mubr.bf16.gmra.mrb[4].mxu1 %v1700_v14 }
  0x2f   : > { %1608 = vmatprep.mubr.bf16.mxu1 %v1701_v15  ;;  %1637 = vmatpush3.bf16.msra.mxu1 %v1715_v13 }
  0x30   : > { %1638 = vmatprep.subr.bf16.mxu1 %v1716_v16 }
  0x33   : > { %1639 = vmatpush3.bf16.msra.mxu1 %v1716_v16 }
  0x34   : > { %1640 = vmatprep.subr.bf16.mxu1 %v1717_v17 }
  0x36   : > { %1609 = vmatmul.mubr.bf16.gmra.mrb[8].mxu1 %v1702_v18 }
  0x37   : > { %1612 = vmatprep.mubr.bf16.mxu1 %v1703_v19  ;;  %1641 = vmatpush3.bf16.msra.mxu1 %v1717_v17 }
  0x38   : > { %1642 = vmatprep.subr.bf16.mxu1 %v1718_v20 }
  0x3b   : > { %1643 = vmatpush3.bf16.msra.mxu1 %v1718_v20 }
  0x3c   : > { %1644 = vmatprep.subr.bf16.mxu1 %v1719_v21 }
  0x3e   : > { %1613 = vmatmul.mubr.bf16.gmra.mrb[12].mxu1 %v1704_v22 }
  0x3f   : > { %1616 = vmatprep.mubr.bf16.mxu1 %v1705_v23  ;;  %1645 = vmatpush3.bf16.msra.mxu1 %v1719_v21 }
  0x40   : > { %1646 = vmatprep.subr.bf16.mxu1 %v1720_v31 }
  0x43   : > { %1647 = vmatpush3.bf16.msra.mxu1 %v1720_v31 }
  0x46   : > { %1617 = vmatmul.mubr.bf16.gmra.mrb[16].mxu1 %v1706_v24 }
  0x47   : > { %1620 = vmatprep.mubr.bf16.mxu1 %v1707_v25 }
  0x4e   : > { %1621 = vmatmul.mubr.bf16.gmra.mrb[20].mxu1 %v1708_v26 }
  0x4f   : > { %1624 = vmatprep.mubr.bf16.mxu1 %v1709_v27 }
  0x56   : > { %1625 = vmatmul.mubr.bf16.gmra.mrb[24].mxu1 %v1710_v28 }
  0x57   : > { %1628 = vmatprep.mubr.bf16.mxu1 %v1711_v29 }
  0x5e   : > { %1629 = vmatmul.mubr.bf16.gmra.mrb[28].mxu1 %v1712_v30 }
  0xf9   : > { %v1602_v45 = vpop.f32.mrb[0].mxu1 }
  0xfa   : > { %v525_v46 = vadd.f32 %v1602_v45, %v1912_v44  ;;  %v516_v47 = vpop.f32.mrb[1].mxu1 }
  0xfb   : > { %v517_v48 = vadd.f32 %v1912_v44, %v516_v47  ;;  %v1603_v49 = vpop.f32.mrb[2].mxu1 }
  0xfc   : > { %v528_v50 = vadd.f32 %v1603_v49, %v1912_v44  ;;  %v519_v51 = vpop.f32.mrb[3].mxu1  ;;  %v645_v53 = vmax.f32 %v525_v46, 0.0 }
  0xfd   : > { %v520_v52 = vadd.f32 %v1912_v44, %v519_v51  ;;  %v643_v55 = vmax.f32 %v517_v48, 0.0 }
  0xfe   : > { %v646_v54 = vmax.f32 %v528_v50, 0.0 }
  0xff   : > { %v644_v56 = vmax.f32 %v520_v52, 0.0 }
 0x100   : > { %v676_v57 = vpack.c.bf16 %v646_v54, %v645_v53 }
 0x101   : > { %v675_v58 = vpack.c.bf16 %v644_v56, %v643_v55  ;;  %v1606_v59 = vpop.f32.mrb[4].mxu1 }
 0x102   : > { %v541_v60 = vadd.f32 %v1606_v59, %v1912_v44  ;;  %v532_v61 = vpop.f32.mrb[5].mxu1 }
 0x103   : > { %v533_v62 = vadd.f32 %v1912_v44, %v532_v61  ;;  %1648 = vmatprep.mubr.bf16.mxu1 %v675_v58  ;;  %v1607_v63 = vpop.f32.mrb[6].mxu1 }
 0x104   : > { %v649_v0 = vmax.f32 %v541_v60, 0.0  ;;  %v544_v1 = vadd.f32 %v1607_v63, %v1912_v44  ;;  %1649 = vmatmul.mubr.bf16.vlgmr.msra.gmra.mrb[32].mxu1 %v676_v57  ;;  %v535_v2 = vpop.f32.mrb[7].mxu1 }
 0x105   : > { %v647_v3 = vmax.f32 %v533_v62, 0.0  ;;  %v536_v4 = vadd.f32 %v1912_v44, %v535_v2 }
 0x106   : > { %v650_v5 = vmax.f32 %v544_v1, 0.0 }
 0x107   : > { %v648_v6 = vmax.f32 %v536_v4, 0.0 }
 0x108   : > { %v678_v7 = vpack.c.bf16 %v650_v5, %v649_v0 }
 0x109   : > { %v677_v8 = vpack.c.bf16 %v648_v6, %v647_v3  ;;  %v1610_v9 = vpop.f32.mrb[8].mxu1 }
 0x10a   : > { %v557_v10 = vadd.f32 %v1610_v9, %v1912_v44  ;;  %v548_v11 = vpop.f32.mrb[9].mxu1 }
 0x10b   : > { %1652 = vmatprep.mubr.bf16.mxu1 %v677_v8  ;;  %v549_v12 = vadd.f32 %v1912_v44, %v548_v11  ;;  %v1611_v13 = vpop.f32.mrb[10].mxu1 }
 0x10c   : > { %1653 = vmatmul.mubr.bf16.gmra.mrb[36].mxu1 %v678_v7  ;;  %v653_v14 = vmax.f32 %v557_v10, 0.0  ;;  %v560_v15 = vadd.f32 %v1611_v13, %v1912_v44  ;;  %v551_v16 = vpop.f32.mrb[11].mxu1 }
 0x10d   : > { %v651_v17 = vmax.f32 %v549_v12, 0.0  ;;  %v552_v18 = vadd.f32 %v1912_v44, %v551_v16 }
 0x10e   : > { %v654_v19 = vmax.f32 %v560_v15, 0.0 }
 0x10f   : > { %v652_v20 = vmax.f32 %v552_v18, 0.0 }
 0x110   : > { %v680_v21 = vpack.c.bf16 %v654_v19, %v653_v14 }
 0x111   : > { %v679_v22 = vpack.c.bf16 %v652_v20, %v651_v17  ;;  %v1614_v23 = vpop.f32.mrb[12].mxu1 }
 0x112   : > { %v573_v24 = vadd.f32 %v1614_v23, %v1912_v44  ;;  %v564_v25 = vpop.f32.mrb[13].mxu1 }
 0x113   : > { %1656 = vmatprep.mubr.bf16.mxu1 %v679_v22  ;;  %v565_v26 = vadd.f32 %v1912_v44, %v564_v25  ;;  %v1615_v27 = vpop.f32.mrb[14].mxu1 }
 0x114   : > { %1657 = vmatmul.mubr.bf16.gmra.mrb[40].mxu1 %v680_v21  ;;  %v657_v28 = vmax.f32 %v573_v24, 0.0  ;;  %v576_v29 = vadd.f32 %v1615_v27, %v1912_v44  ;;  %v567_v30 = vpop.f32.mrb[15].mxu1 }
 0x115   : > { %v655_v31 = vmax.f32 %v565_v26, 0.0  ;;  %v568_v32 = vadd.f32 %v1912_v44, %v567_v30  ;;  %v1739_v30 = vld [vmem:[%s2072_s5 + $0x64] ss:$8 sps:$4 sm:$0xff]  }
 0x116   : > { %v658_v33 = vmax.f32 %v576_v29, 0.0  ;;  %1079 = vmatprep.subr.bf16.mxu0 %v1739_v30 }
 0x117   : > { %v656_v34 = vmax.f32 %v568_v32, 0.0  ;;  %v1744_v32 = vld [vmem:[%s2072_s5 + $0x70] ss:$8 sps:$4 sm:$0xff]  }
 0x118   : > { %v682_v35 = vpack.c.bf16 %v658_v33, %v657_v28  ;;  %v1753_v33 = vmov 0  }
 0x119   : > { %v681_v36 = vpack.c.bf16 %v656_v34, %v655_v31  ;;  %v1618_v37 = vpop.f32.mrb[16].mxu1  ;;  %v1741_v31 = vld [vmem:[%s2072_s5 + $0x60] ss:$8 sps:$4 sm:$0xff]   ;;  %1099 = vmatprep.mubr.bf16.mxu0 %v1753_v33 }
 0x11a   : > { %v589_v38 = vadd.f32 %v1618_v37, %v1912_v44  ;;  %v580_v39 = vpop.f32.mrb[17].mxu1  ;;  %1080 = vmatpush1.bf16.msra.mxu0 %v1741_v31  ;;  %v1962_v34 = vld [vmem:[%s2071_s4] ss:$0 sm:$0xff] }
 0x11b   : > { %1660 = vmatprep.mubr.bf16.mxu1 %v681_v36  ;;  %v581_v40 = vadd.f32 %v1912_v44, %v580_v39  ;;  %v1619_v41 = vpop.f32.mrb[18].mxu1 }
 0x11c   : > { %1661 = vmatmul.mubr.bf16.gmra.mrb[44].mxu1 %v682_v35  ;;  %v661_v42 = vmax.f32 %v589_v38, 0.0  ;;  %v592_v43 = vadd.f32 %v1619_v41, %v1912_v44  ;;  %v583_v45 = vpop.f32.mrb[19].mxu1 }
 0x11d   : > { %v659_v46 = vmax.f32 %v581_v40, 0.0  ;;  %v584_v47 = vadd.f32 %v1912_v44, %v583_v45 }
 0x11e   : > { %v662_v48 = vmax.f32 %v592_v43, 0.0 }
 0x11f   : > { %v660_v49 = vmax.f32 %v584_v47, 0.0 }
 0x120   : > { %v684_v50 = vpack.c.bf16 %v662_v48, %v661_v42 }
 0x121   : > { %v683_v51 = vpack.c.bf16 %v660_v49, %v659_v46  ;;  %v1622_v52 = vpop.f32.mrb[20].mxu1 }
 0x122   : > { %v605_v53 = vadd.f32 %v1622_v52, %v1912_v44  ;;  %v596_v54 = vpop.f32.mrb[21].mxu1 }
 0x123   : > { %1664 = vmatprep.mubr.bf16.mxu1 %v683_v51  ;;  %v597_v55 = vadd.f32 %v1912_v44, %v596_v54  ;;  %v1623_v56 = vpop.f32.mrb[22].mxu1 }
 0x124   : > { %1665 = vmatmul.mubr.bf16.gmra.mrb[48].mxu1 %v684_v50  ;;  %v665_v57 = vmax.f32 %v605_v53, 0.0  ;;  %v608_v58 = vadd.f32 %v1623_v56, %v1912_v44  ;;  %v599_v59 = vpop.f32.mrb[23].mxu1 }
 0x125   : > { %v663_v60 = vmax.f32 %v597_v55, 0.0  ;;  %v600_v61 = vadd.f32 %v1912_v44, %v599_v59 }
 0x126   : > { %v666_v62 = vmax.f32 %v608_v58, 0.0 }
 0x127   : > { %v664_v63 = vmax.f32 %v600_v61, 0.0 }
 0x128   : > { %v686_v0 = vpack.c.bf16 %v666_v62, %v665_v57 }
 0x129   : > { %v685_v1 = vpack.c.bf16 %v664_v63, %v663_v60  ;;  %v1626_v2 = vpop.f32.mrb[24].mxu1 }
 0x12a   : > { %v621_v3 = vadd.f32 %v1626_v2, %v1912_v44  ;;  %v612_v4 = vpop.f32.mrb[25].mxu1 }
 0x12b   : > { %1668 = vmatprep.mubr.bf16.mxu1 %v685_v1  ;;  %v613_v5 = vadd.f32 %v1912_v44, %v612_v4  ;;  %v1627_v6 = vpop.f32.mrb[26].mxu1 }
 0x12c   : > { %1669 = vmatmul.mubr.bf16.gmra.mrb[52].mxu1 %v686_v0  ;;  %v669_v7 = vmax.f32 %v621_v3, 0.0  ;;  %v624_v8 = vadd.f32 %v1627_v6, %v1912_v44  ;;  %v615_v9 = vpop.f32.mrb[27].mxu1 }
 0x12d   : > { %v667_v10 = vmax.f32 %v613_v5, 0.0  ;;  %v616_v11 = vadd.f32 %v1912_v44, %v615_v9 }
 0x12e   : > { %v670_v12 = vmax.f32 %v624_v8, 0.0 }
 0x12f   : > { %v668_v13 = vmax.f32 %v616_v11, 0.0 }
 0x130   : > { %v688_v14 = vpack.c.bf16 %v670_v12, %v669_v7 }
 0x131   : > { %v687_v15 = vpack.c.bf16 %v668_v13, %v667_v10  ;;  %v1630_v16 = vpop.f32.mrb[28].mxu1 }
 0x132   : > { %v637_v17 = vadd.f32 %v1630_v16, %v1912_v44  ;;  %v628_v18 = vpop.f32.mrb[29].mxu1 }
 0x133   : > { %1672 = vmatprep.mubr.bf16.mxu1 %v687_v15  ;;  %v629_v19 = vadd.f32 %v1912_v44, %v628_v18  ;;  %v1631_v20 = vpop.f32.mrb[30].mxu1 }
 0x134   : > { %1673 = vmatmul.mubr.bf16.gmra.mrb[56].mxu1 %v688_v14  ;;  %v673_v21 = vmax.f32 %v637_v17, 0.0  ;;  %v640_v22 = vadd.f32 %v1631_v20, %v1912_v44  ;;  %v631_v23 = vpop.f32.mrb[31].mxu1 }
 0x135   : > { %v671_v24 = vmax.f32 %v629_v19, 0.0  ;;  %v632_v25 = vadd.f32 %v1912_v44, %v631_v23  ;;  %v1742_v44 = vld [vmem:[%s2072_s5 + $0x74] ss:$8 sps:$4 sm:$0xff]  }
 0x136   : > { %v674_v26 = vmax.f32 %v640_v22, 0.0  ;;  %1081 = vmatprep.subr.bf16.mxu0 %v1742_v44 }
 0x137   : > { %v672_v27 = vmax.f32 %v632_v25, 0.0  ;;  %1082 = vmatpush1.bf16.msra.mxu0 %v1744_v32 }
 0x138   : > { %v690_v28 = vpack.c.bf16 %v674_v26, %v673_v21 }
 0x139   : > { %v689_v29 = vpack.c.bf16 %v672_v27, %v671_v24 }
 0x13b   : > { %1676 = vmatprep.mubr.bf16.mxu1 %v689_v29 }
 0x13c   : > { %1677 = vmatmul.mubr.bf16.gmra.mrb[60].mxu1 %v690_v28 }
 0x1d7   : > { %v1650_v35 = vpop.f32.mrb[32].mxu1 }
 0x1d8   : > { %v805_v36 = vadd.f32 %v1650_v35, %v1962_v34  ;;  %v796_v37 = vpop.f32.mrb[33].mxu1 }
 0x1d9   : > { %v797_v38 = vadd.f32 %v1962_v34, %v796_v37  ;;  %v1651_v39 = vpop.f32.mrb[34].mxu1 }
 0x1da   : > { %v808_v40 = vadd.f32 %v1651_v39, %v1962_v34  ;;  %v799_v41 = vpop.f32.mrb[35].mxu1  ;;  %v925_v43 = vmax.f32 %v805_v36, 0.0 }
 0x1db   : > { %v800_v42 = vadd.f32 %v1962_v34, %v799_v41  ;;  %v923_v46 = vmax.f32 %v797_v38, 0.0 }
 0x1dc   : > { %v926_v45 = vmax.f32 %v808_v40, 0.0 }
 0x1dd   : > { %v924_v47 = vmax.f32 %v800_v42, 0.0 }
 0x1de   : > { %v956_v48 = vpack.c.bf16 %v926_v45, %v925_v43 }
 0x1df   : > { %v955_v49 = vpack.c.bf16 %v924_v47, %v923_v46  ;;  %v1654_v50 = vpop.f32.mrb[36].mxu1 }
 0x1e0   : > { %v821_v51 = vadd.f32 %v1654_v50, %v1962_v34  ;;  %v812_v52 = vpop.f32.mrb[37].mxu1 }
 0x1e1   : > { %v813_v53 = vadd.f32 %v1962_v34, %v812_v52  ;;  %1100 = vmatmul.mubr.bf16.vlgmr.msra.gmra.mrb[0].mxu0 %v955_v49  ;;  %v1655_v54 = vpop.f32.mrb[38].mxu1 }
 0x1e2   : > { %v929_v55 = vmax.f32 %v821_v51, 0.0  ;;  %v824_v56 = vadd.f32 %v1655_v54, %v1962_v34  ;;  %v815_v57 = vpop.f32.mrb[39].mxu1  ;;  %1109 = vmatprep.mubr.bf16.mxu0 %v1753_v33 }
 0x1e3   : > { %v927_v58 = vmax.f32 %v813_v53, 0.0  ;;  %v816_v59 = vadd.f32 %v1962_v34, %v815_v57 }
 0x1e4   : > { %v930_v60 = vmax.f32 %v824_v56, 0.0 }
 0x1e5   : > { %v928_v61 = vmax.f32 %v816_v59, 0.0 }
 0x1e6   : > { %v958_v62 = vpack.c.bf16 %v930_v60, %v929_v55 }
 0x1e7   : > { %v957_v63 = vpack.c.bf16 %v928_v61, %v927_v58  ;;  %v1658_v0 = vpop.f32.mrb[40].mxu1 }
 0x1e8   : > { %v837_v1 = vadd.f32 %v1658_v0, %v1962_v34  ;;  %v828_v2 = vpop.f32.mrb[41].mxu1 }
 0x1e9   : > { %1110 = vmatmul.mubr.bf16.gmra.mrb[4].mxu0 %v956_v48  ;;  %v829_v3 = vadd.f32 %v1962_v34, %v828_v2  ;;  %v1659_v4 = vpop.f32.mrb[42].mxu1 }
 0x1ea   : > { %v933_v5 = vmax.f32 %v837_v1, 0.0  ;;  %1119 = vmatprep.mubr.bf16.mxu0 %v1753_v33  ;;  %v840_v6 = vadd.f32 %v1659_v4, %v1962_v34  ;;  %v831_v7 = vpop.f32.mrb[43].mxu1 }
 0x1eb   : > { %v931_v8 = vmax.f32 %v829_v3, 0.0  ;;  %v832_v9 = vadd.f32 %v1962_v34, %v831_v7 }
 0x1ec   : > { %v934_v10 = vmax.f32 %v840_v6, 0.0 }
 0x1ed   : > { %v932_v11 = vmax.f32 %v832_v9, 0.0 }
 0x1ee   : > { %v960_v12 = vpack.c.bf16 %v934_v10, %v933_v5 }
 0x1ef   : > { %v959_v13 = vpack.c.bf16 %v932_v11, %v931_v8  ;;  %v1662_v14 = vpop.f32.mrb[44].mxu1 }
 0x1f0   : > { %v853_v15 = vadd.f32 %v1662_v14, %v1962_v34  ;;  %v844_v16 = vpop.f32.mrb[45].mxu1 }
 0x1f1   : > { %1120 = vmatmul.mubr.bf16.gmra.mrb[8].mxu0 %v957_v63  ;;  %v845_v17 = vadd.f32 %v1962_v34, %v844_v16  ;;  %v1663_v18 = vpop.f32.mrb[46].mxu1 }
 0x1f2   : > { %1129 = vmatprep.mubr.bf16.mxu0 %v1753_v33  ;;  %v937_v19 = vmax.f32 %v853_v15, 0.0  ;;  %v856_v20 = vadd.f32 %v1663_v18, %v1962_v34  ;;  %v847_v21 = vpop.f32.mrb[47].mxu1 }
 0x1f3   : > { %v935_v22 = vmax.f32 %v845_v17, 0.0  ;;  %v848_v23 = vadd.f32 %v1962_v34, %v847_v21 }
 0x1f4   : > { %v938_v24 = vmax.f32 %v856_v20, 0.0 }
 0x1f5   : > { %v936_v25 = vmax.f32 %v848_v23, 0.0 }
 0x1f6   : > { %v1983_v26 = vpack.c.bf16 %v938_v24, %v937_v19 }
 0x1f7   : > { %v961_v27 = vpack.c.bf16 %v936_v25, %v935_v22  ;;  %v1666_v28 = vpop.f32.mrb[48].mxu1 }
 0x1f8   : > { %v869_v29 = vadd.f32 %v1666_v28, %v1962_v34  ;;  %v860_v30 = vpop.f32.mrb[49].mxu1 }
 0x1f9   : > { %1130 = vmatmul.mubr.bf16.gmra.mrb[12].mxu0 %v958_v62  ;;  %v861_v31 = vadd.f32 %v1962_v34, %v860_v30  ;;  %v1667_v44 = vpop.f32.mrb[50].mxu1 }
 0x1fa   : > { %1139 = vmatprep.mubr.bf16.mxu0 %v1753_v33  ;;  %v941_v32 = vmax.f32 %v869_v29, 0.0  ;;  %v872_v35 = vadd.f32 %v1667_v44, %v1962_v34  ;;  %v863_v36 = vpop.f32.mrb[51].mxu1 }
 0x1fb   : > { %v939_v37 = vmax.f32 %v861_v31, 0.0  ;;  %v864_v38 = vadd.f32 %v1962_v34, %v863_v36 }
 0x1fc   : > { %v942_v39 = vmax.f32 %v872_v35, 0.0 }
 0x1fd   : > { %v940_v40 = vmax.f32 %v864_v38, 0.0 }
 0x1fe   : > { %v964_v41 = vpack.c.bf16 %v942_v39, %v941_v32 }
 0x1ff   : > { %v963_v42 = vpack.c.bf16 %v940_v40, %v939_v37  ;;  %v1670_v43 = vpop.f32.mrb[52].mxu1 }
 0x200   : > { %v885_v45 = vadd.f32 %v1670_v43, %v1962_v34  ;;  %v876_v46 = vpop.f32.mrb[53].mxu1 }
 0x201   : > { %1140 = vmatmul.mubr.bf16.gmra.mrb[16].mxu0 %v959_v13  ;;  %v877_v47 = vadd.f32 %v1962_v34, %v876_v46  ;;  %v1671_v48 = vpop.f32.mrb[54].mxu1 }
 0x202   : > { %1149 = vmatprep.mubr.bf16.mxu0 %v1753_v33  ;;  %v945_v49 = vmax.f32 %v885_v45, 0.0  ;;  %v888_v50 = vadd.f32 %v1671_v48, %v1962_v34  ;;  %v879_v51 = vpop.f32.mrb[55].mxu1 }
 0x203   : > { %v943_v52 = vmax.f32 %v877_v47, 0.0  ;;  %v880_v53 = vadd.f32 %v1962_v34, %v879_v51 }
 0x204   : > { %v946_v54 = vmax.f32 %v888_v50, 0.0 }
 0x205   : > { %v944_v55 = vmax.f32 %v880_v53, 0.0 }
 0x206   : > { %v966_v56 = vpack.c.bf16 %v946_v54, %v945_v49 }
 0x207   : > { %v965_v57 = vpack.c.bf16 %v944_v55, %v943_v52  ;;  %v1674_v58 = vpop.f32.mrb[56].mxu1 }
 0x208   : > { %v901_v59 = vadd.f32 %v1674_v58, %v1962_v34  ;;  %v892_v60 = vpop.f32.mrb[57].mxu1 }
 0x209   : > { %1150 = vmatmul.mubr.bf16.gmra.mrb[20].mxu0 %v960_v12  ;;  %v893_v61 = vadd.f32 %v1962_v34, %v892_v60  ;;  %v1675_v62 = vpop.f32.mrb[58].mxu1 }
 0x20a   : > { %1159 = vmatprep.mubr.bf16.mxu0 %v1753_v33  ;;  %v949_v63 = vmax.f32 %v901_v59, 0.0  ;;  %v904_v0 = vadd.f32 %v1675_v62, %v1962_v34  ;;  %v895_v1 = vpop.f32.mrb[59].mxu1 }
 0x20b   : > { %v947_v2 = vmax.f32 %v893_v61, 0.0  ;;  %v896_v3 = vadd.f32 %v1962_v34, %v895_v1 }
 0x20c   : > { %v950_v4 = vmax.f32 %v904_v0, 0.0 }
 0x20d   : > { %v948_v5 = vmax.f32 %v896_v3, 0.0 }
 0x20e   : > { %v968_v6 = vpack.c.bf16 %v950_v4, %v949_v63 }
 0x20f   : > { %v967_v7 = vpack.c.bf16 %v948_v5, %v947_v2  ;;  %v1678_v8 = vpop.f32.mrb[60].mxu1 }
 0x210   : > { %v917_v9 = vadd.f32 %v1678_v8, %v1962_v34  ;;  %v908_v10 = vpop.f32.mrb[61].mxu1 }
 0x211   : > { %1160 = vmatmul.mubr.bf16.gmra.mrb[24].mxu0 %v961_v27  ;;  %v909_v11 = vadd.f32 %v1962_v34, %v908_v10  ;;  %v1679_v12 = vpop.f32.mrb[62].mxu1 }
 0x212   : > { %1169 = vmatprep.mubr.bf16.mxu0 %v1753_v33  ;;  %v953_v13 = vmax.f32 %v917_v9, 0.0  ;;  %v920_v14 = vadd.f32 %v1679_v12, %v1962_v34  ;;  %v911_v15 = vpop.f32.mrb[63].mxu1 }
 0x213   : > { %v951_v16 = vmax.f32 %v909_v11, 0.0  ;;  %v912_v17 = vadd.f32 %v1962_v34, %v911_v15 }
 0x214   : > { %v954_v18 = vmax.f32 %v920_v14, 0.0 }
 0x215   : > { %v952_v19 = vmax.f32 %v912_v17, 0.0 }
 0x216   : > { %v970_v20 = vpack.c.bf16 %v954_v18, %v953_v13 }
 0x217   : > { %v969_v21 = vpack.c.bf16 %v952_v19, %v951_v16 }
 0x219   : > { %1170 = vmatmul.mubr.bf16.gmra.mrb[28].mxu0 %v1983_v26 }
 0x21a   : > { %1179 = vmatprep.mubr.bf16.mxu0 %v1753_v33 }
 0x221   : > { %1180 = vmatmul.mubr.bf16.gmra.mrb[32].mxu0 %v963_v42 }
 0x222   : > { %1189 = vmatprep.mubr.bf16.mxu0 %v1753_v33 }
 0x229   : > { %1190 = vmatmul.mubr.bf16.gmra.mrb[36].mxu0 %v964_v41 }
 0x22a   : > { %1199 = vmatprep.mubr.bf16.mxu0 %v1753_v33 }
 0x231   : > { %1200 = vmatmul.mubr.bf16.gmra.mrb[40].mxu0 %v965_v57 }
 0x232   : > { %1209 = vmatprep.mubr.bf16.mxu0 %v1753_v33 }
 0x239   : > { %1210 = vmatmul.mubr.bf16.gmra.mrb[44].mxu0 %v966_v56 }
 0x23a   : > { %1219 = vmatprep.mubr.bf16.mxu0 %v1753_v33 }
 0x241   : > { %1220 = vmatmul.mubr.bf16.gmra.mrb[48].mxu0 %v967_v7 }
 0x242   : > { %1229 = vmatprep.mubr.bf16.mxu0 %v1753_v33 }
 0x249   : > { %1230 = vmatmul.mubr.bf16.gmra.mrb[52].mxu0 %v968_v6 }
 0x24a   : > { %1239 = vmatprep.mubr.bf16.mxu0 %v1753_v33 }
 0x251   : > { %1240 = vmatmul.mubr.bf16.gmra.mrb[56].mxu0 %v969_v21 }
 0x252   : > { %1249 = vmatprep.mubr.bf16.mxu0 %v1753_v33 }
 0x259   : > { %1250 = vmatmul.mubr.bf16.gmra.mrb[60].mxu0 %v970_v20 }
 0x2b4   : > { %v1101_v34 = vpop.f32.mrb[0].mxu0 }
 0x2b5   : > { %v1103_v22 = vpop.f32.mrb[1].mxu0 }
 0x2b6   : > { %v1260_v23 = vmax.f32 %v1101_v34, %v1103_v22  ;;  %v1105_v24 = vpop.f32.mrb[2].mxu0 }
 0x2b7   : > { %v1107_v25 = vpop.f32.mrb[3].mxu0 }
 0x2b8   : > { %v1261_v26 = vmax.f32 %v1105_v24, %v1107_v25 }
 0x2bc   : > { %v1111_v27 = vpop.f32.mrb[4].mxu0 }
 0x2bd   : > { %v1113_v28 = vpop.f32.mrb[5].mxu0 }
 0x2be   : > { %v1262_v29 = vmax.f32 %v1111_v27, %v1113_v28  ;;  %v1115_v30 = vpop.f32.mrb[6].mxu0 }
 0x2bf   : > { %v1117_v31 = vpop.f32.mrb[7].mxu0 }
 0x2c0   : > { %v1263_v44 = vmax.f32 %v1115_v30, %v1117_v31 }
 0x2c4   : > { %v1121_v32 = vpop.f32.mrb[8].mxu0 }
 0x2c5   : > { %v1123_v35 = vpop.f32.mrb[9].mxu0 }
 0x2c6   : > { %v1264_v36 = vmax.f32 %v1121_v32, %v1123_v35  ;;  %v1125_v37 = vpop.f32.mrb[10].mxu0 }
 0x2c7   : > { %v1127_v38 = vpop.f32.mrb[11].mxu0 }
 0x2c8   : > { %v1265_v39 = vmax.f32 %v1125_v37, %v1127_v38 }
 0x2cc   : > { %v1131_v33 = vpop.f32.mrb[12].mxu0 }
 0x2cd   : > { %v1133_v40 = vpop.f32.mrb[13].mxu0 }
 0x2ce   : > { %v1266_v41 = vmax.f32 %v1131_v33, %v1133_v40  ;;  %v1135_v42 = vpop.f32.mrb[14].mxu0 }
 0x2cf   : > { %v1137_v43 = vpop.f32.mrb[15].mxu0 }
 0x2d0   : > { %v1267_v45 = vmax.f32 %v1135_v42, %v1137_v43 }
 0x2d4   : > { %v1141_v46 = vpop.f32.mrb[16].mxu0 }
 0x2d5   : > { %v1143_v47 = vpop.f32.mrb[17].mxu0 }
 0x2d6   : > { %v1268_v48 = vmax.f32 %v1141_v46, %v1143_v47  ;;  %v1145_v49 = vpop.f32.mrb[18].mxu0 }
 0x2d7   : > { %v1147_v50 = vpop.f32.mrb[19].mxu0 }
 0x2d8   : > { %v2014_v51 = vmax.f32 %v1260_v23, %v1268_v48  ;;  %v1269_v52 = vmax.f32 %v1145_v49, %v1147_v50 }
 0x2da   : > { %v2016_v53 = vmax.f32 %v1261_v26, %v1269_v52 }
 0x2dc   : > { %v1151_v54 = vpop.f32.mrb[20].mxu0 }
 0x2dd   : > { %v1153_v55 = vpop.f32.mrb[21].mxu0 }
 0x2de   : > { %v1270_v56 = vmax.f32 %v1151_v54, %v1153_v55  ;;  %v1155_v57 = vpop.f32.mrb[22].mxu0 }
 0x2df   : > { %v1157_v58 = vpop.f32.mrb[23].mxu0 }
 0x2e0   : > { %v2018_v59 = vmax.f32 %v1262_v29, %v1270_v56  ;;  %v1271_v60 = vmax.f32 %v1155_v57, %v1157_v58 }
 0x2e2   : > { %v2020_v61 = vmax.f32 %v1263_v44, %v1271_v60 }
 0x2e4   : > { %v1161_v62 = vpop.f32.mrb[24].mxu0 }
 0x2e5   : > { %v1163_v63 = vpop.f32.mrb[25].mxu0 }
 0x2e6   : > { %v1272_v0 = vmax.f32 %v1161_v62, %v1163_v63  ;;  %v1165_v1 = vpop.f32.mrb[26].mxu0 }
 0x2e7   : > { %v1167_v2 = vpop.f32.mrb[27].mxu0 }
 0x2e8   : > { %v2022_v3 = vmax.f32 %v1264_v36, %v1272_v0  ;;  %v1273_v4 = vmax.f32 %v1165_v1, %v1167_v2 }
 0x2ea   : > { %v2024_v5 = vmax.f32 %v1265_v39, %v1273_v4 }
 0x2ec   : > { %v1171_v6 = vpop.f32.mrb[28].mxu0 }
 0x2ed   : > { %v1173_v7 = vpop.f32.mrb[29].mxu0 }
 0x2ee   : > { %v1274_v8 = vmax.f32 %v1171_v6, %v1173_v7  ;;  %v1175_v9 = vpop.f32.mrb[30].mxu0 }
 0x2ef   : > { %v1177_v10 = vpop.f32.mrb[31].mxu0 }
 0x2f0   : > { %v2026_v11 = vmax.f32 %v1266_v41, %v1274_v8  ;;  %v1275_v12 = vmax.f32 %v1175_v9, %v1177_v10 }
 0x2f2   : > { %v2028_v13 = vmax.f32 %v1267_v45, %v1275_v12  ;;  %v1494_v45 = vld [vmem:[%s2073_s6] ss:$0 sm:$0xff] }
 0x2f4   : > { %v1181_v14 = vpop.f32.mrb[32].mxu0 }
 0x2f5   : > { %v1183_v15 = vpop.f32.mrb[33].mxu0 }
 0x2f6   : > { %v1276_v16 = vmax.f32 %v1181_v14, %v1183_v15  ;;  %v1185_v17 = vpop.f32.mrb[34].mxu0 }
 0x2f7   : > { %v1187_v18 = vpop.f32.mrb[35].mxu0 }
 0x2f8   : > { %v1277_v19 = vmax.f32 %v1185_v17, %v1187_v18 }
 0x2fc   : > { %v1191_v20 = vpop.f32.mrb[36].mxu0 }
 0x2fd   : > { %v1193_v21 = vpop.f32.mrb[37].mxu0 }
 0x2fe   : > { %v1278_v34 = vmax.f32 %v1191_v20, %v1193_v21  ;;  %v1195_v22 = vpop.f32.mrb[38].mxu0 }
 0x2ff   : > { %v1197_v23 = vpop.f32.mrb[39].mxu0 }
 0x300   : > { %v1279_v24 = vmax.f32 %v1195_v22, %v1197_v23 }
 0x304   : > { %v1201_v25 = vpop.f32.mrb[40].mxu0 }
 0x305   : > { %v1203_v26 = vpop.f32.mrb[41].mxu0 }
 0x306   : > { %v1280_v27 = vmax.f32 %v1201_v25, %v1203_v26  ;;  %v1205_v28 = vpop.f32.mrb[42].mxu0 }
 0x307   : > { %v1207_v29 = vpop.f32.mrb[43].mxu0 }
 0x308   : > { %v1281_v30 = vmax.f32 %v1205_v28, %v1207_v29 }
 0x30c   : > { %v2030_v31 = vpop.f32.mrb[44].mxu0 }
 0x30d   : > { %v2032_v44 = vpop.f32.mrb[45].mxu0 }
 0x30e   : > { %v1282_v32 = vmax.f32 %v2030_v31, %v2032_v44  ;;  %v2036_v35 = vpop.f32.mrb[46].mxu0 }
 0x30f   : > { %v2038_v36 = vpop.f32.mrb[47].mxu0 }
 0x310   : > { %v1283_v37 = vmax.f32 %v2036_v35, %v2038_v36 }
 0x314   : > { %v1221_v38 = vpop.f32.mrb[48].mxu0 }
 0x315   : > { %v1223_v39 = vpop.f32.mrb[49].mxu0 }
 0x316   : > { %v1284_v33 = vmax.f32 %v1221_v38, %v1223_v39  ;;  %v1225_v40 = vpop.f32.mrb[50].mxu0 }
 0x317   : > { %v1227_v41 = vpop.f32.mrb[51].mxu0 }
 0x318   : > { %v1300_v42 = vmax.f32 %v1276_v16, %v1284_v33  ;;  %v1285_v43 = vmax.f32 %v1225_v40, %v1227_v41 }
 0x31a   : > { %v1308_v46 = vmax.f32 %v2014_v51, %v1300_v42  ;;  %v1301_v47 = vmax.f32 %v1277_v19, %v1285_v43 }
 0x31c   : > { %v1323_v48 = vadd.f32 %v1494_v45, %v1308_v46  ;;  %v1309_v49 = vmax.f32 %v2016_v53, %v1301_v47  ;;  %v1231_v50 = vpop.f32.mrb[52].mxu0 }
 0x31d   : > { %v1233_v52 = vpop.f32.mrb[53].mxu0 }
 0x31e   : > { %v1324_v54 = vadd.f32 %v1494_v45, %v1309_v49  ;;  %v1286_v55 = vmax.f32 %v1231_v50, %v1233_v52  ;;  %v1235_v56 = vpop.f32.mrb[54].mxu0  ;;  %v1331_v58 = vmax.f32 %v1323_v48, 0.0 }
 0x31f   : > { %v1237_v57 = vpop.f32.mrb[55].mxu0 }
 0x320   : > { %v1332_v60 = vmax.f32 %v1324_v54, 0.0  ;;  %v1302_v62 = vmax.f32 %v1278_v34, %v1286_v55  ;;  %v1287_v63 = vmax.f32 %v1235_v56, %v1237_v57 }
 0x322   : > { %v1516_v51 = vpack.c.bf16 %v1332_v60, %v1331_v58  ;;  %v1310_v53 = vmax.f32 %v2018_v59, %v1302_v62  ;;  %v1303_v0 = vmax.f32 %v1279_v24, %v1287_v63 }
 0x324   : > { %1517 = vst [vmem:[%s2052_s19] sm:$0xff] %v1516_v51   ;;  %v1325_v1 = vadd.f32 %v1494_v45, %v1310_v53  ;;  %v1311_v2 = vmax.f32 %v2020_v61, %v1303_v0  ;;  %v1241_v4 = vpop.f32.mrb[56].mxu0 }
 0x325   : > { %v1243_v6 = vpop.f32.mrb[57].mxu0 }
 0x326   : > { %v1326_v7 = vadd.f32 %v1494_v45, %v1311_v2  ;;  %v1288_v8 = vmax.f32 %v1241_v4, %v1243_v6  ;;  %v1245_v9 = vpop.f32.mrb[58].mxu0  ;;  %v1333_v12 = vmax.f32 %v1325_v1, 0.0 }
 0x327   : > { %v1247_v10 = vpop.f32.mrb[59].mxu0 }
 0x328   : > { %v1334_v14 = vmax.f32 %v1326_v7, 0.0  ;;  %v1304_v15 = vmax.f32 %v1280_v27, %v1288_v8  ;;  %v1289_v16 = vmax.f32 %v1245_v9, %v1247_v10 }
 0x32a   : > { %v1521_v17 = vpack.c.bf16 %v1334_v14, %v1333_v12  ;;  %v1312_v18 = vmax.f32 %v2022_v3, %v1304_v15  ;;  %v1305_v59 = vmax.f32 %v1281_v30, %v1289_v16 }
 0x32c   : > { %1533 = vst [vmem:[%s2052_s19 + $0x8] sm:$0xff] %v1521_v17   ;;  %v1327_v19 = vadd.f32 %v1494_v45, %v1312_v18  ;;  %v1313_v20 = vmax.f32 %v2024_v5, %v1305_v59  ;;  %v1251_v61 = vpop.f32.mrb[60].mxu0 }
 0x32d   : > { %v1253_v21 = vpop.f32.mrb[61].mxu0 }
 0x32e   : > { %v1328_v34 = vadd.f32 %v1494_v45, %v1313_v20  ;;  %v1290_v22 = vmax.f32 %v1251_v61, %v1253_v21  ;;  %v1255_v23 = vpop.f32.mrb[62].mxu0  ;;  %v1335_v25 = vmax.f32 %v1327_v19, 0.0 }
 0x32f   : > { %v1257_v24 = vpop.f32.mrb[63].mxu0 }
 0x330   : > { %v1336_v26 = vmax.f32 %v1328_v34, 0.0  ;;  %v1306_v27 = vmax.f32 %v1282_v32, %v1290_v22  ;;  %v1291_v28 = vmax.f32 %v1255_v23, %v1257_v24 }
 0x332   : > { %v1526_v29 = vpack.c.bf16 %v1336_v26, %v1335_v25  ;;  %v1314_v3 = vmax.f32 %v2026_v11, %v1306_v27  ;;  %v1307_v30 = vmax.f32 %v1283_v37, %v1291_v28 }
 0x334   : > { %1534 = vst [vmem:[%s2052_s19 + $0x10] sm:$0xff] %v1526_v29   ;;  %v1329_v31 = vadd.f32 %v1494_v45, %v1314_v3  ;;  %v1315_v44 = vmax.f32 %v2028_v13, %v1307_v30 }
 0x336   : > { %v1330_v5 = vadd.f32 %v1494_v45, %v1315_v44  ;;  %v1337_v35 = vmax.f32 %v1329_v31, 0.0 }
 0x338   : > { %v1338_v36 = vmax.f32 %v1330_v5, 0.0 }
 0x33a   : > { %v1531_v38 = vpack.c.bf16 %v1338_v36, %v1337_v35 }
 0x33c   : > { %1535 = vst [vmem:[%s2052_s19 + $0x18] sm:$0xff] %v1531_v38  }
 0x33d PF: > { %s17_s24 = sadd.s32 1, %s1751_s24  }
 0x33e   : > { %p14_p5 = scmp.ge.s32.totalorder %s17_s24, 4  }
 0x340   :  { %16 = sbr.rel (!%p14_p5) target bundleno = 1 (0x1), region = 78 }

// kernel: tile.44
= control target key start
LH: loop header
LB: loop body
LE: loop exit
PB: predicated region body
PF: predicated region fallthrough
CT: control target
= control target key end

     0   :  { %s22_s0 = inlined_call_operand.vmem [shape: f32[32], index: 0, kind: input, shape index: {}]   ;;  %s23_s1 = inlined_call_operand.vmem [shape: f32[4,32], index: 1, kind: output, shape index: {}]  }
   0x1   :  { %v4_v0 = vld [vmem:[%s22_s0] ss:$0 sm:$0xff] }
   0x2   :  { %5 = vst [vmem:[%s23_s1] sm:$0xf] %v4_v0 }

// kernel: tile.45
= control target key start
LH: loop header
LB: loop body
LE: loop exit
PB: predicated region body
PF: predicated region fallthrough
CT: control target
= control target key end

     0   :  { %vm7_vm0 = vcmask 261120   ;;  %s37_s8 = smov 32   ;;  %s38_s9 = smov 64   ;;  %vm13_vm1 = vcmask 1048320   ;;  %vm19_vm2 = vcmask 785920   ;;  %vm25_vm3 = vcmask 523520   ;;  %s55_s0 = inlined_call_operand.vmem [shape: f32[4,32], index: 0, kind: input, shape index: {}]   ;;  %s56_s1 = inlined_call_operand.vmem [shape: f32[1,128], index: 1, kind: output, shape index: {}]  }
   0x1   :  { %v4_v0 = vld [vmem:[%s55_s0] sm:$0xf]  ;;  %s36_s0 = smov 96  }
   0x2   :  { %5 = vst [vmem:[#allocation1] sm:$0xf] %v4_v0 }
   0x9   :  { %v10_v1 = vld [vmem:[#allocation1 + $0x3] sm:$0x1]   ;;  %v22_v2 = vld [vmem:[#allocation1 + $0x1] sm:$0x1]   ;;  %v6_v3 = vld [vmem:[#allocation1] sm:$0x1]  }
   0xa   :  { %11 = vrot.lane.b32.xlu0 %v10_v1, %s36_s0  ;;  %23 = vrot.lane.b32.xlu1 %v22_v2, %s37_s8  ;;  %v16_v4 = vld [vmem:[#allocation1 + $0x2] sm:$0x1]   ;;  %8 = vst.msk [vmem:[#allocation0] sm:$0x1] %vm7_vm0, %v6_v3  }
   0xe   :  { %17 = vrot.lane.b32.xlu0 %v16_v4, %s38_s9 }
  0x7c   :  { %v12_v5 = vpop.permute.xlu0 %11   ;;  %v24_v6 = vpop.permute.xlu1 %23  }
  0x7d   :  { %14 = vst.msk [vmem:[#allocation0] sm:$0x1] %vm13_vm1, %v12_v5  }
  0x80   :  { %v18_v7 = vpop.permute.xlu0 %17  }
  0x81   :  { %20 = vst.msk [vmem:[#allocation0] sm:$0x1] %vm19_vm2, %v18_v7  }
  0x82   :  { %26 = vst.msk [vmem:[#allocation0] sm:$0x1] %vm25_vm3, %v24_v6  }
  0x89   :  { %v30_v8 = vld [vmem:[#allocation0] sm:$0x1] }
  0x8a   :  { %32 = vst [vmem:[%s56_s1] sm:$0x1] %v30_v8 }

// kernel: forward.4
= control target key start
LH: loop header
LB: loop body
LE: loop exit
PB: predicated region body
PF: predicated region fallthrough
CT: control target
= control target key end

     0   :  { %s3600_s12 = smov 0   ;;  %s4511_s0 = inlined_call_operand.vmem [shape: bf16[208,128], index: 0, kind: input, shape index: {}]   ;;  %s4512_s1 = inlined_call_operand.vmem [shape: bf16[9,128,256], index: 1, kind: input, shape index: {}]   ;;  %s4513_s2 = inlined_call_operand.vmem [shape: f32[1,128], index: 2, kind: input, shape index: {}]   ;;  %s4514_s3 = inlined_call_operand.vmem [shape: bf16[32,128], index: 3, kind: output, shape index: {}]  }
   0x1 LB: > { %s2806_s13 = sadd.s32 4294967295, %s3577_s12   ;;  %p2810_p0 = scmp.ge.s32.totalorder %s3577_s12, 1  ;;  %s3577_s12 = sphi %s3600_s12, %s13_s12  }
   0x2   : > { %p138_p1 = scmp.lt.s32.totalorder %s3577_s12, 3 }
   0x4   : > { %p139_p2 = pnand %p2810_p0, %p138_p1 }
   0x5   : > { %v3328_v0 = vld [vmem:[%s4512_s1 + $0x84] ss:$8 sps:$4 sm:$0xff] (!%p139_p2)   ;;  %v3579_v2 = vmov (!%p139_p2), 0   ;;  %v3332_v3 = vld [vmem:[%s4512_s1 + $0x80] ss:$8 sps:$4 sm:$0xff] (!%p139_p2)   ;;  %s162_s22 = smul.u32 (!%p139_p2), 13, %s2806_s13 }
   0x6   : > { %142 = sbr.rel (%p139_p2) target bundleno = 494 (0x1ee), region = 32  ;;  %v3330_v1 = vld [vmem:[%s4512_s1 + $0x204] ss:$8 sps:$4 sm:$0xff] (!%p139_p2)   ;;  %401 = vmatprep.mubr.bf16.mxu1 (!%p139_p2), %v3579_v2  ;;  %1314 = vmatprep.mubr.bf16.mxu0 (!%p139_p2), %v3579_v2  ;;  %v3333_v4 = vld [vmem:[%s4512_s1 + $0x200] ss:$8 sps:$4 sm:$0xff] (!%p139_p2)   ;;  %vm644_vm2 = vcmask (!%p139_p2), 1046528  }
   0x7   : > { %369 = vmatprep.subr.bf16.mxu1 (!%p139_p2), %v3328_v0  ;;  %1282 = vmatprep.subr.bf16.mxu0 (!%p139_p2), %v3330_v1  ;;  %v3334_v5 = vld [vmem:[%s4512_s1 + $0x94] ss:$8 sps:$4 sm:$0xff] (!%p139_p2)   ;;  %v3338_v7 = vld [vmem:[%s4512_s1 + $0x90] ss:$8 sps:$4 sm:$0xff] (!%p139_p2)   ;;  %v3340_v9 = vld [vmem:[%s4512_s1 + $0xa4] ss:$8 sps:$4 sm:$0xff] (!%p139_p2)  }
   0x8   : > { %370 = vmatpush1.bf16.msra.mxu1 (!%p139_p2), %v3332_v3  ;;  %1283 = vmatpush1.bf16.msra.mxu0 (!%p139_p2), %v3333_v4  ;;  %v3336_v6 = vld [vmem:[%s4512_s1 + $0x214] ss:$8 sps:$4 sm:$0xff] (!%p139_p2)   ;;  %v3339_v8 = vld [vmem:[%s4512_s1 + $0x210] ss:$8 sps:$4 sm:$0xff] (!%p139_p2)   ;;  %p163_p3 = scmp.lt.s32.totalorder (!%p139_p2), %s162_s22, 25  ;;  %vm1406_vm3 = vcmask (!%p139_p2), 1045504  }
   0x9   : > { %371 = vmatprep.subr.bf16.mxu1 (!%p139_p2), %v3334_v5  ;;  %1284 = vmatprep.subr.bf16.mxu0 (!%p139_p2), %v3336_v6  ;;  %v3342_v10 = vld [vmem:[%s4512_s1 + $0x224] ss:$8 sps:$4 sm:$0xff] (!%p139_p2)   ;;  %v3344_v11 = vld [vmem:[%s4512_s1 + $0xa0] ss:$8 sps:$4 sm:$0xff] (!%p139_p2)   ;;  %v3346_v13 = vld [vmem:[%s4512_s1 + $0xb4] ss:$8 sps:$4 sm:$0xff] (!%p139_p2)  }
   0xa   : > { %v3345_v12 = vld [vmem:[%s4512_s1 + $0x220] ss:$8 sps:$4 sm:$0xff] (!%p139_p2)   ;;  %v3348_v14 = vld [vmem:[%s4512_s1 + $0x234] ss:$8 sps:$4 sm:$0xff] (!%p139_p2)   ;;  %v3350_v15 = vld [vmem:[%s4512_s1 + $0xb0] ss:$8 sps:$4 sm:$0xff] (!%p139_p2)  }
   0xb   : > { %v3351_v16 = vld [vmem:[%s4512_s1 + $0x230] ss:$8 sps:$4 sm:$0xff] (!%p139_p2)   ;;  %v3352_v17 = vld [vmem:[%s4512_s1 + $0xc4] ss:$8 sps:$4 sm:$0xff] (!%p139_p2)   ;;  %v3356_v19 = vld [vmem:[%s4512_s1 + $0xc0] ss:$8 sps:$4 sm:$0xff] (!%p139_p2)  }
   0xc   : > { %372 = vmatpush1.bf16.msra.mxu1 (!%p139_p2), %v3338_v7  ;;  %1285 = vmatpush1.bf16.msra.mxu0 (!%p139_p2), %v3339_v8  ;;  %v3354_v18 = vld [vmem:[%s4512_s1 + $0x244] ss:$8 sps:$4 sm:$0xff] (!%p139_p2)   ;;  %v3357_v20 = vld [vmem:[%s4512_s1 + $0x240] ss:$8 sps:$4 sm:$0xff] (!%p139_p2)   ;;  %v3358_v21 = vld [vmem:[%s4512_s1 + $0xd4] ss:$8 sps:$4 sm:$0xff] (!%p139_p2)  }
   0xd   : > { %373 = vmatprep.subr.bf16.mxu1 %v3340_v9  ;;  %1286 = vmatprep.subr.bf16.mxu0 %v3342_v10  ;;  %s4532_s22 = smov (!%p163_p3, %s162_s22), 25  ;;  %v3360_v22 = vld [vmem:[%s4512_s1 + $0x254] ss:$8 sps:$4 sm:$0xff]   ;;  %v3362_v23 = vld [vmem:[%s4512_s1 + $0xd0] ss:$8 sps:$4 sm:$0xff]   ;;  %vm2145_vm4 = vcmask 1044480  }
   0xe   : > { %s2811_s4 = sshll.u32 %s4532_s22, 2  ;;  %v3363_v24 = vld [vmem:[%s4512_s1 + $0x250] ss:$8 sps:$4 sm:$0xff]   ;;  %v3364_v25 = vld [vmem:[%s4512_s1 + $0xe4] ss:$8 sps:$4 sm:$0xff]   ;;  %s4306_s16 = sshll.u32 %s2806_s13, 1 }
   0xf   : > { %s3681_s11 = scalar_lea.vmem %s4511_s0, %s2811_s4  ;;  %v3366_v26 = vld [vmem:[%s4512_s1 + $0x264] ss:$8 sps:$4 sm:$0xff]   ;;  %vm244_vm0 = vsmask.f32 7424  ;;  %v3368_v29 = vld [vmem:[%s4512_s1 + $0xe0] ss:$8 sps:$4 sm:$0xff]  }
  0x10   : > { %374 = vmatpush1.bf16.msra.mxu1 %v3344_v11  ;;  %1287 = vmatpush1.bf16.msra.mxu0 %v3345_v12  ;;  %v175_v27 = vld [vmem:[%s3681_s11] sm:$0xf]  ;;  %v3697_v28 = vld [vmem:[%s3681_s11 + $0x4] sm:$0xf]  ;;  %v3709_v32 = vld [vmem:[%s3681_s11 + $0x8] sm:$0xff]   ;;  %vm2368_vm6 = vcmask 1041408  }
  0x11   : > { %375 = vmatprep.subr.bf16.mxu1 %v3346_v13  ;;  %1288 = vmatprep.subr.bf16.mxu0 %v3348_v14  ;;  %v3369_v30 = vld [vmem:[%s4512_s1 + $0x260] ss:$8 sps:$4 sm:$0xff]   ;;  %v3706_v31 = vcombine.low %v175_v27, %v3697_v28  ;;  %v3370_v33 = vld [vmem:[%s4512_s1 + $0xf4] ss:$8 sps:$4 sm:$0xff]   ;;  %v1091_v34 = vld [vmem:[%s3681_s11 + $0x4] sm:$0xe] }
  0x12   : > { %v3716_v35 = vld [vmem:[%s3681_s11 + $0x8] sm:$0xf]  ;;  %v253_v38 = vshll.u32 %v3709_v32, 16  ;;  %v3723_v40 = vld [vmem:[%s3681_s11 + $0xc] sm:$0xff]   ;;  %v3372_v41 = vld [vmem:[%s4512_s1 + $0x274] ss:$8 sps:$4 sm:$0xff]  }
  0x13   : > { %v246_v36 = vshrl.u32 %v3706_v31, 16  ;;  %v248_v37 = vshll.u32 %v3706_v31, 16  ;;  %v2954_v39 = vcombine.low %v1091_v34, %v3716_v35  ;;  %vm1147_vm1 = vsmask.f32 6400  ;;  %v3374_v42 = vld [vmem:[%s4512_s1 + $0xf0] ss:$8 sps:$4 sm:$0xff]  }
  0x14   : > { %376 = vmatpush1.bf16.msra.mxu1 %v3350_v15  ;;  %1289 = vmatpush1.bf16.msra.mxu0 %v3351_v16  ;;  %v3375_v43 = vld [vmem:[%s4512_s1 + $0x270] ss:$8 sps:$4 sm:$0xff]   ;;  %v255_v47 = vrot.slane %v253_v38, 1  ;;  %v1157_v48 = vshrl.u32 %v3723_v40, 16  ;;  %v1160_v49 = vshll.u32 %v3723_v40, 16  ;;  %v257_v0 = vshrl.u32 %v3709_v32, 16 }
  0x15   : > { %377 = vmatprep.subr.bf16.mxu1 %v3352_v17  ;;  %1290 = vmatprep.subr.bf16.mxu0 %v3354_v18  ;;  %v250_v44 = vrot.slane %v248_v37, 1  ;;  %v1149_v45 = vshrl.u32 %v2954_v39, 16  ;;  %v1152_v46 = vshll.u32 %v2954_v39, 16  ;;  %v3382_v53 = vld [vmem:[%s4512_s1 + $0x284] ss:$8 sps:$4 sm:$0xff]   ;;  %v3740_v56 = vld [vmem:[%s3681_s11 + $0x10] sm:$0xff]  }
  0x16   : > { %v1159_v54 = vrot.slane %v1157_v48, 1  ;;  %v1162_v55 = vrot.slane %v1160_v49, 2  ;;  %v3380_v58 = vld [vmem:[%s4512_s1 + $0x280] ss:$8 sps:$4 sm:$0xff]   ;;  %v3389_v59 = vld [vmem:[%s4512_s1 + $0x4] ss:$8 sps:$4 sm:$0xff]   ;;  %v259_v15 = vor.u32 %v257_v0, %v255_v47 }
  0x17   : > { %v251_v50 = vor.u32 %v250_v44, %v246_v36  ;;  %v1151_v51 = vrot.slane %v1149_v45, 1  ;;  %v1154_v52 = vrot.slane %v1152_v46, 2  ;;  %v261_v61 = vshll.u32 %v3740_v56, 16  ;;  %v3750_v62 = vld [vmem:[%s3681_s11 + $0x14] sm:$0xff]   ;;  %v3387_v10 = vld [vmem:[%s4512_s1] ss:$8 sps:$4 sm:$0xff]  }
  0x18   : > { %378 = vmatpush1.bf16.msra.mxu1 %v3356_v19  ;;  %1291 = vmatpush1.bf16.msra.mxu0 %v3357_v20  ;;  %v1163_v60 = vor.u32 %v1162_v55, %v1159_v54  ;;  %v646_v1 = vrot.slane %v3709_v32, 1  ;;  %v648_v3 = vrot.slane %v3740_v56, 1  ;;  %v3385_v5 = vld [vmem:[%s4512_s1 + $0x294] ss:$8 sps:$4 sm:$0xff]   ;;  %v1166_v6 = vshrl.u32 %v3750_v62, 16  ;;  %v3820_v45 = vld [vmem:[%s3681_s11 + $0x24] sm:$0xff]  }
  0x19   : > { %379 = vmatprep.subr.bf16.mxu1 %v3358_v21  ;;  %1292 = vmatprep.subr.bf16.mxu0 %v3360_v22  ;;  %v1155_v57 = vor.u32 %v1154_v52, %v1151_v51  ;;  %v256_v63 = vsel %vm244_vm0, %v251_v50, %v255_v47  ;;  %v1169_v7 = vshll.u32 %v3750_v62, 16  ;;  %v3383_v8 = vld [vmem:[%s4512_s1 + $0x290] ss:$8 sps:$4 sm:$0xff]   ;;  %v263_v9 = vrot.slane %v261_v61, 1  ;;  %v3396_v14 = vld [vmem:[%s4512_s1 + $0x14] ss:$8 sps:$4 sm:$0xff]  }
  0x1a   : > { %v3771_v11 = vsel %vm644_vm2, %v646_v1, %v648_v3  ;;  %v1168_v12 = vrot.slane %v1166_v6, 1  ;;  %v3393_v16 = vld [vmem:[%s4512_s1 + $0x2a4] ss:$8 sps:$4 sm:$0xff]   ;;  %v3782_v18 = vld [vmem:[%s3681_s11 + $0x18] sm:$0xff]   ;;  %v265_v20 = vshrl.u32 %v3740_v56, 16  ;;  %v1184_v50 = vshrl.u32 %v3820_v45, 16 }
  0x1b   : > { %v1164_v4 = vsel %vm1147_vm1, %v1155_v57, %v1163_v60  ;;  %v1171_v13 = vrot.slane %v1169_v7, 2  ;;  %v3394_v19 = vld [vmem:[%s4512_s1 + $0x10] ss:$8 sps:$4 sm:$0xff]   ;;  %v269_v21 = vshll.u32 %v3782_v18, 16  ;;  %v3790_v22 = vld [vmem:[%s3681_s11 + $0x1c] sm:$0xff]   ;;  %v650_v27 = vrot.slane %v3782_v18, 1 }
  0x1c   : > { %380 = vmatpush1.bf16.msra.mxu1 %v3362_v23  ;;  %1293 = vmatpush1.bf16.msra.mxu0 %v3363_v24  ;;  %v264_v23 = vsel %vm244_vm0, %v259_v15, %v263_v9  ;;  %v3397_v34 = vld [vmem:[%s4512_s1 + $0x2b0] ss:$8 sps:$4 sm:$0xff]   ;;  %v3403_v37 = vld [vmem:[%s4512_s1 + $0x24] ss:$8 sps:$4 sm:$0xff]   ;;  %v3813_v38 = vld [vmem:[%s3681_s11 + $0x20] sm:$0xf] }
  0x1d   : > { %381 = vmatprep.subr.bf16.mxu1 %v3364_v25  ;;  %1294 = vmatprep.subr.bf16.mxu0 %v3366_v26  ;;  %v1172_v17 = vor.u32 %v1171_v13, %v1168_v12  ;;  %v3391_v25 = vld [vmem:[%s4512_s1 + $0x2a0] ss:$8 sps:$4 sm:$0xff]   ;;  %v3399_v26 = vld [vmem:[%s4512_s1 + $0x2b4] ss:$8 sps:$4 sm:$0xff]   ;;  %v271_v36 = vrot.slane %v269_v21, 1  ;;  %v3816_v39 = vsel %vm644_vm2, %v648_v3, %v650_v27  ;;  %v1187_v51 = vshll.u32 %v3820_v45, 16 }
  0x1e   : > { %v201_v44 = vld [vmem:[%s3681_s11 + $0x24] sm:$0xf]  ;;  %v3407_v46 = vld [vmem:[%s4512_s1 + $0x34] ss:$8 sps:$4 sm:$0xff]   ;;  %v273_v54 = vshrl.u32 %v3782_v18, 16  ;;  %p169_p4 = scmp.lt.s32.totalorder %s4306_s16, 3 }
  0x1f   : > { %v1173_v24 = vsel %vm1147_vm1, %v1163_v60, %v1172_v17  ;;  %v3410_v47 = vld [vmem:[%s4512_s1 + $0x2c4] ss:$8 sps:$4 sm:$0xff]   ;;  %v3830_v48 = vcombine.low %v3813_v38, %v201_v44  ;;  %v3408_v57 = vld [vmem:[%s4512_s1 + $0x2c0] ss:$8 sps:$4 sm:$0xff]   ;;  %v1189_v60 = vrot.slane %v1187_v51, 2  ;;  %vm2380_vm7 = vcmask 1040384  }
  0x20   : > { %382 = vmatpush1.bf16.msra.mxu1 %v3368_v29  ;;  %1295 = vmatpush1.bf16.msra.mxu0 %v3369_v30  ;;  %v3401_v29 = vld [vmem:[%s4512_s1 + $0x20] ss:$8 sps:$4 sm:$0xff]   ;;  %v1175_v30 = vshrl.u32 %v3790_v22, 16  ;;  %v3418_v0 = vld [vmem:[%s4512_s1 + $0x2d4] ss:$8 sps:$4 sm:$0xff]   ;;  %s4534_s16 = smov (!%p169_p4, %s4306_s16), 3 }
  0x21   : > { %383 = vmatprep.subr.bf16.mxu1 %v3370_v33  ;;  %1296 = vmatprep.subr.bf16.mxu0 %v3372_v41  ;;  %v1178_v33 = vshll.u32 %v3790_v22, 16  ;;  %v267_v41 = vor.u32 %v265_v20, %v263_v9  ;;  %v3412_v61 = vld [vmem:[%s4512_s1 + $0x40] ss:$8 sps:$4 sm:$0xff]   ;;  %v3416_v3 = vld [vmem:[%s4512_s1 + $0x2d0] ss:$8 sps:$4 sm:$0xff]   ;;  %v281_v21 = vshrl.u32 %v3830_v48, 16 }
  0x22   : > { %v3858_v7 = vld [vmem:[%s3681_s11 + $0x2c] ss:$0 sps:$4 sm:$0x11]   ;;  %v3421_v9 = vld [vmem:[%s4512_s1 + $0x54] ss:$8 sps:$4 sm:$0xff]   ;;  %s2813_s13 = sshll.u32 %s4534_s16, 2 }
  0x23   : > { %v272_v52 = vsel %vm244_vm0, %v267_v41, %v271_v36  ;;  %v3419_v15 = vld [vmem:[%s4512_s1 + $0x50] ss:$8 sps:$4 sm:$0xff]   ;;  %v3431_v20 = vld [vmem:[%s4512_s1 + $0x2f4] ss:$8 sps:$4 sm:$0xff]   ;;  %vm1882_vm5 = vsmask.f32 5376  ;;  %s4337_s26 = scalar_lea.vmem %s4514_s3, %s2813_s13 }
  0x24   : > { %384 = vmatpush1.bf16.msra.mxu1 %v3374_v42  ;;  %1297 = vmatpush1.bf16.msra.mxu0 %v3375_v43  ;;  %v1177_v42 = vrot.slane %v1175_v30, 1  ;;  %v1180_v43 = vrot.slane %v1178_v33, 2  ;;  %v3441_v44 = vld [vmem:[%s4512_s1 + $0x314] ss:$8 sps:$4 sm:$0xff]   ;;  %vm2381_vm8 = vsmask.f32 256 }
  0x25   : > { %1503 = vmatprep.subr.bf16.mxu0 %v3382_v53  ;;  %540 = vmatprep.subr.bf16.mxu1 %v3389_v59  ;;  %v3405_v53 = vld [vmem:[%s4512_s1 + $0x30] ss:$8 sps:$4 sm:$0xff]   ;;  %v1186_v59 = vrot.slane %v1184_v50, 1  ;;  %v623_v50 = vld [vmem:[%s3681_s11] sm:$0xe]  ;;  %vm2431_vm9 = vcmask 1041409   ;;  %vm4343_vm10 = vmand %vm2380_vm7, %vm2381_vm8 }
  0x26   : > { %v1181_v49 = vor.u32 %v1180_v43, %v1177_v42  ;;  %v1408_v42 = vrot.slane %v3723_v40, 2  ;;  %v3436_v43 = vld [vmem:[%s4512_s1 + $0x300] ss:$8 sps:$4 sm:$0xff]   ;;  %v3450_v40 = vld [vmem:[%s4512_s1 + $0x114] ss:$8 sps:$4 sm:$0xff]   ;;  %v2884_v51 = vcombine.low %v623_v50, %v3697_v28  ;;  %vm2483_vm14 = vcmask 1042434  }
  0x27   : > { %402 = vmatmul.mubr.bf16.vlgmr.msra.gmra.mrb[0].mxu1 %v256_v63  ;;  %1315 = vmatmul.mubr.bf16.vlgmr.msra.gmra.mrb[0].mxu0 %v1164_v4  ;;  %v3414_v63 = vld [vmem:[%s4512_s1 + $0x44] ss:$8 sps:$4 sm:$0xff]   ;;  %v275_v4 = vor.u32 %v273_v54, %v271_v36  ;;  %v1190_v6 = vor.u32 %v1189_v60, %v1186_v59  ;;  %v3445_v54 = vld [vmem:[%s4512_s1 + $0x320] ss:$8 sps:$4 sm:$0xff]   ;;  %v1412_v59 = vrot.slane %v3790_v22, 2 }
  0x28   : > { %1504 = vmatpush1.bf16.msra.mxu0 %v3380_v58  ;;  %411 = vmatprep.mubr.bf16.mxu1 %v3579_v2  ;;  %v1182_v55 = vsel %vm1147_vm1, %v1172_v17, %v1181_v49  ;;  %v277_v58 = vshll.u32 %v3830_v48, 16  ;;  %v1193_v17 = vshll.u32 %v3858_v7, 16  ;;  %v3462_v60 = vld [vmem:[%s4512_s1 + $0x344] ss:$8 sps:$4 sm:$0xff]   ;;  %v3460_v22 = vld [vmem:[%s4512_s1 + $0x340] ss:$8 sps:$4 sm:$0xff]  }
  0x29   : > { %1505 = vmatprep.subr.bf16.mxu0 %v3385_v5  ;;  %1324 = vmatprep.mubr.bf16.mxu0 %v3579_v2  ;;  %v3491_v50 = vld [vmem:[%s4512_s1 + $0x390] ss:$8 sps:$4 sm:$0xff]   ;;  %vm2432_vm11 = vsmask.f32 1280  ;;  %vm2407_vm13 = vsmask.f32 7938 }
  0x2a   : > { %541 = vmatpush1.bf16.msra.mxu1 %v3387_v10  ;;  %v279_v5 = vrot.slane %v277_v58, 1  ;;  %v3424_v10 = vld [vmem:[%s4512_s1 + $0x2e4] ss:$8 sps:$4 sm:$0xff]   ;;  %v3454_v58 = vld [vmem:[%s4512_s1 + $0x120] ss:$8 sps:$4 sm:$0xff]   ;;  %vm4357_vm12 = vmand %vm2431_vm9, %vm2432_vm11 }
  0x2b   : > { %542 = vmatprep.subr.bf16.mxu1 %v3396_v14  ;;  %v1191_v14 = vsel %vm1147_vm1, %v1181_v49, %v1190_v6  ;;  %v1410_v49 = vrot.slane %v3750_v62, 2  ;;  %vm2484_vm15 = vsmask.f32 2304 }
  0x2c   : > { %1506 = vmatpush1.bf16.msra.mxu0 %v3383_v8  ;;  %v652_v8 = vrot.slane %v3830_v48, 1  ;;  %v280_v13 = vsel %vm244_vm0, %v275_v4, %v279_v5  ;;  %v283_v30 = vor.u32 %v281_v21, %v279_v5  ;;  %v3465_v4 = vld [vmem:[%s4512_s1 + $0x144] ss:$8 sps:$4 sm:$0xff]   ;;  %v3468_v5 = vld [vmem:[%s4512_s1 + $0x354] ss:$8 sps:$4 sm:$0xff]  }
  0x2d   : > { %1507 = vmatprep.subr.bf16.mxu0 %v3393_v16  ;;  %v3422_v16 = vld [vmem:[%s4512_s1 + $0x2e0] ss:$8 sps:$4 sm:$0xff]   ;;  %v1411_v62 = vsel %vm1406_vm3, %v1408_v42, %v1410_v49  ;;  %v3469_v21 = vld [vmem:[%s4512_s1 + $0x150] ss:$8 sps:$4 sm:$0xff]   ;;  %vm2459_vm0 = vsmask.f32 7942 }
  0x2e   : > { %543 = vmatpush1.bf16.msra.mxu1 %v3394_v19  ;;  %v3872_v12 = vsel %vm644_vm2, %v650_v27, %v652_v8  ;;  %v3427_v19 = vld [vmem:[%s4512_s1 + $0x64] ss:$8 sps:$4 sm:$0xff]  }
  0x2f   : > { %412 = vmatmul.mubr.bf16.gmra.mrb[4].mxu1 %v264_v23  ;;  %1325 = vmatmul.mubr.bf16.gmra.mrb[4].mxu0 %v1173_v24  ;;  %v3425_v23 = vld [vmem:[%s4512_s1 + $0x60] ss:$8 sps:$4 sm:$0xff]   ;;  %v1195_v24 = vrot.slane %v1193_v17, 2  ;;  %v1385_v27 = vld [vmem:[%s3681_s11 + $0x4] sm:$0xc] }
  0x30   : > { %1508 = vmatpush1.bf16.msra.mxu0 %v3391_v25  ;;  %421 = vmatprep.mubr.bf16.mxu1 %v3579_v2  ;;  %v3429_v25 = vld [vmem:[%s4512_s1 + $0x2f0] ss:$8 sps:$4 sm:$0xff]   ;;  %v2992_v36 = vcombine.low %v1385_v27, %v3716_v35  ;;  %v3474_v17 = vld [vmem:[%s4512_s1 + $0x364] ss:$8 sps:$4 sm:$0xff]   ;;  %v3476_v27 = vld [vmem:[%s4512_s1 + $0x160] ss:$8 sps:$4 sm:$0xff]  }
  0x31   : > { %1334 = vmatprep.mubr.bf16.mxu0 %v3579_v2  ;;  %1509 = vmatprep.subr.bf16.mxu0 %v3399_v26  ;;  %v3434_v26 = vld [vmem:[%s4512_s1 + $0x74] ss:$8 sps:$4 sm:$0xff]   ;;  %v1196_v33 = vsel %vm1147_vm1, %v1190_v6, %v1195_v24  ;;  %v3995_v6 = vld [vmem:[%s3681_s11 + $0x20] sm:$0xff]   ;;  %vm4372_vm1 = vmand %vm2380_vm7, %vm2407_vm13  ;;  %vm2536_vm7 = vsmask.f32 3328 }
  0x32   : > { %544 = vmatprep.subr.bf16.mxu1 %v3403_v37  ;;  %v3444_v37 = vld [vmem:[%s4512_s1 + $0x104] ss:$8 sps:$4 sm:$0xff]   ;;  %v1407_v41 = vrot.slane %v2992_v36, 2 }
  0x33   : > { %545 = vmatpush1.bf16.msra.mxu1 %v3401_v29  ;;  %v3438_v29 = vld [vmem:[%s4512_s1 + $0x304] ss:$8 sps:$4 sm:$0xff]  }
  0x34   : > { %1510 = vmatpush1.bf16.msra.mxu0 %v3397_v34  ;;  %546 = vmatprep.subr.bf16.mxu1 %v3407_v46  ;;  %v3432_v34 = vld [vmem:[%s4512_s1 + $0x70] ss:$8 sps:$4 sm:$0xff]   ;;  %v1409_v35 = vsel %vm1406_vm3, %v1407_v41, %v1408_v42  ;;  %v3442_v46 = vld [vmem:[%s4512_s1 + $0x100] ss:$8 sps:$4 sm:$0xff]   ;;  %v184_v24 = vld [vmem:[%s3681_s11 + $0x24] sm:$0x7] }
  0x35   : > { %1511 = vmatprep.subr.bf16.mxu0 %v3410_v47  ;;  %v3439_v47 = vld [vmem:[%s4512_s1 + $0x310] ss:$8 sps:$4 sm:$0xff]   ;;  %v3490_v36 = vld [vmem:[%s4512_s1 + $0x384] ss:$8 sps:$4 sm:$0xff]  }
  0x37   : > { %422 = vmatmul.mubr.bf16.gmra.mrb[8].mxu1 %v272_v52  ;;  %1335 = vmatmul.mubr.bf16.gmra.mrb[8].mxu0 %v1182_v55  ;;  %v3448_v52 = vld [vmem:[%s4512_s1 + $0x110] ss:$8 sps:$4 sm:$0xff]   ;;  %v3453_v55 = vld [vmem:[%s4512_s1 + $0x334] ss:$8 sps:$4 sm:$0xff]  }
  0x38   : > { %547 = vmatpush1.bf16.msra.mxu1 %v3405_v53  ;;  %1512 = vmatpush1.bf16.msra.mxu0 %v3408_v57  ;;  %v645_v53 = vrot.slane %v2884_v51, 1  ;;  %v3456_v57 = vld [vmem:[%s4512_s1 + $0x124] ss:$8 sps:$4 sm:$0xff]  }
  0x39   : > { %431 = vmatprep.mubr.bf16.mxu1 %v3579_v2  ;;  %1344 = vmatprep.mubr.bf16.mxu0 %v3579_v2  ;;  %v3500_v51 = vld [vmem:[%s4512_s1 + $0x3a4] ss:$8 sps:$4 sm:$0xff]  }
  0x3a   : > { %548 = vmatprep.subr.bf16.mxu1 %v3414_v63  ;;  %1513 = vmatprep.subr.bf16.mxu0 %v3418_v0  ;;  %v3954_v28 = vsel %vm644_vm2, %v645_v53, %v646_v1  ;;  %v3451_v1 = vld [vmem:[%s4512_s1 + $0x330] ss:$8 sps:$4 sm:$0xff]   ;;  %v1413_v63 = vsel %vm1406_vm3, %v1410_v49, %v1412_v59  ;;  %v3503_v49 = vld [vmem:[%s4512_s1 + $0x194] ss:$8 sps:$4 sm:$0xff]   ;;  %v2124_v53 = vld [vmem:[%s3681_s11 + $0x8] sm:$0x8] }
  0x3b   : > { %v3983_v0 = vld [vmem:[%s3681_s11 + $0x10] sm:$0xff]  }
  0x3c   : > { %549 = vmatpush1.bf16.msra.mxu1 %v3412_v61  ;;  %1514 = vmatpush1.bf16.msra.mxu0 %v3416_v3  ;;  %v3457_v61 = vld [vmem:[%s4512_s1 + $0x130] ss:$8 sps:$4 sm:$0xff]  }
  0x3d   : > { %550 = vmatprep.subr.bf16.mxu1 %v3421_v9  ;;  %1515 = vmatprep.subr.bf16.mxu0 %v3424_v10  ;;  %v3986_v3 = vld [vmem:[%s3681_s11 + $0x18] sm:$0xff]   ;;  %v2147_v9 = vrot.slane %v3983_v0, 3 }
  0x3e   : > { %v2149_v10 = vrot.slane %v3986_v3, 3 }
  0x3f   : > { %432 = vmatmul.mubr.bf16.gmra.mrb[12].mxu1 %v280_v13  ;;  %1345 = vmatmul.mubr.bf16.gmra.mrb[12].mxu0 %v1191_v14  ;;  %v3463_v13 = vld [vmem:[%s4512_s1 + $0x140] ss:$8 sps:$4 sm:$0xff]   ;;  %v1414_v14 = vrot.slane %v3820_v45, 2  ;;  %v3471_v45 = vld [vmem:[%s4512_s1 + $0x154] ss:$8 sps:$4 sm:$0xff]  }
  0x40   : > { %551 = vmatpush1.bf16.msra.mxu1 %v3419_v15  ;;  %441 = vmatprep.mubr.bf16.mxu1 %v3579_v2  ;;  %v3466_v15 = vld [vmem:[%s4512_s1 + $0x350] ss:$8 sps:$4 sm:$0xff]  }
  0x41   : > { %1354 = vmatprep.mubr.bf16.mxu0 %v3579_v2  ;;  %1516 = vmatpush1.bf16.msra.mxu0 %v3422_v16  ;;  %v2151_v16 = vrot.slane %v3995_v6, 3 }
  0x42   : > { %552 = vmatprep.subr.bf16.mxu1 %v3427_v19  ;;  %1517 = vmatprep.subr.bf16.mxu0 %v3431_v20  ;;  %v1415_v20 = vsel %vm1406_vm3, %v1412_v59, %v1414_v14  ;;  %v3504_v59 = vld [vmem:[%s4512_s1 + $0x3b0] ss:$8 sps:$4 sm:$0xff]  }
  0x43   : > { %v4024_v19 = vsel %vm2145_vm4, %v2149_v10, %v2151_v16 }
  0x44   : > { %553 = vmatpush1.bf16.msra.mxu1 %v3425_v23  ;;  %v3472_v23 = vld [vmem:[%s4512_s1 + $0x360] ss:$8 sps:$4 sm:$0xff]  }
  0x45   : > { %554 = vmatprep.subr.bf16.mxu1 %v3434_v26  ;;  %1518 = vmatpush1.bf16.msra.mxu0 %v3429_v25  ;;  %v3478_v25 = vld [vmem:[%s4512_s1 + $0x164] ss:$8 sps:$4 sm:$0xff]   ;;  %v3481_v26 = vld [vmem:[%s4512_s1 + $0x374] ss:$8 sps:$4 sm:$0xff]  }
  0x46   : > { %1758 = vmatprep.subr.bf16.mxu0 %v3438_v29  ;;  %v3479_v29 = vld [vmem:[%s4512_s1 + $0x370] ss:$8 sps:$4 sm:$0xff]  }
  0x47   : > { %442 = vmatmul.mubr.bf16.gmra.mrb[16].mxu1 %v283_v30  ;;  %1355 = vmatmul.mubr.bf16.gmra.mrb[16].mxu0 %v1196_v33  ;;  %v1416_v30 = vrot.slane %v3858_v7, 2  ;;  %v3484_v33 = vld [vmem:[%s4512_s1 + $0x174] ss:$8 sps:$4 sm:$0xff]   ;;  %v3482_v7 = vld [vmem:[%s4512_s1 + $0x170] ss:$8 sps:$4 sm:$0xff]  }
  0x48   : > { %555 = vmatpush1.bf16.msra.mxu1 %v3432_v34  ;;  %572 = vmatprep.mubr.bf16.mxu1 %v3579_v2  ;;  %v1607_v34 = vld [vmem:[%s3681_s11 + $0xc] sm:$0xf] }
  0x49   : > { %1535 = vmatprep.mubr.bf16.mxu0 %v3579_v2  ;;  %739 = vmatprep.subr.bf16.mxu1 %v3444_v37  ;;  %v2851_v37 = vcombine.low %v3813_v38, %v184_v24  ;;  %v1417_v41 = vsel %vm1406_vm3, %v1414_v14, %v1416_v30  ;;  %v3532_v24 = vld [vmem:[%s4512_s1 + $0x1e4] ss:$8 sps:$4 sm:$0xff]   ;;  %v3530_v30 = vld [vmem:[%s4512_s1 + $0x1e0] ss:$8 sps:$4 sm:$0xff]  }
  0x4f   : > { %573 = vmatmul.mubr.bf16.vlgmr.msra.gmra.mrb[0].mxu1 %v3706_v31  ;;  %1536 = vmatmul.mubr.bf16.vlgmr.msra.gmra.mrb[0].mxu0 %v1409_v35  ;;  %v3447_v31 = vld [vmem:[%s4512_s1 + $0x324] ss:$8 sps:$4 sm:$0xff]  }
  0x50   : > { %1759 = vmatpush1.bf16.msra.mxu0 %v3436_v43  ;;  %582 = vmatprep.mubr.bf16.mxu1 %v3579_v2  ;;  %v3496_v35 = vld [vmem:[%s4512_s1 + $0x184] ss:$8 sps:$4 sm:$0xff]   ;;  %v1663_v43 = vrot.slane %v3983_v0, 2 }
  0x51   : > { %1760 = vmatprep.subr.bf16.mxu0 %v3441_v44  ;;  %1545 = vmatprep.mubr.bf16.mxu0 %v3579_v2 }
  0x52   : > { %740 = vmatpush1.bf16.msra.mxu1 %v3442_v46  ;;  %v3488_v46 = vld [vmem:[%s4512_s1 + $0x380] ss:$8 sps:$4 sm:$0xff]  }
  0x53   : > { %741 = vmatprep.subr.bf16.mxu1 %v3450_v40  ;;  %v3493_v40 = vld [vmem:[%s4512_s1 + $0x394] ss:$8 sps:$4 sm:$0xff]  }
  0x54   : > { %1761 = vmatpush1.bf16.msra.mxu0 %v3439_v47  ;;  %v3494_v47 = vld [vmem:[%s4512_s1 + $0x180] ss:$8 sps:$4 sm:$0xff]  }
  0x55   : > { %1762 = vmatprep.subr.bf16.mxu0 %v3447_v31  ;;  %v1665_v31 = vrot.slane %v3986_v3, 2 }
  0x56   : > { %742 = vmatpush1.bf16.msra.mxu1 %v3448_v52  ;;  %v3501_v52 = vld [vmem:[%s4512_s1 + $0x190] ss:$8 sps:$4 sm:$0xff]  }
  0x57   : > { %583 = vmatmul.mubr.bf16.gmra.mrb[4].mxu1 %v3709_v32  ;;  %1546 = vmatmul.mubr.bf16.gmra.mrb[4].mxu0 %v1411_v62  ;;  %v3459_v32 = vld [vmem:[%s4512_s1 + $0x134] ss:$8 sps:$4 sm:$0xff]   ;;  %v1666_v62 = vsel %vm1406_vm3, %v1663_v43, %v1665_v31 }
  0x58   : > { %1763 = vmatpush1.bf16.msra.mxu0 %v3445_v54  ;;  %592 = vmatprep.mubr.bf16.mxu1 %v3579_v2  ;;  %v3498_v54 = vld [vmem:[%s4512_s1 + $0x3a0] ss:$8 sps:$4 sm:$0xff]  }
  0x59   : > { %1555 = vmatprep.mubr.bf16.mxu0 %v3579_v2  ;;  %1764 = vmatprep.subr.bf16.mxu0 %v3453_v55  ;;  %v3096_v55 = vcombine.low %v2124_v53, %v1607_v34 }
  0x5a   : > { %743 = vmatprep.subr.bf16.mxu1 %v3456_v57  ;;  %v3509_v57 = vld [vmem:[%s4512_s1 + $0x1a4] ss:$8 sps:$4 sm:$0xff]  }
  0x5b   : > { %744 = vmatpush1.bf16.msra.mxu1 %v3454_v58  ;;  %v2146_v58 = vrot.slane %v3096_v55, 3 }
  0x5c   : > { %1765 = vmatpush1.bf16.msra.mxu0 %v3451_v1  ;;  %745 = vmatprep.subr.bf16.mxu1 %v3459_v32  ;;  %v3507_v1 = vld [vmem:[%s4512_s1 + $0x1a0] ss:$8 sps:$4 sm:$0xff]   ;;  %v1667_v32 = vrot.slane %v3995_v6, 2 }
  0x5d   : > { %1766 = vmatprep.subr.bf16.mxu0 %v3462_v60  ;;  %v3513_v60 = vld [vmem:[%s4512_s1 + $0x1b4] ss:$8 sps:$4 sm:$0xff]  }
  0x5f   : > { %593 = vmatmul.mubr.bf16.gmra.mrb[8].mxu1 %v3740_v56  ;;  %1556 = vmatmul.mubr.bf16.gmra.mrb[8].mxu0 %v1413_v63  ;;  %v4011_v56 = vsel %vm2145_vm4, %v2147_v9, %v2149_v10  ;;  %v3511_v63 = vld [vmem:[%s4512_s1 + $0x1b0] ss:$8 sps:$4 sm:$0xff]   ;;  %v3523_v10 = vld [vmem:[%s4512_s1 + $0x3d4] ss:$8 sps:$4 sm:$0xff]  }
  0x60   : > { %746 = vmatpush1.bf16.msra.mxu1 %v3457_v61  ;;  %1767 = vmatpush1.bf16.msra.mxu0 %v3460_v22  ;;  %v3516_v61 = vld [vmem:[%s4512_s1 + $0x3c4] ss:$8 sps:$4 sm:$0xff]   ;;  %v1668_v22 = vsel %vm1406_vm3, %v1665_v31, %v1667_v32  ;;  %v3542_v31 = vld [vmem:[%s4512_s1 + $0x400] ss:$8 sps:$4 sm:$0xff]  }
  0x61   : > { %602 = vmatprep.mubr.bf16.mxu1 %v3579_v2  ;;  %1565 = vmatprep.mubr.bf16.mxu0 %v3579_v2 }
  0x62   : > { %747 = vmatprep.subr.bf16.mxu1 %v3465_v4  ;;  %1768 = vmatprep.subr.bf16.mxu0 %v3468_v5  ;;  %v3514_v4 = vld [vmem:[%s4512_s1 + $0x3c0] ss:$8 sps:$4 sm:$0xff]  }
  0x63   : > { %v4138_v5 = vld [vmem:[%s3681_s11 + $0x28] sm:$0xff]  }
  0x64   : > { %748 = vmatpush1.bf16.msra.mxu1 %v3463_v13  ;;  %1769 = vmatpush1.bf16.msra.mxu0 %v3466_v15  ;;  %v3517_v13 = vld [vmem:[%s4512_s1 + $0x1c0] ss:$8 sps:$4 sm:$0xff]   ;;  %v1669_v14 = vrot.slane %v4138_v5, 2  ;;  %v3521_v15 = vld [vmem:[%s4512_s1 + $0x3d0] ss:$8 sps:$4 sm:$0xff]  }
  0x65   : > { %749 = vmatprep.subr.bf16.mxu1 %v3471_v45  ;;  %1770 = vmatprep.subr.bf16.mxu0 %v3474_v17  ;;  %v3529_v45 = vld [vmem:[%s4512_s1 + $0x3e4] ss:$8 sps:$4 sm:$0xff]  }
  0x66   : > { %v1670_v17 = vsel %vm1406_vm3, %v1667_v32, %v1669_v14  ;;  %v3549_v32 = vld [vmem:[%s4512_s1 + $0x420] ss:$8 sps:$4 sm:$0xff]  }
  0x67   : > { %603 = vmatmul.mubr.bf16.gmra.mrb[12].mxu1 %v3782_v18  ;;  %1566 = vmatmul.mubr.bf16.gmra.mrb[12].mxu0 %v1415_v20  ;;  %v1606_v18 = vld [vmem:[%s3681_s11 + $0x8] sm:$0xc]  ;;  %v3524_v20 = vld [vmem:[%s4512_s1 + $0x1d0] ss:$8 sps:$4 sm:$0xff]  }
  0x68   : > { %750 = vmatpush1.bf16.msra.mxu1 %v3469_v21  ;;  %612 = vmatprep.mubr.bf16.mxu1 %v3579_v2  ;;  %v4063_v42 = vcombine.low %v1606_v18, %v1607_v34  ;;  %v3533_v21 = vld [vmem:[%s3681_s11 + $0x30] ss:$0 sps:$4 sm:$0x11]   ;;  %v1895_v18 = vshll.u32 %v3983_v0, 16  ;;  %v3539_v34 = vld [vmem:[%s4512_s1 + $0x1f4] ss:$8 sps:$4 sm:$0xff]  }
  0x69   : > { %1575 = vmatprep.mubr.bf16.mxu0 %v3579_v2  ;;  %1771 = vmatpush1.bf16.msra.mxu0 %v3472_v23  ;;  %v3527_v23 = vld [vmem:[%s4512_s1 + $0x3e0] ss:$8 sps:$4 sm:$0xff]  }
  0x6a   : > { %751 = vmatprep.subr.bf16.mxu1 %v3478_v25  ;;  %1772 = vmatprep.subr.bf16.mxu0 %v3481_v26  ;;  %v1662_v38 = vrot.slane %v4063_v42, 2  ;;  %v3536_v25 = vld [vmem:[%s4512_s1 + $0x3f4] ss:$8 sps:$4 sm:$0xff]   ;;  %v1884_v26 = vshrl.u32 %v4063_v42, 16 }
  0x6c   : > { %752 = vmatpush1.bf16.msra.mxu1 %v3476_v27  ;;  %v1664_v44 = vsel %vm1406_vm3, %v1662_v38, %v1663_v43  ;;  %v1887_v27 = vshll.u32 %v4063_v42, 16  ;;  %v3537_v42 = vld [vmem:[%s4512_s1 + $0x1f0] ss:$8 sps:$4 sm:$0xff]   ;;  %v1897_v43 = vrot.slane %v1895_v18, 3  ;;  %v3565_v18 = vld [vmem:[%s4512_s1 + $0x464] ss:$8 sps:$4 sm:$0xff]  }
  0x6d   : > { %753 = vmatprep.subr.bf16.mxu1 %v3484_v33  ;;  %1773 = vmatpush1.bf16.msra.mxu0 %v3479_v29  ;;  %v1892_v29 = vshrl.u32 %v3983_v0, 16  ;;  %v1671_v33 = vrot.slane %v3533_v21, 2  ;;  %v3541_v38 = vld [vmem:[%s3681_s11 + $0xc] sm:$0xff]   ;;  %v3556_v21 = vld [vmem:[%s4512_s1 + $0x440] ss:$8 sps:$4 sm:$0xff]  }
  0x6e   : > { %2021 = vmatprep.subr.bf16.mxu0 %v3490_v36  ;;  %v3544_v36 = vld [vmem:[%s4512_s1 + $0x404] ss:$8 sps:$4 sm:$0xff]  }
  0x6f   : > { %613 = vmatmul.mubr.bf16.gmra.mrb[16].mxu1 %v2851_v37  ;;  %1576 = vmatmul.mubr.bf16.gmra.mrb[16].mxu0 %v1417_v41  ;;  %v1886_v37 = vrot.slane %v1884_v26, 2  ;;  %v1889_v41 = vrot.slane %v1887_v27, 3  ;;  %v1894_v0 = vrot.slane %v1892_v29, 2  ;;  %v3560_v29 = vld [vmem:[%s4512_s1 + $0x450] ss:$8 sps:$4 sm:$0xff]  }
  0x70   : > { %754 = vmatpush1.bf16.msra.mxu1 %v3482_v7  ;;  %771 = vmatprep.mubr.bf16.mxu1 %v3579_v2  ;;  %v1672_v7 = vsel %vm1406_vm3, %v1669_v14, %v1671_v33  ;;  %vm4389_vm3 = vmand %vm2431_vm9, %vm2459_vm0  ;;  %vm2563_vm9 = vsmask.f32 7950 }
  0x71   : > { %1790 = vmatprep.mubr.bf16.mxu0 %v3579_v2  ;;  %988 = vmatprep.subr.bf16.mxu1 %v3496_v35  ;;  %v3540_v35 = vld [vmem:[%s3681_s11 + $0x4] sm:$0xfe]  }
  0x77   : > { %772 = vmatmul.mubr.bf16.vlgmr.msra.gmra.mrb[0].mxu1 %v3954_v28  ;;  %1791 = vmatmul.mubr.bf16.vlgmr.msra.gmra.mrb[0].mxu0 %v1664_v44  ;;  %v3506_v28 = vld [vmem:[%s4512_s1 + $0x3b4] ss:$8 sps:$4 sm:$0xff]   ;;  %v1890_v44 = vor.u32 %v1889_v41, %v1886_v37  ;;  %v3563_v41 = vld [vmem:[%s4512_s1 + $0x460] ss:$8 sps:$4 sm:$0xff]  }
  0x78   : > { %2022 = vmatpush1.bf16.msra.mxu0 %v3488_v46  ;;  %781 = vmatprep.mubr.bf16.mxu1 %v3579_v2  ;;  %v1901_v46 = vshrl.u32 %v3986_v3, 16 }
  0x79   : > { %2023 = vmatprep.subr.bf16.mxu0 %v3493_v40  ;;  %1800 = vmatprep.mubr.bf16.mxu0 %v3579_v2  ;;  %v894_v40 = vrot.slane %v3540_v35, 1 }
  0x7a   : > { %989 = vmatpush1.bf16.msra.mxu1 %v3494_v47  ;;  %v895_v47 = vrot.slane %v3541_v38, 1  ;;  %v2153_v38 = vrot.slane %v4138_v5, 3 }
  0x7b   : > { %990 = vmatprep.subr.bf16.mxu1 %v3503_v49  ;;  %v1898_v49 = vor.u32 %v1897_v43, %v1894_v0  ;;  %v3569_v0 = vld [vmem:[%s4512_s1 + $0x474] ss:$8 sps:$4 sm:$0xff]  }
  0x7c   : > { %2024 = vmatpush1.bf16.msra.mxu0 %v3491_v50  ;;  %v1904_v50 = vshll.u32 %v3986_v3, 16  ;;  %v896_v48 = vsel %vm644_vm2, %v894_v40, %v895_v47  ;;  %v3545_v3 = vld [vmem:[%s4512_s1 + $0x410] ss:$8 sps:$4 sm:$0xff]   ;;  %v2154_v43 = vsel %vm2145_vm4, %v2151_v16, %v2153_v38 }
  0x7d   : > { %2025 = vmatprep.subr.bf16.mxu0 %v3500_v51  ;;  %v3548_v51 = vld [vmem:[%s3681_s11 + $0x14] sm:$0xff]  }
  0x7e   : > { %991 = vmatpush1.bf16.msra.mxu1 %v3501_v52  ;;  %v1903_v52 = vrot.slane %v1901_v46, 2  ;;  %v1906_v53 = vrot.slane %v1904_v50, 3 }
  0x7f   : > { %782 = vmatmul.mubr.bf16.gmra.mrb[4].mxu1 %v3771_v11  ;;  %1801 = vmatmul.mubr.bf16.gmra.mrb[4].mxu0 %v1666_v62  ;;  %v4124_v11 = vsel %vm2145_vm4, %v2146_v58, %v2147_v9  ;;  %v3519_v9 = vld [vmem:[%s4512_s1 + $0x1c4] ss:$8 sps:$4 sm:$0xff]   ;;  %v3547_v62 = vld [vmem:[%s4512_s1 + $0x414] ss:$8 sps:$4 sm:$0xff]  }
  0x80   : > { %2026 = vmatpush1.bf16.msra.mxu0 %v3498_v54  ;;  %791 = vmatprep.mubr.bf16.mxu1 %v3579_v2  ;;  %v897_v54 = vrot.slane %v3548_v51, 1  ;;  %v1907_v55 = vor.u32 %v1906_v53, %v1903_v52  ;;  %v3551_v58 = vld [vmem:[%s4512_s1 + $0x424] ss:$8 sps:$4 sm:$0xff]  }
  0x81   : > { %1810 = vmatprep.mubr.bf16.mxu0 %v3579_v2  ;;  %2027 = vmatprep.subr.bf16.mxu0 %v3506_v28  ;;  %v1910_v28 = vshrl.u32 %v3995_v6, 16 }
  0x82   : > { %992 = vmatprep.subr.bf16.mxu1 %v3509_v57  ;;  %v1913_v57 = vshll.u32 %v3995_v6, 16 }
  0x83   : > { %993 = vmatpush1.bf16.msra.mxu1 %v3507_v1  ;;  %v898_v1 = vsel %vm644_vm2, %v895_v47, %v897_v54 }
  0x84   : > { %2028 = vmatpush1.bf16.msra.mxu0 %v3504_v59  ;;  %994 = vmatprep.subr.bf16.mxu1 %v3513_v60  ;;  %v1908_v59 = vsel %vm1882_vm5, %v1898_v49, %v1907_v55  ;;  %v3555_v60 = vld [vmem:[%s3681_s11 + $0x1c] sm:$0xff]  }
  0x85   : > { %2029 = vmatprep.subr.bf16.mxu0 %v3516_v61  ;;  %v1912_v61 = vrot.slane %v1910_v28, 2 }
  0x87   : > { %792 = vmatmul.mubr.bf16.gmra.mrb[8].mxu1 %v3816_v39  ;;  %1811 = vmatmul.mubr.bf16.gmra.mrb[8].mxu0 %v1668_v22  ;;  %v3526_v39 = vld [vmem:[%s4512_s1 + $0x1d4] ss:$8 sps:$4 sm:$0xff]   ;;  %v1915_v22 = vrot.slane %v1913_v57, 3 }
  0x88   : > { %995 = vmatpush1.bf16.msra.mxu1 %v3511_v63  ;;  %2030 = vmatpush1.bf16.msra.mxu0 %v3514_v4  ;;  %v3554_v63 = vld [vmem:[%s4512_s1 + $0x434] ss:$8 sps:$4 sm:$0xff]   ;;  %v1919_v4 = vshrl.u32 %v4138_v5, 16 }
  0x89   : > { %801 = vmatprep.mubr.bf16.mxu1 %v3579_v2  ;;  %1820 = vmatprep.mubr.bf16.mxu0 %v3579_v2  ;;  %v1916_v14 = vor.u32 %v1915_v22, %v1912_v61 }
  0x8a   : > { %996 = vmatprep.subr.bf16.mxu1 %v3519_v9  ;;  %2031 = vmatprep.subr.bf16.mxu0 %v3523_v10  ;;  %v1922_v9 = vshll.u32 %v4138_v5, 16  ;;  %v3552_v10 = vld [vmem:[%s4512_s1 + $0x430] ss:$8 sps:$4 sm:$0xff]  }
  0x8c   : > { %997 = vmatpush1.bf16.msra.mxu1 %v3517_v13  ;;  %2032 = vmatpush1.bf16.msra.mxu0 %v3521_v15  ;;  %v899_v13 = vrot.slane %v3555_v60, 1  ;;  %v3558_v15 = vld [vmem:[%s4512_s1 + $0x444] ss:$8 sps:$4 sm:$0xff]  }
  0x8d   : > { %998 = vmatprep.subr.bf16.mxu1 %v3526_v39  ;;  %2033 = vmatprep.subr.bf16.mxu0 %v3529_v45  ;;  %v1921_v39 = vrot.slane %v1919_v4, 2  ;;  %v1924_v45 = vrot.slane %v1922_v9, 3 }
  0x8f   : > { %802 = vmatmul.mubr.bf16.gmra.mrb[12].mxu1 %v3872_v12  ;;  %1821 = vmatmul.mubr.bf16.gmra.mrb[12].mxu0 %v1670_v17  ;;  %v3534_v12 = vld [vmem:[%s4512_s1 + $0x3f0] ss:$8 sps:$4 sm:$0xff]   ;;  %v900_v17 = vsel %vm644_vm2, %v897_v54, %v899_v13  ;;  %v1925_v27 = vor.u32 %v1924_v45, %v1921_v39 }
  0x90   : > { %999 = vmatpush1.bf16.msra.mxu1 %v3524_v20  ;;  %811 = vmatprep.mubr.bf16.mxu1 %v3579_v2  ;;  %v1917_v20 = vsel %vm1882_vm5, %v1907_v55, %v1916_v14 }
  0x91   : > { %1830 = vmatprep.mubr.bf16.mxu0 %v3579_v2  ;;  %2034 = vmatpush1.bf16.msra.mxu0 %v3527_v23  ;;  %v3559_v23 = vld [vmem:[%s3681_s11 + $0x24] sm:$0xff]  }
  0x92   : > { %1000 = vmatprep.subr.bf16.mxu1 %v3532_v24  ;;  %2035 = vmatprep.subr.bf16.mxu0 %v3536_v25  ;;  %v3566_v24 = vld [vmem:[%s3681_s11 + $0x30] ss:$0 sps:$4 sm:$0x33]   ;;  %v3562_v25 = vld [vmem:[%s4512_s1 + $0x454] ss:$8 sps:$4 sm:$0xff]   ;;  %v901_v26 = vrot.slane %v3559_v23, 1 }
  0x93   : > { %v1931_v33 = vshll.u32 %v3566_v24, 16 }
  0x94   : > { %1001 = vmatpush1.bf16.msra.mxu1 %v3530_v30  ;;  %v1928_v30 = vshrl.u32 %v3566_v24, 16 }
  0x95   : > { %1002 = vmatprep.subr.bf16.mxu1 %v3539_v34  ;;  %2036 = vmatpush1.bf16.msra.mxu0 %v3534_v12  ;;  %v902_v12 = vsel %vm644_vm2, %v899_v13, %v901_v26  ;;  %v1926_v34 = vsel %vm1882_vm5, %v1916_v14, %v1925_v27  ;;  %v1933_v37 = vrot.slane %v1931_v33, 3  ;;  %vm4379_vm2 = vmand %vm2483_vm14, %vm2484_vm15 }
  0x96   : > { %2242 = vmatprep.subr.bf16.mxu0 %v3544_v36 }
  0x97   : > { %812 = vmatmul.mubr.bf16.gmra.mrb[16].mxu1 %v652_v8  ;;  %1831 = vmatmul.mubr.bf16.gmra.mrb[16].mxu0 %v1672_v7  ;;  %v1899_v8 = vsel %vm1882_vm5, %v1890_v44, %v1898_v49  ;;  %v2155_v44 = vrot.slane %v3566_v24, 3 }
  0x98   : > { %1003 = vmatpush1.bf16.msra.mxu1 %v3537_v42  ;;  %1020 = vmatprep.mubr.bf16.mxu1 %v3579_v2  ;;  %v3567_v42 = vld [vmem:[%s4512_s1 + $0x470] ss:$8 sps:$4 sm:$0xff]  }
  0x99   : > { %2053 = vmatprep.mubr.bf16.mxu0 %v3579_v2  ;;  %3143 = vmatprep.subr.bf16.mxu1 %v3544_v36  ;;  %v1930_v36 = vrot.slane %v1928_v30, 2  ;;  %v2156_v46 = vsel %vm2145_vm4, %v2153_v38, %v2155_v44  ;;  %vm2511_vm4 = vsmask.f32 7946 }
  0x9b   : > { %v1934_v7 = vor.u32 %v1933_v37, %v1930_v36 }
  0x9d   : > { %v1935_v35 = vsel %vm1882_vm5, %v1925_v27, %v1934_v7  ;;  %vm2535_vm5 = vcmask 1043459  }
  0x9e   : > { %vm4440_vm8 = vmand %vm2535_vm5, %vm2536_vm7 }
  0x9f   : > { %1021 = vmatmul.mubr.bf16.vlgmr.msra.gmra.mrb[0].mxu1 %v896_v48  ;;  %2054 = vmatmul.mubr.bf16.vlgmr.msra.gmra.mrb[0].mxu0 %v1899_v8  ;;  %vm4472_vm11 = vmand %vm2535_vm5, %vm2563_vm9 }
  0xa0   : > { %2243 = vmatpush1.bf16.msra.mxu0 %v3542_v31  ;;  %1030 = vmatprep.mubr.bf16.mxu1 %v3579_v2 }
  0xa1   : > { %2244 = vmatprep.subr.bf16.mxu0 %v3547_v62  ;;  %2063 = vmatprep.mubr.bf16.mxu0 %v3579_v2 }
  0xa2   : > { %3151 = vmatpush1.bf16.msra.mxu1 %v3542_v31 }
  0xa3   : > { %3144 = vmatprep.subr.bf16.mxu1 %v3547_v62 }
  0xa4   : > { %2245 = vmatpush1.bf16.msra.mxu0 %v3545_v3 }
  0xa5   : > { %2246 = vmatprep.subr.bf16.mxu0 %v3551_v58 }
  0xa6   : > { %3152 = vmatpush1.bf16.msra.mxu1 %v3545_v3 }
  0xa7   : > { %1031 = vmatmul.mubr.bf16.gmra.mrb[4].mxu1 %v898_v1  ;;  %2064 = vmatmul.mubr.bf16.gmra.mrb[4].mxu0 %v1908_v59 }
  0xa8   : > { %2247 = vmatpush1.bf16.msra.mxu0 %v3549_v32  ;;  %1040 = vmatprep.mubr.bf16.mxu1 %v3579_v2 }
  0xa9   : > { %2073 = vmatprep.mubr.bf16.mxu0 %v3579_v2  ;;  %2248 = vmatprep.subr.bf16.mxu0 %v3554_v63 }
  0xaa   : > { %3145 = vmatprep.subr.bf16.mxu1 %v3551_v58 }
  0xab   : > { %3153 = vmatpush1.bf16.msra.mxu1 %v3549_v32 }
  0xac   : > { %2249 = vmatpush1.bf16.msra.mxu0 %v3552_v10  ;;  %3146 = vmatprep.subr.bf16.mxu1 %v3554_v63 }
  0xad   : > { %2250 = vmatprep.subr.bf16.mxu0 %v3558_v15 }
  0xaf   : > { %1041 = vmatmul.mubr.bf16.gmra.mrb[8].mxu1 %v900_v17  ;;  %2074 = vmatmul.mubr.bf16.gmra.mrb[8].mxu0 %v1917_v20 }
  0xb0   : > { %3154 = vmatpush1.bf16.msra.mxu1 %v3552_v10  ;;  %2251 = vmatpush1.bf16.msra.mxu0 %v3556_v21 }
  0xb1   : > { %1050 = vmatprep.mubr.bf16.mxu1 %v3579_v2  ;;  %2083 = vmatprep.mubr.bf16.mxu0 %v3579_v2 }
  0xb2   : > { %3147 = vmatprep.subr.bf16.mxu1 %v3558_v15  ;;  %2252 = vmatprep.subr.bf16.mxu0 %v3562_v25 }
  0xb4   : > { %3155 = vmatpush1.bf16.msra.mxu1 %v3556_v21  ;;  %2253 = vmatpush1.bf16.msra.mxu0 %v3560_v29 }
  0xb5   : > { %3148 = vmatprep.subr.bf16.mxu1 %v3562_v25  ;;  %2254 = vmatprep.subr.bf16.mxu0 %v3565_v18 }
  0xb7   : > { %1051 = vmatmul.mubr.bf16.gmra.mrb[12].mxu1 %v902_v12  ;;  %2084 = vmatmul.mubr.bf16.gmra.mrb[12].mxu0 %v1926_v34 }
  0xb8   : > { %3156 = vmatpush1.bf16.msra.mxu1 %v3560_v29  ;;  %1060 = vmatprep.mubr.bf16.mxu1 %v3579_v2 }
  0xb9   : > { %2093 = vmatprep.mubr.bf16.mxu0 %v3579_v2  ;;  %2255 = vmatpush1.bf16.msra.mxu0 %v3563_v41 }
  0xba   : > { %3149 = vmatprep.subr.bf16.mxu1 %v3565_v18  ;;  %2256 = vmatprep.subr.bf16.mxu0 %v3569_v0 }
  0xbc   : > { %3157 = vmatpush1.bf16.msra.mxu1 %v3563_v41 }
  0xbd   : > { %3150 = vmatprep.subr.bf16.mxu1 %v3569_v0  ;;  %2257 = vmatpush1.bf16.msra.mxu0 %v3567_v42 }
  0xbf   : > { %1061 = vmatmul.mubr.bf16.gmra.mrb[16].mxu1 %v901_v26  ;;  %2094 = vmatmul.mubr.bf16.gmra.mrb[16].mxu0 %v1935_v35 }
  0xc0   : > { %3158 = vmatpush1.bf16.msra.mxu1 %v3567_v42  ;;  %2274 = vmatprep.mubr.bf16.mxu0 %v3579_v2 }
  0xc1   : > { %2304 = vmatprep.mubr.bf16.mxu1 %v3579_v2 }
  0xc7   : > { %2275 = vmatmul.mubr.bf16.vlgmr.msra.gmra.mrb[0].mxu0 %v4124_v11  ;;  %2305 = vmatmul.mubr.bf16.vlgmr.msra.gmra.mrb[20].mxu1 %v2154_v43 }
  0xc8   : > { %2284 = vmatprep.mubr.bf16.mxu0 %v3579_v2  ;;  %2314 = vmatprep.mubr.bf16.mxu1 %v3579_v2 }
  0xcf   : > { %2285 = vmatmul.mubr.bf16.gmra.mrb[4].mxu0 %v4011_v56  ;;  %2315 = vmatmul.mubr.bf16.gmra.mrb[24].mxu1 %v2156_v46 }
  0xd0   : > { %2294 = vmatprep.mubr.bf16.mxu0 %v3579_v2 }
  0xd7   : > { %2295 = vmatmul.mubr.bf16.gmra.mrb[8].mxu0 %v4024_v19 }
 0x172   : > { %v1022_v6 = vpop.f32.mrb[0].mxu1 }
 0x173   : > { %v1024_v5 = vpop.f32.mrb[1].mxu1 }
 0x174   : > { %v1026_v16 = vpop.f32.mrb[2].mxu1 }
 0x175   : > { %v1028_v40 = vpop.f32.mrb[3].mxu1 }
 0x17a   : > { %v1032_v11 = vpop.f32.mrb[4].mxu1 }
 0x17b   : > { %v1034_v47 = vpop.f32.mrb[5].mxu1 }
 0x17c   : > { %v4290_v49 = vpop.f32.mrb[6].mxu1 }
 0x17d   : > { %v4292_v50 = vpop.f32.mrb[7].mxu1 }
 0x182   : > { %v4294_v48 = vpop.f32.mrb[8].mxu1 }
 0x183   : > { %v4296_v8 = vpop.f32.mrb[9].mxu1 }
 0x184   : > { %v4298_v56 = vpop.f32.mrb[10].mxu1 }
 0x185   : > { %v4300_v31 = vpop.f32.mrb[11].mxu1 }
 0x18a   : > { %v1052_v2 = vpop.f32.mrb[12].mxu1  ;;  %v2085_v19 = vpop.f32.mrb[12].mxu0 }
 0x18b   : > { %v3171_v51 = vadd.f32 %v2085_v19, %v1052_v2  ;;  %v1054_v52 = vpop.f32.mrb[13].mxu1  ;;  %v2087_v53 = vpop.f32.mrb[13].mxu0 }
 0x18c   : > { %v3173_v62 = vadd.f32 %v2087_v53, %v1054_v52  ;;  %v1056_v3 = vpop.f32.mrb[14].mxu1  ;;  %v2089_v54 = vpop.f32.mrb[14].mxu0 }
 0x18d   : > { %v3175_v55 = vadd.f32 %v2089_v54, %v1056_v3  ;;  %v1058_v28 = vpop.f32.mrb[15].mxu1  ;;  %v2091_v57 = vpop.f32.mrb[15].mxu0 }
 0x18e   : > { %v3177_v58 = vadd.f32 %v2091_v57, %v1058_v28 }
 0x192   : > { %v1062_v1 = vpop.f32.mrb[16].mxu1  ;;  %v2095_v59 = vpop.f32.mrb[16].mxu0 }
 0x193   : > { %v3179_v32 = vadd.f32 %v2095_v59, %v1062_v1  ;;  %v1064_v60 = vpop.f32.mrb[17].mxu1  ;;  %v2097_v61 = vpop.f32.mrb[17].mxu0 }
 0x194   : > { %v3181_v22 = vadd.f32 %v2097_v61, %v1064_v60  ;;  %v1066_v63 = vpop.f32.mrb[18].mxu1  ;;  %v2099_v4 = vpop.f32.mrb[18].mxu0 }
 0x195   : > { %v3183_v9 = vadd.f32 %v2099_v4, %v1066_v63  ;;  %v1068_v10 = vpop.f32.mrb[19].mxu1  ;;  %v2101_v13 = vpop.f32.mrb[19].mxu0 }
 0x196   : > { %v3185_v14 = vadd.f32 %v2101_v13, %v1068_v10 }
 0x19a   : > { %v2276_v15 = vpop.f32.mrb[0].mxu0  ;;  %v2306_v39 = vpop.f32.mrb[20].mxu1 }
 0x19b   : > { %v3159_v45 = vadd.f32 %v2276_v15, %v1022_v6  ;;  %v3172_v17 = vadd.f32 %v3171_v51, %v2306_v39  ;;  %v2278_v20 = vpop.f32.mrb[1].mxu0  ;;  %v2308_v21 = vpop.f32.mrb[21].mxu1 }
 0x19c   : > { %v3160_v23 = vadd.f32 %v2278_v20, %v1024_v5  ;;  %v3174_v24 = vadd.f32 %v3173_v62, %v2308_v21  ;;  %v2280_v25 = vpop.f32.mrb[2].mxu0  ;;  %v2310_v26 = vpop.f32.mrb[22].mxu1 }
 0x19d   : > { %v3161_v27 = vadd.f32 %v2280_v25, %v1026_v16  ;;  %v3176_v29 = vadd.f32 %v3175_v55, %v2310_v26  ;;  %v2282_v30 = vpop.f32.mrb[3].mxu0  ;;  %v2312_v33 = vpop.f32.mrb[23].mxu1 }
 0x19e   : > { %v2345_v18 = vmax.f32 %v3159_v45, %v3160_v23  ;;  %v2351_v12 = vmax.f32 %v3172_v17, %v3174_v24  ;;  %v3162_v34 = vadd.f32 %v2282_v30, %v1028_v40  ;;  %v3178_v36 = vadd.f32 %v3177_v58, %v2312_v33 }
 0x1a0   : > { %2355 = vst [vmem:[#allocation2] sm:$0xff] %v2345_v18  ;;  %2361 = vst [vmem:[#allocation2 + $0x30] sm:$0xff] %v2351_v12  ;;  %v2346_v37 = vmax.f32 %v3161_v27, %v3162_v34  ;;  %v2352_v41 = vmax.f32 %v3176_v29, %v3178_v36 }
 0x1a2   : > { %2356 = vst [vmem:[#allocation2 + $0x8] sm:$0xff] %v2346_v37  ;;  %2362 = vst [vmem:[#allocation2 + $0x38] sm:$0xff] %v2352_v41  ;;  %v2286_v0 = vpop.f32.mrb[4].mxu0  ;;  %v2316_v7 = vpop.f32.mrb[24].mxu1 }
 0x1a3   : > { %v3163_v42 = vadd.f32 %v2286_v0, %v1032_v11  ;;  %v3180_v35 = vadd.f32 %v3179_v32, %v2316_v7  ;;  %v2288_v38 = vpop.f32.mrb[5].mxu0  ;;  %v2318_v43 = vpop.f32.mrb[25].mxu1 }
 0x1a4   : > { %v3164_v44 = vadd.f32 %v2288_v38, %v1034_v47  ;;  %v3182_v46 = vadd.f32 %v3181_v22, %v2318_v43  ;;  %v2290_v6 = vpop.f32.mrb[6].mxu0  ;;  %v2320_v5 = vpop.f32.mrb[26].mxu1 }
 0x1a5   : > { %v3165_v16 = vadd.f32 %v2290_v6, %v4290_v49  ;;  %v3184_v40 = vadd.f32 %v3183_v9, %v2320_v5  ;;  %v2292_v2 = vpop.f32.mrb[7].mxu0  ;;  %v2322_v19 = vpop.f32.mrb[27].mxu1 }
 0x1a6   : > { %v2347_v51 = vmax.f32 %v3163_v42, %v3164_v44  ;;  %v2353_v52 = vmax.f32 %v3180_v35, %v3182_v46  ;;  %v3166_v53 = vadd.f32 %v2292_v2, %v4292_v50  ;;  %v3186_v62 = vadd.f32 %v3185_v14, %v2322_v19 }
 0x1a7   : > { %v2365_v3 = vld [vmem:[#allocation2] sm:$0x3]  ;;  %v2386_v54 = vld [vmem:[#allocation2 + $0x2] sm:$0x3]  ;;  %v2412_v28 = vld [vmem:[#allocation2 + $0x4] sm:$0x3] }
 0x1a8   : > { %2357 = vst [vmem:[#allocation2 + $0x10] sm:$0xff] %v2347_v51  ;;  %2363 = vst [vmem:[#allocation2 + $0x40] sm:$0xff] %v2353_v52  ;;  %v2348_v11 = vmax.f32 %v3165_v16, %v3166_v53  ;;  %v2354_v47 = vmax.f32 %v3184_v40, %v3186_v62  ;;  %v2437_v45 = vld [vmem:[#allocation2 + $0x6] sm:$0x3]  ;;  %v2376_v40 = vld [vmem:[%s4513_s2] sm:$0x1] }
 0x1a9   : > { %v2366_v49 = vld [vmem:[#allocation2 + $0xa] sm:$0x3]  ;;  %v2387_v55 = vld [vmem:[#allocation2 + $0xc] sm:$0x3]  ;;  %v2413_v1 = vld [vmem:[#allocation2 + $0xe] sm:$0x3] }
 0x1aa   : > { %v2367_v57 = vmax.f32 %v2365_v3, %v2366_v49  ;;  %v2388_v58 = vmax.f32 %v2386_v54, %v2387_v55  ;;  %2358 = vst [vmem:[#allocation2 + $0x18] sm:$0xff] %v2348_v11  ;;  %2364 = vst [vmem:[#allocation2 + $0x48] sm:$0x3f] %v2354_v47  ;;  %v2414_v50 = vmax.f32 %v2412_v28, %v2413_v1  ;;  %v2296_v59 = vpop.f32.mrb[8].mxu0  ;;  %v2656_v25 = vld [vmem:[#allocation2 + $0x3c] sm:$0x3] }
 0x1ab   : > { %v3167_v61 = vadd.f32 %v2296_v59, %v4294_v48  ;;  %v2298_v22 = vpop.f32.mrb[9].mxu0  ;;  %v2678_v0 = vld [vmem:[#allocation2 + $0x3e] sm:$0x3]  ;;  %v2396_v62 = vld [vmem:[%s4513_s2] sm:$0x1] }
 0x1ac   : > { %v2369_v32 = vsel %vm2368_vm6, %v2367_v57, -inf  ;;  %v2389_v60 = vsel %vm2368_vm6, %v2388_v58, -inf  ;;  %v2415_v9 = vsel %vm2368_vm6, %v2414_v50, -inf  ;;  %v3168_v10 = vadd.f32 %v2298_v22, %v4296_v8  ;;  %v2300_v13 = vpop.f32.mrb[10].mxu0  ;;  %v2422_v3 = vld [vmem:[%s4513_s2] sm:$0x1] }
 0x1ad   : > { %v2370_v63 = vrot.slane %v2369_v32, 4  ;;  %v2390_v4 = vrot.slane %v2389_v60, 4  ;;  %v2416_v14 = vrot.slane %v2415_v9, 4  ;;  %v3169_v15 = vadd.f32 %v2300_v13, %v4298_v56  ;;  %v2302_v39 = vpop.f32.mrb[11].mxu0 }
 0x1ae   : > { %v2349_v23 = vmax.f32 %v3167_v61, %v3168_v10  ;;  %v3170_v48 = vadd.f32 %v2302_v39, %v4300_v31  ;;  %v2383_v61 = vld [vmem:[%s4337_s26] sm:$0x1] }
 0x1af   : > { %v2371_v17 = vmax.f32 %v2369_v32, %v2370_v63  ;;  %v2391_v20 = vmax.f32 %v2389_v60, %v2390_v4  ;;  %v2438_v21 = vld [vmem:[#allocation2 + $0x10] sm:$0x3]  ;;  %v2417_v24 = vmax.f32 %v2415_v9, %v2416_v14  ;;  %v2657_v27 = vld [vmem:[#allocation2 + $0x46] sm:$0x3]  ;;  %v2464_v30 = vld [vmem:[#allocation2 + $0x14] sm:$0x3] }
 0x1b0   : > { %v2439_v26 = vmax.f32 %v2437_v45, %v2438_v21  ;;  %v2658_v33 = vmax.f32 %v2656_v25, %v2657_v27  ;;  %2359 = vst [vmem:[#allocation2 + $0x20] sm:$0xff] %v2349_v23  ;;  %v2350_v18 = vmax.f32 %v3169_v15, %v3170_v48  ;;  %v2703_v55 = vld [vmem:[#allocation2 + $0x40] sm:$0x3]  ;;  %v2675_v4 = vld [vmem:[%s4337_s26 + $0x4] sm:$0x4] }
 0x1b1   : > { %v2372_v8 = vrot.slane %v2371_v17, 2  ;;  %v2392_v29 = vrot.slane %v2391_v20, 2  ;;  %v2465_v56 = vld [vmem:[#allocation2 + $0x1e] sm:$0x3]  ;;  %v2418_v12 = vrot.slane %v2417_v24, 2 }
 0x1b2   : > { %v2440_v34 = vsel %vm2368_vm6, %v2439_v26, -inf  ;;  %v2466_v36 = vmax.f32 %v2464_v30, %v2465_v56  ;;  %v2679_v31 = vld [vmem:[#allocation2 + $0x48] sm:$0x3]  ;;  %v2659_v42 = vsel %vm2368_vm6, %v2658_v33, -inf  ;;  %2360 = vst [vmem:[#allocation2 + $0x28] sm:$0xff] %v2350_v18 }
 0x1b3   : > { %v2373_v37 = vmax.f32 %v2371_v17, %v2372_v8  ;;  %v2393_v41 = vmax.f32 %v2391_v20, %v2392_v29  ;;  %v2441_v7 = vrot.slane %v2440_v34, 4  ;;  %v2419_v35 = vmax.f32 %v2417_v24, %v2418_v12  ;;  %v2704_v51 = vld [vmem:[#allocation2 + $0x4a] sm:$0x3]  ;;  %v2447_v10 = vld [vmem:[%s4513_s2] sm:$0x1] }
 0x1b4   : > { %v2660_v38 = vrot.slane %v2659_v42, 4  ;;  %v2467_v43 = vsel %vm2368_vm6, %v2466_v36, -inf  ;;  %v2680_v44 = vmax.f32 %v2678_v0, %v2679_v31  ;;  %v2705_v50 = vmax.f32 %v2703_v55, %v2704_v51  ;;  %v2474_v23 = vld [vmem:[%s4513_s2] sm:$0x1]  ;;  %v2434_v26 = vld [vmem:[%s4337_s26] sm:$0x2] }
 0x1b5   : > { %v2374_v46 = vrot.slane %v2373_v37, 1  ;;  %v2394_v6 = vrot.slane %v2393_v41, 1  ;;  %v2442_v5 = vmax.f32 %v2440_v34, %v2441_v7  ;;  %v2468_v16 = vrot.slane %v2467_v43, 4  ;;  %v2489_v30 = vld [vmem:[#allocation2 + $0x16] sm:$0x3] }
 0x1b6   : > { %v2420_v2 = vrot.slane %v2419_v35, 1  ;;  %v2661_v19 = vmax.f32 %v2659_v42, %v2660_v38  ;;  %v2681_v28 = vsel %vm2368_vm6, %v2680_v44, -inf  ;;  %v2706_v17 = vsel %vm2368_vm6, %v2705_v50, -inf  ;;  %v2666_v7 = vld [vmem:[%s4513_s2] sm:$0x1] }
 0x1b7   : > { %v2375_v52 = vmax.f32 %v2373_v37, %v2374_v46  ;;  %v2395_v53 = vmax.f32 %v2393_v41, %v2394_v6  ;;  %v2443_v11 = vrot.slane %v2442_v5, 2  ;;  %v2469_v47 = vmax.f32 %v2467_v43, %v2468_v16  ;;  %v2490_v48 = vld [vmem:[#allocation2 + $0x20] sm:$0x3]  ;;  %v2517_v41 = vld [vmem:[#allocation2 + $0x22] sm:$0x3] }
 0x1b8   : > { %v2421_v54 = vmax.f32 %v2419_v35, %v2420_v2  ;;  %v2662_v49 = vrot.slane %v2661_v19, 2  ;;  %v2682_v14 = vrot.slane %v2681_v28, 4  ;;  %v2707_v18 = vrot.slane %v2706_v17, 4  ;;  %v2726_v35 = vld [vmem:[#allocation2 + $0x4c] sm:$0x3] }
 0x1b9   : > { %v2377_v57 = vadd.f32 %v2376_v40, %v2375_v52  ;;  %v2444_v58 = vmax.f32 %v2442_v5, %v2443_v11  ;;  %v2470_v1 = vrot.slane %v2469_v47, 2  ;;  %v2397_v59 = vadd.f32 %v2396_v62, %v2395_v53  ;;  %v2516_v44 = vld [vmem:[#allocation2 + $0x18] sm:$0x3]  ;;  %v2725_v40 = vld [vmem:[#allocation2 + $0x42] sm:$0x3] }
 0x1ba   : > { %v2423_v32 = vadd.f32 %v2422_v3, %v2421_v54  ;;  %v2663_v13 = vmax.f32 %v2661_v19, %v2662_v49  ;;  %v2683_v56 = vmax.f32 %v2681_v28, %v2682_v14  ;;  %v2491_v36 = vmax.f32 %v2489_v30, %v2490_v48  ;;  %v2486_v19 = vld [vmem:[%s4337_s26] sm:$0x4]  ;;  %v2542_v11 = vld [vmem:[#allocation2 + $0x24] sm:$0x3]  ;;  %v2609_v48 = vld [vmem:[#allocation2 + $0x2c] sm:$0x3] }
 0x1bb   : > { %v2378_v60 = vmax.f32 %v2377_v57, 0.0  ;;  %v2445_v22 = vrot.slane %v2444_v58, 1  ;;  %v2471_v63 = vmax.f32 %v2469_v47, %v2470_v1  ;;  %v2398_v20 = vmax.f32 %v2397_v59, 0.0  ;;  %v2568_v47 = vld [vmem:[#allocation2 + $0x28] sm:$0x3] }
 0x1bc   : > { %v2424_v9 = vmax.f32 %v2423_v32, 0.0  ;;  %v2664_v33 = vrot.slane %v2663_v13, 1  ;;  %v2492_v38 = vsel %vm2368_vm6, %v2491_v36, -inf  ;;  %v2684_v46 = vrot.slane %v2683_v56, 2  ;;  %v2541_v59 = vld [vmem:[#allocation2 + $0x1a] sm:$0x3] }
 0x1bd   : > { %v2379_v15 = vpack.c.bf16 %v2378_v60, %v2378_v60  ;;  %v2446_v39 = vmax.f32 %v2444_v58, %v2445_v22  ;;  %v2472_v45 = vrot.slane %v2471_v63, 1  ;;  %v3129_v31 = vpack.c.bf16 %v2398_v20, %v2398_v20  ;;  %v2610_v30 = vld [vmem:[#allocation2 + $0x36] sm:$0x3] }
 0x1be   : > { %v3130_v21 = vpack.c.bf16 %v2424_v9, %v2424_v9  ;;  %v2665_v43 = vmax.f32 %v2663_v13, %v2664_v33  ;;  %v2708_v6 = vmax.f32 %v2706_v17, %v2707_v18  ;;  %v2493_v51 = vrot.slane %v2492_v38, 4 }
 0x1bf   : > { %v2384_v24 = vsel %vm4343_vm10, %v2379_v15, %v2383_v61  ;;  %v2448_v27 = vadd.f32 %v2447_v10, %v2446_v39  ;;  %v2473_v8 = vmax.f32 %v2471_v63, %v2472_v45  ;;  %v2518_v52 = vmax.f32 %v2516_v44, %v2517_v41  ;;  %v2569_v61 = vld [vmem:[#allocation2 + $0x32] sm:$0x3]  ;;  %v2585_v39 = vld [vmem:[#allocation2 + $0x2a] sm:$0x3]  ;;  %v2586_v45 = vld [vmem:[#allocation2 + $0x34] sm:$0x3] }
 0x1c0   : > { %2385 = vst [vmem:[%s4337_s26] sm:$0x1] %v2384_v24  ;;  %v2429_v29 = vrot.slane %v3130_v21, 7  ;;  %v2404_v53 = vshll.u32 %v3129_v31, 16  ;;  %v2727_v3 = vmax.f32 %v2725_v40, %v2726_v35  ;;  %v2494_v28 = vmax.f32 %v2492_v38, %v2493_v51  ;;  %v2499_v31 = vld [vmem:[%s4513_s2] sm:$0x1] }
 0x1c1   : > { %v2449_v12 = vmax.f32 %v2448_v27, 0.0  ;;  %v2475_v34 = vadd.f32 %v2474_v23, %v2473_v8  ;;  %v2519_v57 = vsel %vm2368_vm6, %v2518_v52, -inf  ;;  %v4393_v50 = vadd.f32 %v2666_v7, %v2665_v43  ;;  %v2526_v52 = vld [vmem:[%s4513_s2] sm:$0x1] }
 0x1c2   : > { %v2435_v37 = vsel %vm4357_vm12, %v2429_v29, %v2434_v26  ;;  %v2685_v32 = vmax.f32 %v2683_v56, %v2684_v46  ;;  %v2709_v60 = vrot.slane %v2708_v6, 2  ;;  %v2495_v63 = vrot.slane %v2494_v28, 2  ;;  %v2631_v29 = vld [vmem:[#allocation2 + $0x2e] sm:$0x3] }
 0x1c3   : > { %2436 = vst [vmem:[%s4337_s26] sm:$0x2] %v2435_v37  ;;  %v3131_v0 = vpack.c.bf16 %v2449_v12, %v2449_v12  ;;  %v2476_v42 = vmax.f32 %v2475_v34, 0.0  ;;  %v2520_v9 = vrot.slane %v2519_v57, 4  ;;  %v2543_v10 = vmax.f32 %v2541_v59, %v2542_v11  ;;  %v2632_v34 = vld [vmem:[#allocation2 + $0x38] sm:$0x3] }
 0x1c4   : > { %v2728_v14 = vsel %vm2368_vm6, %v2727_v3, -inf  ;;  %v2570_v15 = vmax.f32 %v2568_v47, %v2569_v61  ;;  %v2496_v20 = vmax.f32 %v2494_v28, %v2495_v63  ;;  %v2668_v24 = vmax.f32 %v4393_v50, 0.0 }
 0x1c5   : > { %v2455_v16 = vshll.u32 %v3131_v0, 16  ;;  %v3132_v2 = vpack.c.bf16 %v2476_v42, %v2476_v42  ;;  %v2521_v21 = vmax.f32 %v2519_v57, %v2520_v9  ;;  %v2544_v23 = vsel %vm2368_vm6, %v2543_v10, -inf }
 0x1c6   : > { %v2686_v26 = vrot.slane %v2685_v32, 1  ;;  %v4406_v27 = vmax.f32 %v2708_v6, %v2709_v60  ;;  %v2545_v8 = vrot.slane %v2544_v23, 4  ;;  %v2497_v33 = vrot.slane %v2496_v20, 1 }
 0x1c7   : > { %v2409_v54 = vld [vmem:[%s4337_s26] sm:$0x1]  ;;  %v2457_v49 = vrot.slane %v2455_v16, 7  ;;  %v2481_v55 = vrot.slane %v3132_v2, 6  ;;  %v2522_v56 = vrot.slane %v2521_v21, 2  ;;  %v2571_v18 = vsel %vm2368_vm6, %v2570_v15, -inf }
 0x1c8   : > { %v2410_v58 = vsel %vm4372_vm1, %v2404_v53, %v2409_v54  ;;  %v2587_v12 = vmax.f32 %v2585_v39, %v2586_v45  ;;  %v2729_v36 = vrot.slane %v2728_v14, 4  ;;  %v2546_v37 = vmax.f32 %v2544_v23, %v2545_v8 }
 0x1c9   : > { %2411 = vst [vmem:[%s4337_s26] sm:$0x1] %v2410_v58  ;;  %v2487_v22 = vsel %vm4379_vm2, %v2481_v55, %v2486_v19  ;;  %v2572_v41 = vrot.slane %v2571_v18, 4  ;;  %v2611_v0 = vmax.f32 %v2609_v48, %v2610_v30  ;;  %v2498_v7 = vmax.f32 %v2496_v20, %v2497_v33 }
 0x1ca   : > { %v2461_v13 = vld [vmem:[%s4337_s26] sm:$0x2]  ;;  %2488 = vst [vmem:[%s4337_s26] sm:$0x4] %v2487_v22  ;;  %v2523_v42 = vmax.f32 %v2521_v21, %v2522_v56  ;;  %v2588_v35 = vsel %vm2368_vm6, %v2587_v12, -inf  ;;  %v2633_v38 = vmax.f32 %v2631_v29, %v2632_v34  ;;  %v2687_v43 = vmax.f32 %v2685_v32, %v2686_v26  ;;  %v2688_v32 = vld [vmem:[%s4513_s2] sm:$0x1] }
 0x1cb   : > { %v2462_v17 = vsel %vm4389_vm3, %v2457_v49, %v2461_v13  ;;  %v2547_v44 = vrot.slane %v2546_v37, 2  ;;  %v2573_v46 = vmax.f32 %v2571_v18, %v2572_v41  ;;  %v2589_v6 = vrot.slane %v2588_v35, 4  ;;  %v2551_v22 = vld [vmem:[%s4513_s2] sm:$0x1] }
 0x1cc   : > { %2463 = vst [vmem:[%s4337_s26] sm:$0x2] %v2462_v17  ;;  %v2500_v16 = vadd.f32 %v2499_v31, %v2498_v7  ;;  %v2524_v40 = vrot.slane %v2523_v42, 1  ;;  %v2612_v2 = vsel %vm2368_vm6, %v2611_v0, -inf  ;;  %v2634_v19 = vsel %vm2368_vm6, %v2633_v38, -inf  ;;  %v2578_v17 = vld [vmem:[%s4513_s2] sm:$0x1]  ;;  %vm4430_vm6 = vmand %vm2483_vm14, %vm2511_vm4 }
 0x1cd   : > { %v2730_v51 = vmax.f32 %v2728_v14, %v2729_v36  ;;  %v2548_v53 = vmax.f32 %v2546_v37, %v2547_v44  ;;  %v2574_v3 = vrot.slane %v2573_v46, 2  ;;  %v2590_v11 = vmax.f32 %v2588_v35, %v2589_v6  ;;  %v2595_v18 = vld [vmem:[%s4513_s2] sm:$0x1]  ;;  %v2538_v37 = vld [vmem:[%s4337_s26] sm:$0x8] }
 0x1ce   : > { %v2501_v47 = vmax.f32 %v2500_v16, 0.0  ;;  %v2525_v54 = vmax.f32 %v2523_v42, %v2524_v40  ;;  %v2613_v49 = vrot.slane %v2612_v2, 4  ;;  %v2635_v55 = vrot.slane %v2634_v19, 4  ;;  %v2619_v16 = vld [vmem:[%s4513_s2] sm:$0x1] }
 0x1cf   : > { %v2711_v28 = vrot.slane %v4406_v27, 1  ;;  %v2549_v57 = vrot.slane %v2548_v53, 1  ;;  %v2575_v58 = vmax.f32 %v2573_v46, %v2574_v3  ;;  %v2591_v59 = vrot.slane %v2590_v11, 2  ;;  %v2641_v40 = vld [vmem:[%s4513_s2] sm:$0x1] }
 0x1d0   : > { %v3133_v60 = vpack.c.bf16 %v2501_v47, %v2501_v47  ;;  %v2527_v61 = vadd.f32 %v2526_v52, %v2525_v54  ;;  %v2614_v63 = vmax.f32 %v2612_v2, %v2613_v49  ;;  %v2636_v9 = vmax.f32 %v2634_v19, %v2635_v55 }
 0x1d1   : > { %v2731_v10 = vrot.slane %v2730_v51, 2  ;;  %v2550_v13 = vmax.f32 %v2548_v53, %v2549_v57  ;;  %v2576_v14 = vrot.slane %v2575_v58, 1  ;;  %v2592_v15 = vmax.f32 %v2590_v11, %v2591_v59  ;;  %v2513_v26 = vld [vmem:[%s4337_s26] sm:$0x4]  ;;  %v2713_v11 = vld [vmem:[%s4513_s2] sm:$0x1] }
 0x1d2   : > { %v2507_v39 = vshll.u32 %v3133_v60, 16  ;;  %v2528_v45 = vmax.f32 %v2527_v61, 0.0  ;;  %v2615_v20 = vrot.slane %v2614_v63, 2  ;;  %v2637_v21 = vrot.slane %v2636_v9, 2 }
 0x1d3   : > { %v2689_v23 = vadd.f32 %v2688_v32, %v2687_v43  ;;  %v2552_v8 = vadd.f32 %v2551_v22, %v2550_v13  ;;  %v2577_v29 = vmax.f32 %v2575_v58, %v2576_v14  ;;  %v2593_v30 = vrot.slane %v2592_v15, 1  ;;  %v2735_v22 = vld [vmem:[%s4513_s2] sm:$0x1] }
 0x1d4   : > { %v2509_v33 = vrot.slane %v2507_v39, 6  ;;  %v3134_v56 = vpack.c.bf16 %v2528_v45, %v2528_v45  ;;  %v2616_v12 = vmax.f32 %v2614_v63, %v2615_v20  ;;  %v2638_v34 = vmax.f32 %v2636_v9, %v2637_v21 }
 0x1d5   : > { %v2732_v36 = vmax.f32 %v2730_v51, %v2731_v10  ;;  %v2553_v41 = vmax.f32 %v2552_v8, 0.0  ;;  %v2579_v0 = vadd.f32 %v2578_v17, %v2577_v29  ;;  %v2594_v7 = vmax.f32 %v2592_v15, %v2593_v30  ;;  %v2582_v51 = vld [vmem:[%s4337_s26 + $0x4] sm:$0x1]  ;;  %v2628_v15 = vld [vmem:[%s4337_s26 + $0x4] sm:$0x2] }
 0x1d6   : > { %v2514_v42 = vsel %vm4430_vm6, %v2509_v33, %v2513_v26  ;;  %v2533_v35 = vrot.slane %v3134_v56, 5  ;;  %v2617_v38 = vrot.slane %v2616_v12, 1  ;;  %v2639_v43 = vrot.slane %v2638_v34, 1 }
 0x1d7   : > { %2515 = vst [vmem:[%s4337_s26] sm:$0x4] %v2514_v42  ;;  %v3135_v44 = vpack.c.bf16 %v2553_v41, %v2553_v41  ;;  %v2580_v46 = vmax.f32 %v2579_v0, 0.0  ;;  %v2596_v6 = vadd.f32 %v2595_v18, %v2594_v7  ;;  %v2712_v2 = vmax.f32 %v4406_v27, %v2711_v28  ;;  %v2722_v41 = vld [vmem:[%s4337_s26 + $0x4] sm:$0x8] }
 0x1d8   : > { %v2539_v19 = vsel %vm4440_vm8, %v2533_v35, %v2538_v37  ;;  %v2618_v52 = vmax.f32 %v2616_v12, %v2617_v38  ;;  %v2640_v53 = vmax.f32 %v2638_v34, %v2639_v43  ;;  %v3139_v3 = vpack.c.bf16 %v2668_v24, %v2668_v24 }
 0x1d9   : > { %v2733_v47 = vrot.slane %v2732_v36, 1  ;;  %2540 = vst [vmem:[%s4337_s26] sm:$0x8] %v2539_v19  ;;  %v2581_v54 = vpack.c.bf16 %v2580_v46, %v2580_v46  ;;  %v2690_v49 = vmax.f32 %v2689_v23, 0.0  ;;  %v2597_v27 = vmax.f32 %v2596_v6, 0.0 }
 0x1da   : > { %v2620_v55 = vadd.f32 %v2619_v16, %v2618_v52  ;;  %v2642_v28 = vadd.f32 %v2641_v40, %v2640_v53  ;;  %v2559_v57 = vshll.u32 %v3135_v44, 16  ;;  %v2714_v58 = vadd.f32 %v2713_v11, %v2712_v2 }
 0x1db   : > { %v2583_v50 = vsel %vm4343_vm10, %v2581_v54, %v2582_v51  ;;  %v2673_v59 = vrot.slane %v3139_v3, 6  ;;  %v2734_v32 = vmax.f32 %v2732_v36, %v2733_v47  ;;  %v3140_v61 = vpack.c.bf16 %v2690_v49, %v2690_v49 }
 0x1dc   : > { %2584 = vst [vmem:[%s4337_s26 + $0x4] sm:$0x1] %v2583_v50  ;;  %v2621_v24 = vmax.f32 %v2620_v55, 0.0  ;;  %v2643_v60 = vmax.f32 %v2642_v28, 0.0  ;;  %v3136_v9 = vpack.c.bf16 %v2597_v27, %v2597_v27  ;;  %v2561_v13 = vrot.slane %v2559_v57, 5 }
 0x1dd   : > { %v2676_v14 = vsel %vm4379_vm2, %v2673_v59, %v2675_v4  ;;  %v2715_v39 = vmax.f32 %v2714_v58, 0.0  ;;  %v2736_v20 = vadd.f32 %v2735_v22, %v2734_v32  ;;  %v2696_v26 = vshll.u32 %v3140_v61, 16 }
 0x1de   : > { %v3137_v10 = vpack.c.bf16 %v2621_v24, %v2621_v24  ;;  %2677 = vst [vmem:[%s4337_s26 + $0x4] sm:$0x4] %v2676_v14  ;;  %v3138_v23 = vpack.c.bf16 %v2643_v60, %v2643_v60  ;;  %v2603_v8 = vshll.u32 %v3136_v9, 16 }
 0x1df   : > { %v3141_v30 = vpack.c.bf16 %v2715_v39, %v2715_v39  ;;  %v2737_v56 = vmax.f32 %v2736_v20, 0.0  ;;  %v2698_v12 = vrot.slane %v2696_v26, 6 }
 0x1e0   : > { %v2565_v45 = vld [vmem:[%s4337_s26] sm:$0x8]  ;;  %v2626_v17 = vrot.slane %v3137_v10, 7  ;;  %v2649_v18 = vshll.u32 %v3138_v23, 16 }
 0x1e1   : > { %v2566_v21 = vsel %vm4472_vm11, %v2561_v13, %v2565_v45  ;;  %v2720_v36 = vrot.slane %v3141_v30, 5  ;;  %v3142_v37 = vpack.c.bf16 %v2737_v56, %v2737_v56 }
 0x1e2   : > { %2567 = vst [vmem:[%s4337_s26] sm:$0x8] %v2566_v21  ;;  %v2629_v62 = vsel %vm4357_vm12, %v2626_v17, %v2628_v15  ;;  %v2651_v0 = vrot.slane %v2649_v18, 7 }
 0x1e3   : > { %v2606_v29 = vld [vmem:[%s4337_s26 + $0x4] sm:$0x1]  ;;  %2630 = vst [vmem:[%s4337_s26 + $0x4] sm:$0x2] %v2629_v62  ;;  %v2723_v5 = vsel %vm4440_vm8, %v2720_v36, %v2722_v41  ;;  %v2743_v35 = vshll.u32 %v3142_v37, 16 }
 0x1e4   : > { %v2607_v33 = vsel %vm4372_vm1, %v2603_v8, %v2606_v29  ;;  %2724 = vst [vmem:[%s4337_s26 + $0x4] sm:$0x8] %v2723_v5 }
 0x1e5   : > { %2608 = vst [vmem:[%s4337_s26 + $0x4] sm:$0x1] %v2607_v33  ;;  %v2700_v34 = vld [vmem:[%s4337_s26 + $0x4] sm:$0x4]  ;;  %v2745_v38 = vrot.slane %v2743_v35, 5 }
 0x1e6   : > { %v2701_v25 = vsel %vm4430_vm6, %v2698_v12, %v2700_v34 }
 0x1e7   : > { %2702 = vst [vmem:[%s4337_s26 + $0x4] sm:$0x4] %v2701_v25 }
 0x1ea   : > { %v2653_v7 = vld [vmem:[%s4337_s26 + $0x4] sm:$0x2] }
 0x1eb   : > { %v2654_v42 = vsel %vm4389_vm3, %v2651_v0, %v2653_v7  ;;  %v2747_v43 = vld [vmem:[%s4337_s26 + $0x4] sm:$0x8] }
 0x1ec   : > { %2655 = vst [vmem:[%s4337_s26 + $0x4] sm:$0x2] %v2654_v42  ;;  %v2748_v48 = vsel %vm4472_vm11, %v2745_v38, %v2747_v43 }
 0x1ed   : > { %2749 = vst [vmem:[%s4337_s26 + $0x4] sm:$0x8] %v2748_v48 }
 0x1ee PF: > { %s13_s12 = sadd.s32 1, %s3577_s12  }
 0x1ef   : > { %p10_p5 = scmp.ge.s32.totalorder %s13_s12, 4  }
 0x1f1   :  { %12 = sbr.rel (!%p10_p5) target bundleno = 1 (0x1), region = 70 }

// kernel: tile.49
= control target key start
LH: loop header
LB: loop body
LE: loop exit
PB: predicated region body
PF: predicated region fallthrough
CT: control target
= control target key end

     0   :  { %s22_s0 = inlined_call_operand.vmem [shape: f32[64], index: 0, kind: input, shape index: {}]   ;;  %s23_s1 = inlined_call_operand.vmem [shape: f32[2,64], index: 1, kind: output, shape index: {}]  }
   0x1   :  { %v4_v0 = vld [vmem:[%s22_s0] ss:$0 sm:$0xff] }
   0x2   :  { %5 = vst [vmem:[%s23_s1] sm:$0x3] %v4_v0 }

// kernel: tile.50
= control target key start
LH: loop header
LB: loop body
LE: loop exit
PB: predicated region body
PF: predicated region fallthrough
CT: control target
= control target key end

     0   :  { %vm7_vm0 = vcmask 523264   ;;  %vm13_vm1 = vcmask 1048064   ;;  %s39_s0 = inlined_call_operand.vmem [shape: f32[2,64], index: 0, kind: input, shape index: {}]   ;;  %s40_s1 = inlined_call_operand.vmem [shape: f32[1,128], index: 1, kind: output, shape index: {}]  }
   0x1   :  { %v4_v0 = vld [vmem:[%s39_s0] sm:$0x3]  ;;  %s22_s0 = smov 64  }
   0x2   :  { %5 = vst [vmem:[#allocation1] sm:$0x3] %v4_v0 }
   0x9   :  { %v10_v1 = vld [vmem:[#allocation1 + $0x1] sm:$0x1]   ;;  %v6_v2 = vld [vmem:[#allocation1] sm:$0x1]  }
   0xa   :  { %11 = vrot.lane.b32.xlu0 %v10_v1, %s22_s0  ;;  %8 = vst.msk [vmem:[#allocation0] sm:$0x1] %vm7_vm0, %v6_v2  }
  0x7c   :  { %v12_v3 = vpop.permute.xlu0 %11  }
  0x7d   :  { %14 = vst.msk [vmem:[#allocation0] sm:$0x1] %vm13_vm1, %v12_v3  }
  0x84   :  { %v18_v4 = vld [vmem:[#allocation0] sm:$0x1] }
  0x85   :  { %20 = vst [vmem:[%s40_s1] sm:$0x1] %v18_v4 }

// kernel: forward.5
= control target key start
LH: loop header
LB: loop body
LE: loop exit
PB: predicated region body
PF: predicated region fallthrough
CT: control target
= control target key end

     0   :  { %v8014_v2 = vmov 0   ;;  %vm82_vm0 = vsmask.f32 7424  ;;  %vm388_vm1 = vcmask 1046528   ;;  %vm562_vm2 = vcmask 1044480   ;;  %s9375_s0 = inlined_call_operand.vmem [shape: bf16[80,128], index: 0, kind: input, shape index: {}]   ;;  %s9376_s1 = inlined_call_operand.vmem [shape: bf16[9,128,256], index: 1, kind: input, shape index: {}]   ;;  %s9377_s2 = inlined_call_operand.vmem [shape: f32[1,128], index: 2, kind: input, shape index: {}]   ;;  %s9378_s3 = inlined_call_operand.vmem [shape: bf16[9,128,256], index: 3, kind: input, shape index: {}]   ;;  %s9379_s4 = inlined_call_operand.vmem [shape: f32[1,128], index: 4, kind: input, shape index: {}]   ;;  %s9380_s5 = inlined_call_operand.vmem [shape: bf16[128,128], index: 5, kind: input, shape index: {}]   ;;  %s9381_s6 = inlined_call_operand.vmem [shape: f32[1,128], index: 6, kind: input, shape index: {}]   ;;  %s9382_s7 = inlined_call_operand.vmem [shape: bf16[128,34], index: 7, kind: input, shape index: {}]   ;;  %s9383_s8 = inlined_call_operand.vmem [shape: f32[1,34], index: 8, kind: input, shape index: {}]   ;;  %s9384_s9 = inlined_call_operand.hbm [shape: f32[2,34], index: 9, kind: output, shape index: {}]  }
   0x1   :  { %v7515_v0 = vld [vmem:[%s9376_s1 + $0x84] ss:$8 sps:$4 sm:$0xff]   ;;  %v7517_v1 = vld [vmem:[%s9376_s1 + $0x80] ss:$8 sps:$4 sm:$0xff]   ;;  %212 = vmatprep.mubr.bf16.mxu0 %v8014_v2  ;;  %34 = vst [vmem:[#allocation2] sm:$0xff] %v8014_v2  ;;  %35 = vst [vmem:[#allocation2 + $0x8] sm:$0xff] %v8014_v2  ;;  %1831 = vmatprep.mubr.bf16.mxu1 %v8014_v2 }
   0x2   :  { %180 = vmatprep.subr.bf16.mxu0 %v7515_v0  ;;  %1799 = vmatprep.subr.bf16.mxu1 %v7515_v0  ;;  %v7518_v3 = vld [vmem:[%s9376_s1 + $0x94] ss:$8 sps:$4 sm:$0xff]   ;;  %v7520_v4 = vld [vmem:[%s9376_s1 + $0x90] ss:$8 sps:$4 sm:$0xff]   ;;  %v7521_v5 = vld [vmem:[%s9376_s1 + $0xa4] ss:$8 sps:$4 sm:$0xff]  }
   0x3   :  { %181 = vmatpush1.bf16.msra.mxu0 %v7517_v1  ;;  %1800 = vmatpush1.bf16.msra.mxu1 %v7517_v1  ;;  %v7523_v6 = vld [vmem:[%s9376_s1 + $0xa0] ss:$8 sps:$4 sm:$0xff]   ;;  %v7524_v7 = vld [vmem:[%s9376_s1 + $0xb4] ss:$8 sps:$4 sm:$0xff]   ;;  %v7526_v8 = vld [vmem:[%s9376_s1 + $0xb0] ss:$8 sps:$4 sm:$0xff]  }
   0x4   :  { %182 = vmatprep.subr.bf16.mxu0 %v7518_v3  ;;  %1801 = vmatprep.subr.bf16.mxu1 %v7518_v3  ;;  %v7527_v9 = vld [vmem:[%s9376_s1 + $0xc4] ss:$8 sps:$4 sm:$0xff]   ;;  %v37_v10 = vld [vmem:[%s9375_s0] sm:$0xf]  ;;  %v1658_v12 = vld [vmem:[%s9375_s0 + $0x14] sm:$0xf] }
   0x5   :  { %v8105_v11 = vld [vmem:[%s9375_s0 + $0x4] sm:$0xf]  ;;  %v8113_v13 = vld [vmem:[%s9375_s0 + $0x18] sm:$0xf]  ;;  %v7529_v14 = vld [vmem:[%s9376_s1 + $0xc0] ss:$8 sps:$4 sm:$0xff]  }
   0x6   :  { %v8119_v15 = vcombine.low %v37_v10, %v8105_v11  ;;  %v8122_v16 = vcombine.low %v1658_v12, %v8113_v13  ;;  %v7530_v17 = vld [vmem:[%s9376_s1 + $0xd4] ss:$8 sps:$4 sm:$0xff]   ;;  %v7532_v18 = vld [vmem:[%s9376_s1 + $0xd0] ss:$8 sps:$4 sm:$0xff]   ;;  %v8133_v19 = vld [vmem:[%s9375_s0 + $0x8] ss:$0 sps:$4 sm:$0xff]  }
   0x7   :  { %183 = vmatpush1.bf16.msra.mxu0 %v7520_v4  ;;  %1802 = vmatpush1.bf16.msra.mxu1 %v7520_v4  ;;  %v8139_v21 = vld [vmem:[%s9375_s0 + $0x1c] ss:$0 sps:$4 sm:$0xff]   ;;  %v7533_v23 = vld [vmem:[%s9376_s1 + $0xe4] ss:$8 sps:$4 sm:$0xff]   ;;  %v7535_v24 = vld [vmem:[%s9376_s1 + $0xe0] ss:$8 sps:$4 sm:$0xff]  }
   0x8   :  { %184 = vmatprep.subr.bf16.mxu0 %v7521_v5  ;;  %1803 = vmatprep.subr.bf16.mxu1 %v7521_v5  ;;  %v86_v20 = vshll.u32 %v8119_v15, 16  ;;  %v1705_v22 = vshll.u32 %v8122_v16, 16  ;;  %v84_v25 = vshrl.u32 %v8119_v15, 16  ;;  %v91_v26 = vshll.u32 %v8133_v19, 16  ;;  %v7536_v31 = vld [vmem:[%s9376_s1 + $0xf4] ss:$8 sps:$4 sm:$0xff]  }
   0x9   :  { %v1703_v28 = vshrl.u32 %v8122_v16, 16  ;;  %v1710_v30 = vshll.u32 %v8139_v21, 16  ;;  %v7538_v32 = vld [vmem:[%s9376_s1 + $0xf0] ss:$8 sps:$4 sm:$0xff]   ;;  %v7541_v37 = vld [vmem:[%s9376_s1 + $0x4] ss:$8 sps:$4 sm:$0xff]  }
   0xa   :  { %v88_v27 = vrot.slane %v86_v20, 1  ;;  %v1707_v29 = vrot.slane %v1705_v22, 1  ;;  %v93_v34 = vrot.slane %v91_v26, 1  ;;  %v7539_v38 = vld [vmem:[%s9376_s1] ss:$8 sps:$4 sm:$0xff]   ;;  %v95_v42 = vshrl.u32 %v8133_v19, 16 }
   0xb   :  { %185 = vmatpush1.bf16.msra.mxu0 %v7523_v6  ;;  %1804 = vmatpush1.bf16.msra.mxu1 %v7523_v6  ;;  %v1712_v36 = vrot.slane %v1710_v30, 1  ;;  %v7548_v41 = vld [vmem:[%s9376_s1 + $0x14] ss:$8 sps:$4 sm:$0xff]   ;;  %v1714_v43 = vshrl.u32 %v8139_v21, 16  ;;  %v7546_v44 = vld [vmem:[%s9376_s1 + $0x10] ss:$8 sps:$4 sm:$0xff]  }
   0xc   :  { %186 = vmatprep.subr.bf16.mxu0 %v7524_v7  ;;  %1805 = vmatprep.subr.bf16.mxu1 %v7524_v7  ;;  %v89_v33 = vor.u32 %v88_v27, %v84_v25  ;;  %v1708_v35 = vor.u32 %v1707_v29, %v1703_v28  ;;  %v7551_v45 = vld [vmem:[%s9376_s1 + $0x24] ss:$8 sps:$4 sm:$0xff]   ;;  %v97_v46 = vor.u32 %v95_v42, %v93_v34  ;;  %v367_v48 = vld [vmem:[%s9375_s0] sm:$0xe]  ;;  %v1986_v49 = vld [vmem:[%s9375_s0 + $0x14] sm:$0xe] }
   0xd   :  { %v1716_v47 = vor.u32 %v1714_v43, %v1712_v36  ;;  %v7549_v50 = vld [vmem:[%s9376_s1 + $0x20] ss:$8 sps:$4 sm:$0xff]   ;;  %v6196_v51 = vcombine.low %v367_v48, %v8105_v11  ;;  %v390_v52 = vrot.slane %v8133_v19, 1  ;;  %v6481_v53 = vcombine.low %v1986_v49, %v8113_v13  ;;  %v7554_v55 = vld [vmem:[%s9376_s1 + $0x34] ss:$8 sps:$4 sm:$0xff]  }
   0xe   :  { %v94_v39 = vsel %vm82_vm0, %v89_v33, %v93_v34  ;;  %v1713_v40 = vsel %vm82_vm0, %v1708_v35, %v1712_v36  ;;  %v2007_v54 = vrot.slane %v8139_v21, 1  ;;  %v7552_v58 = vld [vmem:[%s9376_s1 + $0x30] ss:$8 sps:$4 sm:$0xff]   ;;  %v7557_v61 = vld [vmem:[%s9376_s1 + $0x44] ss:$8 sps:$4 sm:$0xff]  }
   0xf   :  { %187 = vmatpush1.bf16.msra.mxu0 %v7526_v8  ;;  %1806 = vmatpush1.bf16.msra.mxu1 %v7526_v8  ;;  %v389_v56 = vrot.slane %v6196_v51, 1  ;;  %v2006_v57 = vrot.slane %v6481_v53, 1  ;;  %v7555_v62 = vld [vmem:[%s9376_s1 + $0x40] ss:$8 sps:$4 sm:$0xff]   ;;  %v7560_v63 = vld [vmem:[%s9376_s1 + $0x54] ss:$8 sps:$4 sm:$0xff]  }
  0x10   :  { %188 = vmatprep.subr.bf16.mxu0 %v7527_v9  ;;  %1807 = vmatprep.subr.bf16.mxu1 %v7527_v9  ;;  %v7558_v0 = vld [vmem:[%s9376_s1 + $0x50] ss:$8 sps:$4 sm:$0xff]   ;;  %v7563_v1 = vld [vmem:[%s9376_s1 + $0x64] ss:$8 sps:$4 sm:$0xff]   ;;  %v7561_v3 = vld [vmem:[%s9376_s1 + $0x60] ss:$8 sps:$4 sm:$0xff]  }
  0x11   :  { %v8198_v59 = vsel %vm388_vm1, %v389_v56, %v390_v52  ;;  %v8202_v60 = vsel %vm388_vm1, %v2006_v57, %v2007_v54  ;;  %v7566_v4 = vld [vmem:[%s9376_s1 + $0x74] ss:$8 sps:$4 sm:$0xff]   ;;  %v7564_v5 = vld [vmem:[%s9376_s1 + $0x70] ss:$8 sps:$4 sm:$0xff]   ;;  %v7569_v6 = vld [vmem:[%s9376_s1 + $0x104] ss:$8 sps:$4 sm:$0xff]  }
  0x12   :  { %v7567_v7 = vld [vmem:[%s9376_s1 + $0x100] ss:$8 sps:$4 sm:$0xff]   ;;  %v7572_v8 = vld [vmem:[%s9376_s1 + $0x114] ss:$8 sps:$4 sm:$0xff]   ;;  %v8242_v9 = vld [vmem:[%s9375_s0 + $0x4] sm:$0xf] }
  0x13   :  { %189 = vmatpush1.bf16.msra.mxu0 %v7529_v14  ;;  %1808 = vmatpush1.bf16.msra.mxu1 %v7529_v14  ;;  %v8247_v10 = vld [vmem:[%s9375_s0 + $0x8] sm:$0xf]  ;;  %v8252_v11 = vld [vmem:[%s9375_s0 + $0x18] sm:$0xf]  ;;  %v8257_v12 = vld [vmem:[%s9375_s0 + $0x1c] sm:$0xf] }
  0x14   :  { %190 = vmatprep.subr.bf16.mxu0 %v7530_v17  ;;  %1809 = vmatprep.subr.bf16.mxu1 %v7530_v17  ;;  %v6296_v13 = vcombine.low %v8242_v9, %v8247_v10  ;;  %v6581_v14 = vcombine.low %v8252_v11, %v8257_v12  ;;  %v7570_v17 = vld [vmem:[%s9376_s1 + $0x110] ss:$8 sps:$4 sm:$0xff]   ;;  %v7573_v20 = vld [vmem:[%s9376_s1 + $0x120] ss:$8 sps:$4 sm:$0xff]   ;;  %v7578_v22 = vld [vmem:[%s9376_s1 + $0x134] ss:$8 sps:$4 sm:$0xff]  }
  0x15   :  { %v7579_v25 = vld [vmem:[%s9376_s1 + $0x140] ss:$8 sps:$4 sm:$0xff]   ;;  %v7584_v26 = vld [vmem:[%s9376_s1 + $0x154] ss:$8 sps:$4 sm:$0xff]   ;;  %v7582_v27 = vld [vmem:[%s9376_s1 + $0x150] ss:$8 sps:$4 sm:$0xff]  }
  0x16   :  { %v7587_v28 = vld [vmem:[%s9376_s1 + $0x164] ss:$8 sps:$4 sm:$0xff]   ;;  %v7585_v29 = vld [vmem:[%s9376_s1 + $0x160] ss:$8 sps:$4 sm:$0xff]   ;;  %v7592_v30 = vld [vmem:[%s9376_s1 + $0x174] ss:$8 sps:$4 sm:$0xff]  }
  0x17   :  { %191 = vmatpush1.bf16.msra.mxu0 %v7532_v18  ;;  %1810 = vmatpush1.bf16.msra.mxu1 %v7532_v18  ;;  %v7575_v18 = vld [vmem:[%s9376_s1 + $0x124] ss:$8 sps:$4 sm:$0xff]   ;;  %v7593_v33 = vld [vmem:[%s9376_s1 + $0x180] ss:$8 sps:$4 sm:$0xff]   ;;  %v7600_v34 = vld [vmem:[%s9376_s1 + $0x194] ss:$8 sps:$4 sm:$0xff]  }
  0x18   :  { %192 = vmatprep.subr.bf16.mxu0 %v7533_v23  ;;  %1811 = vmatprep.subr.bf16.mxu1 %v7533_v23  ;;  %v7576_v23 = vld [vmem:[%s9376_s1 + $0x130] ss:$8 sps:$4 sm:$0xff]   ;;  %v7603_v36 = vld [vmem:[%s9376_s1 + $0x1a4] ss:$8 sps:$4 sm:$0xff]   ;;  %v7607_v19 = vld [vmem:[%s9376_s1 + $0x1c0] ss:$8 sps:$4 sm:$0xff]  }
  0x19   :  { %v7598_v35 = vld [vmem:[%s9376_s1 + $0x190] ss:$8 sps:$4 sm:$0xff]   ;;  %v7612_v21 = vld [vmem:[%s9376_s1 + $0x1d4] ss:$8 sps:$4 sm:$0xff]   ;;  %v7615_v42 = vld [vmem:[%s9376_s1 + $0x1e4] ss:$8 sps:$4 sm:$0xff]  }
  0x1a   :  { %v534_v43 = vld [vmem:[%s9375_s0 + $0xc] sm:$0x3]  ;;  %v7618_v48 = vld [vmem:[%s9376_s1 + $0x1f4] ss:$8 sps:$4 sm:$0xff]   ;;  %vm726_vm3 = vsmask.f32 4352 }
  0x1b   :  { %193 = vmatpush1.bf16.msra.mxu0 %v7535_v24  ;;  %1812 = vmatpush1.bf16.msra.mxu1 %v7535_v24  ;;  %v7581_v24 = vld [vmem:[%s9376_s1 + $0x144] ss:$8 sps:$4 sm:$0xff]   ;;  %v6230_v49 = vcombine.low %v8247_v10, %v534_v43  ;;  %v7647_v43 = vld [vmem:[%s9376_s1 + $0x280] ss:$8 sps:$4 sm:$0xff]  }
  0x1c   :  { %194 = vmatprep.subr.bf16.mxu0 %v7536_v31  ;;  %1813 = vmatprep.subr.bf16.mxu1 %v7536_v31  ;;  %v7590_v31 = vld [vmem:[%s9376_s1 + $0x170] ss:$8 sps:$4 sm:$0xff]   ;;  %v7621_v57 = vld [vmem:[%s9376_s1 + $0x204] ss:$8 sps:$4 sm:$0xff]  }
  0x1f   :  { %195 = vmatpush1.bf16.msra.mxu0 %v7538_v32  ;;  %1814 = vmatpush1.bf16.msra.mxu1 %v7538_v32  ;;  %v7595_v32 = vld [vmem:[%s9376_s1 + $0x184] ss:$8 sps:$4 sm:$0xff]  }
  0x20   :  { %316 = vmatprep.subr.bf16.mxu0 %v7541_v37  ;;  %1935 = vmatprep.subr.bf16.mxu1 %v7541_v37  ;;  %v7601_v37 = vld [vmem:[%s9376_s1 + $0x1a0] ss:$8 sps:$4 sm:$0xff]  }
  0x22   :  { %213 = vmatmul.mubr.bf16.vlgmr.msra.gmra.mrb[0].mxu0 %v94_v39  ;;  %1832 = vmatmul.mubr.bf16.vlgmr.msra.gmra.mrb[0].mxu1 %v1713_v40  ;;  %v7604_v39 = vld [vmem:[%s9376_s1 + $0x1b0] ss:$8 sps:$4 sm:$0xff]   ;;  %v7609_v40 = vld [vmem:[%s9376_s1 + $0x1c4] ss:$8 sps:$4 sm:$0xff]  }
  0x23   :  { %317 = vmatpush1.bf16.msra.mxu0 %v7539_v38  ;;  %1936 = vmatpush1.bf16.msra.mxu1 %v7539_v38  ;;  %v7606_v38 = vld [vmem:[%s9376_s1 + $0x1b4] ss:$8 sps:$4 sm:$0xff]  }
  0x24   :  { %318 = vmatprep.subr.bf16.mxu0 %v7548_v41  ;;  %1937 = vmatprep.subr.bf16.mxu1 %v7548_v41  ;;  %v7610_v41 = vld [vmem:[%s9376_s1 + $0x1d0] ss:$8 sps:$4 sm:$0xff]  }
  0x25   :  { %222 = vmatprep.mubr.bf16.mxu0 %v8014_v2  ;;  %1841 = vmatprep.mubr.bf16.mxu1 %v8014_v2 }
  0x27   :  { %319 = vmatpush1.bf16.msra.mxu0 %v7546_v44  ;;  %1938 = vmatpush1.bf16.msra.mxu1 %v7546_v44  ;;  %v2148_v44 = vld [vmem:[%s9375_s0 + $0x14] sm:$0x8] }
  0x28   :  { %320 = vmatprep.subr.bf16.mxu0 %v7551_v45  ;;  %1939 = vmatprep.subr.bf16.mxu1 %v7551_v45  ;;  %v2151_v45 = vld [vmem:[%s9375_s0 + $0x20] sm:$0x3] }
  0x29   :  { %v6515_v51 = vcombine.low %v8257_v12, %v2151_v45 }
  0x2a   :  { %223 = vmatmul.mubr.bf16.gmra.mrb[4].mxu0 %v97_v46  ;;  %1842 = vmatmul.mubr.bf16.gmra.mrb[4].mxu1 %v1716_v47  ;;  %v7613_v47 = vld [vmem:[%s9376_s1 + $0x1e0] ss:$8 sps:$4 sm:$0xff]  }
  0x2b   :  { %321 = vmatpush1.bf16.msra.mxu0 %v7549_v50  ;;  %1940 = vmatpush1.bf16.msra.mxu1 %v7549_v50  ;;  %v8386_v50 = vcombine.low %v2148_v44, %v8252_v11  ;;  %v2179_v56 = vrot.slane %v6515_v51, 3  ;;  %v7658_v51 = vld [vmem:[%s9376_s1 + $0x2b0] ss:$8 sps:$4 sm:$0xff]  }
  0x2c   :  { %322 = vmatprep.subr.bf16.mxu0 %v7554_v55  ;;  %1941 = vmatprep.subr.bf16.mxu1 %v7554_v55 }
  0x2d   :  { %348 = vmatprep.mubr.bf16.mxu0 %v8014_v2  ;;  %1967 = vmatprep.mubr.bf16.mxu1 %v8014_v2  ;;  %v2178_v55 = vrot.slane %v8386_v50, 3 }
  0x2f   :  { %323 = vmatpush1.bf16.msra.mxu0 %v7552_v58  ;;  %1942 = vmatpush1.bf16.msra.mxu1 %v7552_v58  ;;  %v7619_v58 = vld [vmem:[%s9376_s1 + $0x200] ss:$8 sps:$4 sm:$0xff]  }
  0x30   :  { %324 = vmatprep.subr.bf16.mxu0 %v7557_v61  ;;  %1943 = vmatprep.subr.bf16.mxu1 %v7557_v61  ;;  %v7628_v61 = vld [vmem:[%s9376_s1 + $0x214] ss:$8 sps:$4 sm:$0xff]  }
  0x33   :  { %325 = vmatpush1.bf16.msra.mxu0 %v7555_v62  ;;  %1944 = vmatpush1.bf16.msra.mxu1 %v7555_v62  ;;  %v7626_v62 = vld [vmem:[%s9376_s1 + $0x210] ss:$8 sps:$4 sm:$0xff]  }
  0x34   :  { %326 = vmatprep.subr.bf16.mxu0 %v7560_v63  ;;  %1945 = vmatprep.subr.bf16.mxu1 %v7560_v63  ;;  %v7631_v63 = vld [vmem:[%s9376_s1 + $0x224] ss:$8 sps:$4 sm:$0xff]  }
  0x37   :  { %327 = vmatpush1.bf16.msra.mxu0 %v7558_v0  ;;  %1946 = vmatpush1.bf16.msra.mxu1 %v7558_v0  ;;  %v8411_v0 = vld [vmem:[#allocation2] sm:$0xff] }
  0x38   :  { %328 = vmatprep.subr.bf16.mxu0 %v7563_v1  ;;  %1947 = vmatprep.subr.bf16.mxu1 %v7563_v1  ;;  %v7629_v1 = vld [vmem:[%s9376_s1 + $0x220] ss:$8 sps:$4 sm:$0xff]  }
  0x3b   :  { %329 = vmatpush1.bf16.msra.mxu0 %v7561_v3  ;;  %1948 = vmatpush1.bf16.msra.mxu1 %v7561_v3  ;;  %v7634_v3 = vld [vmem:[%s9376_s1 + $0x234] ss:$8 sps:$4 sm:$0xff]  }
  0x3c   :  { %330 = vmatprep.subr.bf16.mxu0 %v7566_v4  ;;  %1949 = vmatprep.subr.bf16.mxu1 %v7566_v4  ;;  %v7632_v4 = vld [vmem:[%s9376_s1 + $0x230] ss:$8 sps:$4 sm:$0xff]  }
  0x3f   :  { %331 = vmatpush1.bf16.msra.mxu0 %v7564_v5  ;;  %1950 = vmatpush1.bf16.msra.mxu1 %v7564_v5  ;;  %v7637_v5 = vld [vmem:[%s9376_s1 + $0x244] ss:$8 sps:$4 sm:$0xff]  }
  0x40   :  { %474 = vmatprep.subr.bf16.mxu0 %v7569_v6  ;;  %2091 = vmatprep.subr.bf16.mxu1 %v7569_v6  ;;  %v8430_v6 = vld [vmem:[%s9375_s0 + $0xc] sm:$0x7] }
  0x42   :  { %349 = vmatmul.mubr.bf16.vlgmr.msra.gmra.mrb[0].mxu0 %v8119_v15  ;;  %1968 = vmatmul.mubr.bf16.vlgmr.msra.gmra.mrb[0].mxu1 %v8122_v16  ;;  %v7588_v15 = vld [vmem:[%s9375_s0 + $0x8] ss:$0 sps:$4 sm:$0x77]   ;;  %v7589_v16 = vld [vmem:[%s9375_s0 + $0x1c] ss:$0 sps:$4 sm:$0x77]  }
  0x43   :  { %475 = vmatpush1.bf16.msra.mxu0 %v7567_v7  ;;  %2092 = vmatpush1.bf16.msra.mxu1 %v7567_v7  ;;  %v8435_v7 = vld [vmem:[%s9375_s0 + $0x20] sm:$0x7] }
  0x44   :  { %476 = vmatprep.subr.bf16.mxu0 %v7572_v8  ;;  %2093 = vmatprep.subr.bf16.mxu1 %v7572_v8  ;;  %v7635_v8 = vld [vmem:[%s9376_s1 + $0x240] ss:$8 sps:$4 sm:$0xff]  }
  0x45   :  { %358 = vmatprep.mubr.bf16.mxu0 %v8014_v2  ;;  %1977 = vmatprep.mubr.bf16.mxu1 %v8014_v2 }
  0x47   :  { %477 = vmatpush1.bf16.msra.mxu0 %v7570_v17  ;;  %2094 = vmatpush1.bf16.msra.mxu1 %v7570_v17  ;;  %v7640_v17 = vld [vmem:[%s9376_s1 + $0x254] ss:$8 sps:$4 sm:$0xff]  }
  0x48   :  { %478 = vmatprep.subr.bf16.mxu0 %v7575_v18  ;;  %2095 = vmatprep.subr.bf16.mxu1 %v7575_v18  ;;  %v6263_v18 = vcombine.low %v8247_v10, %v8430_v6 }
  0x4a   :  { %359 = vmatmul.mubr.bf16.gmra.mrb[4].mxu0 %v7588_v15  ;;  %1978 = vmatmul.mubr.bf16.gmra.mrb[4].mxu1 %v7589_v16  ;;  %v6548_v15 = vcombine.low %v8257_v12, %v8435_v7  ;;  %v7638_v16 = vld [vmem:[%s9376_s1 + $0x250] ss:$8 sps:$4 sm:$0xff]  }
  0x4b   :  { %479 = vmatpush1.bf16.msra.mxu0 %v7573_v20  ;;  %2096 = vmatpush1.bf16.msra.mxu1 %v7573_v20 }
  0x4c   :  { %480 = vmatprep.subr.bf16.mxu0 %v7578_v22  ;;  %2097 = vmatprep.subr.bf16.mxu1 %v7578_v22  ;;  %v7643_v22 = vld [vmem:[%s9376_s1 + $0x264] ss:$8 sps:$4 sm:$0xff]  }
  0x4d   :  { %506 = vmatprep.mubr.bf16.mxu0 %v8014_v2  ;;  %2123 = vmatprep.mubr.bf16.mxu1 %v8014_v2 }
  0x4f   :  { %481 = vmatpush1.bf16.msra.mxu0 %v7576_v23  ;;  %2098 = vmatpush1.bf16.msra.mxu1 %v7576_v23 }
  0x50   :  { %482 = vmatprep.subr.bf16.mxu0 %v7581_v24  ;;  %2099 = vmatprep.subr.bf16.mxu1 %v7581_v24  ;;  %v2341_v24 = vshrl.u32 %v8386_v50, 16 }
  0x53   :  { %483 = vmatpush1.bf16.msra.mxu0 %v7579_v25  ;;  %2100 = vmatpush1.bf16.msra.mxu1 %v7579_v25  ;;  %v2344_v25 = vshll.u32 %v8386_v50, 16  ;;  %v7660_v50 = vld [vmem:[%s9376_s1 + $0x2b4] ss:$8 sps:$4 sm:$0xff]  }
  0x54   :  { %484 = vmatprep.subr.bf16.mxu0 %v7584_v26  ;;  %2101 = vmatprep.subr.bf16.mxu1 %v7584_v26  ;;  %v736_v26 = vshrl.u32 %v6263_v18, 16 }
  0x57   :  { %485 = vmatpush1.bf16.msra.mxu0 %v7582_v27  ;;  %2102 = vmatpush1.bf16.msra.mxu1 %v7582_v27  ;;  %v739_v27 = vshll.u32 %v6263_v18, 16 }
  0x58   :  { %486 = vmatprep.subr.bf16.mxu0 %v7587_v28  ;;  %2103 = vmatprep.subr.bf16.mxu1 %v7587_v28  ;;  %v2349_v28 = vshrl.u32 %v6548_v15, 16 }
  0x5b   :  { %487 = vmatpush1.bf16.msra.mxu0 %v7585_v29  ;;  %2104 = vmatpush1.bf16.msra.mxu1 %v7585_v29  ;;  %v2352_v29 = vshll.u32 %v6548_v15, 16 }
  0x5c   :  { %488 = vmatprep.subr.bf16.mxu0 %v7592_v30  ;;  %2105 = vmatprep.subr.bf16.mxu1 %v7592_v30  ;;  %v7641_v30 = vld [vmem:[%s9376_s1 + $0x260] ss:$8 sps:$4 sm:$0xff]  }
  0x5f   :  { %489 = vmatpush1.bf16.msra.mxu0 %v7590_v31  ;;  %2106 = vmatpush1.bf16.msra.mxu1 %v7590_v31 }
  0x60   :  { %648 = vmatprep.subr.bf16.mxu0 %v7595_v32  ;;  %2263 = vmatprep.subr.bf16.mxu1 %v7595_v32  ;;  %v7646_v32 = vld [vmem:[%s9376_s1 + $0x274] ss:$8 sps:$4 sm:$0xff]  }
  0x62   :  { %507 = vmatmul.mubr.bf16.vlgmr.msra.gmra.mrb[0].mxu0 %v8198_v59  ;;  %2124 = vmatmul.mubr.bf16.vlgmr.msra.gmra.mrb[0].mxu1 %v8202_v60  ;;  %v2180_v60 = vsel %vm562_vm2, %v2178_v55, %v2179_v56 }
  0x63   :  { %649 = vmatpush1.bf16.msra.mxu0 %v7593_v33  ;;  %2264 = vmatpush1.bf16.msra.mxu1 %v7593_v33 }
  0x64   :  { %650 = vmatprep.subr.bf16.mxu0 %v7600_v34  ;;  %2265 = vmatprep.subr.bf16.mxu1 %v7600_v34  ;;  %v2343_v34 = vrot.slane %v2341_v24, 3 }
  0x65   :  { %516 = vmatprep.mubr.bf16.mxu0 %v8014_v2  ;;  %2133 = vmatprep.mubr.bf16.mxu1 %v8014_v2 }
  0x67   :  { %651 = vmatpush1.bf16.msra.mxu0 %v7598_v35  ;;  %2266 = vmatpush1.bf16.msra.mxu1 %v7598_v35  ;;  %v2346_v35 = vrot.slane %v2344_v25, 4 }
  0x68   :  { %652 = vmatprep.subr.bf16.mxu0 %v7603_v36  ;;  %2267 = vmatprep.subr.bf16.mxu1 %v7603_v36  ;;  %v738_v36 = vrot.slane %v736_v26, 3 }
  0x6a   :  { %517 = vmatmul.mubr.bf16.gmra.mrb[4].mxu0 %v390_v52  ;;  %2134 = vmatmul.mubr.bf16.gmra.mrb[4].mxu1 %v2007_v54  ;;  %v7616_v52 = vld [vmem:[%s9376_s1 + $0x1f0] ss:$8 sps:$4 sm:$0xff]   ;;  %v564_v54 = vrot.slane %v6230_v49, 3  ;;  %v7655_v49 = vld [vmem:[%s9376_s1 + $0x2a0] ss:$8 sps:$4 sm:$0xff]  }
  0x6b   :  { %653 = vmatpush1.bf16.msra.mxu0 %v7601_v37  ;;  %2268 = vmatpush1.bf16.msra.mxu1 %v7601_v37  ;;  %v741_v37 = vrot.slane %v739_v27, 4 }
  0x6c   :  { %654 = vmatprep.subr.bf16.mxu0 %v7606_v38  ;;  %2269 = vmatprep.subr.bf16.mxu1 %v7606_v38  ;;  %v2351_v38 = vrot.slane %v2349_v28, 3 }
  0x6d   :  { %680 = vmatprep.mubr.bf16.mxu0 %v8014_v2  ;;  %2295 = vmatprep.mubr.bf16.mxu1 %v8014_v2  ;;  %v531_v2 = vld [vmem:[%s9375_s0] sm:$0x8] }
  0x6e   :  { %v8376_v46 = vcombine.low %v531_v2, %v8242_v9 }
  0x6f   :  { %655 = vmatpush1.bf16.msra.mxu0 %v7604_v39  ;;  %2270 = vmatpush1.bf16.msra.mxu1 %v7604_v39  ;;  %v2354_v39 = vrot.slane %v2352_v29, 4 }
  0x70   :  { %656 = vmatprep.subr.bf16.mxu0 %v7609_v40  ;;  %2271 = vmatprep.subr.bf16.mxu1 %v7609_v40  ;;  %v563_v53 = vrot.slane %v8376_v46, 3  ;;  %v728_v20 = vshrl.u32 %v8376_v46, 16  ;;  %v731_v23 = vshll.u32 %v8376_v46, 16  ;;  %v7654_v46 = vld [vmem:[%s9376_s1 + $0x294] ss:$8 sps:$4 sm:$0xff]  }
  0x71   :  { %v2355_v2 = vor.u32 %v2354_v39, %v2351_v38 }
  0x72   :  { %v565_v59 = vsel %vm562_vm2, %v563_v53, %v564_v54  ;;  %v730_v31 = vrot.slane %v728_v20, 3  ;;  %v733_v33 = vrot.slane %v731_v23, 4 }
  0x73   :  { %657 = vmatpush1.bf16.msra.mxu0 %v7607_v19  ;;  %2272 = vmatpush1.bf16.msra.mxu1 %v7607_v19  ;;  %v7644_v19 = vld [vmem:[%s9376_s1 + $0x270] ss:$8 sps:$4 sm:$0xff]  }
  0x74   :  { %658 = vmatprep.subr.bf16.mxu0 %v7612_v21  ;;  %2273 = vmatprep.subr.bf16.mxu1 %v7612_v21  ;;  %v734_v40 = vor.u32 %v733_v33, %v730_v31  ;;  %v742_v21 = vor.u32 %v741_v37, %v738_v36 }
  0x76   :  { %v743_v44 = vsel %vm726_vm3, %v734_v40, %v742_v21 }
  0x77   :  { %659 = vmatpush1.bf16.msra.mxu0 %v7610_v41  ;;  %2274 = vmatpush1.bf16.msra.mxu1 %v7610_v41  ;;  %v2347_v41 = vor.u32 %v2346_v35, %v2343_v34 }
  0x78   :  { %660 = vmatprep.subr.bf16.mxu0 %v7615_v42  ;;  %2275 = vmatprep.subr.bf16.mxu1 %v7615_v42  ;;  %v7649_v42 = vld [vmem:[%s9376_s1 + $0x284] ss:$8 sps:$4 sm:$0xff]  }
  0x79   :  { %v2356_v45 = vsel %vm726_vm3, %v2347_v41, %v2355_v2 }
  0x7b   :  { %661 = vmatpush1.bf16.msra.mxu0 %v7613_v47  ;;  %2276 = vmatpush1.bf16.msra.mxu1 %v7613_v47  ;;  %v7652_v47 = vld [vmem:[%s9376_s1 + $0x290] ss:$8 sps:$4 sm:$0xff]  }
  0x7c   :  { %662 = vmatprep.subr.bf16.mxu0 %v7618_v48  ;;  %2277 = vmatprep.subr.bf16.mxu1 %v7618_v48  ;;  %v7657_v48 = vld [vmem:[%s9376_s1 + $0x2a4] ss:$8 sps:$4 sm:$0xff]  }
  0x7f   :  { %663 = vmatpush1.bf16.msra.mxu0 %v7616_v52  ;;  %2278 = vmatpush1.bf16.msra.mxu1 %v7616_v52 }
  0x80   :  { %826 = vmatprep.subr.bf16.mxu0 %v7621_v57  ;;  %2439 = vmatprep.subr.bf16.mxu1 %v7621_v57 }
  0x82   :  { %681 = vmatmul.mubr.bf16.vlgmr.msra.gmra.mrb[0].mxu0 %v565_v59  ;;  %2296 = vmatmul.mubr.bf16.vlgmr.msra.gmra.mrb[0].mxu1 %v2180_v60 }
  0x83   :  { %827 = vmatpush1.bf16.msra.mxu0 %v7619_v58  ;;  %2440 = vmatpush1.bf16.msra.mxu1 %v7619_v58 }
  0x84   :  { %828 = vmatprep.subr.bf16.mxu0 %v7628_v61  ;;  %2441 = vmatprep.subr.bf16.mxu1 %v7628_v61 }
  0x85   :  { %690 = vmatprep.mubr.bf16.mxu0 %v8411_v0  ;;  %2305 = vmatprep.mubr.bf16.mxu1 %v8411_v0 }
  0x87   :  { %829 = vmatpush1.bf16.msra.mxu0 %v7626_v62  ;;  %2442 = vmatpush1.bf16.msra.mxu1 %v7626_v62 }
  0x88   :  { %830 = vmatprep.subr.bf16.mxu0 %v7631_v63  ;;  %2443 = vmatprep.subr.bf16.mxu1 %v7631_v63 }
  0x8a   :  { %691 = vmatmul.mubr.bf16.gmra.mrb[4].mxu0 %v564_v54  ;;  %2306 = vmatmul.mubr.bf16.gmra.mrb[4].mxu1 %v2179_v56 }
  0x8b   :  { %831 = vmatpush1.bf16.msra.mxu0 %v7629_v1  ;;  %2444 = vmatpush1.bf16.msra.mxu1 %v7629_v1 }
  0x8c   :  { %832 = vmatprep.subr.bf16.mxu0 %v7634_v3  ;;  %2445 = vmatprep.subr.bf16.mxu1 %v7634_v3 }
  0x8d   :  { %858 = vmatprep.mubr.bf16.mxu0 %v8411_v0  ;;  %2471 = vmatprep.mubr.bf16.mxu1 %v8411_v0 }
  0x8f   :  { %833 = vmatpush1.bf16.msra.mxu0 %v7632_v4  ;;  %2446 = vmatpush1.bf16.msra.mxu1 %v7632_v4 }
  0x90   :  { %834 = vmatprep.subr.bf16.mxu0 %v7637_v5  ;;  %2447 = vmatprep.subr.bf16.mxu1 %v7637_v5 }
  0x93   :  { %835 = vmatpush1.bf16.msra.mxu0 %v7635_v8  ;;  %2448 = vmatpush1.bf16.msra.mxu1 %v7635_v8 }
  0x94   :  { %836 = vmatprep.subr.bf16.mxu0 %v7640_v17  ;;  %2449 = vmatprep.subr.bf16.mxu1 %v7640_v17 }
  0x97   :  { %837 = vmatpush1.bf16.msra.mxu0 %v7638_v16  ;;  %2450 = vmatpush1.bf16.msra.mxu1 %v7638_v16 }
  0x98   :  { %838 = vmatprep.subr.bf16.mxu0 %v7643_v22  ;;  %2451 = vmatprep.subr.bf16.mxu1 %v7643_v22 }
  0x9b   :  { %839 = vmatpush1.bf16.msra.mxu0 %v7641_v30  ;;  %2452 = vmatpush1.bf16.msra.mxu1 %v7641_v30 }
  0x9c   :  { %840 = vmatprep.subr.bf16.mxu0 %v7646_v32  ;;  %2453 = vmatprep.subr.bf16.mxu1 %v7646_v32 }
  0x9f   :  { %841 = vmatpush1.bf16.msra.mxu0 %v7644_v19  ;;  %2454 = vmatpush1.bf16.msra.mxu1 %v7644_v19 }
  0xa0   :  { %984 = vmatprep.subr.bf16.mxu0 %v7649_v42  ;;  %2596 = vmatprep.subr.bf16.mxu1 %v7649_v42 }
  0xa2   :  { %859 = vmatmul.mubr.bf16.vlgmr.msra.gmra.mrb[0].mxu0 %v743_v44  ;;  %2472 = vmatmul.mubr.bf16.vlgmr.msra.gmra.mrb[0].mxu1 %v2356_v45 }
  0xa3   :  { %985 = vmatpush1.bf16.msra.mxu0 %v7647_v43  ;;  %2597 = vmatpush1.bf16.msra.mxu1 %v7647_v43 }
  0xa4   :  { %986 = vmatprep.subr.bf16.mxu0 %v7654_v46  ;;  %2598 = vmatprep.subr.bf16.mxu1 %v7654_v46 }
  0xa5   :  { %868 = vmatprep.mubr.bf16.mxu0 %v8411_v0  ;;  %2481 = vmatprep.mubr.bf16.mxu1 %v8411_v0 }
  0xa7   :  { %987 = vmatpush1.bf16.msra.mxu0 %v7652_v47  ;;  %2599 = vmatpush1.bf16.msra.mxu1 %v7652_v47 }
  0xa8   :  { %988 = vmatprep.subr.bf16.mxu0 %v7657_v48  ;;  %2600 = vmatprep.subr.bf16.mxu1 %v7657_v48 }
  0xaa   :  { %869 = vmatmul.mubr.bf16.gmra.mrb[4].mxu0 %v742_v21  ;;  %2482 = vmatmul.mubr.bf16.gmra.mrb[4].mxu1 %v2355_v2 }
  0xab   :  { %989 = vmatpush1.bf16.msra.mxu0 %v7655_v49  ;;  %2601 = vmatpush1.bf16.msra.mxu1 %v7655_v49 }
  0xac   :  { %14 = vsyncpa [#allocation6], 0  ;;  %990 = vmatprep.subr.bf16.mxu0 %v7660_v50  ;;  %2602 = vmatprep.subr.bf16.mxu1 %v7660_v50  ;;  %v7663_v52 = vld [vmem:[%s9376_s1 + $0x2c4] ss:$8 sps:$4 sm:$0xff]   ;;  %v7661_v53 = vld [vmem:[%s9376_s1 + $0x2c0] ss:$8 sps:$4 sm:$0xff]   ;;  %v6297_v9 = vcombine.low %v8430_v6, %v8430_v6  ;;  %v6582_v10 = vcombine.low %v8435_v7, %v8435_v7 }
  0xad   :  { %1016 = vmatprep.mubr.bf16.mxu0 %v8411_v0  ;;  %2628 = vmatprep.mubr.bf16.mxu1 %v8411_v0  ;;  %v7666_v54 = vld [vmem:[%s9376_s1 + $0x2d4] ss:$8 sps:$4 sm:$0xff]   ;;  %v7664_v55 = vld [vmem:[%s9376_s1 + $0x2d0] ss:$8 sps:$4 sm:$0xff]   ;;  %v7669_v56 = vld [vmem:[%s9376_s1 + $0x2e4] ss:$8 sps:$4 sm:$0xff]  }
  0xae   :  { %v7667_v57 = vld [vmem:[%s9376_s1 + $0x2e0] ss:$8 sps:$4 sm:$0xff]   ;;  %v7672_v58 = vld [vmem:[%s9376_s1 + $0x2f4] ss:$8 sps:$4 sm:$0xff]   ;;  %v7670_v59 = vld [vmem:[%s9376_s1 + $0x2f0] ss:$8 sps:$4 sm:$0xff]  }
  0xaf   :  { %991 = vmatpush1.bf16.msra.mxu0 %v7658_v51  ;;  %2603 = vmatpush1.bf16.msra.mxu1 %v7658_v51  ;;  %v7675_v60 = vld [vmem:[%s9376_s1 + $0x304] ss:$8 sps:$4 sm:$0xff]   ;;  %v7673_v61 = vld [vmem:[%s9376_s1 + $0x300] ss:$8 sps:$4 sm:$0xff]   ;;  %v7680_v62 = vld [vmem:[%s9376_s1 + $0x314] ss:$8 sps:$4 sm:$0xff]  }
  0xb0   :  { %992 = vmatprep.subr.bf16.mxu0 %v7663_v52  ;;  %2604 = vmatprep.subr.bf16.mxu1 %v7663_v52  ;;  %v7678_v63 = vld [vmem:[%s9376_s1 + $0x310] ss:$8 sps:$4 sm:$0xff]   ;;  %v7683_v1 = vld [vmem:[%s9376_s1 + $0x324] ss:$8 sps:$4 sm:$0xff]   ;;  %v7681_v11 = vld [vmem:[%s9376_s1 + $0x320] ss:$8 sps:$4 sm:$0xff]  }
  0xb1   :  { %v7686_v12 = vld [vmem:[%s9376_s1 + $0x334] ss:$8 sps:$4 sm:$0xff]   ;;  %v7687_v3 = vld [vmem:[%s9376_s1 + $0x340] ss:$8 sps:$4 sm:$0xff]   ;;  %v7690_v5 = vld [vmem:[%s9376_s1 + $0x350] ss:$8 sps:$4 sm:$0xff]  }
  0xb2   :  { %v7692_v4 = vld [vmem:[%s9376_s1 + $0x354] ss:$8 sps:$4 sm:$0xff]   ;;  %v7695_v6 = vld [vmem:[%s9376_s1 + $0x364] ss:$8 sps:$4 sm:$0xff]   ;;  %v8579_v8 = vld [vmem:[%s9375_s0 + $0x8] sm:$0xf] }
  0xb3   :  { %993 = vmatpush1.bf16.msra.mxu0 %v7661_v53  ;;  %2605 = vmatpush1.bf16.msra.mxu1 %v7661_v53  ;;  %v1041_v7 = vld [vmem:[%s9375_s0 + $0x4] sm:$0xc]  ;;  %v8584_v17 = vld [vmem:[%s9375_s0 + $0xc] sm:$0xf]  ;;  %v1044_v18 = vld [vmem:[%s9375_s0 + $0x10] sm:$0x1] }
  0xb4   :  { %994 = vmatprep.subr.bf16.mxu0 %v7666_v54  ;;  %2606 = vmatprep.subr.bf16.mxu1 %v7666_v54  ;;  %v2653_v15 = vld [vmem:[%s9375_s0 + $0x18] sm:$0xc]  ;;  %v8595_v16 = vld [vmem:[%s9375_s0 + $0x1c] sm:$0xf]  ;;  %v2655_v20 = vld [vmem:[%s9375_s0 + $0x20] sm:$0xf]  ;;  %v8604_v23 = vcombine.low %v1041_v7, %v8579_v8  ;;  %v6331_v25 = vcombine.low %v8584_v17, %v1044_v18 }
  0xb5   :  { %v2656_v22 = vld [vmem:[%s9375_s0 + $0x24] sm:$0x1]  ;;  %v7693_v24 = vld [vmem:[%s9376_s1 + $0x360] ss:$8 sps:$4 sm:$0xff]   ;;  %v8611_v26 = vcombine.low %v2653_v15, %v8595_v16  ;;  %v7700_v28 = vld [vmem:[%s9376_s1 + $0x374] ss:$8 sps:$4 sm:$0xff]  }
  0xb6   :  { %v6616_v27 = vcombine.low %v2655_v20, %v2656_v22  ;;  %v7698_v29 = vld [vmem:[%s9376_s1 + $0x370] ss:$8 sps:$4 sm:$0xff]   ;;  %v1073_v30 = vrot.slane %v8604_v23, 2  ;;  %v1074_v31 = vrot.slane %v6331_v25, 2  ;;  %v7703_v34 = vld [vmem:[%s9376_s1 + $0x384] ss:$8 sps:$4 sm:$0xff]  }
  0xb7   :  { %995 = vmatpush1.bf16.msra.mxu0 %v7664_v55  ;;  %2607 = vmatpush1.bf16.msra.mxu1 %v7664_v55  ;;  %v2683_v32 = vrot.slane %v8611_v26, 2  ;;  %vm1072_vm4 = vcmask 1045504   ;;  %v7701_v35 = vld [vmem:[%s9376_s1 + $0x380] ss:$8 sps:$4 sm:$0xff]   ;;  %v7712_v38 = vld [vmem:[%s9376_s1 + $0x394] ss:$8 sps:$4 sm:$0xff]  }
  0xb8   :  { %996 = vmatprep.subr.bf16.mxu0 %v7669_v56  ;;  %2608 = vmatprep.subr.bf16.mxu1 %v7669_v56  ;;  %v2684_v33 = vrot.slane %v6616_v27, 2  ;;  %v1075_v36 = vsel %vm1072_vm4, %v1073_v30, %v1074_v31  ;;  %v7710_v39 = vld [vmem:[%s9376_s1 + $0x390] ss:$8 sps:$4 sm:$0xff]   ;;  %v7715_v40 = vld [vmem:[%s9376_s1 + $0x3a4] ss:$8 sps:$4 sm:$0xff]   ;;  %v1238_v48 = vshrl.u32 %v8604_v23, 16 }
  0xb9   :  { %v7713_v19 = vld [vmem:[%s9376_s1 + $0x3a0] ss:$8 sps:$4 sm:$0xff]   ;;  %v7718_v21 = vld [vmem:[%s9376_s1 + $0x3b4] ss:$8 sps:$4 sm:$0xff]   ;;  %v1215_v41 = vld [vmem:[%s9375_s0 + $0x10] sm:$0x3] }
  0xba   :  { %v2685_v37 = vsel %vm1072_vm4, %v2683_v32, %v2684_v33  ;;  %v7716_v2 = vld [vmem:[%s9376_s1 + $0x3b0] ss:$8 sps:$4 sm:$0xff]   ;;  %v2825_v42 = vld [vmem:[%s9375_s0 + $0x24] sm:$0x3]  ;;  %v8659_v44 = vcombine.low %v8584_v17, %v1215_v41  ;;  %v7719_v46 = vld [vmem:[%s9376_s1 + $0x3c0] ss:$8 sps:$4 sm:$0xff]  }
  0xbb   :  { %997 = vmatpush1.bf16.msra.mxu0 %v7667_v57  ;;  %2609 = vmatpush1.bf16.msra.mxu1 %v7667_v57  ;;  %v7721_v43 = vld [vmem:[%s9376_s1 + $0x3c4] ss:$8 sps:$4 sm:$0xff]   ;;  %v8661_v45 = vcombine.low %v2655_v20, %v2825_v42  ;;  %v7724_v47 = vld [vmem:[%s9376_s1 + $0x3d4] ss:$8 sps:$4 sm:$0xff]   ;;  %v1241_v49 = vshll.u32 %v8604_v23, 16  ;;  %v2846_v53 = vshrl.u32 %v8611_v26, 16 }
  0xbc   :  { %998 = vmatprep.subr.bf16.mxu0 %v7672_v58  ;;  %2610 = vmatprep.subr.bf16.mxu1 %v7672_v58  ;;  %v1246_v50 = vshrl.u32 %v8659_v44, 16  ;;  %v1249_v51 = vshll.u32 %v8659_v44, 16  ;;  %v7722_v52 = vld [vmem:[%s9376_s1 + $0x3d0] ss:$8 sps:$4 sm:$0xff]   ;;  %v2849_v54 = vshll.u32 %v8611_v26, 16  ;;  %v1240_v58 = vrot.slane %v1238_v48, 2 }
  0xbd   :  { %v2854_v55 = vshrl.u32 %v8661_v45, 16  ;;  %v2857_v56 = vshll.u32 %v8661_v45, 16  ;;  %v7727_v57 = vld [vmem:[%s9376_s1 + $0x3e4] ss:$8 sps:$4 sm:$0xff]   ;;  %vm1236_vm5 = vsmask.f32 5376 }
  0xbe   :  { %v7736_v18 = vld [vmem:[%s9376_s1 + $0x414] ss:$8 sps:$4 sm:$0xff]   ;;  %v7734_v15 = vld [vmem:[%s9376_s1 + $0x410] ss:$8 sps:$4 sm:$0xff]   ;;  %v7739_v20 = vld [vmem:[%s9376_s1 + $0x424] ss:$8 sps:$4 sm:$0xff]  }
  0xbf   :  { %999 = vmatpush1.bf16.msra.mxu0 %v7670_v59  ;;  %2611 = vmatpush1.bf16.msra.mxu1 %v7670_v59  ;;  %v1243_v59 = vrot.slane %v1241_v49, 3  ;;  %v7737_v22 = vld [vmem:[%s9376_s1 + $0x420] ss:$8 sps:$4 sm:$0xff]   ;;  %v7742_v23 = vld [vmem:[%s9376_s1 + $0x434] ss:$8 sps:$4 sm:$0xff]   ;;  %vm1565_vm6 = vcmask 1041408  }
  0xc0   :  { %1158 = vmatprep.subr.bf16.mxu0 %v7675_v60  ;;  %2768 = vmatprep.subr.bf16.mxu1 %v7675_v60  ;;  %v1248_v60 = vrot.slane %v1246_v50, 2  ;;  %v7745_v25 = vld [vmem:[%s9376_s1 + $0x444] ss:$8 sps:$4 sm:$0xff]   ;;  %v7743_v26 = vld [vmem:[%s9376_s1 + $0x440] ss:$8 sps:$4 sm:$0xff]   ;;  %vm1582_vm7 = vcmask 1042434  }
  0xc1   :  { %v7748_v27 = vld [vmem:[%s9376_s1 + $0x454] ss:$8 sps:$4 sm:$0xff]   ;;  %v1393_v30 = vld [vmem:[%s9375_s0 + $0x4] sm:$0x8]  ;;  %v7749_v32 = vld [vmem:[%s9376_s1 + $0x460] ss:$8 sps:$4 sm:$0xff]  }
  0xc2   :  { %1017 = vmatmul.mubr.bf16.vlgmr.msra.gmra.mrb[0].mxu0 %v6296_v13  ;;  %2629 = vmatmul.mubr.bf16.vlgmr.msra.gmra.mrb[0].mxu1 %v6581_v14  ;;  %v7684_v13 = vld [vmem:[%s9376_s1 + $0x330] ss:$8 sps:$4 sm:$0xff]   ;;  %v7689_v14 = vld [vmem:[%s9376_s1 + $0x344] ss:$8 sps:$4 sm:$0xff]   ;;  %v7762_v41 = vld [vmem:[%s9378_s3 + $0x94] ss:$8 sps:$4 sm:$0xff]  }
  0xc3   :  { %1159 = vmatpush1.bf16.msra.mxu0 %v7673_v61  ;;  %2769 = vmatpush1.bf16.msra.mxu1 %v7673_v61  ;;  %v1251_v61 = vrot.slane %v1249_v51, 3  ;;  %v7765_v42 = vld [vmem:[%s9378_s3 + $0xa4] ss:$8 sps:$4 sm:$0xff]   ;;  %v7774_v48 = vld [vmem:[%s9378_s3 + $0xd4] ss:$8 sps:$4 sm:$0xff]   ;;  %vm1605_vm10 = vcmask 1043459  }
  0xc4   :  { %1160 = vmatprep.subr.bf16.mxu0 %v7680_v62  ;;  %2770 = vmatprep.subr.bf16.mxu1 %v7680_v62  ;;  %v7725_v62 = vld [vmem:[%s9376_s1 + $0x3e0] ss:$8 sps:$4 sm:$0xff]   ;;  %v7772_v49 = vld [vmem:[%s9378_s3 + $0xd0] ss:$8 sps:$4 sm:$0xff]   ;;  %v7777_v50 = vld [vmem:[%s9378_s3 + $0xe4] ss:$8 sps:$4 sm:$0xff]  }
  0xc5   :  { %1026 = vmatprep.mubr.bf16.mxu0 %v8411_v0  ;;  %2638 = vmatprep.mubr.bf16.mxu1 %v8411_v0  ;;  %v7775_v51 = vld [vmem:[%s9378_s3 + $0xe0] ss:$8 sps:$4 sm:$0xff]   ;;  %vm1583_vm8 = vsmask.f32 7946  ;;  %vm1606_vm9 = vsmask.f32 3328 }
  0xc6   :  { %vm1653_vm11 = vcmask 1045509   ;;  %vm8832_vm12 = vmand %vm1582_vm7, %vm1583_vm8  ;;  %vm1630_vm14 = vcmask 1044484   ;;  %vm1631_vm15 = vsmask.f32 7954  ;;  %vm6113_vm3 = vcmask 271360  }
  0xc7   :  { %1161 = vmatpush1.bf16.msra.mxu0 %v7678_v63  ;;  %2771 = vmatpush1.bf16.msra.mxu1 %v7678_v63  ;;  %v2848_v63 = vrot.slane %v2846_v53, 2  ;;  %v7778_v53 = vld [vmem:[%s9378_s3 + $0xf0] ss:$8 sps:$4 sm:$0xff]   ;;  %vm8841_vm13 = vmand %vm1605_vm10, %vm1606_vm9 }
  0xc8   :  { %1162 = vmatprep.subr.bf16.mxu0 %v7683_v1  ;;  %2772 = vmatprep.subr.bf16.mxu1 %v7683_v1  ;;  %v2851_v1 = vrot.slane %v2849_v54, 3  ;;  %v7783_v54 = vld [vmem:[%s9378_s3 + $0x4] ss:$8 sps:$4 sm:$0xff]   ;;  %vm8857_vm0 = vmand %vm1653_vm11, %vm1236_vm5 }
  0xc9   :  { %vm8863_vm1 = vmand %vm1630_vm14, %vm1631_vm15 }
  0xca   :  { %1027 = vmatmul.mubr.bf16.gmra.mrb[4].mxu0 %v6297_v9  ;;  %2639 = vmatmul.mubr.bf16.gmra.mrb[4].mxu1 %v6582_v10  ;;  %v2856_v9 = vrot.slane %v2854_v55, 2  ;;  %v2859_v10 = vrot.slane %v2857_v56, 3 }
  0xcb   :  { %1163 = vmatpush1.bf16.msra.mxu0 %v7681_v11  ;;  %2773 = vmatpush1.bf16.msra.mxu1 %v7681_v11  ;;  %v7730_v11 = vld [vmem:[%s9376_s1 + $0x3f4] ss:$8 sps:$4 sm:$0xff]  }
  0xcc   :  { %1164 = vmatprep.subr.bf16.mxu0 %v7686_v12  ;;  %2774 = vmatprep.subr.bf16.mxu1 %v7686_v12  ;;  %v1244_v12 = vor.u32 %v1243_v59, %v1240_v58 }
  0xcd   :  { %1190 = vmatprep.mubr.bf16.mxu0 %v8411_v0  ;;  %2800 = vmatprep.mubr.bf16.mxu1 %v8411_v0 }
  0xcf   :  { %1165 = vmatpush1.bf16.msra.mxu0 %v7684_v13  ;;  %2775 = vmatpush1.bf16.msra.mxu1 %v7684_v13  ;;  %v7728_v13 = vld [vmem:[%s9376_s1 + $0x3f0] ss:$8 sps:$4 sm:$0xff]  }
  0xd0   :  { %1166 = vmatprep.subr.bf16.mxu0 %v7689_v14  ;;  %2776 = vmatprep.subr.bf16.mxu1 %v7689_v14  ;;  %v1252_v14 = vor.u32 %v1251_v61, %v1248_v60 }
  0xd2   :  { %v1253_v7 = vsel %vm1236_vm5, %v1244_v12, %v1252_v14 }
  0xd3   :  { %1167 = vmatpush1.bf16.msra.mxu0 %v7687_v3  ;;  %2777 = vmatpush1.bf16.msra.mxu1 %v7687_v3  ;;  %v2852_v3 = vor.u32 %v2851_v1, %v2848_v63 }
  0xd4   :  { %1168 = vmatprep.subr.bf16.mxu0 %v7692_v4  ;;  %2778 = vmatprep.subr.bf16.mxu1 %v7692_v4  ;;  %v2860_v4 = vor.u32 %v2859_v10, %v2856_v9 }
  0xd6   :  { %v2861_v17 = vsel %vm1236_vm5, %v2852_v3, %v2860_v4 }
  0xd7   :  { %1169 = vmatpush1.bf16.msra.mxu0 %v7690_v5  ;;  %2779 = vmatpush1.bf16.msra.mxu1 %v7690_v5  ;;  %v7733_v5 = vld [vmem:[%s9376_s1 + $0x404] ss:$8 sps:$4 sm:$0xff]  }
  0xd8   :  { %1170 = vmatprep.subr.bf16.mxu0 %v7695_v6  ;;  %2780 = vmatprep.subr.bf16.mxu1 %v7695_v6  ;;  %v7731_v6 = vld [vmem:[%s9376_s1 + $0x400] ss:$8 sps:$4 sm:$0xff]  }
  0xdb   :  { %1171 = vmatpush1.bf16.msra.mxu0 %v7693_v24  ;;  %2781 = vmatpush1.bf16.msra.mxu1 %v7693_v24  ;;  %v7740_v24 = vld [vmem:[%s9376_s1 + $0x430] ss:$8 sps:$4 sm:$0xff]  }
  0xdc   :  { %1172 = vmatprep.subr.bf16.mxu0 %v7700_v28  ;;  %2782 = vmatprep.subr.bf16.mxu1 %v7700_v28  ;;  %v7746_v28 = vld [vmem:[%s9376_s1 + $0x450] ss:$8 sps:$4 sm:$0xff]  }
  0xdf   :  { %1173 = vmatpush1.bf16.msra.mxu0 %v7698_v29  ;;  %2783 = vmatpush1.bf16.msra.mxu1 %v7698_v29  ;;  %v7751_v29 = vld [vmem:[%s9376_s1 + $0x464] ss:$8 sps:$4 sm:$0xff]  }
  0xe0   :  { %1336 = vmatprep.subr.bf16.mxu0 %v7703_v34  ;;  %2944 = vmatprep.subr.bf16.mxu1 %v7703_v34 }
  0xe2   :  { %1191 = vmatmul.mubr.bf16.vlgmr.msra.gmra.mrb[0].mxu0 %v1075_v36  ;;  %2801 = vmatmul.mubr.bf16.vlgmr.msra.gmra.mrb[0].mxu1 %v2685_v37  ;;  %v7752_v36 = vld [vmem:[%s9376_s1 + $0x470] ss:$8 sps:$4 sm:$0xff]  }
  0xe3   :  { %1337 = vmatpush1.bf16.msra.mxu0 %v7701_v35  ;;  %2945 = vmatpush1.bf16.msra.mxu1 %v7701_v35  ;;  %v7754_v35 = vld [vmem:[%s9376_s1 + $0x474] ss:$8 sps:$4 sm:$0xff]  }
  0xe4   :  { %1338 = vmatprep.subr.bf16.mxu0 %v7712_v38  ;;  %2946 = vmatprep.subr.bf16.mxu1 %v7712_v38  ;;  %v1415_v38 = vrot.slane %v8659_v44, 3  ;;  %v7768_v44 = vld [vmem:[%s9378_s3 + $0xb4] ss:$8 sps:$4 sm:$0xff]  }
  0xe5   :  { %1200 = vmatprep.mubr.bf16.mxu0 %v8411_v0  ;;  %2810 = vmatprep.mubr.bf16.mxu1 %v8411_v0 }
  0xe7   :  { %1339 = vmatpush1.bf16.msra.mxu0 %v7710_v39  ;;  %2947 = vmatpush1.bf16.msra.mxu1 %v7710_v39 }
  0xe8   :  { %1340 = vmatprep.subr.bf16.mxu0 %v7715_v40  ;;  %2948 = vmatprep.subr.bf16.mxu1 %v7715_v40 }
  0xea   :  { %1201 = vmatmul.mubr.bf16.gmra.mrb[4].mxu0 %v1074_v31  ;;  %2811 = vmatmul.mubr.bf16.gmra.mrb[4].mxu1 %v2684_v33  ;;  %v3001_v31 = vld [vmem:[%s9375_s0 + $0x18] sm:$0x8]  ;;  %v6397_v33 = vcombine.low %v1393_v30, %v8579_v8  ;;  %v3022_v8 = vrot.slane %v8661_v45, 3 }
  0xeb   :  { %1341 = vmatpush1.bf16.msra.mxu0 %v7713_v19  ;;  %2949 = vmatpush1.bf16.msra.mxu1 %v7713_v19  ;;  %v6682_v34 = vcombine.low %v3001_v31, %v8595_v16  ;;  %v7759_v19 = vld [vmem:[%s9378_s3 + $0x84] ss:$8 sps:$4 sm:$0xff]   ;;  %v7766_v45 = vld [vmem:[%s9378_s3 + $0xb0] ss:$8 sps:$4 sm:$0xff]  }
  0xec   :  { %1342 = vmatprep.subr.bf16.mxu0 %v7718_v21  ;;  %2950 = vmatprep.subr.bf16.mxu1 %v7718_v21  ;;  %v1414_v37 = vrot.slane %v6397_v33, 3  ;;  %v7757_v21 = vld [vmem:[%s9378_s3 + $0x80] ss:$8 sps:$4 sm:$0xff]  }
  0xed   :  { %1368 = vmatprep.mubr.bf16.mxu0 %v8411_v0  ;;  %2976 = vmatprep.mubr.bf16.mxu1 %v8411_v0  ;;  %v3021_v39 = vrot.slane %v6682_v34, 3 }
  0xee   :  { %v1416_v16 = vsel %vm562_vm2, %v1414_v37, %v1415_v38 }
  0xef   :  { %1343 = vmatpush1.bf16.msra.mxu0 %v7716_v2  ;;  %2951 = vmatpush1.bf16.msra.mxu1 %v7716_v2  ;;  %v3023_v40 = vsel %vm562_vm2, %v3021_v39, %v3022_v8  ;;  %v7760_v2 = vld [vmem:[%s9378_s3 + $0x90] ss:$8 sps:$4 sm:$0xff]   ;;  %vm8016_vm2 = vmmov 0  }
  0xf0   :  { %1344 = vmatprep.subr.bf16.mxu0 %v7721_v43  ;;  %2952 = vmatprep.subr.bf16.mxu1 %v7721_v43  ;;  %v7763_v43 = vld [vmem:[%s9378_s3 + $0xa0] ss:$8 sps:$4 sm:$0xff]  }
  0xf3   :  { %1345 = vmatpush1.bf16.msra.mxu0 %v7719_v46  ;;  %2953 = vmatpush1.bf16.msra.mxu1 %v7719_v46  ;;  %v7769_v46 = vld [vmem:[%s9378_s3 + $0xc0] ss:$8 sps:$4 sm:$0xff]  }
  0xf4   :  { %1346 = vmatprep.subr.bf16.mxu0 %v7724_v47  ;;  %2954 = vmatprep.subr.bf16.mxu1 %v7724_v47  ;;  %v7771_v47 = vld [vmem:[%s9378_s3 + $0xc4] ss:$8 sps:$4 sm:$0xff]  }
  0xf7   :  { %1347 = vmatpush1.bf16.msra.mxu0 %v7722_v52  ;;  %2955 = vmatpush1.bf16.msra.mxu1 %v7722_v52  ;;  %v7780_v52 = vld [vmem:[%s9378_s3 + $0xf4] ss:$8 sps:$4 sm:$0xff]  }
  0xf8   :  { %1348 = vmatprep.subr.bf16.mxu0 %v7727_v57  ;;  %2956 = vmatprep.subr.bf16.mxu1 %v7727_v57 }
  0xfb   :  { %1349 = vmatpush1.bf16.msra.mxu0 %v7725_v62  ;;  %2957 = vmatpush1.bf16.msra.mxu1 %v7725_v62 }
  0xfc   :  { %1350 = vmatprep.subr.bf16.mxu0 %v7730_v11  ;;  %2958 = vmatprep.subr.bf16.mxu1 %v7730_v11 }
  0xff   :  { %1351 = vmatpush1.bf16.msra.mxu0 %v7728_v13  ;;  %2959 = vmatpush1.bf16.msra.mxu1 %v7728_v13 }
 0x100   :  { %1499 = vmatprep.subr.bf16.mxu0 %v7733_v5  ;;  %3106 = vmatprep.subr.bf16.mxu1 %v7733_v5 }
 0x102   :  { %1369 = vmatmul.mubr.bf16.vlgmr.msra.gmra.mrb[0].mxu0 %v1253_v7  ;;  %2977 = vmatmul.mubr.bf16.vlgmr.msra.gmra.mrb[0].mxu1 %v2861_v17 }
 0x103   :  { %1500 = vmatpush1.bf16.msra.mxu0 %v7731_v6  ;;  %3107 = vmatpush1.bf16.msra.mxu1 %v7731_v6 }
 0x104   :  { %1501 = vmatprep.subr.bf16.mxu0 %v7736_v18  ;;  %3108 = vmatprep.subr.bf16.mxu1 %v7736_v18 }
 0x105   :  { %1378 = vmatprep.mubr.bf16.mxu0 %v8411_v0  ;;  %2986 = vmatprep.mubr.bf16.mxu1 %v8411_v0 }
 0x107   :  { %1502 = vmatpush1.bf16.msra.mxu0 %v7734_v15  ;;  %3109 = vmatpush1.bf16.msra.mxu1 %v7734_v15 }
 0x108   :  { %1503 = vmatprep.subr.bf16.mxu0 %v7739_v20  ;;  %3110 = vmatprep.subr.bf16.mxu1 %v7739_v20 }
 0x10a   :  { %1379 = vmatmul.mubr.bf16.gmra.mrb[4].mxu0 %v1252_v14  ;;  %2987 = vmatmul.mubr.bf16.gmra.mrb[4].mxu1 %v2860_v4 }
 0x10b   :  { %1504 = vmatpush1.bf16.msra.mxu0 %v7737_v22  ;;  %3111 = vmatpush1.bf16.msra.mxu1 %v7737_v22 }
 0x10c   :  { %1505 = vmatprep.subr.bf16.mxu0 %v7742_v23  ;;  %3112 = vmatprep.subr.bf16.mxu1 %v7742_v23 }
 0x10d   :  { %1531 = vmatprep.mubr.bf16.mxu0 %v8411_v0  ;;  %3138 = vmatprep.mubr.bf16.mxu1 %v8411_v0 }
 0x10f   :  { %1506 = vmatpush1.bf16.msra.mxu0 %v7740_v24  ;;  %3113 = vmatpush1.bf16.msra.mxu1 %v7740_v24 }
 0x110   :  { %1507 = vmatprep.subr.bf16.mxu0 %v7745_v25  ;;  %3114 = vmatprep.subr.bf16.mxu1 %v7745_v25 }
 0x113   :  { %1508 = vmatpush1.bf16.msra.mxu0 %v7743_v26  ;;  %3115 = vmatpush1.bf16.msra.mxu1 %v7743_v26 }
 0x114   :  { %1509 = vmatprep.subr.bf16.mxu0 %v7748_v27  ;;  %3116 = vmatprep.subr.bf16.mxu1 %v7748_v27 }
 0x117   :  { %1510 = vmatpush1.bf16.msra.mxu0 %v7746_v28  ;;  %3117 = vmatpush1.bf16.msra.mxu1 %v7746_v28 }
 0x118   :  { %1511 = vmatprep.subr.bf16.mxu0 %v7751_v29  ;;  %3118 = vmatprep.subr.bf16.mxu1 %v7751_v29 }
 0x11b   :  { %1512 = vmatpush1.bf16.msra.mxu0 %v7749_v32  ;;  %3119 = vmatpush1.bf16.msra.mxu1 %v7749_v32 }
 0x11c   :  { %1513 = vmatprep.subr.bf16.mxu0 %v7754_v35  ;;  %3120 = vmatprep.subr.bf16.mxu1 %v7754_v35 }
 0x11f   :  { %1514 = vmatpush1.bf16.msra.mxu0 %v7752_v36  ;;  %3121 = vmatpush1.bf16.msra.mxu1 %v7752_v36 }
 0x120   :  { %3376 = vmatprep.subr.bf16.mxu0 %v7759_v19  ;;  %4696 = vmatprep.subr.bf16.mxu1 %v7759_v19 }
 0x122   :  { %1532 = vmatmul.mubr.bf16.vlgmr.msra.gmra.mrb[0].mxu0 %v1416_v16  ;;  %3139 = vmatmul.mubr.bf16.vlgmr.msra.gmra.mrb[0].mxu1 %v3023_v40 }
 0x123   :  { %1541 = vmatprep.mubr.bf16.mxu0 %v8411_v0  ;;  %3148 = vmatprep.mubr.bf16.mxu1 %v8411_v0 }
 0x124   :  { %3377 = vmatpush1.bf16.msra.mxu0 %v7757_v21  ;;  %4697 = vmatpush1.bf16.msra.mxu1 %v7757_v21 }
 0x125   :  { %3378 = vmatprep.subr.bf16.mxu0 %v7762_v41  ;;  %4698 = vmatprep.subr.bf16.mxu1 %v7762_v41 }
 0x128   :  { %3379 = vmatpush1.bf16.msra.mxu0 %v7760_v2  ;;  %4699 = vmatpush1.bf16.msra.mxu1 %v7760_v2 }
 0x129   :  { %3380 = vmatprep.subr.bf16.mxu0 %v7765_v42  ;;  %4700 = vmatprep.subr.bf16.mxu1 %v7765_v42 }
 0x12a   :  { %1542 = vmatmul.mubr.bf16.gmra.mrb[4].mxu0 %v1415_v38  ;;  %3149 = vmatmul.mubr.bf16.gmra.mrb[4].mxu1 %v3022_v8 }
 0x12b   :  { %3408 = vmatprep.mubr.bf16.mxu0 %v8411_v0  ;;  %4728 = vmatprep.mubr.bf16.mxu1 %v8411_v0 }
 0x12c   :  { %3381 = vmatpush1.bf16.msra.mxu0 %v7763_v43  ;;  %4701 = vmatpush1.bf16.msra.mxu1 %v7763_v43 }
 0x12d   :  { %3382 = vmatprep.subr.bf16.mxu0 %v7768_v44  ;;  %4702 = vmatprep.subr.bf16.mxu1 %v7768_v44 }
 0x130   :  { %3383 = vmatpush1.bf16.msra.mxu0 %v7766_v45  ;;  %4703 = vmatpush1.bf16.msra.mxu1 %v7766_v45 }
 0x131   :  { %3384 = vmatprep.subr.bf16.mxu0 %v7771_v47  ;;  %4704 = vmatprep.subr.bf16.mxu1 %v7771_v47 }
 0x134   :  { %3385 = vmatpush1.bf16.msra.mxu0 %v7769_v46  ;;  %4705 = vmatpush1.bf16.msra.mxu1 %v7769_v46  ;;  %v1573_v46 = vld [vmem:[%s9377_s2] sm:$0x1] }
 0x135   :  { %3386 = vmatprep.subr.bf16.mxu0 %v7774_v48  ;;  %4706 = vmatprep.subr.bf16.mxu1 %v7774_v48 }
 0x138   :  { %3387 = vmatpush1.bf16.msra.mxu0 %v7772_v49  ;;  %4707 = vmatpush1.bf16.msra.mxu1 %v7772_v49 }
 0x139   :  { %3388 = vmatprep.subr.bf16.mxu0 %v7777_v50  ;;  %4708 = vmatprep.subr.bf16.mxu1 %v7777_v50 }
 0x13c   :  { %3389 = vmatpush1.bf16.msra.mxu0 %v7775_v51  ;;  %4709 = vmatpush1.bf16.msra.mxu1 %v7775_v51 }
 0x13d   :  { %3390 = vmatprep.subr.bf16.mxu0 %v7780_v52  ;;  %4710 = vmatprep.subr.bf16.mxu1 %v7780_v52 }
 0x140   :  { %3391 = vmatpush1.bf16.msra.mxu0 %v7778_v53  ;;  %4711 = vmatpush1.bf16.msra.mxu1 %v7778_v53  ;;  %v1598_v53 = vld [vmem:[%s9377_s2] sm:$0x1] }
 0x141   :  { %3497 = vmatprep.subr.bf16.mxu0 %v7783_v54  ;;  %4817 = vmatprep.subr.bf16.mxu1 %v7783_v54 }
 0x1f5   :  { %v1533_v55 = vpop.f32.mrb[0].mxu0  ;;  %v3140_v56 = vpop.f32.mrb[0].mxu1 }
 0x1f6   :  { %v1535_v57 = vpop.f32.mrb[1].mxu0  ;;  %v3142_v58 = vpop.f32.mrb[1].mxu1 }
 0x1f7   :  { %v1556_v59 = vmax.f32 %v1533_v55, %v1535_v57  ;;  %v3163_v60 = vmax.f32 %v3140_v56, %v3142_v58  ;;  %v1537_v61 = vpop.f32.mrb[2].mxu0  ;;  %v3144_v62 = vpop.f32.mrb[2].mxu1 }
 0x1f8   :  { %v1539_v63 = vpop.f32.mrb[3].mxu0  ;;  %v3146_v1 = vpop.f32.mrb[3].mxu1 }
 0x1f9   :  { %1559 = vst [vmem:[#allocation3] sm:$0xff] %v1556_v59  ;;  %v1557_v9 = vmax.f32 %v1537_v61, %v1539_v63  ;;  %v3164_v10 = vmax.f32 %v3144_v62, %v3146_v1 }
 0x1fb   :  { %1560 = vst [vmem:[#allocation3 + $0x8] sm:$0xff] %v1557_v9 }
 0x1fd   :  { %v1543_v11 = vpop.f32.mrb[4].mxu0  ;;  %v3150_v12 = vpop.f32.mrb[4].mxu1 }
 0x1fe   :  { %v1545_v13 = vpop.f32.mrb[5].mxu0  ;;  %v3152_v14 = vpop.f32.mrb[5].mxu1 }
 0x1ff   :  { %v1558_v3 = vmax.f32 %v1543_v11, %v1545_v13  ;;  %v3165_v4 = vmax.f32 %v3150_v12, %v3152_v14  ;;  %v1547_v5 = vpop.f32.mrb[6].mxu0  ;;  %v3154_v6 = vpop.f32.mrb[6].mxu1 }
 0x200   :  { %v1562_v7 = vld [vmem:[#allocation3] sm:$0x3]  ;;  %v1563_v17 = vld [vmem:[#allocation3 + $0x6] sm:$0x3]  ;;  %v1588_v18 = vld [vmem:[#allocation3 + $0x2] sm:$0x3] }
 0x201   :  { %v1564_v15 = vmax.f32 %v1562_v7, %v1563_v17  ;;  %3166 = vst [vmem:[#allocation3] sm:$0xff] %v3163_v60  ;;  %1561 = vst [vmem:[#allocation3 + $0x10] sm:$0x3f] %v1558_v3  ;;  %v1548_v20 = vpop.f32.mrb[7].mxu0  ;;  %v3155_v22 = vpop.f32.mrb[7].mxu1 }
 0x202   :  { %v1589_v23 = vld [vmem:[#allocation3 + $0x8] sm:$0x3]  ;;  %v1611_v24 = vld [vmem:[#allocation3 + $0xc] sm:$0x3]  ;;  %v1636_v25 = vld [vmem:[#allocation3 + $0xe] sm:$0x3] }
 0x203   :  { %v1566_v26 = vsel %vm1565_vm6, %v1564_v15, -inf  ;;  %v1590_v27 = vmax.f32 %v1588_v18, %v1589_v23  ;;  %3167 = vst [vmem:[#allocation3 + $0x8] sm:$0xff] %v3164_v10  ;;  %v3179_v18 = vld [vmem:[%s9377_s2] sm:$0x1]  ;;  %v1585_v22 = vld [vmem:[#allocation2] sm:$0x4] }
 0x204   :  { %v1567_v28 = vrot.slane %v1566_v26, 4 }
 0x205   :  { %v1591_v29 = vsel %vm1565_vm6, %v1590_v27, -inf }
 0x206   :  { %v1568_v30 = vmax.f32 %v1566_v26, %v1567_v28  ;;  %v1592_v31 = vrot.slane %v1591_v29, 4 }
 0x208   :  { %v1569_v32 = vrot.slane %v1568_v30, 2  ;;  %v3169_v33 = vld [vmem:[#allocation3] sm:$0x3]  ;;  %v3170_v34 = vld [vmem:[#allocation3 + $0x6] sm:$0x3]  ;;  %v1593_v35 = vmax.f32 %v1591_v29, %v1592_v31 }
 0x209   :  { %v3171_v36 = vmax.f32 %v3169_v33, %v3170_v34  ;;  %v1612_v37 = vld [vmem:[#allocation3 + $0x12] sm:$0x3]  ;;  %v1637_v38 = vld [vmem:[#allocation3 + $0x14] sm:$0x3]  ;;  %v3191_v8 = vld [vmem:[#allocation3 + $0x2] sm:$0x3] }
 0x20a   :  { %v1570_v39 = vmax.f32 %v1568_v30, %v1569_v32  ;;  %v1594_v16 = vrot.slane %v1593_v35, 2  ;;  %v3192_v40 = vld [vmem:[#allocation3 + $0x8] sm:$0x3]  ;;  %v1613_v19 = vmax.f32 %v1611_v24, %v1612_v37  ;;  %v1638_v21 = vmax.f32 %v1636_v25, %v1637_v38  ;;  %3168 = vst [vmem:[#allocation3 + $0x10] sm:$0x3f] %v3165_v4 }
 0x20b   :  { %v3172_v41 = vsel %vm1565_vm6, %v3171_v36, -inf  ;;  %v3193_v2 = vmax.f32 %v3191_v8, %v3192_v40  ;;  %v3211_v13 = vld [vmem:[#allocation3 + $0xc] sm:$0x3]  ;;  %v3233_v14 = vld [vmem:[#allocation3 + $0xe] sm:$0x3] }
 0x20c   :  { %v1571_v42 = vrot.slane %v1570_v39, 1  ;;  %v3173_v43 = vrot.slane %v3172_v41, 4  ;;  %v1595_v44 = vmax.f32 %v1593_v35, %v1594_v16  ;;  %v1614_v45 = vsel %vm1565_vm6, %v1613_v19, -inf  ;;  %v1608_v31 = vld [vmem:[#allocation2] sm:$0x8] }
 0x20d   :  { %v3194_v47 = vsel %vm1565_vm6, %v3193_v2, -inf  ;;  %v1615_v48 = vrot.slane %v1614_v45, 4  ;;  %v1639_v49 = vsel %vm1565_vm6, %v1638_v21, -inf  ;;  %v1621_v33 = vld [vmem:[%s9377_s2] sm:$0x1] }
 0x20e   :  { %v1572_v50 = vmax.f32 %v1570_v39, %v1571_v42  ;;  %v3174_v51 = vmax.f32 %v3172_v41, %v3173_v43  ;;  %v1596_v52 = vrot.slane %v1595_v44, 1  ;;  %v3195_v54 = vrot.slane %v3194_v47, 4  ;;  %v3201_v35 = vld [vmem:[%s9377_s2] sm:$0x1] }
 0x20f   :  { %v1616_v55 = vmax.f32 %v1614_v45, %v1615_v48  ;;  %v1640_v56 = vrot.slane %v1639_v49, 4  ;;  %v1646_v21 = vld [vmem:[%s9377_s2] sm:$0x1] }
 0x210   :  { %v1574_v57 = vadd.f32 %v1573_v46, %v1572_v50  ;;  %v3175_v58 = vrot.slane %v3174_v51, 2  ;;  %v1597_v59 = vmax.f32 %v1595_v44, %v1596_v52  ;;  %v3196_v60 = vmax.f32 %v3194_v47, %v3195_v54  ;;  %v3188_v54 = vld [vmem:[#allocation2 + $0x8] sm:$0x4] }
 0x211   :  { %v1617_v61 = vrot.slane %v1616_v55, 2  ;;  %v1641_v62 = vmax.f32 %v1639_v49, %v1640_v56  ;;  %v3212_v63 = vld [vmem:[#allocation3 + $0x12] sm:$0x3]  ;;  %v3234_v1 = vld [vmem:[#allocation3 + $0x14] sm:$0x3] }
 0x212   :  { %v1575_v9 = vmax.f32 %v1574_v57, 0.0  ;;  %v3176_v10 = vmax.f32 %v3174_v51, %v3175_v58  ;;  %v1599_v11 = vadd.f32 %v1598_v53, %v1597_v59  ;;  %v3197_v12 = vrot.slane %v3196_v60, 2 }
 0x213   :  { %v1618_v3 = vmax.f32 %v1616_v55, %v1617_v61  ;;  %v1642_v4 = vrot.slane %v1641_v62, 2  ;;  %v3213_v5 = vmax.f32 %v3211_v13, %v3212_v63  ;;  %v3235_v6 = vmax.f32 %v3233_v14, %v3234_v1  ;;  %v3208_v61 = vld [vmem:[#allocation2 + $0x8] sm:$0x8] }
 0x214   :  { %v1576_v7 = vpack.c.bf16 %v1575_v9, %v1575_v9  ;;  %v3177_v17 = vrot.slane %v3176_v10, 1  ;;  %v1600_v15 = vmax.f32 %v1599_v11, 0.0  ;;  %v3198_v20 = vmax.f32 %v3196_v60, %v3197_v12  ;;  %v7811_v63 = vld [vmem:[%s9378_s3 + $0x120] ss:$8 sps:$4 sm:$0xff]  }
 0x215   :  { %v1619_v23 = vrot.slane %v1618_v3, 1  ;;  %v1643_v24 = vmax.f32 %v1641_v62, %v1642_v4  ;;  %v3214_v25 = vsel %vm1565_vm6, %v3213_v5, -inf  ;;  %v3236_v26 = vsel %vm1565_vm6, %v3235_v6, -inf  ;;  %v1633_v62 = vld [vmem:[#allocation2] sm:$0x10] }
 0x216   :  { %v1578_v27 = vshll.u32 %v1576_v7, 16  ;;  %v3178_v29 = vmax.f32 %v3176_v10, %v3177_v17  ;;  %v1601_v30 = vpack.c.bf16 %v1600_v15, %v1600_v15  ;;  %v3199_v32 = vrot.slane %v3198_v20, 1  ;;  %v1655_v10 = vld [vmem:[#allocation2] sm:$0x20]  ;;  %v3221_v4 = vld [vmem:[%s9377_s2] sm:$0x1] }
 0x217   :  { %v1620_v36 = vmax.f32 %v1618_v3, %v1619_v23  ;;  %v1644_v37 = vrot.slane %v1643_v24, 1  ;;  %v3215_v38 = vrot.slane %v3214_v25, 4  ;;  %v3237_v39 = vrot.slane %v3236_v26, 4  ;;  %v3243_v5 = vld [vmem:[%s9377_s2] sm:$0x1] }
 0x218   :  { %v1580_v8 = vrot.slane %v1578_v27, 6  ;;  %v3180_v16 = vadd.f32 %v3179_v18, %v3178_v29  ;;  %v1603_v40 = vrot.slane %v1601_v30, 5  ;;  %v3200_v19 = vmax.f32 %v3198_v20, %v3199_v32  ;;  %v7825_v3 = vld [vmem:[%s9378_s3 + $0x164] ss:$8 sps:$4 sm:$0xff]  }
 0x219   :  { %v1622_v41 = vadd.f32 %v1621_v33, %v1620_v36  ;;  %v1645_v2 = vmax.f32 %v1643_v24, %v1644_v37  ;;  %v3216_v42 = vmax.f32 %v3214_v25, %v3215_v38  ;;  %v3238_v43 = vmax.f32 %v3236_v26, %v3237_v39  ;;  %v7781_v33 = vld [vmem:[%s9378_s3] ss:$8 sps:$4 sm:$0xff]   ;;  %v7786_v36 = vld [vmem:[%s9378_s3 + $0x14] ss:$8 sps:$4 sm:$0xff]   ;;  %v3250_v39 = vld [vmem:[#allocation2 + $0x8] sm:$0x20] }
 0x21a   :  { %v1586_v44 = vsel %vm8832_vm12, %v1580_v8, %v1585_v22  ;;  %v3181_v45 = vmax.f32 %v3180_v16, 0.0  ;;  %v1609_v46 = vsel %vm8841_vm13, %v1603_v40, %v1608_v31  ;;  %v3202_v47 = vadd.f32 %v3201_v35, %v3200_v19  ;;  %v3230_v8 = vld [vmem:[#allocation2 + $0x8] sm:$0x10]  ;;  %v7784_v19 = vld [vmem:[%s9378_s3 + $0x10] ss:$8 sps:$4 sm:$0xff]  }
 0x21b   :  { %1587 = vst [vmem:[#allocation2] sm:$0x4] %v1586_v44  ;;  %1610 = vst [vmem:[#allocation2] sm:$0x8] %v1609_v46  ;;  %v1623_v48 = vmax.f32 %v1622_v41, 0.0  ;;  %v1647_v49 = vadd.f32 %v1646_v21, %v1645_v2  ;;  %v3217_v50 = vrot.slane %v3216_v42, 2 }
 0x21c   :  { %v3239_v51 = vrot.slane %v3238_v43, 2  ;;  %v3182_v52 = vpack.c.bf16 %v3181_v45, %v3181_v45  ;;  %v3203_v53 = vmax.f32 %v3202_v47, 0.0  ;;  %v7789_v41 = vld [vmem:[%s9378_s3 + $0x24] ss:$8 sps:$4 sm:$0xff]   ;;  %v7787_v45 = vld [vmem:[%s9378_s3 + $0x20] ss:$8 sps:$4 sm:$0xff]  }
 0x21d   :  { %v1624_v55 = vpack.c.bf16 %v1623_v48, %v1623_v48  ;;  %v1648_v56 = vmax.f32 %v1647_v49, 0.0  ;;  %v3218_v57 = vmax.f32 %v3216_v42, %v3217_v50  ;;  %v7792_v47 = vld [vmem:[%s9378_s3 + $0x34] ss:$8 sps:$4 sm:$0xff]   ;;  %v7790_v48 = vld [vmem:[%s9378_s3 + $0x30] ss:$8 sps:$4 sm:$0xff]  }
 0x21e   :  { %v3240_v58 = vmax.f32 %v3238_v43, %v3239_v51  ;;  %v3184_v59 = vshll.u32 %v3182_v52, 16  ;;  %v3204_v60 = vpack.c.bf16 %v3203_v53, %v3203_v53  ;;  %v7795_v49 = vld [vmem:[%s9378_s3 + $0x44] ss:$8 sps:$4 sm:$0xff]   ;;  %v7793_v50 = vld [vmem:[%s9378_s3 + $0x40] ss:$8 sps:$4 sm:$0xff]  }
 0x21f   :  { %v1626_v1 = vshll.u32 %v1624_v55, 16  ;;  %v1649_v9 = vpack.c.bf16 %v1648_v56, %v1648_v56  ;;  %v3219_v11 = vrot.slane %v3218_v57, 1  ;;  %v7798_v51 = vld [vmem:[%s9378_s3 + $0x54] ss:$8 sps:$4 sm:$0xff]   ;;  %v7796_v52 = vld [vmem:[%s9378_s3 + $0x50] ss:$8 sps:$4 sm:$0xff]  }
 0x220   :  { %v3241_v12 = vrot.slane %v3240_v58, 1  ;;  %v3186_v13 = vrot.slane %v3184_v59, 6  ;;  %v3206_v14 = vrot.slane %v3204_v60, 5  ;;  %v7801_v53 = vld [vmem:[%s9378_s3 + $0x64] ss:$8 sps:$4 sm:$0xff]  }
 0x221   :  { %v1628_v6 = vrot.slane %v1626_v1, 4  ;;  %v1651_v7 = vrot.slane %v1649_v9, 3  ;;  %v3220_v17 = vmax.f32 %v3218_v57, %v3219_v11  ;;  %v7804_v55 = vld [vmem:[%s9378_s3 + $0x74] ss:$8 sps:$4 sm:$0xff]   ;;  %v7802_v56 = vld [vmem:[%s9378_s3 + $0x70] ss:$8 sps:$4 sm:$0xff]  }
 0x222   :  { %v3242_v18 = vmax.f32 %v3240_v58, %v3241_v12  ;;  %v3189_v15 = vsel %vm8832_vm12, %v3186_v13, %v3188_v54  ;;  %v3209_v20 = vsel %vm8841_vm13, %v3206_v14, %v3208_v61  ;;  %v3270_v22 = vld [vmem:[#allocation2] sm:$0xf]  ;;  %v7807_v57 = vld [vmem:[%s9378_s3 + $0x104] ss:$8 sps:$4 sm:$0xff]   ;;  %v7810_v59 = vld [vmem:[%s9378_s3 + $0x114] ss:$8 sps:$4 sm:$0xff]  }
 0x223   :  { %3190 = vst [vmem:[#allocation2 + $0x8] sm:$0x4] %v3189_v15  ;;  %3210 = vst [vmem:[#allocation2 + $0x8] sm:$0x8] %v3209_v20  ;;  %v1634_v23 = vsel %vm8863_vm1, %v1628_v6, %v1633_v62  ;;  %v1656_v24 = vsel %vm8857_vm0, %v1651_v7, %v1655_v10  ;;  %v3222_v25 = vadd.f32 %v3221_v4, %v3220_v17  ;;  %v3291_v27 = vshll.u32 %v3270_v22, 16 }
 0x224   :  { %v3244_v26 = vadd.f32 %v3243_v5, %v3242_v18  ;;  %1635 = vst [vmem:[#allocation2] sm:$0x10] %v1634_v23  ;;  %1657 = vst [vmem:[#allocation2] sm:$0x20] %v1656_v24  ;;  %v3289_v30 = vshrl.u32 %v3270_v22, 16 }
 0x225   :  { %v3223_v29 = vmax.f32 %v3222_v25, 0.0  ;;  %v3293_v31 = vrot.slane %v3291_v27, 1  ;;  %v7799_v54 = vld [vmem:[%s9378_s3 + $0x60] ss:$8 sps:$4 sm:$0xff]   ;;  %v7808_v61 = vld [vmem:[%s9378_s3 + $0x110] ss:$8 sps:$4 sm:$0xff]  }
 0x226   :  { %v3245_v28 = vmax.f32 %v3244_v26, 0.0  ;;  %v7805_v58 = vld [vmem:[%s9378_s3 + $0x100] ss:$8 sps:$4 sm:$0xff]   ;;  %v7813_v62 = vld [vmem:[%s9378_s3 + $0x124] ss:$8 sps:$4 sm:$0xff]  }
 0x227   :  { %v3224_v32 = vpack.c.bf16 %v3223_v29, %v3223_v29  ;;  %v3294_v35 = vor.u32 %v3293_v31, %v3289_v30  ;;  %v3253_v60 = vld [vmem:[#allocation2] sm:$0x7]  ;;  %v7816_v9 = vld [vmem:[%s9378_s3 + $0x134] ss:$8 sps:$4 sm:$0xff]   ;;  %v7814_v10 = vld [vmem:[%s9378_s3 + $0x130] ss:$8 sps:$4 sm:$0xff]  }
 0x228   :  { %v3246_v34 = vpack.c.bf16 %v3245_v28, %v3245_v28  ;;  %v7819_v11 = vld [vmem:[%s9378_s3 + $0x144] ss:$8 sps:$4 sm:$0xff]   ;;  %v7817_v12 = vld [vmem:[%s9378_s3 + $0x140] ss:$8 sps:$4 sm:$0xff]   ;;  %v7822_v13 = vld [vmem:[%s9378_s3 + $0x154] ss:$8 sps:$4 sm:$0xff]  }
 0x229   :  { %v3226_v37 = vshll.u32 %v3224_v32, 16  ;;  %3409 = vmatmul.mubr.bf16.vlgmr.msra.gmra.mrb[8].mxu0 %v3294_v35  ;;  %v7820_v14 = vld [vmem:[%s9378_s3 + $0x150] ss:$8 sps:$4 sm:$0xff]   ;;  %v7823_v4 = vld [vmem:[%s9378_s3 + $0x160] ss:$8 sps:$4 sm:$0xff]  }
 0x22a   :  { %v3248_v38 = vrot.slane %v3246_v34, 3  ;;  %v4591_v16 = vld [vmem:[#allocation2 + $0x8] sm:$0xf]  ;;  %3498 = vmatpush1.bf16.msra.mxu0 %v7781_v33  ;;  %3529 = vmatprep.mubr.bf16.mxu0 %v8411_v0  ;;  %v7828_v5 = vld [vmem:[%s9378_s3 + $0x174] ss:$8 sps:$4 sm:$0xff]  }
 0x22b   :  { %v3228_v40 = vrot.slane %v3226_v37, 4  ;;  %v4611_v21 = vshll.u32 %v4591_v16, 16  ;;  %3499 = vmatprep.subr.bf16.mxu0 %v7786_v36  ;;  %v4609_v43 = vshrl.u32 %v4591_v16, 16  ;;  %v4574_v1 = vld [vmem:[#allocation2 + $0x8] sm:$0x7] }
 0x22c   :  { %v3251_v2 = vsel %vm8857_vm0, %v3248_v38, %v3250_v39  ;;  %v7826_v6 = vld [vmem:[%s9378_s3 + $0x170] ss:$8 sps:$4 sm:$0xff]   ;;  %v7831_v7 = vld [vmem:[%s9378_s3 + $0x184] ss:$8 sps:$4 sm:$0xff]   ;;  %v3538_v17 = vld [vmem:[#allocation2] sm:$0xe] }
 0x22d   :  { %v3231_v42 = vsel %vm8863_vm1, %v3228_v40, %v3230_v8  ;;  %v4613_v44 = vrot.slane %v4611_v21, 1  ;;  %3252 = vst [vmem:[#allocation2 + $0x8] sm:$0x20] %v3251_v2  ;;  %v7829_v18 = vld [vmem:[%s9378_s3 + $0x180] ss:$8 sps:$4 sm:$0xff]   ;;  %v3557_v15 = vrot.slane %v3538_v17, 1 }
 0x22e   :  { %3232 = vst [vmem:[#allocation2 + $0x8] sm:$0x10] %v3231_v42  ;;  %3500 = vmatpush1.bf16.msra.mxu0 %v7784_v19  ;;  %v7834_v20 = vld [vmem:[%s9378_s3 + $0x194] ss:$8 sps:$4 sm:$0xff]   ;;  %v7832_v22 = vld [vmem:[%s9378_s3 + $0x190] ss:$8 sps:$4 sm:$0xff]  }
 0x22f   :  { %v4614_v46 = vor.u32 %v4613_v44, %v4609_v43  ;;  %3501 = vmatprep.subr.bf16.mxu0 %v7789_v41  ;;  %v7837_v23 = vld [vmem:[%s9378_s3 + $0x1a4] ss:$8 sps:$4 sm:$0xff]   ;;  %v4858_v24 = vld [vmem:[#allocation2 + $0x8] sm:$0xe]  ;;  %v7840_v27 = vld [vmem:[%s9378_s3 + $0x1b4] ss:$8 sps:$4 sm:$0xff]  }
 0x230   :  { %v7835_v25 = vld [vmem:[%s9378_s3 + $0x1a0] ss:$8 sps:$4 sm:$0xff]   ;;  %v4876_v26 = vrot.slane %v4858_v24, 1  ;;  %v7838_v29 = vld [vmem:[%s9378_s3 + $0x1b0] ss:$8 sps:$4 sm:$0xff]  }
 0x231   :  { %4729 = vmatmul.mubr.bf16.vlgmr.msra.gmra.mrb[8].mxu1 %v4614_v46  ;;  %v7843_v28 = vld [vmem:[%s9378_s3 + $0x1c4] ss:$8 sps:$4 sm:$0xff]   ;;  %v7841_v30 = vld [vmem:[%s9378_s3 + $0x1c0] ss:$8 sps:$4 sm:$0xff]   ;;  %v7846_v31 = vld [vmem:[%s9378_s3 + $0x1d4] ss:$8 sps:$4 sm:$0xff]  }
 0x232   :  { %4818 = vmatpush1.bf16.msra.mxu1 %v7781_v33  ;;  %4849 = vmatprep.mubr.bf16.mxu1 %v8411_v0  ;;  %v7844_v32 = vld [vmem:[%s9378_s3 + $0x1d0] ss:$8 sps:$4 sm:$0xff]   ;;  %v7849_v33 = vld [vmem:[%s9378_s3 + $0x1e4] ss:$8 sps:$4 sm:$0xff]   ;;  %v7847_v34 = vld [vmem:[%s9378_s3 + $0x1e0] ss:$8 sps:$4 sm:$0xff]  }
 0x233   :  { %3502 = vmatpush1.bf16.msra.mxu0 %v7787_v45  ;;  %4819 = vmatprep.subr.bf16.mxu1 %v7786_v36  ;;  %v7852_v35 = vld [vmem:[%s9378_s3 + $0x1f4] ss:$8 sps:$4 sm:$0xff]   ;;  %v7850_v36 = vld [vmem:[%s9378_s3 + $0x1f0] ss:$8 sps:$4 sm:$0xff]   ;;  %v7855_v37 = vld [vmem:[%s9378_s3 + $0x204] ss:$8 sps:$4 sm:$0xff]  }
 0x234   :  { %3503 = vmatprep.subr.bf16.mxu0 %v7792_v47  ;;  %v3682_v38 = vld [vmem:[#allocation2] sm:$0x1c]  ;;  %v7858_v16 = vld [vmem:[%s9378_s3 + $0x214] ss:$8 sps:$4 sm:$0xff]   ;;  %v7856_v40 = vld [vmem:[%s9378_s3 + $0x210] ss:$8 sps:$4 sm:$0xff]  }
 0x235   :  { %v7853_v39 = vld [vmem:[%s9378_s3 + $0x200] ss:$8 sps:$4 sm:$0xff]   ;;  %v3701_v8 = vrot.slane %v3682_v38, 2  ;;  %v7864_v42 = vld [vmem:[%s9378_s3 + $0x234] ss:$8 sps:$4 sm:$0xff]  }
 0x236   :  { %4820 = vmatpush1.bf16.msra.mxu1 %v7784_v19  ;;  %v7861_v19 = vld [vmem:[%s9378_s3 + $0x224] ss:$8 sps:$4 sm:$0xff]   ;;  %v7862_v43 = vld [vmem:[%s9378_s3 + $0x230] ss:$8 sps:$4 sm:$0xff]   ;;  %v7870_v46 = vld [vmem:[%s9378_s3 + $0x254] ss:$8 sps:$4 sm:$0xff]  }
 0x237   :  { %3504 = vmatpush1.bf16.msra.mxu0 %v7790_v48  ;;  %4821 = vmatprep.subr.bf16.mxu1 %v7789_v41  ;;  %v5001_v21 = vld [vmem:[#allocation2 + $0x8] sm:$0x1c] }
 0x238   :  { %3505 = vmatprep.subr.bf16.mxu0 %v7795_v49  ;;  %v7859_v41 = vld [vmem:[%s9378_s3 + $0x220] ss:$8 sps:$4 sm:$0xff]   ;;  %v5019_v2 = vrot.slane %v5001_v21, 2  ;;  %v7867_v44 = vld [vmem:[%s9378_s3 + $0x244] ss:$8 sps:$4 sm:$0xff]  }
 0x239   :  { %v7897_v17 = vld [vmem:[%s9378_s3 + $0x2e4] ss:$8 sps:$4 sm:$0xff]   ;;  %v7901_v24 = vld [vmem:[%s9378_s3 + $0x300] ss:$8 sps:$4 sm:$0xff]  }
 0x23a   :  { %4822 = vmatpush1.bf16.msra.mxu1 %v7787_v45  ;;  %v7865_v45 = vld [vmem:[%s9378_s3 + $0x240] ss:$8 sps:$4 sm:$0xff]   ;;  %v7921_v38 = vld [vmem:[%s9378_s3 + $0x364] ss:$8 sps:$4 sm:$0xff]  }
 0x23b   :  { %3506 = vmatpush1.bf16.msra.mxu0 %v7793_v50  ;;  %4823 = vmatprep.subr.bf16.mxu1 %v7792_v47  ;;  %v7868_v47 = vld [vmem:[%s9378_s3 + $0x250] ss:$8 sps:$4 sm:$0xff]   ;;  %v7925_v21 = vld [vmem:[%s9378_s3 + $0x380] ss:$8 sps:$4 sm:$0xff]  }
 0x23c   :  { %3507 = vmatprep.subr.bf16.mxu0 %v7798_v51 }
 0x23e   :  { %4824 = vmatpush1.bf16.msra.mxu1 %v7790_v48  ;;  %v7873_v48 = vld [vmem:[%s9378_s3 + $0x264] ss:$8 sps:$4 sm:$0xff]  }
 0x23f   :  { %3508 = vmatpush1.bf16.msra.mxu0 %v7796_v52  ;;  %4825 = vmatprep.subr.bf16.mxu1 %v7795_v49  ;;  %v3826_v49 = vld [vmem:[#allocation2] sm:$0x3c] }
 0x240   :  { %3509 = vmatprep.subr.bf16.mxu0 %v7801_v53 }
 0x242   :  { %4826 = vmatpush1.bf16.msra.mxu1 %v7793_v50  ;;  %v7871_v50 = vld [vmem:[%s9378_s3 + $0x260] ss:$8 sps:$4 sm:$0xff]  }
 0x243   :  { %3510 = vmatpush1.bf16.msra.mxu0 %v7799_v54  ;;  %4827 = vmatprep.subr.bf16.mxu1 %v7798_v51  ;;  %v7876_v51 = vld [vmem:[%s9378_s3 + $0x274] ss:$8 sps:$4 sm:$0xff]  }
 0x244   :  { %3511 = vmatprep.subr.bf16.mxu0 %v7804_v55 }
 0x246   :  { %4828 = vmatpush1.bf16.msra.mxu1 %v7796_v52  ;;  %v3845_v52 = vshrl.u32 %v3826_v49, 16 }
 0x247   :  { %3512 = vmatpush1.bf16.msra.mxu0 %v7802_v56  ;;  %4829 = vmatprep.subr.bf16.mxu1 %v7801_v53  ;;  %v3848_v53 = vshll.u32 %v3826_v49, 16  ;;  %v7939_v49 = vld [vmem:[%s9378_s3 + $0x3c4] ss:$8 sps:$4 sm:$0xff]  }
 0x248   :  { %3639 = vmatprep.subr.bf16.mxu0 %v7807_v57 }
 0x24a   :  { %3530 = vmatmul.mubr.bf16.vlgmr.msra.gmra.mrb[8].mxu0 %v3253_v60  ;;  %4830 = vmatpush1.bf16.msra.mxu1 %v7799_v54  ;;  %v7874_v54 = vld [vmem:[%s9378_s3 + $0x270] ss:$8 sps:$4 sm:$0xff]  }
 0x24b   :  { %3640 = vmatpush1.bf16.msra.mxu0 %v7805_v58  ;;  %4831 = vmatprep.subr.bf16.mxu1 %v7804_v55  ;;  %v3847_v55 = vrot.slane %v3845_v52, 2  ;;  %v7940_v52 = vld [vmem:[%s9378_s3 + $0x3d0] ss:$8 sps:$4 sm:$0xff]  }
 0x24c   :  { %3641 = vmatprep.subr.bf16.mxu0 %v7810_v59  ;;  %3671 = vmatprep.mubr.bf16.mxu0 %v8411_v0 }
 0x24e   :  { %4832 = vmatpush1.bf16.msra.mxu1 %v7802_v56  ;;  %v3850_v56 = vrot.slane %v3848_v53, 3  ;;  %v7945_v53 = vld [vmem:[%s9378_s3 + $0x3e4] ss:$8 sps:$4 sm:$0xff]  }
 0x24f   :  { %3642 = vmatpush1.bf16.msra.mxu0 %v7808_v61  ;;  %4958 = vmatprep.subr.bf16.mxu1 %v7807_v57  ;;  %v7879_v57 = vld [vmem:[%s9378_s3 + $0x284] ss:$8 sps:$4 sm:$0xff]  }
 0x250   :  { %3643 = vmatprep.subr.bf16.mxu0 %v7813_v62 }
 0x251   :  { %4850 = vmatmul.mubr.bf16.vlgmr.msra.gmra.mrb[8].mxu1 %v4574_v1  ;;  %v7880_v1 = vld [vmem:[%s9378_s3 + $0x290] ss:$8 sps:$4 sm:$0xff]  }
 0x252   :  { %4959 = vmatpush1.bf16.msra.mxu1 %v7805_v58  ;;  %4990 = vmatprep.mubr.bf16.mxu1 %v8411_v0  ;;  %v5144_v58 = vld [vmem:[#allocation2 + $0x8] sm:$0x3c] }
 0x253   :  { %3644 = vmatpush1.bf16.msra.mxu0 %v7811_v63  ;;  %4960 = vmatprep.subr.bf16.mxu1 %v7810_v59  ;;  %v7877_v59 = vld [vmem:[%s9378_s3 + $0x280] ss:$8 sps:$4 sm:$0xff]   ;;  %v5162_v60 = vshrl.u32 %v5144_v58, 16 }
 0x254   :  { %3645 = vmatprep.subr.bf16.mxu0 %v7816_v9 }
 0x256   :  { %4961 = vmatpush1.bf16.msra.mxu1 %v7808_v61  ;;  %v5165_v61 = vshll.u32 %v5144_v58, 16 }
 0x257   :  { %3646 = vmatpush1.bf16.msra.mxu0 %v7814_v10  ;;  %4962 = vmatprep.subr.bf16.mxu1 %v7813_v62  ;;  %v3851_v62 = vor.u32 %v3850_v56, %v3847_v55  ;;  %v7943_v55 = vld [vmem:[%s9378_s3 + $0x3e0] ss:$8 sps:$4 sm:$0xff]   ;;  %v7948_v56 = vld [vmem:[%s9378_s3 + $0x3f4] ss:$8 sps:$4 sm:$0xff]  }
 0x258   :  { %3647 = vmatprep.subr.bf16.mxu0 %v7819_v11 }
 0x25a   :  { %4963 = vmatpush1.bf16.msra.mxu1 %v7811_v63  ;;  %v7882_v63 = vld [vmem:[%s9378_s3 + $0x294] ss:$8 sps:$4 sm:$0xff]  }
 0x25b   :  { %3648 = vmatpush1.bf16.msra.mxu0 %v7817_v12  ;;  %4964 = vmatprep.subr.bf16.mxu1 %v7816_v9  ;;  %v5164_v9 = vrot.slane %v5162_v60, 2 }
 0x25c   :  { %3649 = vmatprep.subr.bf16.mxu0 %v7822_v13 }
 0x25e   :  { %4965 = vmatpush1.bf16.msra.mxu1 %v7814_v10  ;;  %v5167_v10 = vrot.slane %v5165_v61, 3 }
 0x25f   :  { %3650 = vmatpush1.bf16.msra.mxu0 %v7820_v14  ;;  %4966 = vmatprep.subr.bf16.mxu1 %v7819_v11  ;;  %v7885_v11 = vld [vmem:[%s9378_s3 + $0x2a4] ss:$8 sps:$4 sm:$0xff]  }
 0x260   :  { %3651 = vmatprep.subr.bf16.mxu0 %v7825_v3 }
 0x262   :  { %4967 = vmatpush1.bf16.msra.mxu1 %v7817_v12  ;;  %v7883_v12 = vld [vmem:[%s9378_s3 + $0x2a0] ss:$8 sps:$4 sm:$0xff]  }
 0x263   :  { %3652 = vmatpush1.bf16.msra.mxu0 %v7823_v4  ;;  %4968 = vmatprep.subr.bf16.mxu1 %v7822_v13  ;;  %v5168_v13 = vor.u32 %v5167_v10, %v5164_v9 }
 0x264   :  { %3653 = vmatprep.subr.bf16.mxu0 %v7828_v5 }
 0x266   :  { %4969 = vmatpush1.bf16.msra.mxu1 %v7820_v14  ;;  %v7888_v14 = vld [vmem:[%s9378_s3 + $0x2b4] ss:$8 sps:$4 sm:$0xff]  }
 0x267   :  { %3654 = vmatpush1.bf16.msra.mxu0 %v7826_v6  ;;  %4970 = vmatprep.subr.bf16.mxu1 %v7825_v3  ;;  %v7886_v3 = vld [vmem:[%s9378_s3 + $0x2b0] ss:$8 sps:$4 sm:$0xff]  }
 0x268   :  { %3783 = vmatprep.subr.bf16.mxu0 %v7831_v7 }
 0x26a   :  { %3672 = vmatmul.mubr.bf16.vlgmr.msra.gmra.mrb[8].mxu0 %v3557_v15  ;;  %4971 = vmatpush1.bf16.msra.mxu1 %v7823_v4  ;;  %v7891_v4 = vld [vmem:[%s9378_s3 + $0x2c4] ss:$8 sps:$4 sm:$0xff]   ;;  %v7900_v15 = vld [vmem:[%s9378_s3 + $0x2f4] ss:$8 sps:$4 sm:$0xff]  }
 0x26b   :  { %3784 = vmatpush1.bf16.msra.mxu0 %v7829_v18  ;;  %4972 = vmatprep.subr.bf16.mxu1 %v7828_v5  ;;  %v7889_v5 = vld [vmem:[%s9378_s3 + $0x2c0] ss:$8 sps:$4 sm:$0xff]  }
 0x26c   :  { %3785 = vmatprep.subr.bf16.mxu0 %v7834_v20  ;;  %3815 = vmatprep.mubr.bf16.mxu0 %v8411_v0 }
 0x26e   :  { %4973 = vmatpush1.bf16.msra.mxu1 %v7826_v6  ;;  %v7894_v6 = vld [vmem:[%s9378_s3 + $0x2d4] ss:$8 sps:$4 sm:$0xff]  }
 0x26f   :  { %3786 = vmatpush1.bf16.msra.mxu0 %v7832_v22  ;;  %5101 = vmatprep.subr.bf16.mxu1 %v7831_v7  ;;  %v7892_v7 = vld [vmem:[%s9378_s3 + $0x2d0] ss:$8 sps:$4 sm:$0xff]  }
 0x270   :  { %3787 = vmatprep.subr.bf16.mxu0 %v7837_v23 }
 0x271   :  { %4991 = vmatmul.mubr.bf16.vlgmr.msra.gmra.mrb[8].mxu1 %v4876_v26  ;;  %v7906_v26 = vld [vmem:[%s9378_s3 + $0x314] ss:$8 sps:$4 sm:$0xff]  }
 0x272   :  { %5102 = vmatpush1.bf16.msra.mxu1 %v7829_v18  ;;  %5133 = vmatprep.mubr.bf16.mxu1 %v8411_v0  ;;  %v7895_v18 = vld [vmem:[%s9378_s3 + $0x2e0] ss:$8 sps:$4 sm:$0xff]  }
 0x273   :  { %3788 = vmatpush1.bf16.msra.mxu0 %v7835_v25  ;;  %5103 = vmatprep.subr.bf16.mxu1 %v7834_v20  ;;  %v7898_v20 = vld [vmem:[%s9378_s3 + $0x2f0] ss:$8 sps:$4 sm:$0xff]  }
 0x274   :  { %3789 = vmatprep.subr.bf16.mxu0 %v7840_v27 }
 0x276   :  { %5104 = vmatpush1.bf16.msra.mxu1 %v7832_v22  ;;  %v7903_v22 = vld [vmem:[%s9378_s3 + $0x304] ss:$8 sps:$4 sm:$0xff]  }
 0x277   :  { %3790 = vmatpush1.bf16.msra.mxu0 %v7838_v29  ;;  %5105 = vmatprep.subr.bf16.mxu1 %v7837_v23  ;;  %v3976_v23 = vld [vmem:[#allocation2] sm:$0x38] }
 0x278   :  { %3791 = vmatprep.subr.bf16.mxu0 %v7843_v28 }
 0x27a   :  { %5106 = vmatpush1.bf16.msra.mxu1 %v7835_v25  ;;  %v3995_v25 = vrot.slane %v3976_v23, 3  ;;  %v7967_v23 = vld [vmem:[%s9378_s3 + $0x460] ss:$8 sps:$4 sm:$0xff]  }
 0x27b   :  { %3792 = vmatpush1.bf16.msra.mxu0 %v7841_v30  ;;  %5107 = vmatprep.subr.bf16.mxu1 %v7840_v27  ;;  %v7904_v27 = vld [vmem:[%s9378_s3 + $0x310] ss:$8 sps:$4 sm:$0xff]  }
 0x27c   :  { %3793 = vmatprep.subr.bf16.mxu0 %v7846_v31 }
 0x27e   :  { %5108 = vmatpush1.bf16.msra.mxu1 %v7838_v29  ;;  %v7909_v29 = vld [vmem:[%s9378_s3 + $0x324] ss:$8 sps:$4 sm:$0xff]  }
 0x27f   :  { %3794 = vmatpush1.bf16.msra.mxu0 %v7844_v32  ;;  %5109 = vmatprep.subr.bf16.mxu1 %v7843_v28  ;;  %v5293_v28 = vld [vmem:[#allocation2 + $0x8] sm:$0x38] }
 0x280   :  { %3795 = vmatprep.subr.bf16.mxu0 %v7849_v33 }
 0x282   :  { %5110 = vmatpush1.bf16.msra.mxu1 %v7841_v30  ;;  %v7907_v30 = vld [vmem:[%s9378_s3 + $0x320] ss:$8 sps:$4 sm:$0xff]  }
 0x283   :  { %3796 = vmatpush1.bf16.msra.mxu0 %v7847_v34  ;;  %5111 = vmatprep.subr.bf16.mxu1 %v7846_v31  ;;  %v5311_v31 = vrot.slane %v5293_v28, 3 }
 0x284   :  { %3797 = vmatprep.subr.bf16.mxu0 %v7852_v35 }
 0x286   :  { %5112 = vmatpush1.bf16.msra.mxu1 %v7844_v32  ;;  %v7912_v32 = vld [vmem:[%s9378_s3 + $0x334] ss:$8 sps:$4 sm:$0xff]  }
 0x287   :  { %3798 = vmatpush1.bf16.msra.mxu0 %v7850_v36  ;;  %5113 = vmatprep.subr.bf16.mxu1 %v7849_v33  ;;  %v7910_v33 = vld [vmem:[%s9378_s3 + $0x330] ss:$8 sps:$4 sm:$0xff]  }
 0x288   :  { %3933 = vmatprep.subr.bf16.mxu0 %v7855_v37 }
 0x28a   :  { %3816 = vmatmul.mubr.bf16.vlgmr.msra.gmra.mrb[8].mxu0 %v3701_v8  ;;  %5114 = vmatpush1.bf16.msra.mxu1 %v7847_v34  ;;  %v7915_v34 = vld [vmem:[%s9378_s3 + $0x344] ss:$8 sps:$4 sm:$0xff]   ;;  %v7924_v8 = vld [vmem:[%s9378_s3 + $0x374] ss:$8 sps:$4 sm:$0xff]  }
 0x28b   :  { %3934 = vmatpush1.bf16.msra.mxu0 %v7853_v39  ;;  %5115 = vmatprep.subr.bf16.mxu1 %v7852_v35  ;;  %v7913_v35 = vld [vmem:[%s9378_s3 + $0x340] ss:$8 sps:$4 sm:$0xff]  }
 0x28c   :  { %3935 = vmatprep.subr.bf16.mxu0 %v7858_v16  ;;  %3965 = vmatprep.mubr.bf16.mxu0 %v8411_v0 }
 0x28e   :  { %5116 = vmatpush1.bf16.msra.mxu1 %v7850_v36  ;;  %v7918_v36 = vld [vmem:[%s9378_s3 + $0x354] ss:$8 sps:$4 sm:$0xff]  }
 0x28f   :  { %3936 = vmatpush1.bf16.msra.mxu0 %v7856_v40  ;;  %5250 = vmatprep.subr.bf16.mxu1 %v7855_v37  ;;  %v7916_v37 = vld [vmem:[%s9378_s3 + $0x350] ss:$8 sps:$4 sm:$0xff]  }
 0x290   :  { %3937 = vmatprep.subr.bf16.mxu0 %v7861_v19 }
 0x291   :  { %5134 = vmatmul.mubr.bf16.vlgmr.msra.gmra.mrb[8].mxu1 %v5019_v2  ;;  %v7930_v2 = vld [vmem:[%s9378_s3 + $0x394] ss:$8 sps:$4 sm:$0xff]  }
 0x292   :  { %5251 = vmatpush1.bf16.msra.mxu1 %v7853_v39  ;;  %5282 = vmatprep.mubr.bf16.mxu1 %v8411_v0  ;;  %v7919_v39 = vld [vmem:[%s9378_s3 + $0x360] ss:$8 sps:$4 sm:$0xff]  }
 0x293   :  { %3938 = vmatpush1.bf16.msra.mxu0 %v7859_v41  ;;  %5252 = vmatprep.subr.bf16.mxu1 %v7858_v16  ;;  %v7922_v16 = vld [vmem:[%s9378_s3 + $0x370] ss:$8 sps:$4 sm:$0xff]  }
 0x294   :  { %3939 = vmatprep.subr.bf16.mxu0 %v7864_v42 }
 0x296   :  { %5253 = vmatpush1.bf16.msra.mxu1 %v7856_v40  ;;  %v7927_v40 = vld [vmem:[%s9378_s3 + $0x384] ss:$8 sps:$4 sm:$0xff]  }
 0x297   :  { %3940 = vmatpush1.bf16.msra.mxu0 %v7862_v43  ;;  %5254 = vmatprep.subr.bf16.mxu1 %v7861_v19  ;;  %v4120_v19 = vld [vmem:[#allocation2] sm:$0x70] }
 0x298   :  { %3941 = vmatprep.subr.bf16.mxu0 %v7867_v44 }
 0x29a   :  { %5255 = vmatpush1.bf16.msra.mxu1 %v7859_v41  ;;  %v4139_v41 = vrot.slane %v4120_v19, 4  ;;  %v7985_v19 = vld [vmem:[%s9382_s7 + $0x20] sm:$0xff]  }
 0x29b   :  { %3942 = vmatpush1.bf16.msra.mxu0 %v7865_v45  ;;  %5256 = vmatprep.subr.bf16.mxu1 %v7864_v42  ;;  %v7928_v42 = vld [vmem:[%s9378_s3 + $0x390] ss:$8 sps:$4 sm:$0xff]  }
 0x29c   :  { %3943 = vmatprep.subr.bf16.mxu0 %v7870_v46 }
 0x29e   :  { %5257 = vmatpush1.bf16.msra.mxu1 %v7862_v43  ;;  %v7933_v43 = vld [vmem:[%s9378_s3 + $0x3a4] ss:$8 sps:$4 sm:$0xff]  }
 0x29f   :  { %3944 = vmatpush1.bf16.msra.mxu0 %v7868_v47  ;;  %5258 = vmatprep.subr.bf16.mxu1 %v7867_v44  ;;  %v5436_v44 = vld [vmem:[#allocation2 + $0x8] sm:$0x70] }
 0x2a0   :  { %3945 = vmatprep.subr.bf16.mxu0 %v7873_v48 }
 0x2a2   :  { %5259 = vmatpush1.bf16.msra.mxu1 %v7865_v45  ;;  %v7931_v45 = vld [vmem:[%s9378_s3 + $0x3a0] ss:$8 sps:$4 sm:$0xff]  }
 0x2a3   :  { %3946 = vmatpush1.bf16.msra.mxu0 %v7871_v50  ;;  %5260 = vmatprep.subr.bf16.mxu1 %v7870_v46  ;;  %v5454_v46 = vrot.slane %v5436_v44, 4 }
 0x2a4   :  { %3947 = vmatprep.subr.bf16.mxu0 %v7876_v51 }
 0x2a6   :  { %5261 = vmatpush1.bf16.msra.mxu1 %v7868_v47  ;;  %v7936_v47 = vld [vmem:[%s9378_s3 + $0x3b4] ss:$8 sps:$4 sm:$0xff]  }
 0x2a7   :  { %3948 = vmatpush1.bf16.msra.mxu0 %v7874_v54  ;;  %5262 = vmatprep.subr.bf16.mxu1 %v7873_v48  ;;  %v7934_v48 = vld [vmem:[%s9378_s3 + $0x3b0] ss:$8 sps:$4 sm:$0xff]  }
 0x2a8   :  { %4077 = vmatprep.subr.bf16.mxu0 %v7879_v57 }
 0x2aa   :  { %3966 = vmatmul.mubr.bf16.vlgmr.msra.gmra.mrb[8].mxu0 %v3851_v62  ;;  %5263 = vmatpush1.bf16.msra.mxu1 %v7871_v50  ;;  %v7937_v50 = vld [vmem:[%s9378_s3 + $0x3c0] ss:$8 sps:$4 sm:$0xff]   ;;  %v7951_v62 = vld [vmem:[%s9378_s3 + $0x404] ss:$8 sps:$4 sm:$0xff]  }
 0x2ab   :  { %4078 = vmatpush1.bf16.msra.mxu0 %v7877_v59  ;;  %5264 = vmatprep.subr.bf16.mxu1 %v7876_v51  ;;  %v7942_v51 = vld [vmem:[%s9378_s3 + $0x3d4] ss:$8 sps:$4 sm:$0xff]  }
 0x2ac   :  { %4079 = vmatprep.subr.bf16.mxu0 %v7882_v63  ;;  %4109 = vmatprep.mubr.bf16.mxu0 %v8411_v0 }
 0x2ae   :  { %5265 = vmatpush1.bf16.msra.mxu1 %v7874_v54  ;;  %v4264_v54 = vld [vmem:[#allocation2] sm:$0xf0] }
 0x2af   :  { %4080 = vmatpush1.bf16.msra.mxu0 %v7880_v1  ;;  %5393 = vmatprep.subr.bf16.mxu1 %v7879_v57  ;;  %v4283_v57 = vshrl.u32 %v4264_v54, 16  ;;  %v4286_v58 = vshll.u32 %v4264_v54, 16 }
 0x2b0   :  { %4081 = vmatprep.subr.bf16.mxu0 %v7885_v11 }
 0x2b1   :  { %5283 = vmatmul.mubr.bf16.vlgmr.msra.gmra.mrb[8].mxu1 %v5168_v13  ;;  %v4285_v60 = vrot.slane %v4283_v57, 4  ;;  %v4288_v61 = vrot.slane %v4286_v58, 5  ;;  %v7952_v13 = vld [vmem:[%s9378_s3 + $0x410] ss:$8 sps:$4 sm:$0xff]  }
 0x2b2   :  { %5394 = vmatpush1.bf16.msra.mxu1 %v7877_v59  ;;  %5425 = vmatprep.mubr.bf16.mxu1 %v8411_v0  ;;  %v7946_v59 = vld [vmem:[%s9378_s3 + $0x3f0] ss:$8 sps:$4 sm:$0xff]  }
 0x2b3   :  { %4082 = vmatpush1.bf16.msra.mxu0 %v7883_v12  ;;  %5395 = vmatprep.subr.bf16.mxu1 %v7882_v63  ;;  %v5579_v63 = vld [vmem:[#allocation2 + $0x8] sm:$0xf0] }
 0x2b4   :  { %4083 = vmatprep.subr.bf16.mxu0 %v7888_v14  ;;  %v5597_v9 = vshrl.u32 %v5579_v63, 16  ;;  %v5600_v10 = vshll.u32 %v5579_v63, 16 }
 0x2b6   :  { %5396 = vmatpush1.bf16.msra.mxu1 %v7880_v1  ;;  %v7949_v1 = vld [vmem:[%s9378_s3 + $0x400] ss:$8 sps:$4 sm:$0xff]  }
 0x2b7   :  { %4084 = vmatpush1.bf16.msra.mxu0 %v7886_v3  ;;  %5397 = vmatprep.subr.bf16.mxu1 %v7885_v11  ;;  %v4289_v11 = vor.u32 %v4288_v61, %v4285_v60 }
 0x2b8   :  { %4085 = vmatprep.subr.bf16.mxu0 %v7891_v4 }
 0x2ba   :  { %5398 = vmatpush1.bf16.msra.mxu1 %v7883_v12  ;;  %v7954_v12 = vld [vmem:[%s9378_s3 + $0x414] ss:$8 sps:$4 sm:$0xff]  }
 0x2bb   :  { %4086 = vmatpush1.bf16.msra.mxu0 %v7889_v5  ;;  %5399 = vmatprep.subr.bf16.mxu1 %v7888_v14  ;;  %v5599_v14 = vrot.slane %v5597_v9, 4 }
 0x2bc   :  { %4087 = vmatprep.subr.bf16.mxu0 %v7894_v6 }
 0x2be   :  { %5400 = vmatpush1.bf16.msra.mxu1 %v7886_v3  ;;  %v5602_v3 = vrot.slane %v5600_v10, 5 }
 0x2bf   :  { %4088 = vmatpush1.bf16.msra.mxu0 %v7892_v7  ;;  %5401 = vmatprep.subr.bf16.mxu1 %v7891_v4  ;;  %v7957_v4 = vld [vmem:[%s9378_s3 + $0x424] ss:$8 sps:$4 sm:$0xff]  }
 0x2c0   :  { %4089 = vmatprep.subr.bf16.mxu0 %v7897_v17 }
 0x2c2   :  { %5402 = vmatpush1.bf16.msra.mxu1 %v7889_v5  ;;  %v7955_v5 = vld [vmem:[%s9378_s3 + $0x420] ss:$8 sps:$4 sm:$0xff]  }
 0x2c3   :  { %4090 = vmatpush1.bf16.msra.mxu0 %v7895_v18  ;;  %5403 = vmatprep.subr.bf16.mxu1 %v7894_v6  ;;  %v5603_v6 = vor.u32 %v5602_v3, %v5599_v14 }
 0x2c4   :  { %4091 = vmatprep.subr.bf16.mxu0 %v7900_v15 }
 0x2c6   :  { %5404 = vmatpush1.bf16.msra.mxu1 %v7892_v7  ;;  %v7960_v7 = vld [vmem:[%s9378_s3 + $0x434] ss:$8 sps:$4 sm:$0xff]  }
 0x2c7   :  { %4092 = vmatpush1.bf16.msra.mxu0 %v7898_v20  ;;  %5405 = vmatprep.subr.bf16.mxu1 %v7897_v17  ;;  %v7958_v17 = vld [vmem:[%s9378_s3 + $0x430] ss:$8 sps:$4 sm:$0xff]  }
 0x2c8   :  { %4221 = vmatprep.subr.bf16.mxu0 %v7903_v22 }
 0x2ca   :  { %4110 = vmatmul.mubr.bf16.vlgmr.msra.gmra.mrb[8].mxu0 %v3995_v25  ;;  %5406 = vmatpush1.bf16.msra.mxu1 %v7895_v18  ;;  %v7963_v18 = vld [vmem:[%s9378_s3 + $0x444] ss:$8 sps:$4 sm:$0xff]   ;;  %v7970_v25 = vld [vmem:[%s9378_s3 + $0x470] ss:$8 sps:$4 sm:$0xff]  }
 0x2cb   :  { %4222 = vmatpush1.bf16.msra.mxu0 %v7901_v24  ;;  %5407 = vmatprep.subr.bf16.mxu1 %v7900_v15  ;;  %v7961_v15 = vld [vmem:[%s9378_s3 + $0x440] ss:$8 sps:$4 sm:$0xff]  }
 0x2cc   :  { %4223 = vmatprep.subr.bf16.mxu0 %v7906_v26  ;;  %4253 = vmatprep.mubr.bf16.mxu0 %v8411_v0 }
 0x2ce   :  { %5408 = vmatpush1.bf16.msra.mxu1 %v7898_v20  ;;  %v7964_v20 = vld [vmem:[%s9378_s3 + $0x450] ss:$8 sps:$4 sm:$0xff]  }
 0x2cf   :  { %4224 = vmatpush1.bf16.msra.mxu0 %v7904_v27  ;;  %5536 = vmatprep.subr.bf16.mxu1 %v7903_v22  ;;  %v7969_v22 = vld [vmem:[%s9378_s3 + $0x464] ss:$8 sps:$4 sm:$0xff]  }
 0x2d0   :  { %4225 = vmatprep.subr.bf16.mxu0 %v7909_v29 }
 0x2d1   :  { %5426 = vmatmul.mubr.bf16.vlgmr.msra.gmra.mrb[8].mxu1 %v5311_v31  ;;  %v8015_v31 = vmov 0.0  }
 0x2d2   :  { %5537 = vmatpush1.bf16.msra.mxu1 %v7901_v24  ;;  %5568 = vmatprep.mubr.bf16.mxu1 %v8411_v0  ;;  %v7972_v24 = vld [vmem:[%s9378_s3 + $0x474] ss:$8 sps:$4 sm:$0xff]   ;;  %36 = vst [vmem:[#allocation4] sm:$0xff] %v8015_v31 }
 0x2d3   :  { %4226 = vmatpush1.bf16.msra.mxu0 %v7907_v30  ;;  %5538 = vmatprep.subr.bf16.mxu1 %v7906_v26  ;;  %v4414_v26 = vld [vmem:[#allocation2] sm:$0xe0] }
 0x2d4   :  { %4227 = vmatprep.subr.bf16.mxu0 %v7912_v32 }
 0x2d6   :  { %5539 = vmatpush1.bf16.msra.mxu1 %v7904_v27  ;;  %v4433_v27 = vrot.slane %v4414_v26, 5 }
 0x2d7   :  { %4228 = vmatpush1.bf16.msra.mxu0 %v7910_v33  ;;  %5540 = vmatprep.subr.bf16.mxu1 %v7909_v29  ;;  %v5728_v29 = vld [vmem:[#allocation2 + $0x8] sm:$0xe0] }
 0x2d8   :  { %4229 = vmatprep.subr.bf16.mxu0 %v7915_v34  ;;  %v5746_v28 = vrot.slane %v5728_v29, 5 }
 0x2da   :  { %5541 = vmatpush1.bf16.msra.mxu1 %v7907_v30  ;;  %v7973_v30 = vld [vmem:[%s9380_s5] sm:$0xff]  }
 0x2db   :  { %4230 = vmatpush1.bf16.msra.mxu0 %v7913_v35  ;;  %5542 = vmatprep.subr.bf16.mxu1 %v7912_v32  ;;  %v7974_v32 = vld [vmem:[%s9380_s5 + $0x8] sm:$0xff]  }
 0x2dc   :  { %4231 = vmatprep.subr.bf16.mxu0 %v7918_v36 }
 0x2de   :  { %5543 = vmatpush1.bf16.msra.mxu1 %v7910_v33  ;;  %v7975_v33 = vld [vmem:[%s9380_s5 + $0x10] sm:$0xff]  }
 0x2df   :  { %4232 = vmatpush1.bf16.msra.mxu0 %v7916_v37  ;;  %5544 = vmatprep.subr.bf16.mxu1 %v7915_v34  ;;  %v7976_v34 = vld [vmem:[%s9380_s5 + $0x18] sm:$0xff]  }
 0x2e0   :  { %4233 = vmatprep.subr.bf16.mxu0 %v7921_v38 }
 0x2e2   :  { %5545 = vmatpush1.bf16.msra.mxu1 %v7913_v35  ;;  %v7977_v35 = vld [vmem:[%s9380_s5 + $0x20] sm:$0xff]  }
 0x2e3   :  { %4234 = vmatpush1.bf16.msra.mxu0 %v7919_v39  ;;  %5546 = vmatprep.subr.bf16.mxu1 %v7918_v36  ;;  %v7978_v36 = vld [vmem:[%s9380_s5 + $0x28] sm:$0xff]  }
 0x2e4   :  { %4235 = vmatprep.subr.bf16.mxu0 %v7924_v8 }
 0x2e6   :  { %5547 = vmatpush1.bf16.msra.mxu1 %v7916_v37  ;;  %v7979_v37 = vld [vmem:[%s9380_s5 + $0x30] sm:$0xff]  }
 0x2e7   :  { %4236 = vmatpush1.bf16.msra.mxu0 %v7922_v16  ;;  %5548 = vmatprep.subr.bf16.mxu1 %v7921_v38  ;;  %v7980_v38 = vld [vmem:[%s9380_s5 + $0x38] sm:$0xff]  }
 0x2e8   :  { %4371 = vmatprep.subr.bf16.mxu0 %v7927_v40 }
 0x2ea   :  { %4254 = vmatmul.mubr.bf16.vlgmr.msra.gmra.mrb[8].mxu0 %v4139_v41  ;;  %5549 = vmatpush1.bf16.msra.mxu1 %v7919_v39  ;;  %v7981_v39 = vld [vmem:[%s9382_s7] sm:$0xff]  }
 0x2eb   :  { %4372 = vmatpush1.bf16.msra.mxu0 %v7925_v21  ;;  %5550 = vmatprep.subr.bf16.mxu1 %v7924_v8  ;;  %v7982_v8 = vld [vmem:[%s9382_s7 + $0x8] sm:$0xff]  }
 0x2ec   :  { %4373 = vmatprep.subr.bf16.mxu0 %v7930_v2  ;;  %4403 = vmatprep.mubr.bf16.mxu0 %v8411_v0 }
 0x2ee   :  { %5551 = vmatpush1.bf16.msra.mxu1 %v7922_v16  ;;  %v7983_v16 = vld [vmem:[%s9382_s7 + $0x10] sm:$0xff]  }
 0x2ef   :  { %4374 = vmatpush1.bf16.msra.mxu0 %v7928_v42  ;;  %5685 = vmatprep.subr.bf16.mxu1 %v7927_v40  ;;  %v7984_v40 = vld [vmem:[%s9382_s7 + $0x18] sm:$0xff]  }
 0x2f0   :  { %4375 = vmatprep.subr.bf16.mxu0 %v7933_v43 }
 0x2f1   :  { %5569 = vmatmul.mubr.bf16.vlgmr.msra.gmra.mrb[8].mxu1 %v5454_v46 }
 0x2f2   :  { %5686 = vmatpush1.bf16.msra.mxu1 %v7925_v21  ;;  %5717 = vmatprep.mubr.bf16.mxu1 %v8411_v0  ;;  %v7986_v21 = vld [vmem:[%s9382_s7 + $0x28] sm:$0xff]  }
 0x2f3   :  { %4376 = vmatpush1.bf16.msra.mxu0 %v7931_v45  ;;  %5687 = vmatprep.subr.bf16.mxu1 %v7930_v2 }
 0x2f4   :  { %4377 = vmatprep.subr.bf16.mxu0 %v7936_v47 }
 0x2f6   :  { %5688 = vmatpush1.bf16.msra.mxu1 %v7928_v42 }
 0x2f7   :  { %4378 = vmatpush1.bf16.msra.mxu0 %v7934_v48  ;;  %5689 = vmatprep.subr.bf16.mxu1 %v7933_v43 }
 0x2f8   :  { %4379 = vmatprep.subr.bf16.mxu0 %v7939_v49 }
 0x2fa   :  { %5690 = vmatpush1.bf16.msra.mxu1 %v7931_v45 }
 0x2fb   :  { %4380 = vmatpush1.bf16.msra.mxu0 %v7937_v50  ;;  %5691 = vmatprep.subr.bf16.mxu1 %v7936_v47 }
 0x2fc   :  { %4381 = vmatprep.subr.bf16.mxu0 %v7942_v51 }
 0x2fe   :  { %5692 = vmatpush1.bf16.msra.mxu1 %v7934_v48 }
 0x2ff   :  { %4382 = vmatpush1.bf16.msra.mxu0 %v7940_v52  ;;  %5693 = vmatprep.subr.bf16.mxu1 %v7939_v49 }
 0x300   :  { %4383 = vmatprep.subr.bf16.mxu0 %v7945_v53 }
 0x302   :  { %5694 = vmatpush1.bf16.msra.mxu1 %v7937_v50 }
 0x303   :  { %4384 = vmatpush1.bf16.msra.mxu0 %v7943_v55  ;;  %5695 = vmatprep.subr.bf16.mxu1 %v7942_v51 }
 0x304   :  { %4385 = vmatprep.subr.bf16.mxu0 %v7948_v56 }
 0x306   :  { %5696 = vmatpush1.bf16.msra.mxu1 %v7940_v52 }
 0x307   :  { %4386 = vmatpush1.bf16.msra.mxu0 %v7946_v59  ;;  %5697 = vmatprep.subr.bf16.mxu1 %v7945_v53 }
 0x308   :  { %4515 = vmatprep.subr.bf16.mxu0 %v7951_v62 }
 0x30a   :  { %4404 = vmatmul.mubr.bf16.vlgmr.msra.gmra.mrb[8].mxu0 %v4289_v11  ;;  %5698 = vmatpush1.bf16.msra.mxu1 %v7943_v55 }
 0x30b   :  { %4516 = vmatpush1.bf16.msra.mxu0 %v7949_v1  ;;  %5699 = vmatprep.subr.bf16.mxu1 %v7948_v56 }
 0x30c   :  { %4517 = vmatprep.subr.bf16.mxu0 %v7954_v12  ;;  %4547 = vmatprep.mubr.bf16.mxu0 %v8411_v0 }
 0x30e   :  { %5700 = vmatpush1.bf16.msra.mxu1 %v7946_v59 }
 0x30f   :  { %4518 = vmatpush1.bf16.msra.mxu0 %v7952_v13  ;;  %5828 = vmatprep.subr.bf16.mxu1 %v7951_v62 }
 0x310   :  { %4519 = vmatprep.subr.bf16.mxu0 %v7957_v4 }
 0x311   :  { %5718 = vmatmul.mubr.bf16.vlgmr.msra.gmra.mrb[8].mxu1 %v5603_v6 }
 0x312   :  { %5829 = vmatpush1.bf16.msra.mxu1 %v7949_v1  ;;  %5860 = vmatprep.mubr.bf16.mxu1 %v8411_v0  ;;  %v7966_v0 = vld [vmem:[%s9378_s3 + $0x454] ss:$8 sps:$4 sm:$0xff]   ;;  %v4570_v1 = vld [vmem:[%s9379_s4] sm:$0x1] }
 0x313   :  { %4520 = vmatpush1.bf16.msra.mxu0 %v7955_v5  ;;  %5830 = vmatprep.subr.bf16.mxu1 %v7954_v12 }
 0x314   :  { %4521 = vmatprep.subr.bf16.mxu0 %v7960_v7 }
 0x316   :  { %5831 = vmatpush1.bf16.msra.mxu1 %v7952_v13 }
 0x317   :  { %4522 = vmatpush1.bf16.msra.mxu0 %v7958_v17  ;;  %5832 = vmatprep.subr.bf16.mxu1 %v7957_v4  ;;  %v5883_v4 = vld [vmem:[%s9379_s4] sm:$0x1] }
 0x318   :  { %4523 = vmatprep.subr.bf16.mxu0 %v7963_v18 }
 0x31a   :  { %5833 = vmatpush1.bf16.msra.mxu1 %v7955_v5 }
 0x31b   :  { %4524 = vmatpush1.bf16.msra.mxu0 %v7961_v15  ;;  %5834 = vmatprep.subr.bf16.mxu1 %v7960_v7 }
 0x31c   :  { %4525 = vmatprep.subr.bf16.mxu0 %v7966_v0 }
 0x31e   :  { %5835 = vmatpush1.bf16.msra.mxu1 %v7958_v17 }
 0x31f   :  { %4526 = vmatpush1.bf16.msra.mxu0 %v7964_v20  ;;  %5836 = vmatprep.subr.bf16.mxu1 %v7963_v18 }
 0x320   :  { %4527 = vmatprep.subr.bf16.mxu0 %v7969_v22 }
 0x322   :  { %5837 = vmatpush1.bf16.msra.mxu1 %v7961_v15  ;;  %v7987_v15 = vld [vmem:[%s9382_s7 + $0x30] sm:$0xff]  }
 0x323   :  { %4528 = vmatpush1.bf16.msra.mxu0 %v7967_v23  ;;  %5838 = vmatprep.subr.bf16.mxu1 %v7966_v0  ;;  %v7988_v0 = vld [vmem:[%s9382_s7 + $0x38] sm:$0xff]   ;;  %s8017_s7 = smov [#allocation5]  }
 0x324   :  { %4529 = vmatprep.subr.bf16.mxu0 %v7972_v24  ;;  %s6121_s28 = sshll.u32 %s8017_s7, 4  ;;  %s6122_s28 = int_to_ptr.vmem [resolvable:$true] %s6121_s28 }
 0x325   :  { %p7995_p1 = scmp.lt.s32.totalorder %s6122_s28, %s6122_s28 }
 0x326   :  { %5839 = vmatpush1.bf16.msra.mxu1 %v7964_v20  ;;  %v7243_v20 = vld [vmem:[%s9381_s6] ss:$0 sm:$0xff]  ;;  %s7990_s6 = scalar_lea.vmem %s6122_s28, 32 }
 0x327   :  { %4530 = vmatpush1.bf16.msra.mxu0 %v7970_v25  ;;  %5840 = vmatprep.subr.bf16.mxu1 %v7969_v22  ;;  %p7991_p0 = scmp.ne.s32.totalorder %s6122_s28, %s7990_s6  ;;  %p7996_p2 = scmp.lt.s32.totalorder %s7990_s6, %s7990_s6 }
 0x328   :  { %7279 = vmatprep.subr.bf16.mxu0 %v8015_v31 }
 0x329   :  { %p7997_p3 = por %p7996_p2, %p7995_p1 }
 0x32a   :  { %4548 = vmatmul.mubr.bf16.vlgmr.msra.gmra.mrb[8].mxu0 %v4433_v27  ;;  %5841 = vmatpush1.bf16.msra.mxu1 %v7967_v23 }
 0x32b   :  { %5842 = vmatprep.subr.bf16.mxu1 %v7972_v24  ;;  %7280 = vmatpush3.bf16.msra.mxu0 %v7973_v30  ;;  %p7998_p4 = pnand %p7997_p3, %p7991_p0 }
 0x32c   :  { %7295 = vmatprep.mubr.msk.bf16.mxu0 %vm8016_vm2, %v8015_v31  ;;  %7281 = vmatprep.subr.bf16.mxu0 %v8015_v31 }
 0x32e   :  { %5843 = vmatpush1.bf16.msra.mxu1 %v7970_v25 }
 0x32f   :  { %7299 = vmatprep.subr.bf16.mxu1 %v8015_v31  ;;  %7282 = vmatpush3.bf16.msra.mxu0 %v7974_v32 }
 0x330   :  { %7283 = vmatprep.subr.bf16.mxu0 %v8015_v31 }
 0x331   :  { %5861 = vmatmul.mubr.bf16.vlgmr.msra.gmra.mrb[8].mxu1 %v5746_v28  ;;  %v7252_v28 = vld [vmem:[%s9383_s8] ss:$0 sm:$0xff] }
 0x332   :  { %7315 = vmatprep.mubr.msk.bf16.mxu1 %vm8016_vm2, %v8015_v31  ;;  %7300 = vmatpush3.bf16.msra.mxu1 %v7981_v39 }
 0x333   :  { %7284 = vmatpush3.bf16.msra.mxu0 %v7975_v33  ;;  %7301 = vmatprep.subr.bf16.mxu1 %v8015_v31 }
 0x334   :  { %7285 = vmatprep.subr.bf16.mxu0 %v8015_v31 }
 0x336   :  { %7302 = vmatpush3.bf16.msra.mxu1 %v7982_v8 }
 0x337   :  { %7286 = vmatpush3.bf16.msra.mxu0 %v7976_v34  ;;  %7303 = vmatprep.subr.bf16.mxu1 %v8015_v31 }
 0x338   :  { %7287 = vmatprep.subr.bf16.mxu0 %v8015_v31 }
 0x33a   :  { %7304 = vmatpush3.bf16.msra.mxu1 %v7983_v16 }
 0x33b   :  { %7288 = vmatpush3.bf16.msra.mxu0 %v7977_v35  ;;  %7305 = vmatprep.subr.bf16.mxu1 %v8015_v31 }
 0x33c   :  { %7289 = vmatprep.subr.bf16.mxu0 %v8015_v31 }
 0x33e   :  { %7306 = vmatpush3.bf16.msra.mxu1 %v7984_v40 }
 0x33f   :  { %7290 = vmatpush3.bf16.msra.mxu0 %v7978_v36  ;;  %7307 = vmatprep.subr.bf16.mxu1 %v8015_v31 }
 0x340   :  { %7291 = vmatprep.subr.bf16.mxu0 %v8015_v31 }
 0x342   :  { %7308 = vmatpush3.bf16.msra.mxu1 %v7985_v19 }
 0x343   :  { %7292 = vmatpush3.bf16.msra.mxu0 %v7979_v37  ;;  %7309 = vmatprep.subr.bf16.mxu1 %v8015_v31 }
 0x344   :  { %7293 = vmatprep.subr.bf16.mxu0 %v8015_v31 }
 0x346   :  { %7310 = vmatpush3.bf16.msra.mxu1 %v7986_v21 }
 0x347   :  { %7294 = vmatpush3.bf16.msra.mxu0 %v7980_v38  ;;  %7311 = vmatprep.subr.bf16.mxu1 %v8015_v31 }
 0x34a   :  { %7312 = vmatpush3.bf16.msra.mxu1 %v7987_v15 }
 0x34b   :  { %7313 = vmatprep.subr.bf16.mxu1 %v8015_v31 }
 0x34e   :  { %7314 = vmatpush3.bf16.msra.mxu1 %v7988_v0 }
 0x3fd   :  { %v4549_v41 = vpop.f32.mrb[8].mxu0 }
 0x3fe   :  { %v4551_v2 = vpop.f32.mrb[9].mxu0 }
 0x3ff   :  { %v4558_v42 = vmax.f32 %v4549_v41, %v4551_v2  ;;  %v4553_v43 = vpop.f32.mrb[10].mxu0 }
 0x400   :  { %v4554_v44 = vpop.f32.mrb[11].mxu0 }
 0x401   :  { %4559 = vst [vmem:[#allocation3] sm:$0x3f] %v4558_v42 }
 0x404   :  { %v5862_v45 = vpop.f32.mrb[8].mxu1 }
 0x405   :  { %v5864_v46 = vpop.f32.mrb[9].mxu1 }
 0x406   :  { %v5871_v47 = vmax.f32 %v5862_v45, %v5864_v46  ;;  %v5866_v48 = vpop.f32.mrb[10].mxu1 }
 0x407   :  { %v5867_v49 = vpop.f32.mrb[11].mxu1 }
 0x408   :  { %v4560_v50 = vld [vmem:[#allocation3] sm:$0x3]  ;;  %v4561_v51 = vld [vmem:[#allocation3 + $0x4] sm:$0x3] }
 0x409   :  { %v4562_v52 = vmax.f32 %v4560_v50, %v4561_v51  ;;  %5872 = vst [vmem:[#allocation3] sm:$0x3f] %v5871_v47 }
 0x40b   :  { %v4563_v53 = vsel %vm1565_vm6, %v4562_v52, -inf }
 0x40c   :  { %v4564_v54 = vrot.slane %v4563_v53, 4 }
 0x40e   :  { %v4565_v55 = vmax.f32 %v4563_v53, %v4564_v54 }
 0x410   :  { %v4566_v56 = vrot.slane %v4565_v55, 2  ;;  %v5873_v57 = vld [vmem:[#allocation3] sm:$0x3]  ;;  %v5874_v58 = vld [vmem:[#allocation3 + $0x4] sm:$0x3] }
 0x411   :  { %v5875_v59 = vmax.f32 %v5873_v57, %v5874_v58 }
 0x412   :  { %v4567_v60 = vmax.f32 %v4565_v55, %v4566_v56 }
 0x413   :  { %v5876_v61 = vsel %vm1565_vm6, %v5875_v59, -inf }
 0x414   :  { %v4568_v62 = vrot.slane %v4567_v60, 1  ;;  %v5877_v63 = vrot.slane %v5876_v61, 4 }
 0x416   :  { %v4569_v9 = vmax.f32 %v4567_v60, %v4568_v62  ;;  %v5878_v10 = vmax.f32 %v5876_v61, %v5877_v63 }
 0x418   :  { %v4571_v11 = vadd.f32 %v4570_v1, %v4569_v9  ;;  %v5879_v12 = vrot.slane %v5878_v10, 2 }
 0x41a   :  { %v4572_v13 = vmax.f32 %v4571_v11, 0.0  ;;  %v5880_v14 = vmax.f32 %v5878_v10, %v5879_v12 }
 0x41c   :  { %4573 = vst [vmem:[#allocation4] sm:$0x1] %v4572_v13  ;;  %v5881_v3 = vrot.slane %v5880_v14, 1 }
 0x41e   :  { %v5882_v5 = vmax.f32 %v5880_v14, %v5881_v3 }
 0x420   :  { %v5884_v6 = vadd.f32 %v5883_v4, %v5882_v5 }
 0x422   :  { %v5885_v7 = vmax.f32 %v5884_v6, 0.0 }
 0x424   :  { %5886 = vst [vmem:[#allocation4 + $0x1] sm:$0x1] %v5885_v7 }
 0x42b   :  { %v5887_v17 = vld [vmem:[#allocation4] sm:$0x3] }
 0x42c   :  { %v5888_v18 = vpack.c.bf16 %v5887_v17, %v5887_v17 }
 0x42e   :  { %7296 = vmatmul.mubr.bf16.vlgmr.msra.gmra.mrb[12].mxu0 %v5888_v18 }
 0x501   :  { %v5994_v22 = vpop.f32.mrb[12].mxu0 }
 0x502   :  { %v5995_v23 = vadd.f32 %v7243_v20, %v5994_v22  ;;  %v7297_v24 = vpop.f32.mrb[13].mxu0 }
 0x503   :  { %v5997_v25 = vpop.f32.mrb[14].mxu0 }
 0x504   :  { %v6000_v26 = vmax.f32 %v5995_v23, 0.0  ;;  %v7298_v27 = vpop.f32.mrb[15].mxu0 }
 0x506   :  { %v6001_v29 = vpack.c.bf16 %v6000_v26, %v6000_v26 }
 0x508   :  { %7316 = vmatmul.mubr.bf16.vlgmr.msra.gmra.mrb[12].mxu1 %v6001_v29 }
 0x5db   :  { %v6107_v30 = vpop.f32.mrb[12].mxu1 }
 0x5dc   :  { %v6108_v31 = vadd.f32 %v7252_v28, %v6107_v30  ;;  %v7317_v32 = vpop.f32.mrb[13].mxu1 }
 0x5dd   :  { %v6110_v33 = vpop.f32.mrb[14].mxu1 }
 0x5de   :  { %v7318_v34 = vpop.f32.mrb[15].mxu1  ;;  %6114 = vst.msk [vmem:[#allocation5] sm:$0x3] %vm6113_vm3, %v6108_v31 }
 0x5df   :  { %8001 = shalt.err (!%p7998_p4)
}
 0x5e0   :  { %s8002_s8 = scalar_lea.hbm %s9384_s9, 32 }
 0x5e1   :  { %p8003_p5 = scmp.ne.s32.totalorder %s9384_s9, %s8002_s8  ;;  %p8006_p6 = scmp.lt.u32.totalorder %s8002_s8, %s9384_s9 }
 0x5e3   :  { %p8008_p7 = pnand %p8006_p6, %p8003_p5 }
 0x5e5   :  { %8011 = shalt.err (!%p8008_p7)
}
 0x5e6   :  { %6124 = dma.vmem_to_hbm [thread:$0]  %s6122_s28, 32, %s9384_s9, [#allocation6]  }
 0x5e7   :  { %8012 = dma.done.wait [#allocation6], 32  }
 0x5e8   :  { %8013 = vsyncadd [#allocation6], 4294967264 }
 0x5e9   :  { %6128 = vsyncpa [#allocation6], 1 }

</bundles_post_ra>
